<compile_context>
chip_gen: v7x
topology: tpu7x:2x2x1
jax: 0.10.0
libtpu: 0.0.40
codegen_flags: <defaults>
</compile_context>

<pallas_src>
import functools

import jax
import jax.numpy as jnp
from jax.experimental import pallas as pl
from jax.experimental.pallas import tpu as pltpu

NEG_SLOPE = 0.2
BN_EPS = 1e-5

_VMEM_LIMIT = 48 * 1024 * 1024   # < v7x's 64 MiB physical; ample on v5e/v6e
_TARGET_TILE_M = 4096            # target output rows per conv tile (f32 acc <= ~4 MiB)


def _round_up(x, m):
    return (x + m - 1) // m * m


def _leaky_relu(y):
    # valid for 0 < slope < 1
    return jnp.maximum(y, NEG_SLOPE * y)


def _pick_tile_rows(ho, wo, target_m=_TARGET_TILE_M):
    """Largest divisor th of ho with th*wo <= target_m and (th*wo) % 8 == 0."""
    if ho * wo <= target_m:
        return ho
    best = None
    for d in range(1, ho):
        if ho % d == 0 and d * wo <= target_m and (d * wo) % 8 == 0:
            best = d
    return best if best is not None else ho


# ------------------------------ conv Pallas kernel ---------------------------


def _conv_kernel(x_ref, w_ref, b_ref, o_ref, st_ref, *, taps, th, wo, ck, pack,
                 apply_lrelu):
    """One (batch, row-tile, cout-tile) output block in a single grid step."""
    tile_m = th * wo

    if pack:
        # Small-K layer (image channels): pack all taps along the contraction.
        parts = [x_ref[pl.ds(dh, th), pl.ds(dw, wo), :].reshape(tile_m, ck)
                 for dh, dw in taps]
        acc = jnp.dot(jnp.concatenate(parts, axis=-1), w_ref[0],
                      preferred_element_type=jnp.float32)
    else:
        acc = None
        for g, (dh, dw) in enumerate(taps):          # static unroll, static offsets
            a = x_ref[pl.ds(dh, th), pl.ds(dw, wo), :].reshape(tile_m, ck)
            d = jnp.dot(a, w_ref[g], preferred_element_type=jnp.float32)
            acc = d if acc is None else acc + d

    y = acc + b_ref[...]                             # bias (zeros for BN layers)
    if apply_lrelu:
        y = _leaky_relu(y)
    o_ref[...] = y.astype(o_ref.dtype)

    # Fused BatchNorm partials: per-tile centred (sum, sum of squared deviations
    # from the tile mean).  Combined with Chan's formula in the wrapper.
    s0 = jnp.sum(y, axis=0, keepdims=True)
    c = y - s0 * (1.0 / tile_m)
    s2 = jnp.sum(c * c, axis=0, keepdims=True)
    st_ref[...] = jnp.concatenate([s0, s2], axis=0)


def _make_weights(w_hwio, bias, stride, cin_p, cout_p):
    """Rearrange the 4x4 kernel into per-tap (K, cout_p) matrices (bf16)."""
    kh, kw, cin_w, cout = w_hwio.shape
    assert kh == 4 and kw == 4
    w_pad = jnp.zeros((4, 4, cin_p, cout_p), jnp.float32)
    w_pad = w_pad.at[:, :, :cin_w, :cout].set(w_hwio.astype(jnp.float32))
    if stride == 2:
        # Phase packing: ki = 2*dh + ph, kj = 2*dw + pw.  Tap (dh, dw) in {0,1}^2
        # contracts over K = 4*cin ordered (ph, pw, cin) to match _prep_conv_input.
        w2 = w_pad.reshape(2, 2, 2, 2, cin_p, cout_p)      # (dh, ph, dw, pw, ci, co)
        w2 = w2.transpose(0, 2, 1, 3, 4, 5)                # (dh, dw, ph, pw, ci, co)
        w_taps = w2.reshape(4, 4 * cin_p, cout_p)
        taps = [(0, 0), (0, 1), (1, 0), (1, 1)]
        ck = 4 * cin_p
        halo = 1
    else:
        w_taps = w_pad.reshape(16, cin_p, cout_p)
        taps = [(t // 4, t % 4) for t in range(16)]
        ck = cin_p
        halo = 3
    pack = stride == 2 and ck < 128                        # only the cin=3 layer
    if pack:
        w_taps = w_taps.reshape(1, len(taps) * ck, cout_p)
    b_pad = jnp.zeros((1, cout_p), jnp.float32).at[0, :cout].set(
        bias.astype(jnp.float32))
    return w_taps.astype(jnp.bfloat16), b_pad, taps, ck, halo, pack


def _prep_conv_input(x_nhwc, stride, th, halo):
    """Pad; fold 2x2 phases into channels (s=2); cut haloed output-row tiles."""
    n, h, w, c = x_nhwc.shape
    xp = jnp.pad(x_nhwc.astype(jnp.bfloat16), ((0, 0), (1, 1), (1, 1), (0, 0)))
    if stride == 2:
        assert h % 2 == 0 and w % 2 == 0, "stride-2 layers need even H, W"
        hq, wq = (h + 2) // 2, (w + 2) // 2
        xp = xp.reshape(n, hq, 2, wq, 2, c)
        xp = xp.transpose(0, 1, 3, 2, 4, 5).reshape(n, hq, wq, 4 * c)
        ho = h // 2
    else:
        hq, wq = h + 2, w + 2
        ho = h - 1
    n_rt = ho // th
    if n_rt == 1:
        xt = xp[:, None]                                   # th + halo == hq
    else:
        rows = jnp.arange(n_rt)[:, None] * th + jnp.arange(th + halo)[None, :]
        xt = xp[:, rows]                                   # (n, n_rt, th+halo, wq, ck)
    return xt, wq


def conv2d_k4(x_nhwc, w_hwio, bias, *, stride, apply_lrelu, out_dtype):
    """Conv2d(kernel=4, padding=1, stride) -> (y, bn_partials, tile_m)."""
    n, h, w, cin_p = x_nhwc.shape
    cout = w_hwio.shape[-1]
    cout_p = _round_up(cout, 128)
    w_taps, b_pad, taps, ck, halo, pack = _make_weights(
        w_hwio, bias, stride, cin_p, cout_p)

    ho, wo = (h // 2, w // 2) if stride == 2 else (h - 1, w - 1)
    th = _pick_tile_rows(ho, wo)
    n_rt = ho // th
    tile_m = th * wo
    m = ho * wo

    xt, wq = _prep_conv_input(x_nhwc, stride, th, halo)    # (n, n_rt, th+halo, wq, ck)

    tco = 256 if cout_p % 256 == 0 else 128
    n_co = cout_p // tco

    kernel = functools.partial(_conv_kernel, taps=taps, th=th, wo=wo, ck=ck,
                               pack=pack, apply_lrelu=apply_lrelu)

    out_bytes = n * m * cout_p * jnp.dtype(out_dtype).itemsize
    y, stats = pl.pallas_call(
        kernel,
        out_shape=(jax.ShapeDtypeStruct((n, m, cout_p), out_dtype),
                   jax.ShapeDtypeStruct((n, n_rt, 2, cout_p), jnp.float32)),
        grid_spec=pltpu.PrefetchScalarGridSpec(
            num_scalar_prefetch=0,
            grid=(n, n_rt, n_co),
            in_specs=[
                pl.BlockSpec((None, None, th + halo, wq, ck),
                             lambda b, r, j: (b, r, 0, 0, 0)),
                pl.BlockSpec((w_taps.shape[0], w_taps.shape[1], tco),
                             lambda b, r, j: (0, 0, j)),
                pl.BlockSpec((1, tco), lambda b, r, j: (0, j)),
            ],
            out_specs=[
                pl.BlockSpec((None, tile_m, tco), lambda b, r, j: (b, r, j)),
                pl.BlockSpec((None, None, 2, tco), lambda b, r, j: (b, r, 0, j)),
            ],
        ),
        compiler_params=pltpu.CompilerParams(
            dimension_semantics=("parallel", "parallel", "parallel"),
            vmem_limit_bytes=_VMEM_LIMIT),
        cost_estimate=pl.CostEstimate(
            flops=2 * n * m * 16 * cin_p * cout_p,
            transcendentals=0,
            bytes_accessed=xt.size * 2 * n_co + w_taps.size * 2 * n * n_rt
                           + out_bytes),
    )(xt, w_taps, b_pad)
    return y.reshape(n, ho, wo, cout_p), stats, tile_m


# --------------------------- BatchNorm + LeakyReLU ---------------------------


def _bn_apply_kernel(x_ref, scale_ref, shift_ref, o_ref):
    y = x_ref[...].astype(jnp.float32) * scale_ref[...] + shift_ref[...]
    o_ref[...] = _leaky_relu(y).astype(o_ref.dtype)


def batchnorm_lrelu(y4d, stats, tile_m, gamma, beta):
    """Training-mode BatchNorm2d (biased batch variance) + LeakyReLU(0.2)."""
    n, ho, wo, cp = y4d.shape
    c = gamma.shape[0]
    m = ho * wo
    n_rt = stats.shape[1]
    count = n * m

    # Combine per-tile centred partials (equal tile sizes -> simple Chan combine).
    s0 = stats[:, :, 0, :]
    s2 = stats[:, :, 1, :]
    mean = jnp.sum(s0, axis=(0, 1)) / count
    mu_t = s0 / tile_m
    m2 = jnp.sum(s2, axis=(0, 1)) + tile_m * jnp.sum((mu_t - mean) ** 2, axis=(0, 1))
    var = jnp.maximum(m2 / count, 0.0)

    # Padded channels get gamma=0 so they stay exactly 0 after BN + LeakyReLU.
    g = jnp.zeros((cp,), jnp.float32).at[:c].set(gamma.astype(jnp.float32))
    b = jnp.zeros((cp,), jnp.float32).at[:c].set(beta.astype(jnp.float32))
    scale = (g * jax.lax.rsqrt(var + BN_EPS)).reshape(1, cp)
    shift = (b - mean * scale[0]).reshape(1, cp)

    out = pl.pallas_call(
        _bn_apply_kernel,
        out_shape=jax.ShapeDtypeStruct((n, m, cp), jnp.bfloat16),
        grid_spec=pltpu.PrefetchScalarGridSpec(
            num_scalar_prefetch=0,
            grid=(n, n_rt),
            in_specs=[
                pl.BlockSpec((None, tile_m, cp), lambda bi, r: (bi, r, 0)),
                pl.BlockSpec((1, cp), lambda bi, r: (0, 0)),
                pl.BlockSpec((1, cp), lambda bi, r: (0, 0)),
            ],
            out_specs=pl.BlockSpec((None, tile_m, cp), lambda bi, r: (bi, r, 0)),
        ),
        compiler_params=pltpu.CompilerParams(
            dimension_semantics=("parallel", "parallel"),
            vmem_limit_bytes=_VMEM_LIMIT),
    )(y4d.reshape(n, m, cp), scale, shift)
    return out.reshape(n, ho, wo, cp)


# ------------------------------ model definition -----------------------------


def build_config(image_channels, num_filters_last=64, n_layers=3):
    cfg = [
        dict(cin=image_channels, cout=num_filters_last, stride=2,
             use_bias=True, bn=False, lrelu_in_conv=True)
    ]
    mult = 1
    for i in range(1, n_layers + 1):
        mult_last = mult
        mult = min(2 ** i, 8)
        cfg.append(
            dict(cin=num_filters_last * mult_last, cout=num_filters_last * mult,
                 stride=2 if i < n_layers else 1,
                 use_bias=False, bn=True, lrelu_in_conv=False)
        )
    cfg.append(
        dict(cin=num_filters_last * mult, cout=1, stride=1,
             use_bias=True, bn=False, lrelu_in_conv=False)
    )
    return cfg


def init_params(key, cfg):
    params = []
    for layer in cfg:
        key, kw_, kb_ = jax.random.split(key, 3)
        w = 0.05 * jax.random.normal(
            kw_, (4, 4, layer["cin"], layer["cout"]), dtype=jnp.float32)
        if layer["use_bias"]:
            b = 0.05 * jax.random.normal(kb_, (layer["cout"],), dtype=jnp.float32)
        else:
            b = jnp.zeros((layer["cout"],), dtype=jnp.float32)
        p = dict(w=w, b=b)
        if layer["bn"]:
            # PyTorch BatchNorm2d default init: gamma=1, beta=0.
            p["gamma"] = jnp.ones((layer["cout"],), dtype=jnp.float32)
            p["beta"] = jnp.zeros((layer["cout"],), dtype=jnp.float32)
        params.append(p)
    return params


def discriminator_forward(params, cfg, x_nchw):
    x = jnp.transpose(x_nchw, (0, 2, 3, 1)).astype(jnp.float32)   # NCHW -> NHWC
    last = len(cfg) - 1
    for idx, (layer, p) in enumerate(zip(cfg, params)):
        out_dtype = jnp.float32 if idx == last else jnp.bfloat16
        y, stats, tile_m = conv2d_k4(
            x, p["w"], p["b"], stride=layer["stride"],
            apply_lrelu=layer["lrelu_in_conv"], out_dtype=out_dtype)
        if layer["bn"]:
            x = batchnorm_lrelu(y, stats, tile_m, p["gamma"], p["beta"])
        else:
            x = y
    x = x[..., :1].astype(jnp.float32)               # drop channel padding (Cout=1)
    return jnp.transpose(x, (0, 3, 1, 2))            # NHWC -> NCHW


# ----------------------------------- main ------------------------------------

if __name__ == "__main__":
    image_channels = 3
    num_filters_last = 16   # small for a quick synthetic run (default is 64)
    n_layers = 3
    N, H, W = 2, 32, 32

    key = jax.random.PRNGKey(0)
    kx, kp = jax.random.split(key)
    x = jax.random.normal(kx, (N, image_channels, H, W), dtype=jnp.float32)

    cfg = build_config(image_channels, num_filters_last, n_layers)
    params = init_params(kp, cfg)

    fwd = jax.jit(functools.partial(discriminator_forward, params, cfg))
    out = fwd(x)
    jax.block_until_ready(out)

    assert out.shape == (N, 1, 2, 2), out.shape
    assert jnp.all(jnp.isfinite(out))
    print("KERNEL_OK")
</pallas_src>

<mosaic_0001>
module attributes {stable_mosaic.version = 11 : i64} {
  func.func @_conv_kernel(%arg0: i32, %arg1: i32, %arg2: i32, %arg3: memref<1x1x17x17x12xbf16, #tpu.memory_space<vmem>>, %arg4: memref<1x48x128xbf16, #tpu.memory_space<vmem>>, %arg5: memref<1x128xf32, #tpu.memory_space<vmem>>, %arg6: memref<1x256x128xbf16, #tpu.memory_space<vmem>>, %arg7: memref<1x1x2x128xf32, #tpu.memory_space<vmem>>) attributes {dimension_semantics = [#tpu.dimension_semantics<parallel>, #tpu.dimension_semantics<parallel>, #tpu.dimension_semantics<parallel>], iteration_bounds = array<i64: 2, 1, 1>, scalar_prefetch = 0 : i64, scratch_operands = 0 : i64, tpu.core_type = #tpu.core_type<tc>, window_params = [{transform_indices = @transform_0, window_bounds = array<i64: 1, 1, 17, 17, 12>}, {transform_indices = @transform_1, window_bounds = array<i64: 1, 48, 128>}, {transform_indices = @transform_2, window_bounds = array<i64: 1, 128>}, {transform_indices = @transform_3, window_bounds = array<i64: 1, 256, 128>}, {transform_indices = @transform_4, window_bounds = array<i64: 1, 1, 2, 128>}]} {
    %c0 = arith.constant 0 : index
    %c0_0 = arith.constant 0 : index
    %c0_1 = arith.constant 0 : index
    %c0_2 = arith.constant 0 : index
    %c0_3 = arith.constant 0 : index
    %0 = vector.load %arg3[%c0, %c0_0, %c0_1, %c0_2, %c0_3] : memref<1x1x17x17x12xbf16, #tpu.memory_space<vmem>>, vector<1x1x16x16x12xbf16>
    %1 = vector.shape_cast %0 : vector<1x1x16x16x12xbf16> to vector<16x16x12xbf16>
    %2 = vector.shape_cast %1 : vector<16x16x12xbf16> to vector<256x12xbf16>
    %c0_4 = arith.constant 0 : index
    %c0_5 = arith.constant 0 : index
    %c0_6 = arith.constant 0 : index
    %c1 = arith.constant 1 : index
    %c0_7 = arith.constant 0 : index
    %3 = vector.load %arg3[%c0_4, %c0_5, %c0_6, %c1, %c0_7] : memref<1x1x17x17x12xbf16, #tpu.memory_space<vmem>>, vector<1x1x16x16x12xbf16>
    %4 = vector.shape_cast %3 : vector<1x1x16x16x12xbf16> to vector<16x16x12xbf16>
    %5 = vector.shape_cast %4 : vector<16x16x12xbf16> to vector<256x12xbf16>
    %c0_8 = arith.constant 0 : index
    %c0_9 = arith.constant 0 : index
    %c1_10 = arith.constant 1 : index
    %c0_11 = arith.constant 0 : index
    %c0_12 = arith.constant 0 : index
    %6 = vector.load %arg3[%c0_8, %c0_9, %c1_10, %c0_11, %c0_12] : memref<1x1x17x17x12xbf16, #tpu.memory_space<vmem>>, vector<1x1x16x16x12xbf16>
    %7 = vector.shape_cast %6 : vector<1x1x16x16x12xbf16> to vector<16x16x12xbf16>
    %8 = vector.shape_cast %7 : vector<16x16x12xbf16> to vector<256x12xbf16>
    %c0_13 = arith.constant 0 : index
    %c0_14 = arith.constant 0 : index
    %c1_15 = arith.constant 1 : index
    %c1_16 = arith.constant 1 : index
    %c0_17 = arith.constant 0 : index
    %9 = vector.load %arg3[%c0_13, %c0_14, %c1_15, %c1_16, %c0_17] : memref<1x1x17x17x12xbf16, #tpu.memory_space<vmem>>, vector<1x1x16x16x12xbf16>
    %10 = vector.shape_cast %9 : vector<1x1x16x16x12xbf16> to vector<16x16x12xbf16>
    %11 = vector.shape_cast %10 : vector<16x16x12xbf16> to vector<256x12xbf16>
    %12 = tpu.concatenate %2, %5, %8, %11 in 1 : vector<256x12xbf16>, vector<256x12xbf16>, vector<256x12xbf16>, vector<256x12xbf16> -> vector<256x48xbf16>
    %c0_18 = arith.constant 0 : index
    %c0_19 = arith.constant 0 : index
    %c0_20 = arith.constant 0 : index
    %13 = vector.load %arg4[%c0_18, %c0_19, %c0_20] : memref<1x48x128xbf16, #tpu.memory_space<vmem>>, vector<1x48x128xbf16>
    %14 = vector.shape_cast %13 : vector<1x48x128xbf16> to vector<48x128xbf16>
    %cst = arith.constant dense<0.000000e+00> : vector<256x128xf32>
    %15 = tpu.matmul %12, %14, %cst {dimension_numbers = #tpu.dot_dimension_numbers<[1], [0], [0], [1], [0, 0, 1, 1], [], []>} : vector<256x48xbf16>, vector<48x128xbf16>, vector<256x128xf32> -> vector<256x128xf32>
    %c0_21 = arith.constant 0 : index
    %c0_22 = arith.constant 0 : index
    %16 = vector.load %arg5[%c0_21, %c0_22] : memref<1x128xf32, #tpu.memory_space<vmem>>, vector<1x128xf32>
    %17 = vector.broadcast %16 : vector<1x128xf32> to vector<256x128xf32>
    %18 = arith.addf %15, %17 : vector<256x128xf32>
    %cst_23 = arith.constant 2.000000e-01 : f32
    %19 = vector.broadcast %cst_23 : f32 to vector<256x128xf32>
    %20 = arith.mulf %19, %18 : vector<256x128xf32>
    %21 = arith.maximumf %18, %20 : vector<256x128xf32>
    %22 = arith.truncf %21 : vector<256x128xf32> to vector<256x128xbf16>
    %c0_24 = arith.constant 0 : index
    %c0_25 = arith.constant 0 : index
    %c0_26 = arith.constant 0 : index
    %23 = vector.load %arg6[%c0_24, %c0_25, %c0_26] : memref<1x256x128xbf16, #tpu.memory_space<vmem>>, vector<1x256x128xbf16>
    %24 = vector.shape_cast %23 : vector<1x256x128xbf16> to vector<256x128xbf16>
    %25 = vector.shape_cast %22 : vector<256x128xbf16> to vector<1x256x128xbf16>
    tpu.vector_store %arg6[%c0_24, %c0_25, %c0_26], %25 {strides = array<i32>} : memref<1x256x128xbf16, #tpu.memory_space<vmem>>, vector<1x256x128xbf16>,
    %cst_27 = arith.constant dense<0.000000e+00> : vector<128xf32>
    %26 = vector.multi_reduction <add>, %21, %cst_27 [0] : vector<256x128xf32> to vector<128xf32>
    %27 = vector.shape_cast %26 : vector<128xf32> to vector<1x128xf32>
    %cst_28 = arith.constant 3.906250e-03 : f32
    %28 = vector.broadcast %cst_28 : f32 to vector<1x128xf32>
    %29 = arith.mulf %27, %28 : vector<1x128xf32>
    %30 = vector.broadcast %29 : vector<1x128xf32> to vector<256x128xf32>
    %31 = arith.subf %21, %30 : vector<256x128xf32>
    %32 = arith.mulf %31, %31 : vector<256x128xf32>
    %cst_29 = arith.constant dense<0.000000e+00> : vector<128xf32>
    %33 = vector.multi_reduction <add>, %32, %cst_29 [0] : vector<256x128xf32> to vector<128xf32>
    %34 = vector.shape_cast %33 : vector<128xf32> to vector<1x128xf32>
    %35 = tpu.concatenate %27, %34 in 0 : vector<1x128xf32>, vector<1x128xf32> -> vector<2x128xf32>
    %c0_30 = arith.constant 0 : index
    %c0_31 = arith.constant 0 : index
    %c0_32 = arith.constant 0 : index
    %c0_33 = arith.constant 0 : index
    %36 = vector.load %arg7[%c0_30, %c0_31, %c0_32, %c0_33] : memref<1x1x2x128xf32, #tpu.memory_space<vmem>>, vector<1x1x2x128xf32>
    %37 = vector.shape_cast %36 : vector<1x1x2x128xf32> to vector<2x128xf32>
    %38 = vector.shape_cast %35 : vector<2x128xf32> to vector<1x1x2x128xf32>
    tpu.vector_store %arg7[%c0_30, %c0_31, %c0_32, %c0_33], %38 {strides = array<i32>} : memref<1x1x2x128xf32, #tpu.memory_space<vmem>>, vector<1x1x2x128xf32>,
    return
  }
  func.func @transform_0(%arg0: i32, %arg1: i32, %arg2: i32) -> (i32, i32, i32, i32, i32) {
    %c0_i32 = arith.constant 0 : i32
    %c0_i32_0 = arith.constant 0 : i32
    %c0_i32_1 = arith.constant 0 : i32
    %c0_i32_2 = arith.constant 0 : i32
    return %arg0, %arg1, %c0_i32, %c0_i32_0, %c0_i32_1 : i32, i32, i32, i32, i32
  }
  func.func @transform_1(%arg0: i32, %arg1: i32, %arg2: i32) -> (i32, i32, i32) {
    %c0_i32 = arith.constant 0 : i32
    %c0_i32_0 = arith.constant 0 : i32
    %c0_i32_1 = arith.constant 0 : i32
    return %c0_i32, %c0_i32_0, %arg2 : i32, i32, i32
  }
  func.func @transform_2(%arg0: i32, %arg1: i32, %arg2: i32) -> (i32, i32) {
    %c0_i32 = arith.constant 0 : i32
    %c0_i32_0 = arith.constant 0 : i32
    return %c0_i32, %arg2 : i32, i32
  }
  func.func @transform_3(%arg0: i32, %arg1: i32, %arg2: i32) -> (i32, i32, i32) {
    %c0_i32 = arith.constant 0 : i32
    return %arg0, %arg1, %arg2 : i32, i32, i32
  }
  func.func @transform_4(%arg0: i32, %arg1: i32, %arg2: i32) -> (i32, i32, i32, i32) {
    %c0_i32 = arith.constant 0 : i32
    %c0_i32_0 = arith.constant 0 : i32
    return %arg0, %arg1, %c0_i32, %arg2 : i32, i32, i32, i32
  }
}

module attributes {stable_mosaic.version = 11 : i64} {
  func.func @_conv_kernel(%arg0: i32, %arg1: i32, %arg2: i32, %arg3: memref<1x1x9x9x512xbf16, #tpu.memory_space<vmem>>, %arg4: memref<4x512x128xbf16, #tpu.memory_space<vmem>>, %arg5: memref<1x128xf32, #tpu.memory_space<vmem>>, %arg6: memref<1x64x128xbf16, #tpu.memory_space<vmem>>, %arg7: memref<1x1x2x128xf32, #tpu.memory_space<vmem>>) attributes {dimension_semantics = [#tpu.dimension_semantics<parallel>, #tpu.dimension_semantics<parallel>, #tpu.dimension_semantics<parallel>], iteration_bounds = array<i64: 2, 1, 1>, scalar_prefetch = 0 : i64, scratch_operands = 0 : i64, tpu.core_type = #tpu.core_type<tc>, window_params = [{transform_indices = @transform_0, window_bounds = array<i64: 1, 1, 9, 9, 512>}, {transform_indices = @transform_1, window_bounds = array<i64: 4, 512, 128>}, {transform_indices = @transform_2, window_bounds = array<i64: 1, 128>}, {transform_indices = @transform_3, window_bounds = array<i64: 1, 64, 128>}, {transform_indices = @transform_4, window_bounds = array<i64: 1, 1, 2, 128>}]} {
    %c0 = arith.constant 0 : index
    %c0_0 = arith.constant 0 : index
    %c0_1 = arith.constant 0 : index
    %c0_2 = arith.constant 0 : index
    %c0_3 = arith.constant 0 : index
    %0 = vector.load %arg3[%c0, %c0_0, %c0_1, %c0_2, %c0_3] : memref<1x1x9x9x512xbf16, #tpu.memory_space<vmem>>, vector<1x1x8x8x512xbf16>
    %1 = vector.shape_cast %0 : vector<1x1x8x8x512xbf16> to vector<8x8x512xbf16>
    %2 = vector.shape_cast %1 : vector<8x8x512xbf16> to vector<64x512xbf16>
    %c0_4 = arith.constant 0 : index
    %c0_5 = arith.constant 0 : index
    %c0_6 = arith.constant 0 : index
    %3 = vector.load %arg4[%c0_4, %c0_5, %c0_6] : memref<4x512x128xbf16, #tpu.memory_space<vmem>>, vector<1x512x128xbf16>
    %4 = vector.shape_cast %3 : vector<1x512x128xbf16> to vector<512x128xbf16>
    %cst = arith.constant dense<0.000000e+00> : vector<64x128xf32>
    %5 = tpu.matmul %2, %4, %cst {dimension_numbers = #tpu.dot_dimension_numbers<[1], [0], [0], [1], [0, 0, 1, 1], [], []>} : vector<64x512xbf16>, vector<512x128xbf16>, vector<64x128xf32> -> vector<64x128xf32>
    %c0_7 = arith.constant 0 : index
    %c0_8 = arith.constant 0 : index
    %c0_9 = arith.constant 0 : index
    %c1 = arith.constant 1 : index
    %c0_10 = arith.constant 0 : index
    %6 = vector.load %arg3[%c0_7, %c0_8, %c0_9, %c1, %c0_10] : memref<1x1x9x9x512xbf16, #tpu.memory_space<vmem>>, vector<1x1x8x8x512xbf16>
    %7 = vector.shape_cast %6 : vector<1x1x8x8x512xbf16> to vector<8x8x512xbf16>
    %8 = vector.shape_cast %7 : vector<8x8x512xbf16> to vector<64x512xbf16>
    %c1_11 = arith.constant 1 : index
    %c0_12 = arith.constant 0 : index
    %c0_13 = arith.constant 0 : index
    %9 = vector.load %arg4[%c1_11, %c0_12, %c0_13] : memref<4x512x128xbf16, #tpu.memory_space<vmem>>, vector<1x512x128xbf16>
    %10 = vector.shape_cast %9 : vector<1x512x128xbf16> to vector<512x128xbf16>
    %cst_14 = arith.constant dense<0.000000e+00> : vector<64x128xf32>
    %11 = tpu.matmul %8, %10, %cst_14 {dimension_numbers = #tpu.dot_dimension_numbers<[1], [0], [0], [1], [0, 0, 1, 1], [], []>} : vector<64x512xbf16>, vector<512x128xbf16>, vector<64x128xf32> -> vector<64x128xf32>
    %12 = arith.addf %5, %11 : vector<64x128xf32>
    %c0_15 = arith.constant 0 : index
    %c0_16 = arith.constant 0 : index
    %c1_17 = arith.constant 1 : index
    %c0_18 = arith.constant 0 : index
    %c0_19 = arith.constant 0 : index
    %13 = vector.load %arg3[%c0_15, %c0_16, %c1_17, %c0_18, %c0_19] : memref<1x1x9x9x512xbf16, #tpu.memory_space<vmem>>, vector<1x1x8x8x512xbf16>
    %14 = vector.shape_cast %13 : vector<1x1x8x8x512xbf16> to vector<8x8x512xbf16>
    %15 = vector.shape_cast %14 : vector<8x8x512xbf16> to vector<64x512xbf16>
    %c2 = arith.constant 2 : index
    %c0_20 = arith.constant 0 : index
    %c0_21 = arith.constant 0 : index
    %16 = vector.load %arg4[%c2, %c0_20, %c0_21] : memref<4x512x128xbf16, #tpu.memory_space<vmem>>, vector<1x512x128xbf16>
    %17 = vector.shape_cast %16 : vector<1x512x128xbf16> to vector<512x128xbf16>
    %cst_22 = arith.constant dense<0.000000e+00> : vector<64x128xf32>
    %18 = tpu.matmul %15, %17, %cst_22 {dimension_numbers = #tpu.dot_dimension_numbers<[1], [0], [0], [1], [0, 0, 1, 1], [], []>} : vector<64x512xbf16>, vector<512x128xbf16>, vector<64x128xf32> -> vector<64x128xf32>
    %19 = arith.addf %12, %18 : vector<64x128xf32>
    %c0_23 = arith.constant 0 : index
    %c0_24 = arith.constant 0 : index
    %c1_25 = arith.constant 1 : index
    %c1_26 = arith.constant 1 : index
    %c0_27 = arith.constant 0 : index
    %20 = vector.load %arg3[%c0_23, %c0_24, %c1_25, %c1_26, %c0_27] : memref<1x1x9x9x512xbf16, #tpu.memory_space<vmem>>, vector<1x1x8x8x512xbf16>
    %21 = vector.shape_cast %20 : vector<1x1x8x8x512xbf16> to vector<8x8x512xbf16>
    %22 = vector.shape_cast %21 : vector<8x8x512xbf16> to vector<64x512xbf16>
    %c3 = arith.constant 3 : index
    %c0_28 = arith.constant 0 : index
    %c0_29 = arith.constant 0 : index
    %23 = vector.load %arg4[%c3, %c0_28, %c0_29] : memref<4x512x128xbf16, #tpu.memory_space<vmem>>, vector<1x512x128xbf16>
    %24 = vector.shape_cast %23 : vector<1x512x128xbf16> to vector<512x128xbf16>
    %cst_30 = arith.constant dense<0.000000e+00> : vector<64x128xf32>
    %25 = tpu.matmul %22, %24, %cst_30 {dimension_numbers = #tpu.dot_dimension_numbers<[1], [0], [0], [1], [0, 0, 1, 1], [], []>} : vector<64x512xbf16>, vector<512x128xbf16>, vector<64x128xf32> -> vector<64x128xf32>
    %26 = arith.addf %19, %25 : vector<64x128xf32>
    %c0_31 = arith.constant 0 : index
    %c0_32 = arith.constant 0 : index
    %27 = vector.load %arg5[%c0_31, %c0_32] : memref<1x128xf32, #tpu.memory_space<vmem>>, vector<1x128xf32>
    %28 = vector.broadcast %27 : vector<1x128xf32> to vector<64x128xf32>
    %29 = arith.addf %26, %28 : vector<64x128xf32>
    %30 = arith.truncf %29 : vector<64x128xf32> to vector<64x128xbf16>
    %c0_33 = arith.constant 0 : index
    %c0_34 = arith.constant 0 : index
    %c0_35 = arith.constant 0 : index
    %31 = vector.load %arg6[%c0_33, %c0_34, %c0_35] : memref<1x64x128xbf16, #tpu.memory_space<vmem>>, vector<1x64x128xbf16>
    %32 = vector.shape_cast %31 : vector<1x64x128xbf16> to vector<64x128xbf16>
    %33 = vector.shape_cast %30 : vector<64x128xbf16> to vector<1x64x128xbf16>
    tpu.vector_store %arg6[%c0_33, %c0_34, %c0_35], %33 {strides = array<i32>} : memref<1x64x128xbf16, #tpu.memory_space<vmem>>, vector<1x64x128xbf16>,
    %cst_36 = arith.constant dense<0.000000e+00> : vector<128xf32>
    %34 = vector.multi_reduction <add>, %29, %cst_36 [0] : vector<64x128xf32> to vector<128xf32>
    %35 = vector.shape_cast %34 : vector<128xf32> to vector<1x128xf32>
    %cst_37 = arith.constant 1.562500e-02 : f32
    %36 = vector.broadcast %cst_37 : f32 to vector<1x128xf32>
    %37 = arith.mulf %35, %36 : vector<1x128xf32>
    %38 = vector.broadcast %37 : vector<1x128xf32> to vector<64x128xf32>
    %39 = arith.subf %29, %38 : vector<64x128xf32>
    %40 = arith.mulf %39, %39 : vector<64x128xf32>
    %cst_38 = arith.constant dense<0.000000e+00> : vector<128xf32>
    %41 = vector.multi_reduction <add>, %40, %cst_38 [0] : vector<64x128xf32> to vector<128xf32>
    %42 = vector.shape_cast %41 : vector<128xf32> to vector<1x128xf32>
    %43 = tpu.concatenate %35, %42 in 0 : vector<1x128xf32>, vector<1x128xf32> -> vector<2x128xf32>
    %c0_39 = arith.constant 0 : index
    %c0_40 = arith.constant 0 : index
    %c0_41 = arith.constant 0 : index
    %c0_42 = arith.constant 0 : index
    %44 = vector.load %arg7[%c0_39, %c0_40, %c0_41, %c0_42] : memref<1x1x2x128xf32, #tpu.memory_space<vmem>>, vector<1x1x2x128xf32>
    %45 = vector.shape_cast %44 : vector<1x1x2x128xf32> to vector<2x128xf32>
    %46 = vector.shape_cast %43 : vector<2x128xf32> to vector<1x1x2x128xf32>
    tpu.vector_store %arg7[%c0_39, %c0_40, %c0_41, %c0_42], %46 {strides = array<i32>} : memref<1x1x2x128xf32, #tpu.memory_space<vmem>>, vector<1x1x2x128xf32>,
    return
  }
  func.func @transform_0(%arg0: i32, %arg1: i32, %arg2: i32) -> (i32, i32, i32, i32, i32) {
    %c0_i32 = arith.constant 0 : i32
    %c0_i32_0 = arith.constant 0 : i32
    %c0_i32_1 = arith.constant 0 : i32
    %c0_i32_2 = arith.constant 0 : i32
    return %arg0, %arg1, %c0_i32, %c0_i32_0, %c0_i32_1 : i32, i32, i32, i32, i32
  }
  func.func @transform_1(%arg0: i32, %arg1: i32, %arg2: i32) -> (i32, i32, i32) {
    %c0_i32 = arith.constant 0 : i32
    %c0_i32_0 = arith.constant 0 : i32
    %c0_i32_1 = arith.constant 0 : i32
    return %c0_i32, %c0_i32_0, %arg2 : i32, i32, i32
  }
  func.func @transform_2(%arg0: i32, %arg1: i32, %arg2: i32) -> (i32, i32) {
    %c0_i32 = arith.constant 0 : i32
    %c0_i32_0 = arith.constant 0 : i32
    return %c0_i32, %arg2 : i32, i32
  }
  func.func @transform_3(%arg0: i32, %arg1: i32, %arg2: i32) -> (i32, i32, i32) {
    %c0_i32 = arith.constant 0 : i32
    return %arg0, %arg1, %arg2 : i32, i32, i32
  }
  func.func @transform_4(%arg0: i32, %arg1: i32, %arg2: i32) -> (i32, i32, i32, i32) {
    %c0_i32 = arith.constant 0 : i32
    %c0_i32_0 = arith.constant 0 : i32
    return %arg0, %arg1, %c0_i32, %arg2 : i32, i32, i32, i32
  }
}

module attributes {stable_mosaic.version = 11 : i64} {
  func.func @_bn_apply_kernel(%arg0: i32, %arg1: i32, %arg2: memref<1x64x128xbf16, #tpu.memory_space<vmem>>, %arg3: memref<1x128xf32, #tpu.memory_space<vmem>>, %arg4: memref<1x128xf32, #tpu.memory_space<vmem>>, %arg5: memref<1x64x128xbf16, #tpu.memory_space<vmem>>) attributes {dimension_semantics = [#tpu.dimension_semantics<parallel>, #tpu.dimension_semantics<parallel>], iteration_bounds = array<i64: 2, 1>, scalar_prefetch = 0 : i64, scratch_operands = 0 : i64, tpu.core_type = #tpu.core_type<tc>, window_params = [{transform_indices = @transform_0, window_bounds = array<i64: 1, 64, 128>}, {pipeline_mode = #tpu.pipeline_mode<synchronous>, transform_indices = @transform_1, window_bounds = array<i64: 1, 128>}, {pipeline_mode = #tpu.pipeline_mode<synchronous>, transform_indices = @transform_2, window_bounds = array<i64: 1, 128>}, {transform_indices = @transform_3, window_bounds = array<i64: 1, 64, 128>}]} {
    %c0 = arith.constant 0 : index
    %c0_0 = arith.constant 0 : index
    %c0_1 = arith.constant 0 : index
    %0 = vector.load %arg2[%c0, %c0_0, %c0_1] : memref<1x64x128xbf16, #tpu.memory_space<vmem>>, vector<1x64x128xbf16>
    %1 = vector.shape_cast %0 : vector<1x64x128xbf16> to vector<64x128xbf16>
    %2 = arith.extf %1 : vector<64x128xbf16> to vector<64x128xf32>
    %c0_2 = arith.constant 0 : index
    %c0_3 = arith.constant 0 : index
    %3 = vector.load %arg3[%c0_2, %c0_3] : memref<1x128xf32, #tpu.memory_space<vmem>>, vector<1x128xf32>
    %4 = vector.broadcast %3 : vector<1x128xf32> to vector<64x128xf32>
    %5 = arith.mulf %2, %4 : vector<64x128xf32>
    %c0_4 = arith.constant 0 : index
    %c0_5 = arith.constant 0 : index
    %6 = vector.load %arg4[%c0_4, %c0_5] : memref<1x128xf32, #tpu.memory_space<vmem>>, vector<1x128xf32>
    %7 = vector.broadcast %6 : vector<1x128xf32> to vector<64x128xf32>
    %8 = arith.addf %5, %7 : vector<64x128xf32>
    %cst = arith.constant 2.000000e-01 : f32
    %9 = vector.broadcast %cst : f32 to vector<64x128xf32>
    %10 = arith.mulf %9, %8 : vector<64x128xf32>
    %11 = arith.maximumf %8, %10 : vector<64x128xf32>
    %12 = arith.truncf %11 : vector<64x128xf32> to vector<64x128xbf16>
    %c0_6 = arith.constant 0 : index
    %c0_7 = arith.constant 0 : index
    %c0_8 = arith.constant 0 : index
    %13 = vector.load %arg5[%c0_6, %c0_7, %c0_8] : memref<1x64x128xbf16, #tpu.memory_space<vmem>>, vector<1x64x128xbf16>
    %14 = vector.shape_cast %13 : vector<1x64x128xbf16> to vector<64x128xbf16>
    %15 = vector.shape_cast %12 : vector<64x128xbf16> to vector<1x64x128xbf16>
    tpu.vector_store %arg5[%c0_6, %c0_7, %c0_8], %15 {strides = array<i32>} : memref<1x64x128xbf16, #tpu.memory_space<vmem>>, vector<1x64x128xbf16>,
    return
  }
  func.func @transform_0(%arg0: i32, %arg1: i32) -> (i32, i32, i32) {
    %c0_i32 = arith.constant 0 : i32
    %c0_i32_0 = arith.constant 0 : i32
    return %arg0, %arg1, %c0_i32 : i32, i32, i32
  }
  func.func @transform_1(%arg0: i32, %arg1: i32) -> (i32, i32) {
    %c0_i32 = arith.constant 0 : i32
    %c0_i32_0 = arith.constant 0 : i32
    %c0_i32_1 = arith.constant 0 : i32
    return %c0_i32, %c0_i32_0 : i32, i32
  }
  func.func @transform_2(%arg0: i32, %arg1: i32) -> (i32, i32) {
    %c0_i32 = arith.constant 0 : i32
    %c0_i32_0 = arith.constant 0 : i32
    %c0_i32_1 = arith.constant 0 : i32
    return %c0_i32, %c0_i32_0 : i32, i32
  }
  func.func @transform_3(%arg0: i32, %arg1: i32) -> (i32, i32, i32) {
    %c0_i32 = arith.constant 0 : i32
    %c0_i32_0 = arith.constant 0 : i32
    return %arg0, %arg1, %c0_i32 : i32, i32, i32
  }
}

module attributes {stable_mosaic.version = 11 : i64} {
  func.func @_conv_kernel(%arg0: i32, %arg1: i32, %arg2: i32, %arg3: memref<1x1x5x5x512xbf16, #tpu.memory_space<vmem>>, %arg4: memref<4x512x128xbf16, #tpu.memory_space<vmem>>, %arg5: memref<1x128xf32, #tpu.memory_space<vmem>>, %arg6: memref<1x16x128xbf16, #tpu.memory_space<vmem>>, %arg7: memref<1x1x2x128xf32, #tpu.memory_space<vmem>>) attributes {dimension_semantics = [#tpu.dimension_semantics<parallel>, #tpu.dimension_semantics<parallel>, #tpu.dimension_semantics<parallel>], iteration_bounds = array<i64: 2, 1, 1>, scalar_prefetch = 0 : i64, scratch_operands = 0 : i64, tpu.core_type = #tpu.core_type<tc>, window_params = [{transform_indices = @transform_0, window_bounds = array<i64: 1, 1, 5, 5, 512>}, {transform_indices = @transform_1, window_bounds = array<i64: 4, 512, 128>}, {transform_indices = @transform_2, window_bounds = array<i64: 1, 128>}, {transform_indices = @transform_3, window_bounds = array<i64: 1, 16, 128>}, {transform_indices = @transform_4, window_bounds = array<i64: 1, 1, 2, 128>}]} {
    %c0 = arith.constant 0 : index
    %c0_0 = arith.constant 0 : index
    %c0_1 = arith.constant 0 : index
    %c0_2 = arith.constant 0 : index
    %c0_3 = arith.constant 0 : index
    %0 = vector.load %arg3[%c0, %c0_0, %c0_1, %c0_2, %c0_3] : memref<1x1x5x5x512xbf16, #tpu.memory_space<vmem>>, vector<1x1x4x4x512xbf16>
    %1 = vector.shape_cast %0 : vector<1x1x4x4x512xbf16> to vector<4x4x512xbf16>
    %2 = vector.shape_cast %1 : vector<4x4x512xbf16> to vector<16x512xbf16>
    %c0_4 = arith.constant 0 : index
    %c0_5 = arith.constant 0 : index
    %c0_6 = arith.constant 0 : index
    %3 = vector.load %arg4[%c0_4, %c0_5, %c0_6] : memref<4x512x128xbf16, #tpu.memory_space<vmem>>, vector<1x512x128xbf16>
    %4 = vector.shape_cast %3 : vector<1x512x128xbf16> to vector<512x128xbf16>
    %cst = arith.constant dense<0.000000e+00> : vector<16x128xf32>
    %5 = tpu.matmul %2, %4, %cst {dimension_numbers = #tpu.dot_dimension_numbers<[1], [0], [0], [1], [0, 0, 1, 1], [], []>} : vector<16x512xbf16>, vector<512x128xbf16>, vector<16x128xf32> -> vector<16x128xf32>
    %c0_7 = arith.constant 0 : index
    %c0_8 = arith.constant 0 : index
    %c0_9 = arith.constant 0 : index
    %c1 = arith.constant 1 : index
    %c0_10 = arith.constant 0 : index
    %6 = vector.load %arg3[%c0_7, %c0_8, %c0_9, %c1, %c0_10] : memref<1x1x5x5x512xbf16, #tpu.memory_space<vmem>>, vector<1x1x4x4x512xbf16>
    %7 = vector.shape_cast %6 : vector<1x1x4x4x512xbf16> to vector<4x4x512xbf16>
    %8 = vector.shape_cast %7 : vector<4x4x512xbf16> to vector<16x512xbf16>
    %c1_11 = arith.constant 1 : index
    %c0_12 = arith.constant 0 : index
    %c0_13 = arith.constant 0 : index
    %9 = vector.load %arg4[%c1_11, %c0_12, %c0_13] : memref<4x512x128xbf16, #tpu.memory_space<vmem>>, vector<1x512x128xbf16>
    %10 = vector.shape_cast %9 : vector<1x512x128xbf16> to vector<512x128xbf16>
    %cst_14 = arith.constant dense<0.000000e+00> : vector<16x128xf32>
    %11 = tpu.matmul %8, %10, %cst_14 {dimension_numbers = #tpu.dot_dimension_numbers<[1], [0], [0], [1], [0, 0, 1, 1], [], []>} : vector<16x512xbf16>, vector<512x128xbf16>, vector<16x128xf32> -> vector<16x128xf32>
    %12 = arith.addf %5, %11 : vector<16x128xf32>
    %c0_15 = arith.constant 0 : index
    %c0_16 = arith.constant 0 : index
    %c1_17 = arith.constant 1 : index
    %c0_18 = arith.constant 0 : index
    %c0_19 = arith.constant 0 : index
    %13 = vector.load %arg3[%c0_15, %c0_16, %c1_17, %c0_18, %c0_19] : memref<1x1x5x5x512xbf16, #tpu.memory_space<vmem>>, vector<1x1x4x4x512xbf16>
    %14 = vector.shape_cast %13 : vector<1x1x4x4x512xbf16> to vector<4x4x512xbf16>
    %15 = vector.shape_cast %14 : vector<4x4x512xbf16> to vector<16x512xbf16>
    %c2 = arith.constant 2 : index
    %c0_20 = arith.constant 0 : index
    %c0_21 = arith.constant 0 : index
    %16 = vector.load %arg4[%c2, %c0_20, %c0_21] : memref<4x512x128xbf16, #tpu.memory_space<vmem>>, vector<1x512x128xbf16>
    %17 = vector.shape_cast %16 : vector<1x512x128xbf16> to vector<512x128xbf16>
    %cst_22 = arith.constant dense<0.000000e+00> : vector<16x128xf32>
    %18 = tpu.matmul %15, %17, %cst_22 {dimension_numbers = #tpu.dot_dimension_numbers<[1], [0], [0], [1], [0, 0, 1, 1], [], []>} : vector<16x512xbf16>, vector<512x128xbf16>, vector<16x128xf32> -> vector<16x128xf32>
    %19 = arith.addf %12, %18 : vector<16x128xf32>
    %c0_23 = arith.constant 0 : index
    %c0_24 = arith.constant 0 : index
    %c1_25 = arith.constant 1 : index
    %c1_26 = arith.constant 1 : index
    %c0_27 = arith.constant 0 : index
    %20 = vector.load %arg3[%c0_23, %c0_24, %c1_25, %c1_26, %c0_27] : memref<1x1x5x5x512xbf16, #tpu.memory_space<vmem>>, vector<1x1x4x4x512xbf16>
    %21 = vector.shape_cast %20 : vector<1x1x4x4x512xbf16> to vector<4x4x512xbf16>
    %22 = vector.shape_cast %21 : vector<4x4x512xbf16> to vector<16x512xbf16>
    %c3 = arith.constant 3 : index
    %c0_28 = arith.constant 0 : index
    %c0_29 = arith.constant 0 : index
    %23 = vector.load %arg4[%c3, %c0_28, %c0_29] : memref<4x512x128xbf16, #tpu.memory_space<vmem>>, vector<1x512x128xbf16>
    %24 = vector.shape_cast %23 : vector<1x512x128xbf16> to vector<512x128xbf16>
    %cst_30 = arith.constant dense<0.000000e+00> : vector<16x128xf32>
    %25 = tpu.matmul %22, %24, %cst_30 {dimension_numbers = #tpu.dot_dimension_numbers<[1], [0], [0], [1], [0, 0, 1, 1], [], []>} : vector<16x512xbf16>, vector<512x128xbf16>, vector<16x128xf32> -> vector<16x128xf32>
    %26 = arith.addf %19, %25 : vector<16x128xf32>
    %c0_31 = arith.constant 0 : index
    %c0_32 = arith.constant 0 : index
    %27 = vector.load %arg5[%c0_31, %c0_32] : memref<1x128xf32, #tpu.memory_space<vmem>>, vector<1x128xf32>
    %28 = vector.broadcast %27 : vector<1x128xf32> to vector<16x128xf32>
    %29 = arith.addf %26, %28 : vector<16x128xf32>
    %30 = arith.truncf %29 : vector<16x128xf32> to vector<16x128xbf16>
    %c0_33 = arith.constant 0 : index
    %c0_34 = arith.constant 0 : index
    %c0_35 = arith.constant 0 : index
    %31 = vector.load %arg6[%c0_33, %c0_34, %c0_35] : memref<1x16x128xbf16, #tpu.memory_space<vmem>>, vector<1x16x128xbf16>
    %32 = vector.shape_cast %31 : vector<1x16x128xbf16> to vector<16x128xbf16>
    %33 = vector.shape_cast %30 : vector<16x128xbf16> to vector<1x16x128xbf16>
    tpu.vector_store %arg6[%c0_33, %c0_34, %c0_35], %33 {strides = array<i32>} : memref<1x16x128xbf16, #tpu.memory_space<vmem>>, vector<1x16x128xbf16>,
    %cst_36 = arith.constant dense<0.000000e+00> : vector<128xf32>
    %34 = vector.multi_reduction <add>, %29, %cst_36 [0] : vector<16x128xf32> to vector<128xf32>
    %35 = vector.shape_cast %34 : vector<128xf32> to vector<1x128xf32>
    %cst_37 = arith.constant 6.250000e-02 : f32
    %36 = vector.broadcast %cst_37 : f32 to vector<1x128xf32>
    %37 = arith.mulf %35, %36 : vector<1x128xf32>
    %38 = vector.broadcast %37 : vector<1x128xf32> to vector<16x128xf32>
    %39 = arith.subf %29, %38 : vector<16x128xf32>
    %40 = arith.mulf %39, %39 : vector<16x128xf32>
    %cst_38 = arith.constant dense<0.000000e+00> : vector<128xf32>
    %41 = vector.multi_reduction <add>, %40, %cst_38 [0] : vector<16x128xf32> to vector<128xf32>
    %42 = vector.shape_cast %41 : vector<128xf32> to vector<1x128xf32>
    %43 = tpu.concatenate %35, %42 in 0 : vector<1x128xf32>, vector<1x128xf32> -> vector<2x128xf32>
    %c0_39 = arith.constant 0 : index
    %c0_40 = arith.constant 0 : index
    %c0_41 = arith.constant 0 : index
    %c0_42 = arith.constant 0 : index
    %44 = vector.load %arg7[%c0_39, %c0_40, %c0_41, %c0_42] : memref<1x1x2x128xf32, #tpu.memory_space<vmem>>, vector<1x1x2x128xf32>
    %45 = vector.shape_cast %44 : vector<1x1x2x128xf32> to vector<2x128xf32>
    %46 = vector.shape_cast %43 : vector<2x128xf32> to vector<1x1x2x128xf32>
    tpu.vector_store %arg7[%c0_39, %c0_40, %c0_41, %c0_42], %46 {strides = array<i32>} : memref<1x1x2x128xf32, #tpu.memory_space<vmem>>, vector<1x1x2x128xf32>,
    return
  }
  func.func @transform_0(%arg0: i32, %arg1: i32, %arg2: i32) -> (i32, i32, i32, i32, i32) {
    %c0_i32 = arith.constant 0 : i32
    %c0_i32_0 = arith.constant 0 : i32
    %c0_i32_1 = arith.constant 0 : i32
    %c0_i32_2 = arith.constant 0 : i32
    return %arg0, %arg1, %c0_i32, %c0_i32_0, %c0_i32_1 : i32, i32, i32, i32, i32
  }
  func.func @transform_1(%arg0: i32, %arg1: i32, %arg2: i32) -> (i32, i32, i32) {
    %c0_i32 = arith.constant 0 : i32
    %c0_i32_0 = arith.constant 0 : i32
    %c0_i32_1 = arith.constant 0 : i32
    return %c0_i32, %c0_i32_0, %arg2 : i32, i32, i32
  }
  func.func @transform_2(%arg0: i32, %arg1: i32, %arg2: i32) -> (i32, i32) {
    %c0_i32 = arith.constant 0 : i32
    %c0_i32_0 = arith.constant 0 : i32
    return %c0_i32, %arg2 : i32, i32
  }
  func.func @transform_3(%arg0: i32, %arg1: i32, %arg2: i32) -> (i32, i32, i32) {
    %c0_i32 = arith.constant 0 : i32
    return %arg0, %arg1, %arg2 : i32, i32, i32
  }
  func.func @transform_4(%arg0: i32, %arg1: i32, %arg2: i32) -> (i32, i32, i32, i32) {
    %c0_i32 = arith.constant 0 : i32
    %c0_i32_0 = arith.constant 0 : i32
    return %arg0, %arg1, %c0_i32, %arg2 : i32, i32, i32, i32
  }
}

module attributes {stable_mosaic.version = 11 : i64} {
  func.func @_bn_apply_kernel(%arg0: i32, %arg1: i32, %arg2: memref<1x16x128xbf16, #tpu.memory_space<vmem>>, %arg3: memref<1x128xf32, #tpu.memory_space<vmem>>, %arg4: memref<1x128xf32, #tpu.memory_space<vmem>>, %arg5: memref<1x16x128xbf16, #tpu.memory_space<vmem>>) attributes {dimension_semantics = [#tpu.dimension_semantics<parallel>, #tpu.dimension_semantics<parallel>], iteration_bounds = array<i64: 2, 1>, scalar_prefetch = 0 : i64, scratch_operands = 0 : i64, tpu.core_type = #tpu.core_type<tc>, window_params = [{transform_indices = @transform_0, window_bounds = array<i64: 1, 16, 128>}, {pipeline_mode = #tpu.pipeline_mode<synchronous>, transform_indices = @transform_1, window_bounds = array<i64: 1, 128>}, {pipeline_mode = #tpu.pipeline_mode<synchronous>, transform_indices = @transform_2, window_bounds = array<i64: 1, 128>}, {transform_indices = @transform_3, window_bounds = array<i64: 1, 16, 128>}]} {
    %c0 = arith.constant 0 : index
    %c0_0 = arith.constant 0 : index
    %c0_1 = arith.constant 0 : index
    %0 = vector.load %arg2[%c0, %c0_0, %c0_1] : memref<1x16x128xbf16, #tpu.memory_space<vmem>>, vector<1x16x128xbf16>
    %1 = vector.shape_cast %0 : vector<1x16x128xbf16> to vector<16x128xbf16>
    %2 = arith.extf %1 : vector<16x128xbf16> to vector<16x128xf32>
    %c0_2 = arith.constant 0 : index
    %c0_3 = arith.constant 0 : index
    %3 = vector.load %arg3[%c0_2, %c0_3] : memref<1x128xf32, #tpu.memory_space<vmem>>, vector<1x128xf32>
    %4 = vector.broadcast %3 : vector<1x128xf32> to vector<16x128xf32>
    %5 = arith.mulf %2, %4 : vector<16x128xf32>
    %c0_4 = arith.constant 0 : index
    %c0_5 = arith.constant 0 : index
    %6 = vector.load %arg4[%c0_4, %c0_5] : memref<1x128xf32, #tpu.memory_space<vmem>>, vector<1x128xf32>
    %7 = vector.broadcast %6 : vector<1x128xf32> to vector<16x128xf32>
    %8 = arith.addf %5, %7 : vector<16x128xf32>
    %cst = arith.constant 2.000000e-01 : f32
    %9 = vector.broadcast %cst : f32 to vector<16x128xf32>
    %10 = arith.mulf %9, %8 : vector<16x128xf32>
    %11 = arith.maximumf %8, %10 : vector<16x128xf32>
    %12 = arith.truncf %11 : vector<16x128xf32> to vector<16x128xbf16>
    %c0_6 = arith.constant 0 : index
    %c0_7 = arith.constant 0 : index
    %c0_8 = arith.constant 0 : index
    %13 = vector.load %arg5[%c0_6, %c0_7, %c0_8] : memref<1x16x128xbf16, #tpu.memory_space<vmem>>, vector<1x16x128xbf16>
    %14 = vector.shape_cast %13 : vector<1x16x128xbf16> to vector<16x128xbf16>
    %15 = vector.shape_cast %12 : vector<16x128xbf16> to vector<1x16x128xbf16>
    tpu.vector_store %arg5[%c0_6, %c0_7, %c0_8], %15 {strides = array<i32>} : memref<1x16x128xbf16, #tpu.memory_space<vmem>>, vector<1x16x128xbf16>,
    return
  }
  func.func @transform_0(%arg0: i32, %arg1: i32) -> (i32, i32, i32) {
    %c0_i32 = arith.constant 0 : i32
    %c0_i32_0 = arith.constant 0 : i32
    return %arg0, %arg1, %c0_i32 : i32, i32, i32
  }
  func.func @transform_1(%arg0: i32, %arg1: i32) -> (i32, i32) {
    %c0_i32 = arith.constant 0 : i32
    %c0_i32_0 = arith.constant 0 : i32
    %c0_i32_1 = arith.constant 0 : i32
    return %c0_i32, %c0_i32_0 : i32, i32
  }
  func.func @transform_2(%arg0: i32, %arg1: i32) -> (i32, i32) {
    %c0_i32 = arith.constant 0 : i32
    %c0_i32_0 = arith.constant 0 : i32
    %c0_i32_1 = arith.constant 0 : i32
    return %c0_i32, %c0_i32_0 : i32, i32
  }
  func.func @transform_3(%arg0: i32, %arg1: i32) -> (i32, i32, i32) {
    %c0_i32 = arith.constant 0 : i32
    %c0_i32_0 = arith.constant 0 : i32
    return %arg0, %arg1, %c0_i32 : i32, i32, i32
  }
}

module attributes {stable_mosaic.version = 11 : i64} {
  func.func @_conv_kernel(%arg0: i32, %arg1: i32, %arg2: i32, %arg3: memref<1x1x6x6x128xbf16, #tpu.memory_space<vmem>>, %arg4: memref<16x128x128xbf16, #tpu.memory_space<vmem>>, %arg5: memref<1x128xf32, #tpu.memory_space<vmem>>, %arg6: memref<1x9x128xbf16, #tpu.memory_space<vmem>>, %arg7: memref<1x1x2x128xf32, #tpu.memory_space<vmem>>) attributes {dimension_semantics = [#tpu.dimension_semantics<parallel>, #tpu.dimension_semantics<parallel>, #tpu.dimension_semantics<parallel>], iteration_bounds = array<i64: 2, 1, 1>, scalar_prefetch = 0 : i64, scratch_operands = 0 : i64, tpu.core_type = #tpu.core_type<tc>, window_params = [{transform_indices = @transform_0, window_bounds = array<i64: 1, 1, 6, 6, 128>}, {transform_indices = @transform_1, window_bounds = array<i64: 16, 128, 128>}, {transform_indices = @transform_2, window_bounds = array<i64: 1, 128>}, {transform_indices = @transform_3, window_bounds = array<i64: 1, 9, 128>}, {transform_indices = @transform_4, window_bounds = array<i64: 1, 1, 2, 128>}]} {
    %c0 = arith.constant 0 : index
    %c0_0 = arith.constant 0 : index
    %c0_1 = arith.constant 0 : index
    %c0_2 = arith.constant 0 : index
    %c0_3 = arith.constant 0 : index
    %0 = vector.load %arg3[%c0, %c0_0, %c0_1, %c0_2, %c0_3] : memref<1x1x6x6x128xbf16, #tpu.memory_space<vmem>>, vector<1x1x3x3x128xbf16>
    %1 = vector.shape_cast %0 : vector<1x1x3x3x128xbf16> to vector<3x3x128xbf16>
    %2 = vector.shape_cast %1 : vector<3x3x128xbf16> to vector<9x128xbf16>
    %c0_4 = arith.constant 0 : index
    %c0_5 = arith.constant 0 : index
    %c0_6 = arith.constant 0 : index
    %3 = vector.load %arg4[%c0_4, %c0_5, %c0_6] : memref<16x128x128xbf16, #tpu.memory_space<vmem>>, vector<1x128x128xbf16>
    %4 = vector.shape_cast %3 : vector<1x128x128xbf16> to vector<128x128xbf16>
    %cst = arith.constant dense<0.000000e+00> : vector<9x128xf32>
    %5 = tpu.matmul %2, %4, %cst {dimension_numbers = #tpu.dot_dimension_numbers<[1], [0], [0], [1], [0, 0, 1, 1], [], []>} : vector<9x128xbf16>, vector<128x128xbf16>, vector<9x128xf32> -> vector<9x128xf32>
    %c0_7 = arith.constant 0 : index
    %c0_8 = arith.constant 0 : index
    %c0_9 = arith.constant 0 : index
    %c1 = arith.constant 1 : index
    %c0_10 = arith.constant 0 : index
    %6 = vector.load %arg3[%c0_7, %c0_8, %c0_9, %c1, %c0_10] : memref<1x1x6x6x128xbf16, #tpu.memory_space<vmem>>, vector<1x1x3x3x128xbf16>
    %7 = vector.shape_cast %6 : vector<1x1x3x3x128xbf16> to vector<3x3x128xbf16>
    %8 = vector.shape_cast %7 : vector<3x3x128xbf16> to vector<9x128xbf16>
    %c1_11 = arith.constant 1 : index
    %c0_12 = arith.constant 0 : index
    %c0_13 = arith.constant 0 : index
    %9 = vector.load %arg4[%c1_11, %c0_12, %c0_13] : memref<16x128x128xbf16, #tpu.memory_space<vmem>>, vector<1x128x128xbf16>
    %10 = vector.shape_cast %9 : vector<1x128x128xbf16> to vector<128x128xbf16>
    %cst_14 = arith.constant dense<0.000000e+00> : vector<9x128xf32>
    %11 = tpu.matmul %8, %10, %cst_14 {dimension_numbers = #tpu.dot_dimension_numbers<[1], [0], [0], [1], [0, 0, 1, 1], [], []>} : vector<9x128xbf16>, vector<128x128xbf16>, vector<9x128xf32> -> vector<9x128xf32>
    %12 = arith.addf %5, %11 : vector<9x128xf32>
    %c0_15 = arith.constant 0 : index
    %c0_16 = arith.constant 0 : index
    %c0_17 = arith.constant 0 : index
    %c2 = arith.constant 2 : index
    %c0_18 = arith.constant 0 : index
    %13 = vector.load %arg3[%c0_15, %c0_16, %c0_17, %c2, %c0_18] : memref<1x1x6x6x128xbf16, #tpu.memory_space<vmem>>, vector<1x1x3x3x128xbf16>
    %14 = vector.shape_cast %13 : vector<1x1x3x3x128xbf16> to vector<3x3x128xbf16>
    %15 = vector.shape_cast %14 : vector<3x3x128xbf16> to vector<9x128xbf16>
    %c2_19 = arith.constant 2 : index
    %c0_20 = arith.constant 0 : index
    %c0_21 = arith.constant 0 : index
    %16 = vector.load %arg4[%c2_19, %c0_20, %c0_21] : memref<16x128x128xbf16, #tpu.memory_space<vmem>>, vector<1x128x128xbf16>
    %17 = vector.shape_cast %16 : vector<1x128x128xbf16> to vector<128x128xbf16>
    %cst_22 = arith.constant dense<0.000000e+00> : vector<9x128xf32>
    %18 = tpu.matmul %15, %17, %cst_22 {dimension_numbers = #tpu.dot_dimension_numbers<[1], [0], [0], [1], [0, 0, 1, 1], [], []>} : vector<9x128xbf16>, vector<128x128xbf16>, vector<9x128xf32> -> vector<9x128xf32>
    %19 = arith.addf %12, %18 : vector<9x128xf32>
    %c0_23 = arith.constant 0 : index
    %c0_24 = arith.constant 0 : index
    %c0_25 = arith.constant 0 : index
    %c3 = arith.constant 3 : index
    %c0_26 = arith.constant 0 : index
    %20 = vector.load %arg3[%c0_23, %c0_24, %c0_25, %c3, %c0_26] : memref<1x1x6x6x128xbf16, #tpu.memory_space<vmem>>, vector<1x1x3x3x128xbf16>
    %21 = vector.shape_cast %20 : vector<1x1x3x3x128xbf16> to vector<3x3x128xbf16>
    %22 = vector.shape_cast %21 : vector<3x3x128xbf16> to vector<9x128xbf16>
    %c3_27 = arith.constant 3 : index
    %c0_28 = arith.constant 0 : index
    %c0_29 = arith.constant 0 : index
    %23 = vector.load %arg4[%c3_27, %c0_28, %c0_29] : memref<16x128x128xbf16, #tpu.memory_space<vmem>>, vector<1x128x128xbf16>
    %24 = vector.shape_cast %23 : vector<1x128x128xbf16> to vector<128x128xbf16>
    %cst_30 = arith.constant dense<0.000000e+00> : vector<9x128xf32>
    %25 = tpu.matmul %22, %24, %cst_30 {dimension_numbers = #tpu.dot_dimension_numbers<[1], [0], [0], [1], [0, 0, 1, 1], [], []>} : vector<9x128xbf16>, vector<128x128xbf16>, vector<9x128xf32> -> vector<9x128xf32>
    %26 = arith.addf %19, %25 : vector<9x128xf32>
    %c0_31 = arith.constant 0 : index
    %c0_32 = arith.constant 0 : index
    %c1_33 = arith.constant 1 : index
    %c0_34 = arith.constant 0 : index
    %c0_35 = arith.constant 0 : index
    %27 = vector.load %arg3[%c0_31, %c0_32, %c1_33, %c0_34, %c0_35] : memref<1x1x6x6x128xbf16, #tpu.memory_space<vmem>>, vector<1x1x3x3x128xbf16>
    %28 = vector.shape_cast %27 : vector<1x1x3x3x128xbf16> to vector<3x3x128xbf16>
    %29 = vector.shape_cast %28 : vector<3x3x128xbf16> to vector<9x128xbf16>
    %c4 = arith.constant 4 : index
    %c0_36 = arith.constant 0 : index
    %c0_37 = arith.constant 0 : index
    %30 = vector.load %arg4[%c4, %c0_36, %c0_37] : memref<16x128x128xbf16, #tpu.memory_space<vmem>>, vector<1x128x128xbf16>
    %31 = vector.shape_cast %30 : vector<1x128x128xbf16> to vector<128x128xbf16>
    %cst_38 = arith.constant dense<0.000000e+00> : vector<9x128xf32>
    %32 = tpu.matmul %29, %31, %cst_38 {dimension_numbers = #tpu.dot_dimension_numbers<[1], [0], [0], [1], [0, 0, 1, 1], [], []>} : vector<9x128xbf16>, vector<128x128xbf16>, vector<9x128xf32> -> vector<9x128xf32>
    %33 = arith.addf %26, %32 : vector<9x128xf32>
    %c0_39 = arith.constant 0 : index
    %c0_40 = arith.constant 0 : index
    %c1_41 = arith.constant 1 : index
    %c1_42 = arith.constant 1 : index
    %c0_43 = arith.constant 0 : index
    %34 = vector.load %arg3[%c0_39, %c0_40, %c1_41, %c1_42, %c0_43] : memref<1x1x6x6x128xbf16, #tpu.memory_space<vmem>>, vector<1x1x3x3x128xbf16>
    %35 = vector.shape_cast %34 : vector<1x1x3x3x128xbf16> to vector<3x3x128xbf16>
    %36 = vector.shape_cast %35 : vector<3x3x128xbf16> to vector<9x128xbf16>
    %c5 = arith.constant 5 : index
    %c0_44 = arith.constant 0 : index
    %c0_45 = arith.constant 0 : index
    %37 = vector.load %arg4[%c5, %c0_44, %c0_45] : memref<16x128x128xbf16, #tpu.memory_space<vmem>>, vector<1x128x128xbf16>
    %38 = vector.shape_cast %37 : vector<1x128x128xbf16> to vector<128x128xbf16>
    %cst_46 = arith.constant dense<0.000000e+00> : vector<9x128xf32>
    %39 = tpu.matmul %36, %38, %cst_46 {dimension_numbers = #tpu.dot_dimension_numbers<[1], [0], [0], [1], [0, 0, 1, 1], [], []>} : vector<9x128xbf16>, vector<128x128xbf16>, vector<9x128xf32> -> vector<9x128xf32>
    %40 = arith.addf %33, %39 : vector<9x128xf32>
    %c0_47 = arith.constant 0 : index
    %c0_48 = arith.constant 0 : index
    %c1_49 = arith.constant 1 : index
    %c2_50 = arith.constant 2 : index
    %c0_51 = arith.constant 0 : index
    %41 = vector.load %arg3[%c0_47, %c0_48, %c1_49, %c2_50, %c0_51] : memref<1x1x6x6x128xbf16, #tpu.memory_space<vmem>>, vector<1x1x3x3x128xbf16>
    %42 = vector.shape_cast %41 : vector<1x1x3x3x128xbf16> to vector<3x3x128xbf16>
    %43 = vector.shape_cast %42 : vector<3x3x128xbf16> to vector<9x128xbf16>
    %c6 = arith.constant 6 : index
    %c0_52 = arith.constant 0 : index
    %c0_53 = arith.constant 0 : index
    %44 = vector.load %arg4[%c6, %c0_52, %c0_53] : memref<16x128x128xbf16, #tpu.memory_space<vmem>>, vector<1x128x128xbf16>
    %45 = vector.shape_cast %44 : vector<1x128x128xbf16> to vector<128x128xbf16>
    %cst_54 = arith.constant dense<0.000000e+00> : vector<9x128xf32>
    %46 = tpu.matmul %43, %45, %cst_54 {dimension_numbers = #tpu.dot_dimension_numbers<[1], [0], [0], [1], [0, 0, 1, 1], [], []>} : vector<9x128xbf16>, vector<128x128xbf16>, vector<9x128xf32> -> vector<9x128xf32>
    %47 = arith.addf %40, %46 : vector<9x128xf32>
    %c0_55 = arith.constant 0 : index
    %c0_56 = arith.constant 0 : index
    %c1_57 = arith.constant 1 : index
    %c3_58 = arith.constant 3 : index
    %c0_59 = arith.constant 0 : index
    %48 = vector.load %arg3[%c0_55, %c0_56, %c1_57, %c3_58, %c0_59] : memref<1x1x6x6x128xbf16, #tpu.memory_space<vmem>>, vector<1x1x3x3x128xbf16>
    %49 = vector.shape_cast %48 : vector<1x1x3x3x128xbf16> to vector<3x3x128xbf16>
    %50 = vector.shape_cast %49 : vector<3x3x128xbf16> to vector<9x128xbf16>
    %c7 = arith.constant 7 : index
    %c0_60 = arith.constant 0 : index
    %c0_61 = arith.constant 0 : index
    %51 = vector.load %arg4[%c7, %c0_60, %c0_61] : memref<16x128x128xbf16, #tpu.memory_space<vmem>>, vector<1x128x128xbf16>
    %52 = vector.shape_cast %51 : vector<1x128x128xbf16> to vector<128x128xbf16>
    %cst_62 = arith.constant dense<0.000000e+00> : vector<9x128xf32>
    %53 = tpu.matmul %50, %52, %cst_62 {dimension_numbers = #tpu.dot_dimension_numbers<[1], [0], [0], [1], [0, 0, 1, 1], [], []>} : vector<9x128xbf16>, vector<128x128xbf16>, vector<9x128xf32> -> vector<9x128xf32>
    %54 = arith.addf %47, %53 : vector<9x128xf32>
    %c0_63 = arith.constant 0 : index
    %c0_64 = arith.constant 0 : index
    %c2_65 = arith.constant 2 : index
    %c0_66 = arith.constant 0 : index
    %c0_67 = arith.constant 0 : index
    %55 = vector.load %arg3[%c0_63, %c0_64, %c2_65, %c0_66, %c0_67] : memref<1x1x6x6x128xbf16, #tpu.memory_space<vmem>>, vector<1x1x3x3x128xbf16>
    %56 = vector.shape_cast %55 : vector<1x1x3x3x128xbf16> to vector<3x3x128xbf16>
    %57 = vector.shape_cast %56 : vector<3x3x128xbf16> to vector<9x128xbf16>
    %c8 = arith.constant 8 : index
    %c0_68 = arith.constant 0 : index
    %c0_69 = arith.constant 0 : index
    %58 = vector.load %arg4[%c8, %c0_68, %c0_69] : memref<16x128x128xbf16, #tpu.memory_space<vmem>>, vector<1x128x128xbf16>
    %59 = vector.shape_cast %58 : vector<1x128x128xbf16> to vector<128x128xbf16>
    %cst_70 = arith.constant dense<0.000000e+00> : vector<9x128xf32>
    %60 = tpu.matmul %57, %59, %cst_70 {dimension_numbers = #tpu.dot_dimension_numbers<[1], [0], [0], [1], [0, 0, 1, 1], [], []>} : vector<9x128xbf16>, vector<128x128xbf16>, vector<9x128xf32> -> vector<9x128xf32>
    %61 = arith.addf %54, %60 : vector<9x128xf32>
    %c0_71 = arith.constant 0 : index
    %c0_72 = arith.constant 0 : index
    %c2_73 = arith.constant 2 : index
    %c1_74 = arith.constant 1 : index
    %c0_75 = arith.constant 0 : index
    %62 = vector.load %arg3[%c0_71, %c0_72, %c2_73, %c1_74, %c0_75] : memref<1x1x6x6x128xbf16, #tpu.memory_space<vmem>>, vector<1x1x3x3x128xbf16>
    %63 = vector.shape_cast %62 : vector<1x1x3x3x128xbf16> to vector<3x3x128xbf16>
    %64 = vector.shape_cast %63 : vector<3x3x128xbf16> to vector<9x128xbf16>
    %c9 = arith.constant 9 : index
    %c0_76 = arith.constant 0 : index
    %c0_77 = arith.constant 0 : index
    %65 = vector.load %arg4[%c9, %c0_76, %c0_77] : memref<16x128x128xbf16, #tpu.memory_space<vmem>>, vector<1x128x128xbf16>
    %66 = vector.shape_cast %65 : vector<1x128x128xbf16> to vector<128x128xbf16>
    %cst_78 = arith.constant dense<0.000000e+00> : vector<9x128xf32>
    %67 = tpu.matmul %64, %66, %cst_78 {dimension_numbers = #tpu.dot_dimension_numbers<[1], [0], [0], [1], [0, 0, 1, 1], [], []>} : vector<9x128xbf16>, vector<128x128xbf16>, vector<9x128xf32> -> vector<9x128xf32>
    %68 = arith.addf %61, %67 : vector<9x128xf32>
    %c0_79 = arith.constant 0 : index
    %c0_80 = arith.constant 0 : index
    %c2_81 = arith.constant 2 : index
    %c2_82 = arith.constant 2 : index
    %c0_83 = arith.constant 0 : index
    %69 = vector.load %arg3[%c0_79, %c0_80, %c2_81, %c2_82, %c0_83] : memref<1x1x6x6x128xbf16, #tpu.memory_space<vmem>>, vector<1x1x3x3x128xbf16>
    %70 = vector.shape_cast %69 : vector<1x1x3x3x128xbf16> to vector<3x3x128xbf16>
    %71 = vector.shape_cast %70 : vector<3x3x128xbf16> to vector<9x128xbf16>
    %c10 = arith.constant 10 : index
    %c0_84 = arith.constant 0 : index
    %c0_85 = arith.constant 0 : index
    %72 = vector.load %arg4[%c10, %c0_84, %c0_85] : memref<16x128x128xbf16, #tpu.memory_space<vmem>>, vector<1x128x128xbf16>
    %73 = vector.shape_cast %72 : vector<1x128x128xbf16> to vector<128x128xbf16>
    %cst_86 = arith.constant dense<0.000000e+00> : vector<9x128xf32>
    %74 = tpu.matmul %71, %73, %cst_86 {dimension_numbers = #tpu.dot_dimension_numbers<[1], [0], [0], [1], [0, 0, 1, 1], [], []>} : vector<9x128xbf16>, vector<128x128xbf16>, vector<9x128xf32> -> vector<9x128xf32>
    %75 = arith.addf %68, %74 : vector<9x128xf32>
    %c0_87 = arith.constant 0 : index
    %c0_88 = arith.constant 0 : index
    %c2_89 = arith.constant 2 : index
    %c3_90 = arith.constant 3 : index
    %c0_91 = arith.constant 0 : index
    %76 = vector.load %arg3[%c0_87, %c0_88, %c2_89, %c3_90, %c0_91] : memref<1x1x6x6x128xbf16, #tpu.memory_space<vmem>>, vector<1x1x3x3x128xbf16>
    %77 = vector.shape_cast %76 : vector<1x1x3x3x128xbf16> to vector<3x3x128xbf16>
    %78 = vector.shape_cast %77 : vector<3x3x128xbf16> to vector<9x128xbf16>
    %c11 = arith.constant 11 : index
    %c0_92 = arith.constant 0 : index
    %c0_93 = arith.constant 0 : index
    %79 = vector.load %arg4[%c11, %c0_92, %c0_93] : memref<16x128x128xbf16, #tpu.memory_space<vmem>>, vector<1x128x128xbf16>
    %80 = vector.shape_cast %79 : vector<1x128x128xbf16> to vector<128x128xbf16>
    %cst_94 = arith.constant dense<0.000000e+00> : vector<9x128xf32>
    %81 = tpu.matmul %78, %80, %cst_94 {dimension_numbers = #tpu.dot_dimension_numbers<[1], [0], [0], [1], [0, 0, 1, 1], [], []>} : vector<9x128xbf16>, vector<128x128xbf16>, vector<9x128xf32> -> vector<9x128xf32>
    %82 = arith.addf %75, %81 : vector<9x128xf32>
    %c0_95 = arith.constant 0 : index
    %c0_96 = arith.constant 0 : index
    %c3_97 = arith.constant 3 : index
    %c0_98 = arith.constant 0 : index
    %c0_99 = arith.constant 0 : index
    %83 = vector.load %arg3[%c0_95, %c0_96, %c3_97, %c0_98, %c0_99] : memref<1x1x6x6x128xbf16, #tpu.memory_space<vmem>>, vector<1x1x3x3x128xbf16>
    %84 = vector.shape_cast %83 : vector<1x1x3x3x128xbf16> to vector<3x3x128xbf16>
    %85 = vector.shape_cast %84 : vector<3x3x128xbf16> to vector<9x128xbf16>
    %c12 = arith.constant 12 : index
    %c0_100 = arith.constant 0 : index
    %c0_101 = arith.constant 0 : index
    %86 = vector.load %arg4[%c12, %c0_100, %c0_101] : memref<16x128x128xbf16, #tpu.memory_space<vmem>>, vector<1x128x128xbf16>
    %87 = vector.shape_cast %86 : vector<1x128x128xbf16> to vector<128x128xbf16>
    %cst_102 = arith.constant dense<0.000000e+00> : vector<9x128xf32>
    %88 = tpu.matmul %85, %87, %cst_102 {dimension_numbers = #tpu.dot_dimension_numbers<[1], [0], [0], [1], [0, 0, 1, 1], [], []>} : vector<9x128xbf16>, vector<128x128xbf16>, vector<9x128xf32> -> vector<9x128xf32>
    %89 = arith.addf %82, %88 : vector<9x128xf32>
    %c0_103 = arith.constant 0 : index
    %c0_104 = arith.constant 0 : index
    %c3_105 = arith.constant 3 : index
    %c1_106 = arith.constant 1 : index
    %c0_107 = arith.constant 0 : index
    %90 = vector.load %arg3[%c0_103, %c0_104, %c3_105, %c1_106, %c0_107] : memref<1x1x6x6x128xbf16, #tpu.memory_space<vmem>>, vector<1x1x3x3x128xbf16>
    %91 = vector.shape_cast %90 : vector<1x1x3x3x128xbf16> to vector<3x3x128xbf16>
    %92 = vector.shape_cast %91 : vector<3x3x128xbf16> to vector<9x128xbf16>
    %c13 = arith.constant 13 : index
    %c0_108 = arith.constant 0 : index
    %c0_109 = arith.constant 0 : index
    %93 = vector.load %arg4[%c13, %c0_108, %c0_109] : memref<16x128x128xbf16, #tpu.memory_space<vmem>>, vector<1x128x128xbf16>
    %94 = vector.shape_cast %93 : vector<1x128x128xbf16> to vector<128x128xbf16>
    %cst_110 = arith.constant dense<0.000000e+00> : vector<9x128xf32>
    %95 = tpu.matmul %92, %94, %cst_110 {dimension_numbers = #tpu.dot_dimension_numbers<[1], [0], [0], [1], [0, 0, 1, 1], [], []>} : vector<9x128xbf16>, vector<128x128xbf16>, vector<9x128xf32> -> vector<9x128xf32>
    %96 = arith.addf %89, %95 : vector<9x128xf32>
    %c0_111 = arith.constant 0 : index
    %c0_112 = arith.constant 0 : index
    %c3_113 = arith.constant 3 : index
    %c2_114 = arith.constant 2 : index
    %c0_115 = arith.constant 0 : index
    %97 = vector.load %arg3[%c0_111, %c0_112, %c3_113, %c2_114, %c0_115] : memref<1x1x6x6x128xbf16, #tpu.memory_space<vmem>>, vector<1x1x3x3x128xbf16>
    %98 = vector.shape_cast %97 : vector<1x1x3x3x128xbf16> to vector<3x3x128xbf16>
    %99 = vector.shape_cast %98 : vector<3x3x128xbf16> to vector<9x128xbf16>
    %c14 = arith.constant 14 : index
    %c0_116 = arith.constant 0 : index
    %c0_117 = arith.constant 0 : index
    %100 = vector.load %arg4[%c14, %c0_116, %c0_117] : memref<16x128x128xbf16, #tpu.memory_space<vmem>>, vector<1x128x128xbf16>
    %101 = vector.shape_cast %100 : vector<1x128x128xbf16> to vector<128x128xbf16>
    %cst_118 = arith.constant dense<0.000000e+00> : vector<9x128xf32>
    %102 = tpu.matmul %99, %101, %cst_118 {dimension_numbers = #tpu.dot_dimension_numbers<[1], [0], [0], [1], [0, 0, 1, 1], [], []>} : vector<9x128xbf16>, vector<128x128xbf16>, vector<9x128xf32> -> vector<9x128xf32>
    %103 = arith.addf %96, %102 : vector<9x128xf32>
    %c0_119 = arith.constant 0 : index
    %c0_120 = arith.constant 0 : index
    %c3_121 = arith.constant 3 : index
    %c3_122 = arith.constant 3 : index
    %c0_123 = arith.constant 0 : index
    %104 = vector.load %arg3[%c0_119, %c0_120, %c3_121, %c3_122, %c0_123] : memref<1x1x6x6x128xbf16, #tpu.memory_space<vmem>>, vector<1x1x3x3x128xbf16>
    %105 = vector.shape_cast %104 : vector<1x1x3x3x128xbf16> to vector<3x3x128xbf16>
    %106 = vector.shape_cast %105 : vector<3x3x128xbf16> to vector<9x128xbf16>
    %c15 = arith.constant 15 : index
    %c0_124 = arith.constant 0 : index
    %c0_125 = arith.constant 0 : index
    %107 = vector.load %arg4[%c15, %c0_124, %c0_125] : memref<16x128x128xbf16, #tpu.memory_space<vmem>>, vector<1x128x128xbf16>
    %108 = vector.shape_cast %107 : vector<1x128x128xbf16> to vector<128x128xbf16>
    %cst_126 = arith.constant dense<0.000000e+00> : vector<9x128xf32>
    %109 = tpu.matmul %106, %108, %cst_126 {dimension_numbers = #tpu.dot_dimension_numbers<[1], [0], [0], [1], [0, 0, 1, 1], [], []>} : vector<9x128xbf16>, vector<128x128xbf16>, vector<9x128xf32> -> vector<9x128xf32>
    %110 = arith.addf %103, %109 : vector<9x128xf32>
    %c0_127 = arith.constant 0 : index
    %c0_128 = arith.constant 0 : index
    %111 = vector.load %arg5[%c0_127, %c0_128] : memref<1x128xf32, #tpu.memory_space<vmem>>, vector<1x128xf32>
    %112 = vector.broadcast %111 : vector<1x128xf32> to vector<9x128xf32>
    %113 = arith.addf %110, %112 : vector<9x128xf32>
    %114 = arith.truncf %113 : vector<9x128xf32> to vector<9x128xbf16>
    %c0_129 = arith.constant 0 : index
    %c0_130 = arith.constant 0 : index
    %c0_131 = arith.constant 0 : index
    %115 = vector.load %arg6[%c0_129, %c0_130, %c0_131] : memref<1x9x128xbf16, #tpu.memory_space<vmem>>, vector<1x9x128xbf16>
    %116 = vector.shape_cast %115 : vector<1x9x128xbf16> to vector<9x128xbf16>
    %117 = vector.shape_cast %114 : vector<9x128xbf16> to vector<1x9x128xbf16>
    tpu.vector_store %arg6[%c0_129, %c0_130, %c0_131], %117 {strides = array<i32>} : memref<1x9x128xbf16, #tpu.memory_space<vmem>>, vector<1x9x128xbf16>,
    %cst_132 = arith.constant dense<0.000000e+00> : vector<128xf32>
    %118 = vector.multi_reduction <add>, %113, %cst_132 [0] : vector<9x128xf32> to vector<128xf32>
    %119 = vector.shape_cast %118 : vector<128xf32> to vector<1x128xf32>
    %cst_133 = arith.constant 0.111111112 : f32
    %120 = vector.broadcast %cst_133 : f32 to vector<1x128xf32>
    %121 = arith.mulf %119, %120 : vector<1x128xf32>
    %122 = vector.broadcast %121 : vector<1x128xf32> to vector<9x128xf32>
    %123 = arith.subf %113, %122 : vector<9x128xf32>
    %124 = arith.mulf %123, %123 : vector<9x128xf32>
    %cst_134 = arith.constant dense<0.000000e+00> : vector<128xf32>
    %125 = vector.multi_reduction <add>, %124, %cst_134 [0] : vector<9x128xf32> to vector<128xf32>
    %126 = vector.shape_cast %125 : vector<128xf32> to vector<1x128xf32>
    %127 = tpu.concatenate %119, %126 in 0 : vector<1x128xf32>, vector<1x128xf32> -> vector<2x128xf32>
    %c0_135 = arith.constant 0 : index
    %c0_136 = arith.constant 0 : index
    %c0_137 = arith.constant 0 : index
    %c0_138 = arith.constant 0 : index
    %128 = vector.load %arg7[%c0_135, %c0_136, %c0_137, %c0_138] : memref<1x1x2x128xf32, #tpu.memory_space<vmem>>, vector<1x1x2x128xf32>
    %129 = vector.shape_cast %128 : vector<1x1x2x128xf32> to vector<2x128xf32>
    %130 = vector.shape_cast %127 : vector<2x128xf32> to vector<1x1x2x128xf32>
    tpu.vector_store %arg7[%c0_135, %c0_136, %c0_137, %c0_138], %130 {strides = array<i32>} : memref<1x1x2x128xf32, #tpu.memory_space<vmem>>, vector<1x1x2x128xf32>,
    return
  }
  func.func @transform_0(%arg0: i32, %arg1: i32, %arg2: i32) -> (i32, i32, i32, i32, i32) {
    %c0_i32 = arith.constant 0 : i32
    %c0_i32_0 = arith.constant 0 : i32
    %c0_i32_1 = arith.constant 0 : i32
    %c0_i32_2 = arith.constant 0 : i32
    return %arg0, %arg1, %c0_i32, %c0_i32_0, %c0_i32_1 : i32, i32, i32, i32, i32
  }
  func.func @transform_1(%arg0: i32, %arg1: i32, %arg2: i32) -> (i32, i32, i32) {
    %c0_i32 = arith.constant 0 : i32
    %c0_i32_0 = arith.constant 0 : i32
    %c0_i32_1 = arith.constant 0 : i32
    return %c0_i32, %c0_i32_0, %arg2 : i32, i32, i32
  }
  func.func @transform_2(%arg0: i32, %arg1: i32, %arg2: i32) -> (i32, i32) {
    %c0_i32 = arith.constant 0 : i32
    %c0_i32_0 = arith.constant 0 : i32
    return %c0_i32, %arg2 : i32, i32
  }
  func.func @transform_3(%arg0: i32, %arg1: i32, %arg2: i32) -> (i32, i32, i32) {
    %c0_i32 = arith.constant 0 : i32
    return %arg0, %arg1, %arg2 : i32, i32, i32
  }
  func.func @transform_4(%arg0: i32, %arg1: i32, %arg2: i32) -> (i32, i32, i32, i32) {
    %c0_i32 = arith.constant 0 : i32
    %c0_i32_0 = arith.constant 0 : i32
    return %arg0, %arg1, %c0_i32, %arg2 : i32, i32, i32, i32
  }
}

module attributes {stable_mosaic.version = 11 : i64} {
  func.func @_bn_apply_kernel(%arg0: i32, %arg1: i32, %arg2: memref<1x9x128xbf16, #tpu.memory_space<vmem>>, %arg3: memref<1x128xf32, #tpu.memory_space<vmem>>, %arg4: memref<1x128xf32, #tpu.memory_space<vmem>>, %arg5: memref<1x9x128xbf16, #tpu.memory_space<vmem>>) attributes {dimension_semantics = [#tpu.dimension_semantics<parallel>, #tpu.dimension_semantics<parallel>], iteration_bounds = array<i64: 2, 1>, scalar_prefetch = 0 : i64, scratch_operands = 0 : i64, tpu.core_type = #tpu.core_type<tc>, window_params = [{transform_indices = @transform_0, window_bounds = array<i64: 1, 9, 128>}, {pipeline_mode = #tpu.pipeline_mode<synchronous>, transform_indices = @transform_1, window_bounds = array<i64: 1, 128>}, {pipeline_mode = #tpu.pipeline_mode<synchronous>, transform_indices = @transform_2, window_bounds = array<i64: 1, 128>}, {transform_indices = @transform_3, window_bounds = array<i64: 1, 9, 128>}]} {
    %c0 = arith.constant 0 : index
    %c0_0 = arith.constant 0 : index
    %c0_1 = arith.constant 0 : index
    %0 = vector.load %arg2[%c0, %c0_0, %c0_1] : memref<1x9x128xbf16, #tpu.memory_space<vmem>>, vector<1x9x128xbf16>
    %1 = vector.shape_cast %0 : vector<1x9x128xbf16> to vector<9x128xbf16>
    %2 = arith.extf %1 : vector<9x128xbf16> to vector<9x128xf32>
    %c0_2 = arith.constant 0 : index
    %c0_3 = arith.constant 0 : index
    %3 = vector.load %arg3[%c0_2, %c0_3] : memref<1x128xf32, #tpu.memory_space<vmem>>, vector<1x128xf32>
    %4 = vector.broadcast %3 : vector<1x128xf32> to vector<9x128xf32>
    %5 = arith.mulf %2, %4 : vector<9x128xf32>
    %c0_4 = arith.constant 0 : index
    %c0_5 = arith.constant 0 : index
    %6 = vector.load %arg4[%c0_4, %c0_5] : memref<1x128xf32, #tpu.memory_space<vmem>>, vector<1x128xf32>
    %7 = vector.broadcast %6 : vector<1x128xf32> to vector<9x128xf32>
    %8 = arith.addf %5, %7 : vector<9x128xf32>
    %cst = arith.constant 2.000000e-01 : f32
    %9 = vector.broadcast %cst : f32 to vector<9x128xf32>
    %10 = arith.mulf %9, %8 : vector<9x128xf32>
    %11 = arith.maximumf %8, %10 : vector<9x128xf32>
    %12 = arith.truncf %11 : vector<9x128xf32> to vector<9x128xbf16>
    %c0_6 = arith.constant 0 : index
    %c0_7 = arith.constant 0 : index
    %c0_8 = arith.constant 0 : index
    %13 = vector.load %arg5[%c0_6, %c0_7, %c0_8] : memref<1x9x128xbf16, #tpu.memory_space<vmem>>, vector<1x9x128xbf16>
    %14 = vector.shape_cast %13 : vector<1x9x128xbf16> to vector<9x128xbf16>
    %15 = vector.shape_cast %12 : vector<9x128xbf16> to vector<1x9x128xbf16>
    tpu.vector_store %arg5[%c0_6, %c0_7, %c0_8], %15 {strides = array<i32>} : memref<1x9x128xbf16, #tpu.memory_space<vmem>>, vector<1x9x128xbf16>,
    return
  }
  func.func @transform_0(%arg0: i32, %arg1: i32) -> (i32, i32, i32) {
    %c0_i32 = arith.constant 0 : i32
    %c0_i32_0 = arith.constant 0 : i32
    return %arg0, %arg1, %c0_i32 : i32, i32, i32
  }
  func.func @transform_1(%arg0: i32, %arg1: i32) -> (i32, i32) {
    %c0_i32 = arith.constant 0 : i32
    %c0_i32_0 = arith.constant 0 : i32
    %c0_i32_1 = arith.constant 0 : i32
    return %c0_i32, %c0_i32_0 : i32, i32
  }
  func.func @transform_2(%arg0: i32, %arg1: i32) -> (i32, i32) {
    %c0_i32 = arith.constant 0 : i32
    %c0_i32_0 = arith.constant 0 : i32
    %c0_i32_1 = arith.constant 0 : i32
    return %c0_i32, %c0_i32_0 : i32, i32
  }
  func.func @transform_3(%arg0: i32, %arg1: i32) -> (i32, i32, i32) {
    %c0_i32 = arith.constant 0 : i32
    %c0_i32_0 = arith.constant 0 : i32
    return %arg0, %arg1, %c0_i32 : i32, i32, i32
  }
}

module attributes {stable_mosaic.version = 11 : i64} {
  func.func @_conv_kernel(%arg0: i32, %arg1: i32, %arg2: i32, %arg3: memref<1x1x5x5x128xbf16, #tpu.memory_space<vmem>>, %arg4: memref<16x128x128xbf16, #tpu.memory_space<vmem>>, %arg5: memref<1x128xf32, #tpu.memory_space<vmem>>, %arg6: memref<1x4x128xf32, #tpu.memory_space<vmem>>, %arg7: memref<1x1x2x128xf32, #tpu.memory_space<vmem>>) attributes {dimension_semantics = [#tpu.dimension_semantics<parallel>, #tpu.dimension_semantics<parallel>, #tpu.dimension_semantics<parallel>], iteration_bounds = array<i64: 2, 1, 1>, scalar_prefetch = 0 : i64, scratch_operands = 0 : i64, tpu.core_type = #tpu.core_type<tc>, window_params = [{transform_indices = @transform_0, window_bounds = array<i64: 1, 1, 5, 5, 128>}, {transform_indices = @transform_1, window_bounds = array<i64: 16, 128, 128>}, {transform_indices = @transform_2, window_bounds = array<i64: 1, 128>}, {transform_indices = @transform_3, window_bounds = array<i64: 1, 4, 128>}, {transform_indices = @transform_4, window_bounds = array<i64: 1, 1, 2, 128>}]} {
    %c0 = arith.constant 0 : index
    %c0_0 = arith.constant 0 : index
    %c0_1 = arith.constant 0 : index
    %c0_2 = arith.constant 0 : index
    %c0_3 = arith.constant 0 : index
    %0 = vector.load %arg3[%c0, %c0_0, %c0_1, %c0_2, %c0_3] : memref<1x1x5x5x128xbf16, #tpu.memory_space<vmem>>, vector<1x1x2x2x128xbf16>
    %1 = vector.shape_cast %0 : vector<1x1x2x2x128xbf16> to vector<2x2x128xbf16>
    %2 = vector.shape_cast %1 : vector<2x2x128xbf16> to vector<4x128xbf16>
    %c0_4 = arith.constant 0 : index
    %c0_5 = arith.constant 0 : index
    %c0_6 = arith.constant 0 : index
    %3 = vector.load %arg4[%c0_4, %c0_5, %c0_6] : memref<16x128x128xbf16, #tpu.memory_space<vmem>>, vector<1x128x128xbf16>
    %4 = vector.shape_cast %3 : vector<1x128x128xbf16> to vector<128x128xbf16>
    %cst = arith.constant dense<0.000000e+00> : vector<4x128xf32>
    %5 = tpu.matmul %2, %4, %cst {dimension_numbers = #tpu.dot_dimension_numbers<[1], [0], [0], [1], [0, 0, 1, 1], [], []>} : vector<4x128xbf16>, vector<128x128xbf16>, vector<4x128xf32> -> vector<4x128xf32>
    %c0_7 = arith.constant 0 : index
    %c0_8 = arith.constant 0 : index
    %c0_9 = arith.constant 0 : index
    %c1 = arith.constant 1 : index
    %c0_10 = arith.constant 0 : index
    %6 = vector.load %arg3[%c0_7, %c0_8, %c0_9, %c1, %c0_10] : memref<1x1x5x5x128xbf16, #tpu.memory_space<vmem>>, vector<1x1x2x2x128xbf16>
    %7 = vector.shape_cast %6 : vector<1x1x2x2x128xbf16> to vector<2x2x128xbf16>
    %8 = vector.shape_cast %7 : vector<2x2x128xbf16> to vector<4x128xbf16>
    %c1_11 = arith.constant 1 : index
    %c0_12 = arith.constant 0 : index
    %c0_13 = arith.constant 0 : index
    %9 = vector.load %arg4[%c1_11, %c0_12, %c0_13] : memref<16x128x128xbf16, #tpu.memory_space<vmem>>, vector<1x128x128xbf16>
    %10 = vector.shape_cast %9 : vector<1x128x128xbf16> to vector<128x128xbf16>
    %cst_14 = arith.constant dense<0.000000e+00> : vector<4x128xf32>
    %11 = tpu.matmul %8, %10, %cst_14 {dimension_numbers = #tpu.dot_dimension_numbers<[1], [0], [0], [1], [0, 0, 1, 1], [], []>} : vector<4x128xbf16>, vector<128x128xbf16>, vector<4x128xf32> -> vector<4x128xf32>
    %12 = arith.addf %5, %11 : vector<4x128xf32>
    %c0_15 = arith.constant 0 : index
    %c0_16 = arith.constant 0 : index
    %c0_17 = arith.constant 0 : index
    %c2 = arith.constant 2 : index
    %c0_18 = arith.constant 0 : index
    %13 = vector.load %arg3[%c0_15, %c0_16, %c0_17, %c2, %c0_18] : memref<1x1x5x5x128xbf16, #tpu.memory_space<vmem>>, vector<1x1x2x2x128xbf16>
    %14 = vector.shape_cast %13 : vector<1x1x2x2x128xbf16> to vector<2x2x128xbf16>
    %15 = vector.shape_cast %14 : vector<2x2x128xbf16> to vector<4x128xbf16>
    %c2_19 = arith.constant 2 : index
    %c0_20 = arith.constant 0 : index
    %c0_21 = arith.constant 0 : index
    %16 = vector.load %arg4[%c2_19, %c0_20, %c0_21] : memref<16x128x128xbf16, #tpu.memory_space<vmem>>, vector<1x128x128xbf16>
    %17 = vector.shape_cast %16 : vector<1x128x128xbf16> to vector<128x128xbf16>
    %cst_22 = arith.constant dense<0.000000e+00> : vector<4x128xf32>
    %18 = tpu.matmul %15, %17, %cst_22 {dimension_numbers = #tpu.dot_dimension_numbers<[1], [0], [0], [1], [0, 0, 1, 1], [], []>} : vector<4x128xbf16>, vector<128x128xbf16>, vector<4x128xf32> -> vector<4x128xf32>
    %19 = arith.addf %12, %18 : vector<4x128xf32>
    %c0_23 = arith.constant 0 : index
    %c0_24 = arith.constant 0 : index
    %c0_25 = arith.constant 0 : index
    %c3 = arith.constant 3 : index
    %c0_26 = arith.constant 0 : index
    %20 = vector.load %arg3[%c0_23, %c0_24, %c0_25, %c3, %c0_26] : memref<1x1x5x5x128xbf16, #tpu.memory_space<vmem>>, vector<1x1x2x2x128xbf16>
    %21 = vector.shape_cast %20 : vector<1x1x2x2x128xbf16> to vector<2x2x128xbf16>
    %22 = vector.shape_cast %21 : vector<2x2x128xbf16> to vector<4x128xbf16>
    %c3_27 = arith.constant 3 : index
    %c0_28 = arith.constant 0 : index
    %c0_29 = arith.constant 0 : index
    %23 = vector.load %arg4[%c3_27, %c0_28, %c0_29] : memref<16x128x128xbf16, #tpu.memory_space<vmem>>, vector<1x128x128xbf16>
    %24 = vector.shape_cast %23 : vector<1x128x128xbf16> to vector<128x128xbf16>
    %cst_30 = arith.constant dense<0.000000e+00> : vector<4x128xf32>
    %25 = tpu.matmul %22, %24, %cst_30 {dimension_numbers = #tpu.dot_dimension_numbers<[1], [0], [0], [1], [0, 0, 1, 1], [], []>} : vector<4x128xbf16>, vector<128x128xbf16>, vector<4x128xf32> -> vector<4x128xf32>
    %26 = arith.addf %19, %25 : vector<4x128xf32>
    %c0_31 = arith.constant 0 : index
    %c0_32 = arith.constant 0 : index
    %c1_33 = arith.constant 1 : index
    %c0_34 = arith.constant 0 : index
    %c0_35 = arith.constant 0 : index
    %27 = vector.load %arg3[%c0_31, %c0_32, %c1_33, %c0_34, %c0_35] : memref<1x1x5x5x128xbf16, #tpu.memory_space<vmem>>, vector<1x1x2x2x128xbf16>
    %28 = vector.shape_cast %27 : vector<1x1x2x2x128xbf16> to vector<2x2x128xbf16>
    %29 = vector.shape_cast %28 : vector<2x2x128xbf16> to vector<4x128xbf16>
    %c4 = arith.constant 4 : index
    %c0_36 = arith.constant 0 : index
    %c0_37 = arith.constant 0 : index
    %30 = vector.load %arg4[%c4, %c0_36, %c0_37] : memref<16x128x128xbf16, #tpu.memory_space<vmem>>, vector<1x128x128xbf16>
    %31 = vector.shape_cast %30 : vector<1x128x128xbf16> to vector<128x128xbf16>
    %cst_38 = arith.constant dense<0.000000e+00> : vector<4x128xf32>
    %32 = tpu.matmul %29, %31, %cst_38 {dimension_numbers = #tpu.dot_dimension_numbers<[1], [0], [0], [1], [0, 0, 1, 1], [], []>} : vector<4x128xbf16>, vector<128x128xbf16>, vector<4x128xf32> -> vector<4x128xf32>
    %33 = arith.addf %26, %32 : vector<4x128xf32>
    %c0_39 = arith.constant 0 : index
    %c0_40 = arith.constant 0 : index
    %c1_41 = arith.constant 1 : index
    %c1_42 = arith.constant 1 : index
    %c0_43 = arith.constant 0 : index
    %34 = vector.load %arg3[%c0_39, %c0_40, %c1_41, %c1_42, %c0_43] : memref<1x1x5x5x128xbf16, #tpu.memory_space<vmem>>, vector<1x1x2x2x128xbf16>
    %35 = vector.shape_cast %34 : vector<1x1x2x2x128xbf16> to vector<2x2x128xbf16>
    %36 = vector.shape_cast %35 : vector<2x2x128xbf16> to vector<4x128xbf16>
    %c5 = arith.constant 5 : index
    %c0_44 = arith.constant 0 : index
    %c0_45 = arith.constant 0 : index
    %37 = vector.load %arg4[%c5, %c0_44, %c0_45] : memref<16x128x128xbf16, #tpu.memory_space<vmem>>, vector<1x128x128xbf16>
    %38 = vector.shape_cast %37 : vector<1x128x128xbf16> to vector<128x128xbf16>
    %cst_46 = arith.constant dense<0.000000e+00> : vector<4x128xf32>
    %39 = tpu.matmul %36, %38, %cst_46 {dimension_numbers = #tpu.dot_dimension_numbers<[1], [0], [0], [1], [0, 0, 1, 1], [], []>} : vector<4x128xbf16>, vector<128x128xbf16>, vector<4x128xf32> -> vector<4x128xf32>
    %40 = arith.addf %33, %39 : vector<4x128xf32>
    %c0_47 = arith.constant 0 : index
    %c0_48 = arith.constant 0 : index
    %c1_49 = arith.constant 1 : index
    %c2_50 = arith.constant 2 : index
    %c0_51 = arith.constant 0 : index
    %41 = vector.load %arg3[%c0_47, %c0_48, %c1_49, %c2_50, %c0_51] : memref<1x1x5x5x128xbf16, #tpu.memory_space<vmem>>, vector<1x1x2x2x128xbf16>
    %42 = vector.shape_cast %41 : vector<1x1x2x2x128xbf16> to vector<2x2x128xbf16>
    %43 = vector.shape_cast %42 : vector<2x2x128xbf16> to vector<4x128xbf16>
    %c6 = arith.constant 6 : index
    %c0_52 = arith.constant 0 : index
    %c0_53 = arith.constant 0 : index
    %44 = vector.load %arg4[%c6, %c0_52, %c0_53] : memref<16x128x128xbf16, #tpu.memory_space<vmem>>, vector<1x128x128xbf16>
    %45 = vector.shape_cast %44 : vector<1x128x128xbf16> to vector<128x128xbf16>
    %cst_54 = arith.constant dense<0.000000e+00> : vector<4x128xf32>
    %46 = tpu.matmul %43, %45, %cst_54 {dimension_numbers = #tpu.dot_dimension_numbers<[1], [0], [0], [1], [0, 0, 1, 1], [], []>} : vector<4x128xbf16>, vector<128x128xbf16>, vector<4x128xf32> -> vector<4x128xf32>
    %47 = arith.addf %40, %46 : vector<4x128xf32>
    %c0_55 = arith.constant 0 : index
    %c0_56 = arith.constant 0 : index
    %c1_57 = arith.constant 1 : index
    %c3_58 = arith.constant 3 : index
    %c0_59 = arith.constant 0 : index
    %48 = vector.load %arg3[%c0_55, %c0_56, %c1_57, %c3_58, %c0_59] : memref<1x1x5x5x128xbf16, #tpu.memory_space<vmem>>, vector<1x1x2x2x128xbf16>
    %49 = vector.shape_cast %48 : vector<1x1x2x2x128xbf16> to vector<2x2x128xbf16>
    %50 = vector.shape_cast %49 : vector<2x2x128xbf16> to vector<4x128xbf16>
    %c7 = arith.constant 7 : index
    %c0_60 = arith.constant 0 : index
    %c0_61 = arith.constant 0 : index
    %51 = vector.load %arg4[%c7, %c0_60, %c0_61] : memref<16x128x128xbf16, #tpu.memory_space<vmem>>, vector<1x128x128xbf16>
    %52 = vector.shape_cast %51 : vector<1x128x128xbf16> to vector<128x128xbf16>
    %cst_62 = arith.constant dense<0.000000e+00> : vector<4x128xf32>
    %53 = tpu.matmul %50, %52, %cst_62 {dimension_numbers = #tpu.dot_dimension_numbers<[1], [0], [0], [1], [0, 0, 1, 1], [], []>} : vector<4x128xbf16>, vector<128x128xbf16>, vector<4x128xf32> -> vector<4x128xf32>
    %54 = arith.addf %47, %53 : vector<4x128xf32>
    %c0_63 = arith.constant 0 : index
    %c0_64 = arith.constant 0 : index
    %c2_65 = arith.constant 2 : index
    %c0_66 = arith.constant 0 : index
    %c0_67 = arith.constant 0 : index
    %55 = vector.load %arg3[%c0_63, %c0_64, %c2_65, %c0_66, %c0_67] : memref<1x1x5x5x128xbf16, #tpu.memory_space<vmem>>, vector<1x1x2x2x128xbf16>
    %56 = vector.shape_cast %55 : vector<1x1x2x2x128xbf16> to vector<2x2x128xbf16>
    %57 = vector.shape_cast %56 : vector<2x2x128xbf16> to vector<4x128xbf16>
    %c8 = arith.constant 8 : index
    %c0_68 = arith.constant 0 : index
    %c0_69 = arith.constant 0 : index
    %58 = vector.load %arg4[%c8, %c0_68, %c0_69] : memref<16x128x128xbf16, #tpu.memory_space<vmem>>, vector<1x128x128xbf16>
    %59 = vector.shape_cast %58 : vector<1x128x128xbf16> to vector<128x128xbf16>
    %cst_70 = arith.constant dense<0.000000e+00> : vector<4x128xf32>
    %60 = tpu.matmul %57, %59, %cst_70 {dimension_numbers = #tpu.dot_dimension_numbers<[1], [0], [0], [1], [0, 0, 1, 1], [], []>} : vector<4x128xbf16>, vector<128x128xbf16>, vector<4x128xf32> -> vector<4x128xf32>
    %61 = arith.addf %54, %60 : vector<4x128xf32>
    %c0_71 = arith.constant 0 : index
    %c0_72 = arith.constant 0 : index
    %c2_73 = arith.constant 2 : index
    %c1_74 = arith.constant 1 : index
    %c0_75 = arith.constant 0 : index
    %62 = vector.load %arg3[%c0_71, %c0_72, %c2_73, %c1_74, %c0_75] : memref<1x1x5x5x128xbf16, #tpu.memory_space<vmem>>, vector<1x1x2x2x128xbf16>
    %63 = vector.shape_cast %62 : vector<1x1x2x2x128xbf16> to vector<2x2x128xbf16>
    %64 = vector.shape_cast %63 : vector<2x2x128xbf16> to vector<4x128xbf16>
    %c9 = arith.constant 9 : index
    %c0_76 = arith.constant 0 : index
    %c0_77 = arith.constant 0 : index
    %65 = vector.load %arg4[%c9, %c0_76, %c0_77] : memref<16x128x128xbf16, #tpu.memory_space<vmem>>, vector<1x128x128xbf16>
    %66 = vector.shape_cast %65 : vector<1x128x128xbf16> to vector<128x128xbf16>
    %cst_78 = arith.constant dense<0.000000e+00> : vector<4x128xf32>
    %67 = tpu.matmul %64, %66, %cst_78 {dimension_numbers = #tpu.dot_dimension_numbers<[1], [0], [0], [1], [0, 0, 1, 1], [], []>} : vector<4x128xbf16>, vector<128x128xbf16>, vector<4x128xf32> -> vector<4x128xf32>
    %68 = arith.addf %61, %67 : vector<4x128xf32>
    %c0_79 = arith.constant 0 : index
    %c0_80 = arith.constant 0 : index
    %c2_81 = arith.constant 2 : index
    %c2_82 = arith.constant 2 : index
    %c0_83 = arith.constant 0 : index
    %69 = vector.load %arg3[%c0_79, %c0_80, %c2_81, %c2_82, %c0_83] : memref<1x1x5x5x128xbf16, #tpu.memory_space<vmem>>, vector<1x1x2x2x128xbf16>
    %70 = vector.shape_cast %69 : vector<1x1x2x2x128xbf16> to vector<2x2x128xbf16>
    %71 = vector.shape_cast %70 : vector<2x2x128xbf16> to vector<4x128xbf16>
    %c10 = arith.constant 10 : index
    %c0_84 = arith.constant 0 : index
    %c0_85 = arith.constant 0 : index
    %72 = vector.load %arg4[%c10, %c0_84, %c0_85] : memref<16x128x128xbf16, #tpu.memory_space<vmem>>, vector<1x128x128xbf16>
    %73 = vector.shape_cast %72 : vector<1x128x128xbf16> to vector<128x128xbf16>
    %cst_86 = arith.constant dense<0.000000e+00> : vector<4x128xf32>
    %74 = tpu.matmul %71, %73, %cst_86 {dimension_numbers = #tpu.dot_dimension_numbers<[1], [0], [0], [1], [0, 0, 1, 1], [], []>} : vector<4x128xbf16>, vector<128x128xbf16>, vector<4x128xf32> -> vector<4x128xf32>
    %75 = arith.addf %68, %74 : vector<4x128xf32>
    %c0_87 = arith.constant 0 : index
    %c0_88 = arith.constant 0 : index
    %c2_89 = arith.constant 2 : index
    %c3_90 = arith.constant 3 : index
    %c0_91 = arith.constant 0 : index
    %76 = vector.load %arg3[%c0_87, %c0_88, %c2_89, %c3_90, %c0_91] : memref<1x1x5x5x128xbf16, #tpu.memory_space<vmem>>, vector<1x1x2x2x128xbf16>
    %77 = vector.shape_cast %76 : vector<1x1x2x2x128xbf16> to vector<2x2x128xbf16>
    %78 = vector.shape_cast %77 : vector<2x2x128xbf16> to vector<4x128xbf16>
    %c11 = arith.constant 11 : index
    %c0_92 = arith.constant 0 : index
    %c0_93 = arith.constant 0 : index
    %79 = vector.load %arg4[%c11, %c0_92, %c0_93] : memref<16x128x128xbf16, #tpu.memory_space<vmem>>, vector<1x128x128xbf16>
    %80 = vector.shape_cast %79 : vector<1x128x128xbf16> to vector<128x128xbf16>
    %cst_94 = arith.constant dense<0.000000e+00> : vector<4x128xf32>
    %81 = tpu.matmul %78, %80, %cst_94 {dimension_numbers = #tpu.dot_dimension_numbers<[1], [0], [0], [1], [0, 0, 1, 1], [], []>} : vector<4x128xbf16>, vector<128x128xbf16>, vector<4x128xf32> -> vector<4x128xf32>
    %82 = arith.addf %75, %81 : vector<4x128xf32>
    %c0_95 = arith.constant 0 : index
    %c0_96 = arith.constant 0 : index
    %c3_97 = arith.constant 3 : index
    %c0_98 = arith.constant 0 : index
    %c0_99 = arith.constant 0 : index
    %83 = vector.load %arg3[%c0_95, %c0_96, %c3_97, %c0_98, %c0_99] : memref<1x1x5x5x128xbf16, #tpu.memory_space<vmem>>, vector<1x1x2x2x128xbf16>
    %84 = vector.shape_cast %83 : vector<1x1x2x2x128xbf16> to vector<2x2x128xbf16>
    %85 = vector.shape_cast %84 : vector<2x2x128xbf16> to vector<4x128xbf16>
    %c12 = arith.constant 12 : index
    %c0_100 = arith.constant 0 : index
    %c0_101 = arith.constant 0 : index
    %86 = vector.load %arg4[%c12, %c0_100, %c0_101] : memref<16x128x128xbf16, #tpu.memory_space<vmem>>, vector<1x128x128xbf16>
    %87 = vector.shape_cast %86 : vector<1x128x128xbf16> to vector<128x128xbf16>
    %cst_102 = arith.constant dense<0.000000e+00> : vector<4x128xf32>
    %88 = tpu.matmul %85, %87, %cst_102 {dimension_numbers = #tpu.dot_dimension_numbers<[1], [0], [0], [1], [0, 0, 1, 1], [], []>} : vector<4x128xbf16>, vector<128x128xbf16>, vector<4x128xf32> -> vector<4x128xf32>
    %89 = arith.addf %82, %88 : vector<4x128xf32>
    %c0_103 = arith.constant 0 : index
    %c0_104 = arith.constant 0 : index
    %c3_105 = arith.constant 3 : index
    %c1_106 = arith.constant 1 : index
    %c0_107 = arith.constant 0 : index
    %90 = vector.load %arg3[%c0_103, %c0_104, %c3_105, %c1_106, %c0_107] : memref<1x1x5x5x128xbf16, #tpu.memory_space<vmem>>, vector<1x1x2x2x128xbf16>
    %91 = vector.shape_cast %90 : vector<1x1x2x2x128xbf16> to vector<2x2x128xbf16>
    %92 = vector.shape_cast %91 : vector<2x2x128xbf16> to vector<4x128xbf16>
    %c13 = arith.constant 13 : index
    %c0_108 = arith.constant 0 : index
    %c0_109 = arith.constant 0 : index
    %93 = vector.load %arg4[%c13, %c0_108, %c0_109] : memref<16x128x128xbf16, #tpu.memory_space<vmem>>, vector<1x128x128xbf16>
    %94 = vector.shape_cast %93 : vector<1x128x128xbf16> to vector<128x128xbf16>
    %cst_110 = arith.constant dense<0.000000e+00> : vector<4x128xf32>
    %95 = tpu.matmul %92, %94, %cst_110 {dimension_numbers = #tpu.dot_dimension_numbers<[1], [0], [0], [1], [0, 0, 1, 1], [], []>} : vector<4x128xbf16>, vector<128x128xbf16>, vector<4x128xf32> -> vector<4x128xf32>
    %96 = arith.addf %89, %95 : vector<4x128xf32>
    %c0_111 = arith.constant 0 : index
    %c0_112 = arith.constant 0 : index
    %c3_113 = arith.constant 3 : index
    %c2_114 = arith.constant 2 : index
    %c0_115 = arith.constant 0 : index
    %97 = vector.load %arg3[%c0_111, %c0_112, %c3_113, %c2_114, %c0_115] : memref<1x1x5x5x128xbf16, #tpu.memory_space<vmem>>, vector<1x1x2x2x128xbf16>
    %98 = vector.shape_cast %97 : vector<1x1x2x2x128xbf16> to vector<2x2x128xbf16>
    %99 = vector.shape_cast %98 : vector<2x2x128xbf16> to vector<4x128xbf16>
    %c14 = arith.constant 14 : index
    %c0_116 = arith.constant 0 : index
    %c0_117 = arith.constant 0 : index
    %100 = vector.load %arg4[%c14, %c0_116, %c0_117] : memref<16x128x128xbf16, #tpu.memory_space<vmem>>, vector<1x128x128xbf16>
    %101 = vector.shape_cast %100 : vector<1x128x128xbf16> to vector<128x128xbf16>
    %cst_118 = arith.constant dense<0.000000e+00> : vector<4x128xf32>
    %102 = tpu.matmul %99, %101, %cst_118 {dimension_numbers = #tpu.dot_dimension_numbers<[1], [0], [0], [1], [0, 0, 1, 1], [], []>} : vector<4x128xbf16>, vector<128x128xbf16>, vector<4x128xf32> -> vector<4x128xf32>
    %103 = arith.addf %96, %102 : vector<4x128xf32>
    %c0_119 = arith.constant 0 : index
    %c0_120 = arith.constant 0 : index
    %c3_121 = arith.constant 3 : index
    %c3_122 = arith.constant 3 : index
    %c0_123 = arith.constant 0 : index
    %104 = vector.load %arg3[%c0_119, %c0_120, %c3_121, %c3_122, %c0_123] : memref<1x1x5x5x128xbf16, #tpu.memory_space<vmem>>, vector<1x1x2x2x128xbf16>
    %105 = vector.shape_cast %104 : vector<1x1x2x2x128xbf16> to vector<2x2x128xbf16>
    %106 = vector.shape_cast %105 : vector<2x2x128xbf16> to vector<4x128xbf16>
    %c15 = arith.constant 15 : index
    %c0_124 = arith.constant 0 : index
    %c0_125 = arith.constant 0 : index
    %107 = vector.load %arg4[%c15, %c0_124, %c0_125] : memref<16x128x128xbf16, #tpu.memory_space<vmem>>, vector<1x128x128xbf16>
    %108 = vector.shape_cast %107 : vector<1x128x128xbf16> to vector<128x128xbf16>
    %cst_126 = arith.constant dense<0.000000e+00> : vector<4x128xf32>
    %109 = tpu.matmul %106, %108, %cst_126 {dimension_numbers = #tpu.dot_dimension_numbers<[1], [0], [0], [1], [0, 0, 1, 1], [], []>} : vector<4x128xbf16>, vector<128x128xbf16>, vector<4x128xf32> -> vector<4x128xf32>
    %110 = arith.addf %103, %109 : vector<4x128xf32>
    %c0_127 = arith.constant 0 : index
    %c0_128 = arith.constant 0 : index
    %111 = vector.load %arg5[%c0_127, %c0_128] : memref<1x128xf32, #tpu.memory_space<vmem>>, vector<1x128xf32>
    %112 = vector.broadcast %111 : vector<1x128xf32> to vector<4x128xf32>
    %113 = arith.addf %110, %112 : vector<4x128xf32>
    %c0_129 = arith.constant 0 : index
    %c0_130 = arith.constant 0 : index
    %c0_131 = arith.constant 0 : index
    %114 = vector.load %arg6[%c0_129, %c0_130, %c0_131] : memref<1x4x128xf32, #tpu.memory_space<vmem>>, vector<1x4x128xf32>
    %115 = vector.shape_cast %114 : vector<1x4x128xf32> to vector<4x128xf32>
    %116 = vector.shape_cast %113 : vector<4x128xf32> to vector<1x4x128xf32>
    tpu.vector_store %arg6[%c0_129, %c0_130, %c0_131], %116 {strides = array<i32>} : memref<1x4x128xf32, #tpu.memory_space<vmem>>, vector<1x4x128xf32>,
    %cst_132 = arith.constant dense<0.000000e+00> : vector<128xf32>
    %117 = vector.multi_reduction <add>, %113, %cst_132 [0] : vector<4x128xf32> to vector<128xf32>
    %118 = vector.shape_cast %117 : vector<128xf32> to vector<1x128xf32>
    %cst_133 = arith.constant 2.500000e-01 : f32
    %119 = vector.broadcast %cst_133 : f32 to vector<1x128xf32>
    %120 = arith.mulf %118, %119 : vector<1x128xf32>
    %121 = vector.broadcast %120 : vector<1x128xf32> to vector<4x128xf32>
    %122 = arith.subf %113, %121 : vector<4x128xf32>
    %123 = arith.mulf %122, %122 : vector<4x128xf32>
    %cst_134 = arith.constant dense<0.000000e+00> : vector<128xf32>
    %124 = vector.multi_reduction <add>, %123, %cst_134 [0] : vector<4x128xf32> to vector<128xf32>
    %125 = vector.shape_cast %124 : vector<128xf32> to vector<1x128xf32>
    %126 = tpu.concatenate %118, %125 in 0 : vector<1x128xf32>, vector<1x128xf32> -> vector<2x128xf32>
    %c0_135 = arith.constant 0 : index
    %c0_136 = arith.constant 0 : index
    %c0_137 = arith.constant 0 : index
    %c0_138 = arith.constant 0 : index
    %127 = vector.load %arg7[%c0_135, %c0_136, %c0_137, %c0_138] : memref<1x1x2x128xf32, #tpu.memory_space<vmem>>, vector<1x1x2x128xf32>
    %128 = vector.shape_cast %127 : vector<1x1x2x128xf32> to vector<2x128xf32>
    %129 = vector.shape_cast %126 : vector<2x128xf32> to vector<1x1x2x128xf32>
    tpu.vector_store %arg7[%c0_135, %c0_136, %c0_137, %c0_138], %129 {strides = array<i32>} : memref<1x1x2x128xf32, #tpu.memory_space<vmem>>, vector<1x1x2x128xf32>,
    return
  }
  func.func @transform_0(%arg0: i32, %arg1: i32, %arg2: i32) -> (i32, i32, i32, i32, i32) {
    %c0_i32 = arith.constant 0 : i32
    %c0_i32_0 = arith.constant 0 : i32
    %c0_i32_1 = arith.constant 0 : i32
    %c0_i32_2 = arith.constant 0 : i32
    return %arg0, %arg1, %c0_i32, %c0_i32_0, %c0_i32_1 : i32, i32, i32, i32, i32
  }
  func.func @transform_1(%arg0: i32, %arg1: i32, %arg2: i32) -> (i32, i32, i32) {
    %c0_i32 = arith.constant 0 : i32
    %c0_i32_0 = arith.constant 0 : i32
    %c0_i32_1 = arith.constant 0 : i32
    return %c0_i32, %c0_i32_0, %arg2 : i32, i32, i32
  }
  func.func @transform_2(%arg0: i32, %arg1: i32, %arg2: i32) -> (i32, i32) {
    %c0_i32 = arith.constant 0 : i32
    %c0_i32_0 = arith.constant 0 : i32
    return %c0_i32, %arg2 : i32, i32
  }
  func.func @transform_3(%arg0: i32, %arg1: i32, %arg2: i32) -> (i32, i32, i32) {
    %c0_i32 = arith.constant 0 : i32
    return %arg0, %arg1, %arg2 : i32, i32, i32
  }
  func.func @transform_4(%arg0: i32, %arg1: i32, %arg2: i32) -> (i32, i32, i32, i32) {
    %c0_i32 = arith.constant 0 : i32
    %c0_i32_0 = arith.constant 0 : i32
    return %arg0, %arg1, %c0_i32, %arg2 : i32, i32, i32, i32
  }
}

</mosaic_0001>

<bundles_post_ra>
// kernel: discriminator_forward.8
= control target key start
LH: loop header
LB: loop body
LE: loop exit
PB: predicated region body
PF: predicated region fallthrough
CT: control target
= control target key end

     0   :  { %10 = vsyncpa [#allocation3], 0  ;;  %s3977_s0 = inlined_call_operand.vmem [shape: bf16[2,1,17,17,12], index: 0, kind: input, shape index: {}]   ;;  %s3978_s1 = inlined_call_operand.vmem [shape: bf16[1,48,128], index: 1, kind: input, shape index: {}]   ;;  %s3979_s2 = inlined_call_operand.vmem [shape: f32[1,128], index: 2, kind: input, shape index: {}]   ;;  %s3980_s3 = inlined_call_operand.vmem [shape: bf16[2,256,128], index: 3, kind: output, shape index: {0}]   ;;  %s3981_s4 = inlined_call_operand.hbm [shape: f32[2,1,2,128], index: 4, kind: output, shape index: {1}]  }
   0x1   :  { %12 = vsyncpa [#allocation3 + $0x1], 0  ;;  %s2994_s15 = smov 0   ;;  %s2996_s16 = smov 0  }
   0x2   :  { %s2998_s17 = smov 0   ;;  %s3000_s18 = smov 0  }
   0x3   :  { %s3002_s19 = smov 0   ;;  %s3004_s20 = smov 0  }
   0x4 LB: > { %s2407_s21 = sadd.s32 4294967295, %s2963_s20   ;;  %s2408_s22 = sadd.s32 4294967294, %s2963_s20   ;;  %s2963_s20 = sphi %s3004_s20, %s18_s20   ;;  %s2959_s19 = sphi %s3002_s19, %s3990_s19   ;;  %s2955_s18 = sphi %s3000_s18, %s3989_s18   ;;  %s2951_s17 = sphi %s2998_s17, %s3988_s17   ;;  %s2947_s16 = sphi %s2996_s16, %s3987_s16   ;;  %s2943_s15 = sphi %s2994_s15, %s3986_s15  }
   0x5   : > { %s37_s23 = sadd.s32 1, %s2959_s19  ;;  %s158_s24 = sadd.s32 1, %s2951_s17 }
   0x6   : > { %p39_p0 = scmp.ge.s32.totalorder %s37_s23, 2  ;;  %p168_p1 = scmp.ne.s32.totalorder %s2951_s17, %s2947_s16 }
   0x7   : > { %p169_p2 = scmp.eq.s32.totalorder %s2407_s21, 1  ;;  %p174_p3 = scmp.ne.s32.totalorder %s2947_s16, %s2943_s15 }
   0x8   : > { %s3992_s23 = smov (%p39_p0, %s37_s23), 0  ;;  %p175_p5 = scmp.eq.s32.totalorder %s2408_s22, 1 }
   0x9   : > { %p3034_p4 = por %p169_p2, %p168_p1  ;;  %s151_s26 = ssub.s32 %s2959_s19, %s3992_s23 }
   0xa   : > { %p2413_p6 = scmp.ge.s32.totalorder %s2963_s20, 1  ;;  %p156_p7 = scmp.eq.s32.totalorder %s151_s26, 0 }
   0xb   : > { %p3041_p8 = por %p175_p5, %p174_p3  ;;  %p218_p9 = scmp.lt.s32.totalorder %s2963_s20, 3 }
   0xc   : > { %s3047_s28 = scalar_select %p156_p7, %s2951_s17, %s158_s24  }
   0xd   : > { %p219_p10 = pnand %p2413_p6, %p218_p9 }
   0xe   : > { %p267_p11 = scmp.lt.s32.totalorder (!%p219_p10), %s2955_s18, 1  ;;  %s2965_s8 = smov (!%p219_p10), 24   ;;  %vm345_vm0 = vsmask.f32 (!%p219_p10), 3328  ;;  %vm346_vm1 = vsmask.f32 (!%p219_p10), 7440 }
   0xf   : > { %222 = sbr.rel (%p219_p10) target bundleno = 628 (0x274), region = 32  ;;  %vm3104_vm2 = vmor (!%p219_p10), %vm345_vm0, %vm346_vm1  ;;  %s2966_s9 = smov (!%p219_p10), 36   ;;  %vm1517_vm3 = vcmask (!%p219_p10), 97280   ;;  %vm1566_vm4 = vcmask (!%p219_p10), 195584   ;;  %vm1599_vm5 = vcmask (!%p219_p10), 293888   ;;  %vm1663_vm6 = vcmask (!%p219_p10), 392192  }
  0x10   : > { %s2967_s12 = smov (!%p219_p10), 12   ;;  %vm2220_vm7 = vcmask (!%p219_p10), 1040384  }
  0x16   : > { %s3051_s29 = scalar_select %p267_p11, %s2955_s18, 1 }
  0x18   : > { %s2777_s30 = smul.u32 204, %s3051_s29 }
  0x1a   : > { %s3057_s7 = scalar_lea.vmem %s3977_s0, %s2777_s30  ;;  %s2586_s30 = sshll.u32 %s3051_s29, 7 }
  0x1b   : > { %v2418_v0 = vld [vmem:[%s3057_s7 + $0xc] sm:$0xf]  ;;  %v2419_v1 = vld [vmem:[%s3057_s7 + $0x10] sm:$0xf]  ;;  %v2420_v2 = vld [vmem:[%s3057_s7 + $0x18] sm:$0xf] }
  0x1c   : > { %v791_v3 = vshll.u32 %v2419_v1, 16  ;;  %v795_v4 = vshrl.u32 %v2419_v1, 16  ;;  %v2498_v5 = vcombine.low %v2418_v0, %v2419_v1  ;;  %v782_v6 = vshrl.u32 %v2418_v0, 16  ;;  %v2421_v7 = vld [vmem:[%s3057_s7 + $0x1c] sm:$0xf]  ;;  %s264_s29 = sand.u32 1, %s2947_s16  }
  0x1d   : > { %v785_v8 = vshll.u32 %v2418_v0, 16  ;;  %v806_v9 = vshrl.u32 %v2420_v2, 16  ;;  %v809_v10 = vshll.u32 %v2420_v2, 16  ;;  %v815_v11 = vshll.u32 %v2421_v7, 16  ;;  %v2422_v12 = vld [vmem:[%s3057_s7 + $0x24] sm:$0xf] }
  0x1e   : > { %v3064_v13 = vrot.slane %v791_v3, 5  ;;  %v797_v14 = vrot.slane %v795_v4, 4  ;;  %1405 = vrot.lane.b32.xlu1 %v2498_v5, %s2965_s8  ;;  %v784_v15 = vrot.slane %v782_v6, 4  ;;  %v819_v16 = vshrl.u32 %v2421_v7, 16  ;;  %v2423_v17 = vld [vmem:[%s3057_s7 + $0x28] sm:$0xf] }
  0x1f   : > { %v787_v18 = vrot.slane %v785_v8, 5  ;;  %v808_v19 = vrot.slane %v806_v9, 4  ;;  %v811_v20 = vrot.slane %v809_v10, 5  ;;  %v3068_v21 = vrot.slane %v815_v11, 5  ;;  %v2424_v30 = vld [vmem:[%s3057_s7 + $0x30] sm:$0xf] }
  0x20   : > { %v798_v22 = vor.u32 %v797_v14, %v3064_v13  ;;  %v821_v23 = vrot.slane %v819_v16, 4  ;;  %v2499_v24 = vcombine.low %v2420_v2, %v2421_v7  ;;  %v839_v25 = vshll.u32 %v2423_v17, 16  ;;  %v2425_v31 = vld [vmem:[%s3057_s7 + $0x34] sm:$0xf]  ;;  %v297_v36 = vld [vmem:[%s3057_s7] sm:$0xf] }
  0x21   : > { %v788_v26 = vor.u32 %v787_v18, %v784_v15  ;;  %v843_v27 = vshrl.u32 %v2423_v17, 16  ;;  %v2500_v28 = vcombine.low %v2422_v12, %v2423_v17  ;;  %v830_v29 = vshrl.u32 %v2422_v12, 16  ;;  %v298_v45 = vld [vmem:[%s3057_s7 + $0x4] sm:$0xf]  ;;  %v329_v49 = vld [vmem:[%s3057_s7 + $0x8] sm:$0x1] }
  0x22   : > { %v3073_v32 = vrot.slane %v798_v22, 4  ;;  %1407 = vrot.lane.b32.xlu1 %v2499_v24, %s2965_s8  ;;  %v3076_v33 = vrot.slane %v839_v25, 5  ;;  %v833_v34 = vshll.u32 %v2422_v12, 16  ;;  %v854_v35 = vshrl.u32 %v2424_v30, 16  ;;  %v2451_v55 = vld [vmem:[%s3057_s7 + $0x20] sm:$0x1] }
  0x23   : > { %v3079_v37 = vrot.slane %v788_v26, 4  ;;  %v845_v38 = vrot.slane %v843_v27, 4  ;;  %1409 = vrot.lane.b32.xlu0 %v2500_v28, %s2965_s8  ;;  %v832_v39 = vrot.slane %v830_v29, 4  ;;  %v857_v40 = vshll.u32 %v2424_v30, 16  ;;  %v299_v60 = vld [vmem:[%s3057_s7 + $0xc] sm:$0xf] }
  0x24   : > { %v835_v41 = vrot.slane %v833_v34, 5  ;;  %v3082_v42 = vrot.slane %v854_v35, 4  ;;  %v863_v43 = vshll.u32 %v2425_v31, 16  ;;  %v867_v44 = vshrl.u32 %v2425_v31, 16  ;;  %v300_v5 = vld [vmem:[%s3057_s7 + $0x10] sm:$0xf] }
  0x25   : > { %v846_v46 = vor.u32 %v845_v38, %v3076_v33  ;;  %v3086_v47 = vrot.slane %v857_v40, 5  ;;  %v2501_v48 = vcombine.low %v2424_v30, %v2425_v31  ;;  %v349_v50 = vshrl.u32 %v297_v36, 16  ;;  %v330_v15 = vld [vmem:[%s3057_s7 + $0x14] sm:$0x1]  ;;  %v303_v22 = vld [vmem:[%s3057_s7 + $0x24] sm:$0xf] }
  0x26   : > { %v836_v51 = vor.u32 %v835_v41, %v832_v39  ;;  %v3089_v52 = vrot.slane %v863_v43, 5  ;;  %v3091_v53 = vrot.slane %v867_v44, 4  ;;  %v352_v54 = vshll.u32 %v297_v36, 16  ;;  %v304_v27 = vld [vmem:[%s3057_s7 + $0x28] sm:$0xf]  ;;  %s2236_s21 = scalar_lea.sflag [#allocation3], %s264_s29 }
  0x27   : > { %v3094_v56 = vrot.slane %v846_v46, 4  ;;  %1411 = vrot.lane.b32.xlu1 %v2501_v48, %s2965_s8  ;;  %v351_v57 = vrot.slane %v349_v50, 4  ;;  %v358_v58 = vshll.u32 %v298_v45, 16  ;;  %v362_v59 = vshrl.u32 %v298_v45, 16  ;;  %v332_v36 = vld [vmem:[%s3057_s7 + $0x2c] sm:$0x1] }
  0x28   : > { %v3098_v61 = vrot.slane %v836_v51, 4  ;;  %v354_v62 = vrot.slane %v352_v54, 5  ;;  %v368_v63 = vshll.u32 %v329_v49, 16  ;;  %v812_v0 = vor.u32 %v811_v20, %v808_v19  ;;  %v2450_v44 = vld [vmem:[%s3057_s7 + $0x14] sm:$0x1]  ;;  %v2852_v50 = vld [vmem:[%s3978_s1] sm:$0xff]  }
  0x29   : > { %v360_v1 = vrot.slane %v358_v58, 5  ;;  %v364_v2 = vrot.slane %v362_v59, 4  ;;  %v822_v3 = vor.u32 %v821_v23, %v3068_v21  ;;  %v825_v4 = vshll.u32 %v2451_v55, 16  ;;  %v2453_v58 = vld [vmem:[%s3057_s7 + $0x38] sm:$0x1]  ;;  %v2854_v59 = vld [vmem:[%s3978_s1 + $0x8] sm:$0xff]   ;;  %2733 = vmatprep.subr.bf16.mxu0 %v2852_v50  ;;  %2771 = vmatprep.subr.bf16.mxu1 %v2852_v50 }
  0x2a   : > { %v355_v6 = vor.u32 %v354_v62, %v351_v57  ;;  %v370_v7 = vrot.slane %v368_v63, 5  ;;  %v813_v8 = vrot.slane %v812_v0, 4  ;;  %v373_v9 = vshrl.u32 %v299_v60, 16  ;;  %2734 = vmatpush3.bf16.msra.mxu0 %v2852_v50  ;;  %2774 = vmatpush3.bf16.msra.mxu1 %v2852_v50 }
  0x2b   : > { %v365_v11 = vor.u32 %v364_v2, %v360_v1  ;;  %v823_v12 = vrot.slane %v822_v3, 4  ;;  %v827_v14 = vrot.slane %v825_v4, 5  ;;  %v376_v16 = vshll.u32 %v299_v60, 16  ;;  %2735 = vmatprep.subr.bf16.mxu0 %v2854_v59  ;;  %2772 = vmatprep.subr.bf16.mxu1 %v2854_v59 }
  0x2c   : > { %v356_v17 = vrot.slane %v355_v6, 4  ;;  %v818_v18 = vsel %vm3104_vm2, %v813_v8, %v3068_v21  ;;  %v375_v19 = vrot.slane %v373_v9, 4  ;;  %v382_v20 = vshll.u32 %v300_v5, 16  ;;  %v2856_v8 = vld [vmem:[%s3978_s1 + $0x10] sm:$0xff]  }
  0x2d   : > { %v366_v23 = vrot.slane %v365_v11, 4  ;;  %v828_v24 = vsel %vm3104_vm2, %v823_v12, %v827_v14  ;;  %v378_v25 = vrot.slane %v376_v16, 5  ;;  %v386_v26 = vshrl.u32 %v300_v5, 16  ;;  %v302_v11 = vld [vmem:[%s3057_s7 + $0x1c] sm:$0xf] }
  0x2e   : > { %v361_v28 = vsel %vm3104_vm2, %v356_v17, %v360_v1  ;;  %v2515_v29 = vcombine.low %v818_v18, %v828_v24  ;;  %v384_v30 = vrot.slane %v382_v20, 5  ;;  %v392_v31 = vshll.u32 %v330_v15, 16  ;;  %v331_v20 = vld [vmem:[%s3057_s7 + $0x20] sm:$0x1]  ;;  %2736 = vmatpush3.bf16.msra.mxu0 %v2854_v59  ;;  %2775 = vmatpush3.bf16.msra.mxu1 %v2854_v59 }
  0x2f   : > { %v371_v21 = vsel %vm3104_vm2, %v366_v23, %v370_v7  ;;  %v379_v34 = vor.u32 %v378_v25, %v375_v19  ;;  %v388_v35 = vrot.slane %v386_v26, 4  ;;  %v421_v38 = vshrl.u32 %v303_v22, 16  ;;  %v307_v23 = vld [vmem:[%s3057_s7 + $0x3c] sm:$0xf]  ;;  %2737 = vmatprep.subr.bf16.mxu0 %v2856_v8  ;;  %2773 = vmatprep.subr.bf16.mxu1 %v2856_v8 }
  0x30   : > { %v2482_v39 = vcombine.low %v361_v28, %v371_v21  ;;  %1487 = vrot.lane.b32.xlu1 %v2515_v29, %s2966_s9  ;;  %v394_v40 = vrot.slane %v392_v31, 5  ;;  %v424_v41 = vshll.u32 %v303_v22, 16  ;;  %v430_v43 = vshll.u32 %v304_v27, 16  ;;  %v334_v31 = vld [vmem:[%s3057_s7 + $0x44] sm:$0x1] }
  0x31   : > { %v380_v45 = vrot.slane %v379_v34, 4  ;;  %v389_v46 = vor.u32 %v388_v35, %v384_v30  ;;  %v423_v48 = vrot.slane %v421_v38, 4  ;;  %v434_v49 = vshrl.u32 %v304_v27, 16  ;;  %v308_v27 = vld [vmem:[%s3057_s7 + $0x40] sm:$0xf] }
  0x32   : > { %1293 = vrot.lane.b32.xlu0 %v2482_v39, %s2967_s12  ;;  %v426_v51 = vrot.slane %v424_v41, 5  ;;  %v432_v54 = vrot.slane %v430_v43, 5  ;;  %v440_v55 = vshll.u32 %v332_v36, 16  ;;  %v794_v57 = vsel %vm3104_vm2, %v3079_v37, %v3064_v13  ;;  %v301_v37 = vld [vmem:[%s3057_s7 + $0x18] sm:$0xf]  ;;  %2738 = vmatpush3.bf16.msra.mxu0 %v2856_v8 }
  0x33   : > { %v385_v60 = vsel %vm3104_vm2, %v380_v45, %v384_v30  ;;  %v390_v62 = vrot.slane %v389_v46, 4  ;;  %v436_v63 = vrot.slane %v434_v49, 4  ;;  %v801_v0 = vshll.u32 %v2450_v44, 16  ;;  %v2452_v43 = vld [vmem:[%s3057_s7 + $0x2c] sm:$0x1]  ;;  %2776 = vmatpush3.bf16.msra.mxu1 %v2856_v8 }
  0x34   : > { %v427_v1 = vor.u32 %v426_v51, %v423_v48  ;;  %v442_v2 = vrot.slane %v440_v55, 5  ;;  %v860_v3 = vor.u32 %v3086_v47, %v3082_v42  ;;  %v870_v13 = vor.u32 %v3091_v53, %v3089_v52  ;;  %v3169_v49 = vld [vmem:[%s3057_s7 + $0x48] sm:$0xf] }
  0x35   : > { %v395_v4 = vsel %vm3104_vm2, %v390_v62, %v394_v40  ;;  %v437_v5 = vor.u32 %v436_v63, %v432_v54  ;;  %v803_v6 = vrot.slane %v801_v0, 5  ;;  %v873_v7 = vshll.u32 %v2453_v58, 16 }
  0x36   : > { %v2483_v42 = vcombine.low %v385_v60, %v395_v4  ;;  %v428_v47 = vrot.slane %v427_v1, 4  ;;  %v861_v53 = vrot.slane %v860_v3, 4  ;;  %v871_v9 = vrot.slane %v870_v13, 4 }
  0x37   : > { %v438_v12 = vrot.slane %v437_v5, 4  ;;  %v804_v14 = vsel %vm3104_vm2, %v3073_v32, %v803_v6  ;;  %v875_v15 = vrot.slane %v873_v7, 5  ;;  %v397_v16 = vshrl.u32 %v301_v37, 16  ;;  %v305_v7 = vld [vmem:[%s3057_s7 + $0x30] sm:$0xf] }
  0x38   : > { %1295 = vrot.lane.b32.xlu0 %v2483_v42, %s2967_s12  ;;  %v433_v17 = vsel %vm3104_vm2, %v428_v47, %v432_v54  ;;  %v2514_v18 = vcombine.low %v794_v57, %v804_v14  ;;  %v866_v19 = vsel %vm3104_vm2, %v861_v53, %v3089_v52  ;;  %v400_v22 = vshll.u32 %v301_v37, 16  ;;  %v2429_v57 = vld [vmem:[%s3057_s7 + $0x4c] sm:$0xf] }
  0x39   : > { %v443_v32 = vsel %vm3104_vm2, %v438_v12, %v442_v2  ;;  %v876_v24 = vsel %vm3104_vm2, %v871_v9, %v875_v15  ;;  %v399_v25 = vrot.slane %v397_v16, 4  ;;  %v406_v26 = vshll.u32 %v302_v11, 16  ;;  %v306_v9 = vld [vmem:[%s3057_s7 + $0x34] sm:$0xf] }
  0x3a   : > { %v2485_v28 = vcombine.low %v433_v17, %v443_v32  ;;  %v2517_v29 = vcombine.low %v866_v19, %v876_v24  ;;  %v402_v52 = vrot.slane %v400_v22, 5  ;;  %v410_v30 = vshrl.u32 %v302_v11, 16  ;;  %v333_v11 = vld [vmem:[%s3057_s7 + $0x38] sm:$0x1]  ;;  %v2455_v17 = vld [vmem:[%s3057_s7 + $0x50] sm:$0x1] }
  0x3b   : > { %v408_v21 = vrot.slane %v406_v26, 5  ;;  %v416_v34 = vshll.u32 %v331_v20, 16  ;;  %v469_v35 = vshrl.u32 %v307_v23, 16  ;;  %v472_v36 = vshll.u32 %v307_v23, 16 }
  0x3c   : > { %1299 = vrot.lane.b32.xlu1 %v2485_v28, %s2967_s12  ;;  %1485 = vrot.lane.b32.xlu0 %v2514_v18, %s2966_s9  ;;  %v403_v38 = vor.u32 %v402_v52, %v399_v25  ;;  %v412_v39 = vrot.slane %v410_v30, 4  ;;  %v478_v40 = vshll.u32 %v308_v27, 16  ;;  %v482_v41 = vshrl.u32 %v308_v27, 16  ;;  %v3197_v25 = vld [vmem:[%s3057_s7 + $0x3c] sm:$0xf] }
  0x3d   : > { %v418_v44 = vrot.slane %v416_v34, 5  ;;  %v471_v45 = vrot.slane %v469_v35, 4  ;;  %v474_v46 = vrot.slane %v472_v36, 5  ;;  %v488_v48 = vshll.u32 %v334_v31, 16  ;;  %v3201_v52 = vld [vmem:[%s3057_s7 + $0x40] sm:$0xf] }
  0x3e   : > { %v404_v50 = vrot.slane %v403_v38, 4  ;;  %v413_v51 = vor.u32 %v412_v39, %v408_v21  ;;  %v480_v54 = vrot.slane %v478_v40, 5  ;;  %v484_v55 = vrot.slane %v482_v41, 4 }
  0x3f   : > { %v475_v58 = vor.u32 %v474_v46, %v471_v45  ;;  %v490_v59 = vrot.slane %v488_v48, 5  ;;  %v842_v60 = vsel %vm3104_vm2, %v3098_v61, %v3076_v33  ;;  %v849_v62 = vshll.u32 %v2452_v43, 16  ;;  %v311_v45 = vld [vmem:[%s3057_s7 + $0x54] sm:$0xf] }
  0x40   : > { %1491 = vrot.lane.b32.xlu1 %v2517_v29, %s2966_s9  ;;  %v409_v63 = vsel %vm3104_vm2, %v404_v50, %v408_v21  ;;  %v414_v0 = vrot.slane %v413_v51, 4  ;;  %v485_v1 = vor.u32 %v484_v55, %v480_v54  ;;  %v902_v2 = vshrl.u32 %v3169_v49, 16  ;;  %v312_v51 = vld [vmem:[%s3057_s7 + $0x58] sm:$0xf] }
  0x41   : > { %v476_v3 = vrot.slane %v475_v58, 4  ;;  %v851_v13 = vrot.slane %v849_v62, 5  ;;  %v905_v37 = vshll.u32 %v3169_v49, 16  ;;  %v911_v4 = vshll.u32 %v2429_v57, 16 }
  0x42   : > { %v419_v33 = vsel %vm3104_vm2, %v414_v0, %v418_v44  ;;  %v486_v61 = vrot.slane %v485_v1, 4  ;;  %v904_v5 = vrot.slane %v902_v2, 4  ;;  %v915_v6 = vshrl.u32 %v2429_v57, 16  ;;  %v2454_v1 = vld [vmem:[%s3057_s7 + $0x44] sm:$0x1] }
  0x43   : > { %v2484_v8 = vcombine.low %v409_v63, %v419_v33  ;;  %v481_v42 = vsel %vm3104_vm2, %v476_v3, %v480_v54  ;;  %v852_v47 = vsel %vm3104_vm2, %v3094_v56, %v851_v13  ;;  %v907_v53 = vrot.slane %v905_v37, 5 }
  0x44   : > { %v491_v12 = vsel %vm3104_vm2, %v486_v61, %v490_v59  ;;  %v2516_v14 = vcombine.low %v842_v60, %v852_v47  ;;  %v913_v15 = vrot.slane %v911_v4, 5  ;;  %v917_v16 = vrot.slane %v915_v6, 4  ;;  %v336_v59 = vld [vmem:[%s3057_s7 + $0x5c] sm:$0x1]  ;;  %v3224_v4 = vld [vmem:[%s3057_s7 + $0x60] sm:$0xf] }
  0x45   : > { %1297 = vrot.lane.b32.xlu0 %v2484_v8, %s2967_s12  ;;  %v2487_v18 = vcombine.low %v481_v42, %v491_v12  ;;  %v2503_v19 = vcombine.low %v3169_v49, %v2429_v57  ;;  %v445_v20 = vshrl.u32 %v305_v7, 16  ;;  %v448_v22 = vshll.u32 %v305_v7, 16 }
  0x46   : > { %v454_v56 = vshll.u32 %v306_v9, 16  ;;  %v458_v23 = vshrl.u32 %v306_v9, 16  ;;  %v464_v32 = vshll.u32 %v333_v11, 16  ;;  %v908_v24 = vor.u32 %v907_v53, %v904_v5  ;;  %v2433_v53 = vld [vmem:[%s3057_s7 + $0x64] sm:$0xf] }
  0x47   : > { %1303 = vrot.lane.b32.xlu1 %v2487_v18, %s2967_s12  ;;  %v447_v26 = vrot.slane %v445_v20, 4  ;;  %v450_v27 = vrot.slane %v448_v22, 5  ;;  %v918_v28 = vor.u32 %v917_v16, %v913_v15  ;;  %v921_v29 = vshll.u32 %v2455_v17, 16 }
  0x48   : > { %v456_v30 = vrot.slane %v454_v56, 5  ;;  %v460_v31 = vrot.slane %v458_v23, 4  ;;  %v466_v21 = vrot.slane %v464_v32, 5  ;;  %v909_v34 = vrot.slane %v908_v24, 4 }
  0x49   : > { %1489 = vrot.lane.b32.xlu0 %v2516_v14, %s2966_s9  ;;  %v451_v35 = vor.u32 %v450_v27, %v447_v26  ;;  %v919_v36 = vrot.slane %v918_v28, 4  ;;  %v923_v38 = vrot.slane %v921_v29, 5  ;;  %v878_v39 = vshrl.u32 %v3197_v25, 16  ;;  %v3237_v27 = vld [vmem:[%s3057_s7 + $0x4c] sm:$0xf] }
  0x4a   : > { %v461_v40 = vor.u32 %v460_v31, %v456_v30  ;;  %v914_v41 = vsel %vm3104_vm2, %v909_v34, %v913_v15  ;;  %v881_v43 = vshll.u32 %v3197_v25, 16  ;;  %v887_v44 = vshll.u32 %v3201_v52, 16 }
  0x4b   : > { %1415 = vrot.lane.b32.xlu1 %v2503_v19, %s2965_s8  ;;  %v452_v46 = vrot.slane %v451_v35, 4  ;;  %v924_v48 = vsel %vm3104_vm2, %v919_v36, %v923_v38  ;;  %v880_v49 = vrot.slane %v878_v39, 4  ;;  %v891_v50 = vshrl.u32 %v3201_v52, 16  ;;  %v3232_v19 = vld [vmem:[%s3057_s7 + $0x48] sm:$0xf] }
  0x4c   : > { %v462_v54 = vrot.slane %v461_v40, 4  ;;  %v2519_v55 = vcombine.low %v914_v41, %v924_v48  ;;  %v883_v57 = vrot.slane %v881_v43, 5  ;;  %v889_v58 = vrot.slane %v887_v44, 5  ;;  %v2457_v38 = vld [vmem:[%s3057_s7 + $0x68] sm:$0x1] }
  0x4d   : > { %v457_v60 = vsel %vm3104_vm2, %v452_v46, %v456_v30  ;;  %v893_v62 = vrot.slane %v891_v50, 4  ;;  %v2502_v63 = vcombine.low %v3197_v25, %v3201_v52  ;;  %v517_v0 = vshrl.u32 %v311_v45, 16  ;;  %v335_v30 = vld [vmem:[%s3057_s7 + $0x50] sm:$0x1]  ;;  %v3251_v39 = vld [vmem:[%s3057_s7 + $0x54] sm:$0xf] }
  0x4e   : > { %v467_v2 = vsel %vm3104_vm2, %v462_v54, %v466_v21  ;;  %v520_v3 = vshll.u32 %v311_v45, 16  ;;  %v526_v13 = vshll.u32 %v312_v51, 16  ;;  %v530_v37 = vshrl.u32 %v312_v51, 16 }
  0x4f   : > { %v2486_v33 = vcombine.low %v457_v60, %v467_v2  ;;  %1495 = vrot.lane.b32.xlu1 %v2519_v55, %s2966_s9  ;;  %v519_v61 = vrot.slane %v517_v0, 4  ;;  %v536_v5 = vshll.u32 %v336_v59, 16  ;;  %v884_v6 = vor.u32 %v883_v57, %v880_v49  ;;  %v3259_v55 = vld [vmem:[%s3057_s7 + $0x58] sm:$0xf] }
  0x50   : > { %v522_v7 = vrot.slane %v520_v3, 5  ;;  %v528_v8 = vrot.slane %v526_v13, 5  ;;  %v532_v42 = vrot.slane %v530_v37, 4  ;;  %v894_v47 = vor.u32 %v893_v62, %v889_v58 }
  0x51   : > { %1301 = vrot.lane.b32.xlu0 %v2486_v33, %s2967_s12  ;;  %v538_v9 = vrot.slane %v536_v5, 5  ;;  %v885_v11 = vrot.slane %v884_v6, 4  ;;  %v897_v12 = vshll.u32 %v2454_v1, 16  ;;  %v950_v14 = vshrl.u32 %v3224_v4, 16  ;;  %v3268_v33 = vld [vmem:[%s3057_s7 + $0x6c] sm:$0xf] }
  0x52   : > { %v523_v15 = vor.u32 %v522_v7, %v519_v61  ;;  %v533_v16 = vor.u32 %v532_v42, %v528_v8  ;;  %v895_v17 = vrot.slane %v894_v47, 4  ;;  %v953_v18 = vshll.u32 %v3224_v4, 16  ;;  %v3271_v61 = vld [vmem:[%s3057_s7 + $0x70] sm:$0xf]  ;;  %v338_v42 = vld [vmem:[%s3057_s7 + $0x74] sm:$0x1] }
  0x53   : > { %v890_v20 = vsel %vm3104_vm2, %v885_v11, %v889_v58  ;;  %v899_v22 = vrot.slane %v897_v12, 5  ;;  %v952_v56 = vrot.slane %v950_v14, 4  ;;  %v959_v23 = vshll.u32 %v2433_v53, 16 }
  0x54   : > { %v524_v32 = vrot.slane %v523_v15, 4  ;;  %v534_v24 = vrot.slane %v533_v16, 4  ;;  %v955_v25 = vrot.slane %v953_v18, 5  ;;  %v963_v26 = vshrl.u32 %v2433_v53, 16 }
  0x55   : > { %1413 = vrot.lane.b32.xlu0 %v2502_v63, %s2965_s8  ;;  %v900_v28 = vsel %vm3104_vm2, %v895_v17, %v899_v22  ;;  %v961_v29 = vrot.slane %v959_v23, 5  ;;  %v2505_v52 = vcombine.low %v3224_v4, %v2433_v53  ;;  %v493_v31 = vshrl.u32 %v3232_v19, 16  ;;  %v2456_v22 = vld [vmem:[%s3057_s7 + $0x5c] sm:$0x1]  ;;  %v3289_v23 = vld [vmem:[%s3057_s7 + $0x78] sm:$0xf] }
  0x56   : > { %v529_v21 = vsel %vm3104_vm2, %v524_v32, %v528_v8  ;;  %v539_v34 = vsel %vm3104_vm2, %v534_v24, %v538_v9  ;;  %v2518_v35 = vcombine.low %v890_v20, %v900_v28  ;;  %v965_v36 = vrot.slane %v963_v26, 4  ;;  %v3293_v28 = vld [vmem:[%s3057_s7 + $0x7c] sm:$0xf] }
  0x57   : > { %v2489_v40 = vcombine.low %v529_v21, %v539_v34  ;;  %v495_v41 = vrot.slane %v493_v31, 4  ;;  %v496_v43 = vshll.u32 %v3232_v19, 16  ;;  %v502_v44 = vshll.u32 %v3237_v27, 16 }
  0x58   : > { %v506_v45 = vshrl.u32 %v3237_v27, 16  ;;  %v512_v46 = vshll.u32 %v335_v30, 16  ;;  %v956_v48 = vor.u32 %v955_v25, %v952_v56  ;;  %v966_v49 = vor.u32 %v965_v36, %v961_v29 }
  0x59   : > { %1307 = vrot.lane.b32.xlu1 %v2489_v40, %s2967_s12  ;;  %1493 = vrot.lane.b32.xlu0 %v2518_v35, %s2966_s9  ;;  %v498_v50 = vrot.slane %v496_v43, 5  ;;  %v504_v51 = vrot.slane %v502_v44, 5  ;;  %v969_v54 = vshll.u32 %v2457_v38, 16  ;;  %v926_v57 = vshrl.u32 %v3251_v39, 16  ;;  %v3302_v43 = vld [vmem:[%s3057_s7 + $0x60] sm:$0xf] }
  0x5a   : > { %v508_v58 = vrot.slane %v506_v45, 4  ;;  %v514_v59 = vrot.slane %v512_v46, 5  ;;  %v957_v60 = vrot.slane %v956_v48, 4  ;;  %v967_v62 = vrot.slane %v966_v49, 4  ;;  %v3305_v49 = vld [vmem:[%s3057_s7 + $0x64] sm:$0xf] }
  0x5b   : > { %v499_v63 = vor.u32 %v498_v50, %v495_v41  ;;  %v971_v0 = vrot.slane %v969_v54, 5  ;;  %v928_v1 = vrot.slane %v926_v57, 4  ;;  %v929_v2 = vshll.u32 %v3251_v39, 16 }
  0x5c   : > { %v509_v3 = vor.u32 %v508_v58, %v504_v51  ;;  %v962_v13 = vsel %vm3104_vm2, %v957_v60, %v961_v29  ;;  %v935_v37 = vshll.u32 %v3259_v55, 16  ;;  %v939_v4 = vshrl.u32 %v3259_v55, 16 }
  0x5d   : > { %1419 = vrot.lane.b32.xlu1 %v2505_v52, %s2965_s8  ;;  %v500_v5 = vrot.slane %v499_v63, 4  ;;  %v972_v6 = vsel %vm3104_vm2, %v967_v62, %v971_v0  ;;  %v931_v7 = vrot.slane %v929_v2, 5  ;;  %v2504_v8 = vcombine.low %v3251_v39, %v3259_v55 }
  0x5e   : > { %v510_v47 = vrot.slane %v509_v3, 4  ;;  %v2521_v53 = vcombine.low %v962_v13, %v972_v6  ;;  %v937_v9 = vrot.slane %v935_v37, 5  ;;  %v941_v11 = vrot.slane %v939_v4, 4  ;;  %v2459_v3 = vld [vmem:[%s3057_s7 + $0x80] sm:$0x1] }
  0x5f   : > { %v505_v12 = vsel %vm3104_vm2, %v500_v5, %v504_v51  ;;  %v565_v14 = vshrl.u32 %v3268_v33, 16  ;;  %v568_v15 = vshll.u32 %v3268_v33, 16  ;;  %v574_v16 = vshll.u32 %v3271_v61, 16  ;;  %v3323_v13 = vld [vmem:[%s3057_s7 + $0x6c] sm:$0xf] }
  0x60   : > { %v515_v17 = vsel %vm3104_vm2, %v510_v47, %v514_v59  ;;  %v578_v18 = vshrl.u32 %v3271_v61, 16  ;;  %v584_v20 = vshll.u32 %v338_v42, 16  ;;  %v932_v56 = vor.u32 %v931_v7, %v928_v1  ;;  %v337_v59 = vld [vmem:[%s3057_s7 + $0x68] sm:$0x1] }
  0x61   : > { %v2488_v32 = vcombine.low %v505_v12, %v515_v17  ;;  %1499 = vrot.lane.b32.xlu1 %v2521_v53, %s2966_s9  ;;  %v567_v24 = vrot.slane %v565_v14, 4  ;;  %v570_v25 = vrot.slane %v568_v15, 5  ;;  %v576_v26 = vrot.slane %v574_v16, 5  ;;  %v2435_v12 = vld [vmem:[%s3057_s7 + $0x70] sm:$0xf] }
  0x62   : > { %v580_v29 = vrot.slane %v578_v18, 4  ;;  %v586_v52 = vrot.slane %v584_v20, 5  ;;  %v933_v30 = vrot.slane %v932_v56, 4  ;;  %v942_v31 = vor.u32 %v941_v11, %v937_v9 }
  0x63   : > { %1305 = vrot.lane.b32.xlu0 %v2488_v32, %s2967_s12  ;;  %v571_v21 = vor.u32 %v570_v25, %v567_v24  ;;  %v945_v34 = vshll.u32 %v2456_v22, 16  ;;  %v998_v35 = vshrl.u32 %v3289_v23, 16  ;;  %v1001_v36 = vshll.u32 %v3289_v23, 16  ;;  %v3332_v32 = vld [vmem:[%s3057_s7 + $0x84] sm:$0xf] }
  0x64   : > { %v581_v38 = vor.u32 %v580_v29, %v576_v26  ;;  %v938_v39 = vsel %vm3104_vm2, %v933_v30, %v937_v9  ;;  %v943_v40 = vrot.slane %v942_v31, 4  ;;  %v1007_v41 = vshll.u32 %v3293_v28, 16  ;;  %v3337_v29 = vld [vmem:[%s3057_s7 + $0x88] sm:$0xf] }
  0x65   : > { %v572_v44 = vrot.slane %v571_v21, 4  ;;  %v947_v45 = vrot.slane %v945_v34, 5  ;;  %v1000_v46 = vrot.slane %v998_v35, 4  ;;  %v1003_v48 = vrot.slane %v1001_v36, 5  ;;  %v340_v34 = vld [vmem:[%s3057_s7 + $0x8c] sm:$0x1] }
  0x66   : > { %v582_v50 = vrot.slane %v581_v38, 4  ;;  %v1009_v51 = vrot.slane %v1007_v41, 5  ;;  %v1011_v54 = vshrl.u32 %v3293_v28, 16  ;;  %v2507_v55 = vcombine.low %v3289_v23, %v3293_v28 }
  0x67   : > { %1417 = vrot.lane.b32.xlu0 %v2504_v8, %s2965_s8  ;;  %v577_v57 = vsel %vm3104_vm2, %v572_v44, %v576_v26  ;;  %v948_v58 = vsel %vm3104_vm2, %v943_v40, %v947_v45  ;;  %v541_v60 = vshrl.u32 %v3302_v43, 16  ;;  %v544_v62 = vshll.u32 %v3302_v43, 16  ;;  %v2458_v40 = vld [vmem:[%s3057_s7 + $0x74] sm:$0x1] }
  0x68   : > { %v587_v63 = vsel %vm3104_vm2, %v582_v50, %v586_v52  ;;  %v2520_v0 = vcombine.low %v938_v39, %v948_v58  ;;  %v1013_v1 = vrot.slane %v1011_v54, 4  ;;  %v550_v2 = vshll.u32 %v3305_v49, 16 }
  0x69   : > { %v2491_v37 = vcombine.low %v577_v57, %v587_v63  ;;  %v543_v4 = vrot.slane %v541_v60, 4  ;;  %v546_v5 = vrot.slane %v544_v62, 5  ;;  %v554_v6 = vshrl.u32 %v3305_v49, 16  ;;  %v2441_v62 = vld [vmem:[%s3057_s7 + $0x94] sm:$0xf] }
  0x6a   : > { %v552_v7 = vrot.slane %v550_v2, 5  ;;  %v560_v8 = vshll.u32 %v337_v59, 16  ;;  %v1004_v42 = vor.u32 %v1003_v48, %v1000_v46  ;;  %v1014_v47 = vor.u32 %v1013_v1, %v1009_v51  ;;  %v3354_v48 = vld [vmem:[%s3057_s7 + $0x90] sm:$0xf] }
  0x6b   : > { %1311 = vrot.lane.b32.xlu1 %v2491_v37, %s2967_s12  ;;  %1497 = vrot.lane.b32.xlu0 %v2520_v0, %s2966_s9  ;;  %v547_v53 = vor.u32 %v546_v5, %v543_v4  ;;  %v556_v9 = vrot.slane %v554_v6, 4  ;;  %v1017_v11 = vshll.u32 %v2459_v3, 16  ;;  %v974_v14 = vshrl.u32 %v3323_v13, 16  ;;  %v3362_v5 = vld [vmem:[%s3057_s7 + $0x78] sm:$0xf] }
  0x6c   : > { %v562_v15 = vrot.slane %v560_v8, 5  ;;  %v1005_v16 = vrot.slane %v1004_v42, 4  ;;  %v1015_v17 = vrot.slane %v1014_v47, 4  ;;  %v977_v18 = vshll.u32 %v3323_v13, 16 }
  0x6d   : > { %v548_v20 = vrot.slane %v547_v53, 4  ;;  %v557_v22 = vor.u32 %v556_v9, %v552_v7  ;;  %v1019_v56 = vrot.slane %v1017_v11, 5  ;;  %v976_v23 = vrot.slane %v974_v14, 4 }
  0x6e   : > { %v1010_v24 = vsel %vm3104_vm2, %v1005_v16, %v1009_v51  ;;  %v979_v25 = vrot.slane %v977_v18, 5  ;;  %v983_v26 = vshll.u32 %v2435_v12, 16  ;;  %v987_v28 = vshrl.u32 %v2435_v12, 16 }
  0x6f   : > { %1423 = vrot.lane.b32.xlu1 %v2507_v55, %s2965_s8  ;;  %v553_v52 = vsel %vm3104_vm2, %v548_v20, %v552_v7  ;;  %v558_v30 = vrot.slane %v557_v22, 4  ;;  %v1020_v31 = vsel %vm3104_vm2, %v1015_v17, %v1019_v56  ;;  %v2506_v21 = vcombine.low %v3323_v13, %v2435_v12  ;;  %v3367_v12 = vld [vmem:[%s3057_s7 + $0x7c] sm:$0xf]  ;;  %v339_v17 = vld [vmem:[%s3057_s7 + $0x80] sm:$0x1] }
  0x70   : > { %v2523_v35 = vcombine.low %v1010_v24, %v1020_v31  ;;  %v985_v36 = vrot.slane %v983_v26, 5  ;;  %v989_v38 = vrot.slane %v987_v28, 4  ;;  %v613_v39 = vshrl.u32 %v3332_v32, 16  ;;  %v2461_v24 = vld [vmem:[%s3057_s7 + $0x98] sm:$0x1] }
  0x71   : > { %v563_v41 = vsel %vm3104_vm2, %v558_v30, %v562_v15  ;;  %v616_v44 = vshll.u32 %v3332_v32, 16  ;;  %v622_v45 = vshll.u32 %v3337_v29, 16  ;;  %v626_v46 = vshrl.u32 %v3337_v29, 16 }
  0x72   : > { %v2490_v50 = vcombine.low %v553_v52, %v563_v41  ;;  %v615_v51 = vrot.slane %v613_v39, 4  ;;  %v632_v54 = vshll.u32 %v340_v34, 16  ;;  %v980_v55 = vor.u32 %v979_v25, %v976_v23  ;;  %v3381_v25 = vld [vmem:[%s3057_s7 + $0x84] sm:$0xf] }
  0x73   : > { %1503 = vrot.lane.b32.xlu1 %v2523_v35, %s2966_s9  ;;  %v618_v57 = vrot.slane %v616_v44, 5  ;;  %v624_v58 = vrot.slane %v622_v45, 5  ;;  %v628_v59 = vrot.slane %v626_v46, 4  ;;  %v990_v60 = vor.u32 %v989_v38, %v985_v36 }
  0x74   : > { %1309 = vrot.lane.b32.xlu0 %v2490_v50, %s2967_s12  ;;  %v634_v63 = vrot.slane %v632_v54, 5  ;;  %v981_v0 = vrot.slane %v980_v55, 4  ;;  %v993_v1 = vshll.u32 %v2458_v40, 16  ;;  %v1046_v2 = vshrl.u32 %v3354_v48, 16  ;;  %v3389_v40 = vld [vmem:[%s3057_s7 + $0x88] sm:$0xf] }
  0x75   : > { %v619_v3 = vor.u32 %v618_v57, %v615_v51  ;;  %v629_v13 = vor.u32 %v628_v59, %v624_v58  ;;  %v991_v37 = vrot.slane %v990_v60, 4  ;;  %v1049_v4 = vshll.u32 %v3354_v48, 16 }
  0x76   : > { %v986_v6 = vsel %vm3104_vm2, %v981_v0, %v985_v36  ;;  %v995_v7 = vrot.slane %v993_v1, 5  ;;  %v1048_v8 = vrot.slane %v1046_v2, 4  ;;  %v1055_v42 = vshll.u32 %v2441_v62, 16 }
  0x77   : > { %v620_v47 = vrot.slane %v619_v3, 4  ;;  %v630_v53 = vrot.slane %v629_v13, 4  ;;  %v1051_v9 = vrot.slane %v1049_v4, 5  ;;  %v1059_v11 = vshrl.u32 %v2441_v62, 16  ;;  %v342_v13 = vld [vmem:[%s3057_s7 + $0xa4] sm:$0x1] }
  0x78   : > { %1421 = vrot.lane.b32.xlu0 %v2506_v21, %s2965_s8  ;;  %v996_v14 = vsel %vm3104_vm2, %v991_v37, %v995_v7  ;;  %v1057_v15 = vrot.slane %v1055_v42, 5  ;;  %v2509_v16 = vcombine.low %v3354_v48, %v2441_v62  ;;  %v589_v18 = vshrl.u32 %v3362_v5, 16  ;;  %v3398_v62 = vld [vmem:[%s3057_s7 + $0x9c] sm:$0xf] }
  0x79   : > { %v625_v20 = vsel %vm3104_vm2, %v620_v47, %v624_v58  ;;  %v635_v22 = vsel %vm3104_vm2, %v630_v53, %v634_v63  ;;  %v2522_v56 = vcombine.low %v986_v6, %v996_v14  ;;  %v1061_v23 = vrot.slane %v1059_v11, 4  ;;  %v3401_v63 = vld [vmem:[%s3057_s7 + $0xa0] sm:$0xf] }
  0x7a   : > { %v2493_v26 = vcombine.low %v625_v20, %v635_v22  ;;  %v591_v28 = vrot.slane %v589_v18, 4  ;;  %v592_v52 = vshll.u32 %v3362_v5, 16  ;;  %v598_v30 = vshll.u32 %v3367_v12, 16 }
  0x7b   : > { %v602_v31 = vshrl.u32 %v3367_v12, 16  ;;  %v608_v21 = vshll.u32 %v339_v17, 16  ;;  %v1052_v34 = vor.u32 %v1051_v9, %v1048_v8  ;;  %v1062_v35 = vor.u32 %v1061_v23, %v1057_v15  ;;  %v3419_v17 = vld [vmem:[%s3057_s7 + $0xa8] sm:$0xf]  ;;  %v3423_v23 = vld [vmem:[%s3057_s7 + $0xac] sm:$0xf] }
  0x7c   : > { %1315 = vrot.lane.b32.xlu1 %v2493_v26, %s2967_s12  ;;  %1501 = vrot.lane.b32.xlu0 %v2522_v56, %s2966_s9  ;;  %v594_v36 = vrot.slane %v592_v52, 5  ;;  %v600_v38 = vrot.slane %v598_v30, 5  ;;  %v1065_v39 = vshll.u32 %v2461_v24, 16  ;;  %v1022_v41 = vshrl.u32 %v3381_v25, 16 }
  0x7d   : > { %v604_v44 = vrot.slane %v602_v31, 4  ;;  %v610_v45 = vrot.slane %v608_v21, 5  ;;  %v1053_v46 = vrot.slane %v1052_v34, 4  ;;  %v1063_v48 = vrot.slane %v1062_v35, 4 }
  0x7e   : > { %v595_v50 = vor.u32 %v594_v36, %v591_v28  ;;  %v1067_v51 = vrot.slane %v1065_v39, 5  ;;  %v1024_v54 = vrot.slane %v1022_v41, 4  ;;  %v1025_v55 = vshll.u32 %v3381_v25, 16  ;;  %v3432_v39 = vld [vmem:[%s3057_s7 + $0x90] sm:$0xf] }
  0x7f   : > { %v605_v57 = vor.u32 %v604_v44, %v600_v38  ;;  %v1058_v58 = vsel %vm3104_vm2, %v1053_v46, %v1057_v15  ;;  %v1031_v59 = vshll.u32 %v3389_v40, 16  ;;  %v1035_v60 = vshrl.u32 %v3389_v40, 16  ;;  %v2460_v15 = vld [vmem:[%s3057_s7 + $0x8c] sm:$0x1]  ;;  %v3435_v46 = vld [vmem:[%s3057_s7 + $0x94] sm:$0xf] }
  0x80   : > { %1427 = vrot.lane.b32.xlu1 %v2509_v16, %s2965_s8  ;;  %v596_v0 = vrot.slane %v595_v50, 4  ;;  %v1068_v1 = vsel %vm3104_vm2, %v1063_v48, %v1067_v51  ;;  %v1027_v2 = vrot.slane %v1025_v55, 5  ;;  %v2508_v3 = vcombine.low %v3381_v25, %v3389_v40 }
  0x81   : > { %v606_v37 = vrot.slane %v605_v57, 4  ;;  %v2525_v4 = vcombine.low %v1058_v58, %v1068_v1  ;;  %v1033_v6 = vrot.slane %v1031_v59, 5  ;;  %v1037_v7 = vrot.slane %v1035_v60, 4  ;;  %v341_v58 = vld [vmem:[%s3057_s7 + $0x98] sm:$0x1] }
  0x82   : > { %v601_v8 = vsel %vm3104_vm2, %v596_v0, %v600_v38  ;;  %v661_v42 = vshrl.u32 %v3398_v62, 16  ;;  %v664_v47 = vshll.u32 %v3398_v62, 16  ;;  %v670_v53 = vshll.u32 %v3401_v63, 16 }
  0x83   : > { %v611_v9 = vsel %vm3104_vm2, %v606_v37, %v610_v45  ;;  %v674_v11 = vshrl.u32 %v3401_v63, 16  ;;  %v680_v14 = vshll.u32 %v342_v13, 16  ;;  %v1028_v16 = vor.u32 %v1027_v2, %v1024_v54  ;;  %v3453_v37 = vld [vmem:[%s3057_s7 + $0x9c] sm:$0xf] }
  0x84   : > { %v2492_v18 = vcombine.low %v601_v8, %v611_v9  ;;  %1507 = vrot.lane.b32.xlu1 %v2525_v4, %s2966_s9  ;;  %v663_v20 = vrot.slane %v661_v42, 4  ;;  %v666_v22 = vrot.slane %v664_v47, 5  ;;  %v672_v56 = vrot.slane %v670_v53, 5 }
  0x85   : > { %v676_v24 = vrot.slane %v674_v11, 4  ;;  %v682_v25 = vrot.slane %v680_v14, 5  ;;  %v1029_v26 = vrot.slane %v1028_v16, 4  ;;  %v1038_v28 = vor.u32 %v1037_v7, %v1033_v6  ;;  %v2443_v16 = vld [vmem:[%s3057_s7 + $0xa0] sm:$0xf] }
  0x86   : > { %1313 = vrot.lane.b32.xlu0 %v2492_v18, %s2967_s12  ;;  %v667_v52 = vor.u32 %v666_v22, %v663_v20  ;;  %v1041_v30 = vshll.u32 %v2460_v15, 16  ;;  %v1094_v31 = vshrl.u32 %v3419_v17, 16  ;;  %v1097_v21 = vshll.u32 %v3419_v17, 16 }
  0x87   : > { %v677_v34 = vor.u32 %v676_v24, %v672_v56  ;;  %v1034_v35 = vsel %vm3104_vm2, %v1029_v26, %v1033_v6  ;;  %v1039_v36 = vrot.slane %v1038_v28, 4  ;;  %v1103_v38 = vshll.u32 %v3423_v23, 16  ;;  %v3462_v28 = vld [vmem:[%s3057_s7 + $0xb4] sm:$0xf] }
  0x88   : > { %v668_v40 = vrot.slane %v667_v52, 4  ;;  %v1043_v41 = vrot.slane %v1041_v30, 5  ;;  %v1096_v44 = vrot.slane %v1094_v31, 4  ;;  %v1099_v45 = vrot.slane %v1097_v21, 5 }
  0x89   : > { %v678_v48 = vrot.slane %v677_v34, 4  ;;  %v1105_v50 = vrot.slane %v1103_v38, 5  ;;  %v1107_v51 = vshrl.u32 %v3423_v23, 16  ;;  %v2511_v54 = vcombine.low %v3419_v17, %v3423_v23  ;;  %v3467_v34 = vld [vmem:[%s3057_s7 + $0xb8] sm:$0xf] }
  0x8a   : > { %1425 = vrot.lane.b32.xlu0 %v2508_v3, %s2965_s8  ;;  %v673_v55 = vsel %vm3104_vm2, %v668_v40, %v672_v56  ;;  %v1044_v57 = vsel %vm3104_vm2, %v1039_v36, %v1043_v41  ;;  %v637_v59 = vshrl.u32 %v3432_v39, 16  ;;  %v640_v60 = vshll.u32 %v3432_v39, 16  ;;  %v2463_v3 = vld [vmem:[%s3057_s7 + $0xb0] sm:$0x1]  ;;  %v344_v41 = vld [vmem:[%s3057_s7 + $0xbc] sm:$0x1] }
  0x8b   : > { %v683_v0 = vsel %vm3104_vm2, %v678_v48, %v682_v25  ;;  %v2524_v1 = vcombine.low %v1034_v35, %v1044_v57  ;;  %v1109_v2 = vrot.slane %v1107_v51, 4  ;;  %v646_v13 = vshll.u32 %v3435_v46, 16  ;;  %v2462_v51 = vld [vmem:[%s3057_s7 + $0xa4] sm:$0x1] }
  0x8c   : > { %v2495_v4 = vcombine.low %v673_v55, %v683_v0  ;;  %v639_v6 = vrot.slane %v637_v59, 4  ;;  %v642_v7 = vrot.slane %v640_v60, 5  ;;  %v650_v8 = vshrl.u32 %v3435_v46, 16  ;;  %v3484_v59 = vld [vmem:[%s3057_s7 + $0xc0] sm:$0xf] }
  0x8d   : > { %v648_v42 = vrot.slane %v646_v13, 5  ;;  %v656_v47 = vshll.u32 %v341_v58, 16  ;;  %v1100_v53 = vor.u32 %v1099_v45, %v1096_v44  ;;  %v1110_v9 = vor.u32 %v1109_v2, %v1105_v50 }
  0x8e   : > { %1319 = vrot.lane.b32.xlu1 %v2495_v4, %s2967_s12  ;;  %1505 = vrot.lane.b32.xlu0 %v2524_v1, %s2966_s9  ;;  %v643_v11 = vor.u32 %v642_v7, %v639_v6  ;;  %v652_v14 = vrot.slane %v650_v8, 4  ;;  %v1113_v15 = vshll.u32 %v2463_v3, 16  ;;  %v1070_v17 = vshrl.u32 %v3453_v37, 16  ;;  %v3488_v6 = vld [vmem:[%s3057_s7 + $0xc4] sm:$0xf] }
  0x8f   : > { %v658_v18 = vrot.slane %v656_v47, 5  ;;  %v1101_v20 = vrot.slane %v1100_v53, 4  ;;  %v1111_v22 = vrot.slane %v1110_v9, 4  ;;  %v1073_v56 = vshll.u32 %v3453_v37, 16 }
  0x90   : > { %v644_v23 = vrot.slane %v643_v11, 4  ;;  %v653_v24 = vor.u32 %v652_v14, %v648_v42  ;;  %v1115_v25 = vrot.slane %v1113_v15, 5  ;;  %v1072_v26 = vrot.slane %v1070_v17, 4  ;;  %v3494_v15 = vld [vmem:[%s3057_s7 + $0xa8] sm:$0xf] }
  0x91   : > { %v1106_v52 = vsel %vm3104_vm2, %v1101_v20, %v1105_v50  ;;  %v1075_v30 = vrot.slane %v1073_v56, 5  ;;  %v1079_v31 = vshll.u32 %v2443_v16, 16  ;;  %v1083_v21 = vshrl.u32 %v2443_v16, 16 }
  0x92   : > { %1431 = vrot.lane.b32.xlu1 %v2511_v54, %s2965_s8  ;;  %v649_v35 = vsel %vm3104_vm2, %v644_v23, %v648_v42  ;;  %v654_v36 = vrot.slane %v653_v24, 4  ;;  %v1116_v38 = vsel %vm3104_vm2, %v1111_v22, %v1115_v25  ;;  %v2510_v40 = vcombine.low %v3453_v37, %v2443_v16  ;;  %v3496_v16 = vpop.permute.xlu1 %1405 }
  0x93   : > { %v2527_v44 = vcombine.low %v1106_v52, %v1116_v38  ;;  %v1081_v45 = vrot.slane %v1079_v31, 5  ;;  %v1085_v48 = vrot.slane %v1083_v21, 4  ;;  %v709_v50 = vshrl.u32 %v3462_v28, 16  ;;  %v343_v21 = vld [vmem:[%s3057_s7 + $0xb0] sm:$0x1] }
  0x94   : > { %v659_v54 = vsel %vm3104_vm2, %v654_v36, %v658_v18  ;;  %v712_v55 = vshll.u32 %v3462_v28, 16  ;;  %v718_v57 = vshll.u32 %v3467_v34, 16  ;;  %v722_v58 = vshrl.u32 %v3467_v34, 16 }
  0x95   : > { %v2494_v60 = vcombine.low %v649_v35, %v659_v54  ;;  %v711_v0 = vrot.slane %v709_v50, 4  ;;  %v728_v1 = vshll.u32 %v344_v41, 16  ;;  %v1076_v2 = vor.u32 %v1075_v30, %v1072_v26  ;;  %v3503_v26 = vld [vmem:[%s3057_s7 + $0xac] sm:$0xf] }
  0x96   : > { %1511 = vrot.lane.b32.xlu1 %v2527_v44, %s2966_s9  ;;  %v714_v13 = vrot.slane %v712_v55, 5  ;;  %v720_v3 = vrot.slane %v718_v57, 5  ;;  %v724_v37 = vrot.slane %v722_v58, 4  ;;  %v1086_v4 = vor.u32 %v1085_v48, %v1081_v45 }
  0x97   : > { %1317 = vrot.lane.b32.xlu0 %v2494_v60, %s2967_s12  ;;  %v730_v7 = vrot.slane %v728_v1, 5  ;;  %v1077_v8 = vrot.slane %v1076_v2, 4  ;;  %v1089_v42 = vshll.u32 %v2462_v51, 16  ;;  %v1142_v47 = vshrl.u32 %v3484_v59, 16  ;;  %v3523_v60 = vpop.permute.xlu1 %1407 }
  0x98   : > { %v715_v53 = vor.u32 %v714_v13, %v711_v0  ;;  %v725_v9 = vor.u32 %v724_v37, %v720_v3  ;;  %v1087_v11 = vrot.slane %v1086_v4, 4  ;;  %v1145_v14 = vshll.u32 %v3484_v59, 16  ;;  %v3525_v0 = vpop.permute.xlu0 %1409 }
  0x99   : > { %v1082_v17 = vsel %vm3104_vm2, %v1077_v8, %v1081_v45  ;;  %v1091_v18 = vrot.slane %v1089_v42, 5  ;;  %v1144_v20 = vrot.slane %v1142_v47, 4  ;;  %v1151_v22 = vshll.u32 %v3488_v6, 16  ;;  %v2465_v45 = vld [vmem:[%s3057_s7 + $0xc8] sm:$0x1] }
  0x9a   : > { %v716_v56 = vrot.slane %v715_v53, 4  ;;  %v726_v23 = vrot.slane %v725_v9, 4  ;;  %v1147_v24 = vrot.slane %v1145_v14, 5  ;;  %v1155_v25 = vshrl.u32 %v3488_v6, 16 }
  0x9b   : > { %1429 = vrot.lane.b32.xlu0 %v2510_v40, %s2965_s8  ;;  %v1092_v52 = vsel %vm3104_vm2, %v1087_v11, %v1091_v18  ;;  %v1153_v30 = vrot.slane %v1151_v22, 5  ;;  %v2513_v31 = vcombine.low %v3484_v59, %v3488_v6  ;;  %v685_v35 = vshrl.u32 %v3494_v15, 16  ;;  %v3518_v40 = vld [vmem:[%s3057_s7 + $0xb4] sm:$0xf] }
  0x9c   : > { %v721_v36 = vsel %vm3104_vm2, %v716_v56, %v720_v3  ;;  %v731_v38 = vsel %vm3104_vm2, %v726_v23, %v730_v7  ;;  %v2526_v41 = vcombine.low %v1082_v17, %v1092_v52  ;;  %v1157_v44 = vrot.slane %v1155_v25, 4  ;;  %v2447_v3 = vld [vmem:[%s3057_s7 + $0xb8] sm:$0xf] }
  0x9d   : > { %v2497_v48 = vcombine.low %v721_v36, %v731_v38  ;;  %v687_v50 = vrot.slane %v685_v35, 4  ;;  %v688_v51 = vshll.u32 %v3494_v15, 16  ;;  %v694_v54 = vshll.u32 %v3503_v26, 16  ;;  %v1412_v35 = vpop.permute.xlu1 %1411 }
  0x9e   : > { %v698_v55 = vshrl.u32 %v3503_v26, 16  ;;  %v704_v57 = vshll.u32 %v343_v21, 16  ;;  %v1148_v58 = vor.u32 %v1147_v24, %v1144_v20  ;;  %v1158_v59 = vor.u32 %v1157_v44, %v1153_v30  ;;  %v2464_v20 = vld [vmem:[%s3057_s7 + $0xbc] sm:$0x1] }
  0x9f   : > { %1323 = vrot.lane.b32.xlu1 %v2497_v48, %s2967_s12  ;;  %1509 = vrot.lane.b32.xlu0 %v2526_v41, %s2966_s9  ;;  %v690_v1 = vrot.slane %v688_v51, 5  ;;  %v696_v2 = vrot.slane %v694_v54, 5  ;;  %v1161_v13 = vshll.u32 %v2465_v45, 16  ;;  %v1118_v37 = vshrl.u32 %v3518_v40, 16  ;;  %v2871_v45 = vld [vmem:[%s3057_s7] sm:$0xf] }
  0xa0   : > { %v700_v4 = vrot.slane %v698_v55, 4  ;;  %v706_v6 = vrot.slane %v704_v57, 5  ;;  %v1149_v7 = vrot.slane %v1148_v58, 4  ;;  %v1159_v8 = vrot.slane %v1158_v59, 4  ;;  %v2872_v48 = vld [vmem:[%s3057_s7 + $0x4] sm:$0xf] }
  0xa1   : > { %v691_v42 = vor.u32 %v690_v1, %v687_v50  ;;  %v1163_v47 = vrot.slane %v1161_v13, 5  ;;  %v1120_v53 = vrot.slane %v1118_v37, 4  ;;  %v1121_v9 = vshll.u32 %v3518_v40, 16  ;;  %v2873_v57 = vld [vmem:[%s3057_s7 + $0xc] sm:$0xf] }
  0xa2   : > { %v701_v11 = vor.u32 %v700_v4, %v696_v2  ;;  %v1154_v14 = vsel %vm3104_vm2, %v1149_v7, %v1153_v30  ;;  %v1127_v17 = vshll.u32 %v2447_v3, 16  ;;  %v1131_v18 = vshrl.u32 %v2447_v3, 16  ;;  %v2874_v58 = vld [vmem:[%s3057_s7 + $0x10] sm:$0xf]  ;;  %v1488_v4 = vpop.permute.xlu1 %1487 }
  0xa3   : > { %1435 = vrot.lane.b32.xlu1 %v2513_v31, %s2965_s8  ;;  %v692_v22 = vrot.slane %v691_v42, 4  ;;  %v1164_v56 = vsel %vm3104_vm2, %v1159_v8, %v1163_v47  ;;  %v1123_v23 = vrot.slane %v1121_v9, 5  ;;  %v1137_v41 = vshll.u32 %v2464_v20, 16 }
  0xa4   : > { %v702_v24 = vrot.slane %v701_v11, 4  ;;  %v2529_v25 = vcombine.low %v1154_v14, %v1164_v56  ;;  %v1129_v52 = vrot.slane %v1127_v17, 5  ;;  %v1133_v21 = vrot.slane %v1131_v18, 4  ;;  %v1294_v30 = vpop.permute.xlu0 %1293  ;;  %v2876_v56 = vld [vmem:[%s3057_s7 + $0x1c] sm:$0xf] }
  0xa5   : > { %v697_v36 = vsel %vm3104_vm2, %v692_v22, %v696_v2  ;;  %v1124_v38 = vor.u32 %v1123_v23, %v1120_v53  ;;  %v2466_v50 = vcombine.low %v2871_v45, %v2872_v48  ;;  %v1139_v55 = vrot.slane %v1137_v41, 5  ;;  %v2875_v22 = vld [vmem:[%s3057_s7 + $0x18] sm:$0xf] }
  0xa6   : > { %v707_v31 = vsel %vm3104_vm2, %v702_v24, %v706_v6  ;;  %v1134_v44 = vor.u32 %v1133_v21, %v1129_v52  ;;  %v2467_v59 = vcombine.low %v2873_v57, %v2874_v58  ;;  %v2512_v2 = vcombine.low %v3518_v40, %v2447_v3  ;;  %v2877_v24 = vld [vmem:[%s3057_s7 + $0x24] sm:$0xf]  ;;  %v2881_v58 = vld [vmem:[%s3057_s7 + $0x30] sm:$0xf] }
  0xa7   : > { %v2496_v51 = vcombine.low %v697_v36, %v707_v31  ;;  %1515 = vrot.lane.b32.xlu1 %v2529_v25, %s2966_s9  ;;  %v1125_v54 = vrot.slane %v1124_v38, 4  ;;  %v1520_v7 = vsel %vm1517_vm3, %v2466_v50, %v1294_v30  ;;  %v2477_v47 = vcombine.low %v3332_v32, %v3337_v29 }
  0xa8   : > { %v1135_v1 = vrot.slane %v1134_v44, 4  ;;  %v2476_v40 = vcombine.low %v3362_v5, %v3367_v12  ;;  %v2479_v3 = vcombine.low %v3398_v62, %v3401_v63  ;;  %v2478_v53 = vcombine.low %v3432_v39, %v3435_v46 }
  0xa9   : > { %1321 = vrot.lane.b32.xlu0 %v2496_v51, %s2967_s12  ;;  %v1130_v13 = vsel %vm3104_vm2, %v1125_v54, %v1129_v52  ;;  %v2481_v9 = vcombine.low %v3462_v28, %v3467_v34  ;;  %v1568_v14 = vsel %vm1566_vm4, %v1520_v7, %v3496_v16  ;;  %v2480_v17 = vcombine.low %v3494_v15, %v3503_v26  ;;  %v2878_v16 = vld [vmem:[%s3057_s7 + $0x28] sm:$0xf]  ;;  %v2879_v51 = vld [vmem:[%s3057_s7 + $0x3c] sm:$0xf]  ;;  %v2880_v54 = vld [vmem:[%s3057_s7 + $0x40] sm:$0xf] }
  0xaa   : > { %v1140_v37 = vsel %vm3104_vm2, %v1135_v1, %v1139_v55  ;;  %v1296_v6 = vpop.permute.xlu0 %1295  ;;  %v2468_v23 = vcombine.low %v2875_v22, %v2876_v56  ;;  %v2469_v25 = vcombine.low %v2877_v24, %v2878_v16  ;;  %v2471_v55 = vcombine.low %v2879_v51, %v2880_v54  ;;  %v3671_v28 = vld [vmem:[%s3979_s2] ss:$0 sm:$0xff] }
  0xab   : > { %v1523_v8 = vsel %vm1517_vm3, %v2467_v59, %v1296_v6  ;;  %v2528_v42 = vcombine.low %v1130_v13, %v1140_v37 }
  0xac   : > { %v1570_v10 = vsel %vm1566_vm4, %v1523_v8, %v3523_v60 }
  0xad   : > { %1433 = vrot.lane.b32.xlu0 %v2512_v2, %s2965_s8  ;;  %v1603_v20 = vsel %vm1599_vm5, %v1570_v10, %v1488_v4  ;;  %s2414_s8 = sshll.u32 %s264_s29, 1 }
  0xae   : > { %v1486_v11 = vpop.permute.xlu0 %1485  ;;  %v1300_v18 = vpop.permute.xlu1 %1299  ;;  %s266_s10 = scalar_lea.vmem [#allocation2], %s2414_s8 }
  0xaf   : > { %v1601_v60 = vsel %vm1599_vm5, %v1568_v14, %v1486_v11  ;;  %v1529_v36 = vsel %vm1517_vm3, %v2469_v25, %v1300_v18  ;;  %v2883_v11 = vld [vmem:[%s3057_s7 + $0x54] sm:$0xf]  ;;  %v2884_v14 = vld [vmem:[%s3057_s7 + $0x58] sm:$0xf]  ;;  %s2255_s11 = sshll.u32 %s266_s10, 4  ;;  %s3931_s11 = int_to_ptr.vmem [resolvable:$true] %s2255_s11 }
  0xb0   : > { %2739 = vmatprep.mubr.msk.bf16.mxu0 %vm1663_vm6, %v1601_v60  ;;  %v1574_v31 = vsel %vm1566_vm4, %v1529_v36, %v1412_v35  ;;  %v2473_v60 = vcombine.low %v2883_v11, %v2884_v14  ;;  %s2885_s22 = scalar_lea.vmem %s3931_s11, 32 }
  0xb1   : > { %1513 = vrot.lane.b32.xlu0 %v2528_v42, %s2966_s9  ;;  %2740 = vmatmul.mubr.msk.bf16.vlgmr.msra.gmra.mrb[0].mxu0 %vm1663_vm6, %v1603_v20  ;;  %v2472_v20 = vcombine.low %v3232_v19, %v3237_v27  ;;  %v2475_v19 = vcombine.low %v3268_v33, %v3271_v61  ;;  %s2583_s9 = sshll.u32 %s2955_s18, 5  ;;  %p2886_p12 = scmp.ne.s32.totalorder %s3931_s11, %s2885_s22 }
  0xb2   : > { %v1492_v52 = vpop.permute.xlu1 %1491  ;;  %s3929_s14 = scalar_lea.hbm %s3981_s4, %s2583_s9  ;;  %s2968_s18 = smov [#allocation2]  }
  0xb3   : > { %v1607_v48 = vsel %vm1599_vm5, %v1574_v31, %v1492_v52  ;;  %p2887_p13 = pnand %p2886_p12, %p3034_p4  ;;  %s2889_s24 = sshll.u32 %s2968_s18, 4  ;;  %s2890_s24 = int_to_ptr.vmem [resolvable:$false] %s2889_s24 }
  0xb4   : > { %s2891_s26 = scalar_lea.vmem %s2890_s24, 64  ;;  %p2892_p1 = scmp.lt.s32.totalorder %s3931_s11, %s2890_s24 }
  0xb5   : > { %p2888_p0 = pneg %p2887_p13  ;;  %p2893_p2 = scmp.lt.s32.totalorder %s2891_s26, %s2885_s22 }
  0xb7   : > { %v1298_v21 = vpop.permute.xlu0 %1297  ;;  %p2894_p3 = por %p2893_p2, %p2892_p1 }
  0xb8   : > { %v1526_v30 = vsel %vm1517_vm3, %v2468_v23, %v1298_v21 }
  0xb9   : > { %v1572_v38 = vsel %vm1566_vm4, %v1526_v30, %v3525_v0  ;;  %v1304_v44 = vpop.permute.xlu1 %1303  ;;  %v2882_v0 = vld [vmem:[%s3057_s7 + $0x34] sm:$0xf]  ;;  %s3687_s7 = scalar_lea.vmem %s3980_s3, %s2586_s30  ;;  %p2895_p5 = pnand %p2894_p3, %p2888_p0 }
  0xba   : > { %v2470_v59 = vcombine.low %v2881_v58, %v2882_v0  ;;  %v1535_v35 = vsel %vm1517_vm3, %v2471_v55, %v1304_v44 }
  0xbb   : > { %v1490_v41 = vpop.permute.xlu0 %1489 }
  0xbc   : > { %v1605_v45 = vsel %vm1599_vm5, %v1572_v38, %v1490_v41  ;;  %v2474_v41 = vcombine.low %v3302_v43, %v3305_v49 }
  0xbd   : > { %2743 = vmatprep.mubr.msk.bf16.mxu0 %vm1663_vm6, %v1605_v45  ;;  %v1416_v50 = vpop.permute.xlu1 %1415 }
  0xbe   : > { %2744 = vmatmul.mubr.msk.bf16.gmra.mrb[4].mxu0 %vm1663_vm6, %v1607_v48  ;;  %v1578_v13 = vsel %vm1566_vm4, %v1535_v35, %v1416_v50 }
  0xc1   : > { %v1496_v2 = vpop.permute.xlu1 %1495 }
  0xc2   : > { %v1611_v8 = vsel %vm1599_vm5, %v1578_v13, %v1496_v2 }
  0xc3   : > { %v1302_v57 = vpop.permute.xlu0 %1301 }
  0xc4   : > { %v1532_v37 = vsel %vm1517_vm3, %v2470_v59, %v1302_v57 }
  0xc7   : > { %v1414_v1 = vpop.permute.xlu0 %1413 }
  0xc8   : > { %v1576_v4 = vsel %vm1566_vm4, %v1532_v37, %v1414_v1 }
  0xcb   : > { %v1494_v6 = vpop.permute.xlu0 %1493  ;;  %v1308_v42 = vpop.permute.xlu1 %1307 }
  0xcc   : > { %v1609_v7 = vsel %vm1599_vm5, %v1576_v4, %v1494_v6  ;;  %v1541_v22 = vsel %vm1517_vm3, %v2473_v60, %v1308_v42 }
  0xcd   : > { %2747 = vmatprep.mubr.msk.bf16.mxu0 %vm1663_vm6, %v1609_v7 }
  0xce   : > { %2748 = vmatmul.mubr.msk.bf16.gmra.mrb[8].mxu0 %vm1663_vm6, %v1611_v8 }
  0xcf   : > { %v1420_v10 = vpop.permute.xlu1 %1419 }
  0xd0   : > { %v1582_v24 = vsel %vm1566_vm4, %v1541_v22, %v1420_v10 }
  0xd3   : > { %v1500_v23 = vpop.permute.xlu1 %1499 }
  0xd4   : > { %v1615_v30 = vsel %vm1599_vm5, %v1582_v24, %v1500_v23 }
  0xd5   : > { %v1306_v18 = vpop.permute.xlu0 %1305 }
  0xd6   : > { %v1538_v16 = vsel %vm1517_vm3, %v2472_v20, %v1306_v18 }
  0xd9   : > { %v1418_v56 = vpop.permute.xlu0 %1417 }
  0xda   : > { %v1580_v25 = vsel %vm1566_vm4, %v1538_v16, %v1418_v56 }
  0xdd   : > { %v1498_v52 = vpop.permute.xlu0 %1497  ;;  %v1312_v36 = vpop.permute.xlu1 %1311 }
  0xde   : > { %v1613_v21 = vsel %vm1599_vm5, %v1580_v25, %v1498_v52  ;;  %v1547_v31 = vsel %vm1517_vm3, %v2475_v19, %v1312_v36 }
  0xdf   : > { %2751 = vmatprep.mubr.msk.bf16.mxu0 %vm1663_vm6, %v1613_v21 }
  0xe0   : > { %2752 = vmatmul.mubr.msk.bf16.gmra.mrb[12].mxu0 %vm1663_vm6, %v1615_v30 }
  0xe1   : > { %v1424_v27 = vpop.permute.xlu1 %1423 }
  0xe2   : > { %v1586_v48 = vsel %vm1566_vm4, %v1547_v31, %v1424_v27 }
  0xe5   : > { %v1504_v45 = vpop.permute.xlu1 %1503 }
  0xe6   : > { %v1310_v38 = vpop.permute.xlu0 %1309  ;;  %v1619_v33 = vsel %vm1599_vm5, %v1586_v48, %v1504_v45 }
  0xe7   : > { %v1544_v50 = vsel %vm1517_vm3, %v2474_v41, %v1310_v38 }
  0xea   : > { %v1422_v44 = vpop.permute.xlu0 %1421 }
  0xeb   : > { %v1584_v51 = vsel %vm1566_vm4, %v1544_v50, %v1422_v44 }
  0xee   : > { %v1502_v54 = vpop.permute.xlu0 %1501  ;;  %v1316_v61 = vpop.permute.xlu1 %1315 }
  0xef   : > { %v1617_v55 = vsel %vm1599_vm5, %v1584_v51, %v1502_v54  ;;  %v1553_v57 = vsel %vm1517_vm3, %v2477_v47, %v1316_v61 }
  0xf0   : > { %2755 = vmatprep.mubr.msk.bf16.mxu1 %vm1663_vm6, %v1617_v55 }
  0xf1   : > { %2756 = vmatmul.mubr.msk.bf16.vlgmr.msra.gmra.mrb[0].mxu1 %vm1663_vm6, %v1619_v33 }
  0xf2   : > { %v1428_v43 = vpop.permute.xlu1 %1427 }
  0xf3   : > { %v1590_v59 = vsel %vm1566_vm4, %v1553_v57, %v1428_v43 }
  0xf6   : > { %v1508_v0 = vpop.permute.xlu1 %1507 }
  0xf7   : > { %v1623_v37 = vsel %vm1599_vm5, %v1590_v59, %v1508_v0 }
  0xf8   : > { %v1314_v49 = vpop.permute.xlu0 %1313 }
  0xf9   : > { %v1550_v35 = vsel %vm1517_vm3, %v2476_v40, %v1314_v49 }
  0xfc   : > { %v1426_v58 = vpop.permute.xlu0 %1425 }
  0xfd   : > { %v1588_v1 = vsel %vm1566_vm4, %v1550_v35, %v1426_v58 }
 0x100   : > { %v1506_v2 = vpop.permute.xlu0 %1505  ;;  %v1320_v32 = vpop.permute.xlu1 %1319 }
 0x101   : > { %v1621_v13 = vsel %vm1599_vm5, %v1588_v1, %v1506_v2  ;;  %v1559_v5 = vsel %vm1517_vm3, %v2479_v3, %v1320_v32 }
 0x102   : > { %2759 = vmatprep.mubr.msk.bf16.mxu1 %vm1663_vm6, %v1621_v13 }
 0x103   : > { %2760 = vmatmul.mubr.msk.bf16.gmra.mrb[4].mxu1 %vm1663_vm6, %v1623_v37 }
 0x104   : > { %v1432_v47 = vpop.permute.xlu1 %1431 }
 0x105   : > { %v1594_v40 = vsel %vm1566_vm4, %v1559_v5, %v1432_v47 }
 0x108   : > { %v1512_v6 = vpop.permute.xlu1 %1511 }
 0x109   : > { %v1318_v29 = vpop.permute.xlu0 %1317  ;;  %v1627_v10 = vsel %vm1599_vm5, %v1594_v40, %v1512_v6 }
 0x10a   : > { %v1556_v4 = vsel %vm1517_vm3, %v2478_v53, %v1318_v29 }
 0x10d   : > { %v1430_v12 = vpop.permute.xlu0 %1429 }
 0x10e   : > { %v1592_v7 = vsel %vm1566_vm4, %v1556_v4, %v1430_v12 }
 0x111   : > { %v1510_v8 = vpop.permute.xlu0 %1509  ;;  %v1324_v62 = vpop.permute.xlu1 %1323 }
 0x112   : > { %v1625_v42 = vsel %vm1599_vm5, %v1592_v7, %v1510_v8  ;;  %v1565_v39 = vsel %vm1517_vm3, %v2481_v9, %v1324_v62 }
 0x113   : > { %2763 = vmatprep.mubr.msk.bf16.mxu1 %vm1663_vm6, %v1625_v42 }
 0x114   : > { %2764 = vmatmul.mubr.msk.bf16.gmra.mrb[8].mxu1 %vm1663_vm6, %v1627_v10 }
 0x115   : > { %v1436_v3 = vpop.permute.xlu1 %1435 }
 0x116   : > { %v1598_v53 = vsel %vm1566_vm4, %v1565_v39, %v1436_v3 }
 0x119   : > { %v1516_v14 = vpop.permute.xlu1 %1515 }
 0x11a   : > { %v1631_v22 = vsel %vm1599_vm5, %v1598_v53, %v1516_v14 }
 0x11b   : > { %v1322_v63 = vpop.permute.xlu0 %1321 }
 0x11c   : > { %v1562_v11 = vsel %vm1517_vm3, %v2480_v17, %v1322_v63 }
 0x11f   : > { %v1434_v46 = vpop.permute.xlu0 %1433 }
 0x120   : > { %v1596_v60 = vsel %vm1566_vm4, %v1562_v11, %v1434_v46 }
 0x123   : > { %v1514_v18 = vpop.permute.xlu0 %1513 }
 0x124   : > { %v1629_v20 = vsel %vm1599_vm5, %v1596_v60, %v1514_v18 }
 0x125   : > { %2767 = vmatprep.mubr.msk.bf16.mxu1 %vm1663_vm6, %v1629_v20 }
 0x126   : > { %2768 = vmatmul.mubr.msk.bf16.gmra.mrb[12].mxu1 %vm1663_vm6, %v1631_v22 }
 0x184   : > { %v2741_v34 = vpop.f32.mrb[0].mxu0 }
 0x185   : > { %v1739_v15 = vadd.f32 %v2741_v34, %v3671_v28  ;;  %v1730_v26 = vpop.f32.mrb[1].mxu0 }
 0x186   : > { %v1731_v9 = vadd.f32 %v3671_v28, %v1730_v26  ;;  %v2742_v17 = vpop.f32.mrb[2].mxu0 }
 0x187   : > { %v1859_v56 = vmul.f32 0.2, %v1739_v15  ;;  %v1742_v23 = vadd.f32 %v2742_v17, %v3671_v28  ;;  %v1733_v24 = vpop.f32.mrb[3].mxu0 }
 0x188   : > { %v1857_v16 = vmul.f32 0.2, %v1731_v9  ;;  %v1734_v25 = vadd.f32 %v3671_v28, %v1733_v24 }
 0x189   : > { %v1860_v52 = vmul.f32 0.2, %v1742_v23  ;;  %v3678_v30 = vmax.f32 %v1739_v15, %v1859_v56 }
 0x18a   : > { %v1858_v21 = vmul.f32 0.2, %v1734_v25  ;;  %v3682_v19 = vmax.f32 %v1731_v9, %v1857_v16 }
 0x18b   : > { %v3680_v36 = vmax.f32 %v1742_v23, %v1860_v52 }
 0x18c   : > { %v3689_v27 = vmax.f32 %v1734_v25, %v1858_v21 }
 0x18d   : > { %v2627_v38 = vpack.c.bf16 %v3680_v36, %v3678_v30 }
 0x18e   : > { %v2622_v41 = vpack.c.bf16 %v3689_v27, %v3682_v19  ;;  %v2081_v35 = vadd.f32 %v3689_v27, %v3682_v19 }
 0x18f   : > { %2699 = vst [vmem:[%s3687_s7 + $0x8] sm:$0xff] %v2627_v38  }
 0x190   : > { %2623 = vst [vmem:[%s3687_s7] sm:$0xff] %v2622_v41   ;;  %v2082_v13 = vadd.f32 %v2081_v35, %v3678_v30 }
 0x191   : > { %v2745_v31 = vpop.f32.mrb[4].mxu0 }
 0x192   : > { %v1755_v44 = vadd.f32 %v2745_v31, %v3671_v28  ;;  %v1746_v45 = vpop.f32.mrb[5].mxu0  ;;  %v2083_v32 = vadd.f32 %v2082_v13, %v3680_v36 }
 0x193   : > { %v1747_v48 = vadd.f32 %v3671_v28, %v1746_v45  ;;  %v2746_v50 = vpop.f32.mrb[6].mxu0 }
 0x194   : > { %v1863_v51 = vmul.f32 0.2, %v1755_v44  ;;  %v1758_v54 = vadd.f32 %v2746_v50, %v3671_v28  ;;  %v1749_v55 = vpop.f32.mrb[7].mxu0 }
 0x195   : > { %v1861_v33 = vmul.f32 0.2, %v1747_v48  ;;  %v1750_v61 = vadd.f32 %v3671_v28, %v1749_v55 }
 0x196   : > { %v1864_v43 = vmul.f32 0.2, %v1758_v54  ;;  %v3701_v57 = vmax.f32 %v1755_v44, %v1863_v51 }
 0x197   : > { %v1862_v49 = vmul.f32 0.2, %v1750_v61  ;;  %v3705_v0 = vmax.f32 %v1747_v48, %v1861_v33 }
 0x198   : > { %v3703_v58 = vmax.f32 %v1758_v54, %v1864_v43 }
 0x199   : > { %v3707_v59 = vmax.f32 %v1750_v61, %v1862_v49  ;;  %v2084_v42 = vadd.f32 %v2083_v32, %v3705_v0 }
 0x19a   : > { %v2637_v1 = vpack.c.bf16 %v3703_v58, %v3701_v57 }
 0x19b   : > { %v2632_v2 = vpack.c.bf16 %v3707_v59, %v3705_v0  ;;  %v2085_v53 = vadd.f32 %v2084_v42, %v3707_v59 }
 0x19c   : > { %2701 = vst [vmem:[%s3687_s7 + $0x18] sm:$0xff] %v2637_v1  }
 0x19d   : > { %2700 = vst [vmem:[%s3687_s7 + $0x10] sm:$0xff] %v2632_v2   ;;  %v2086_v60 = vadd.f32 %v2085_v53, %v3701_v57 }
 0x19f   : > { %v2087_v18 = vadd.f32 %v2086_v60, %v3703_v58 }
 0x1a1   : > { %v2749_v37 = vpop.f32.mrb[8].mxu0 }
 0x1a2   : > { %v1771_v29 = vadd.f32 %v2749_v37, %v3671_v28  ;;  %v1762_v47 = vpop.f32.mrb[9].mxu0 }
 0x1a3   : > { %v1763_v5 = vadd.f32 %v3671_v28, %v1762_v47  ;;  %v2750_v12 = vpop.f32.mrb[10].mxu0 }
 0x1a4   : > { %v1867_v40 = vmul.f32 0.2, %v1771_v29  ;;  %v1774_v4 = vadd.f32 %v2750_v12, %v3671_v28  ;;  %v1765_v6 = vpop.f32.mrb[11].mxu0 }
 0x1a5   : > { %v1865_v7 = vmul.f32 0.2, %v1763_v5  ;;  %v1766_v8 = vadd.f32 %v3671_v28, %v1765_v6 }
 0x1a6   : > { %v1868_v10 = vmul.f32 0.2, %v1774_v4  ;;  %v3724_v63 = vmax.f32 %v1771_v29, %v1867_v40 }
 0x1a7   : > { %v1866_v62 = vmul.f32 0.2, %v1766_v8  ;;  %v3728_v39 = vmax.f32 %v1763_v5, %v1865_v7 }
 0x1a8   : > { %v3726_v3 = vmax.f32 %v1774_v4, %v1868_v10 }
 0x1a9   : > { %v3730_v46 = vmax.f32 %v1766_v8, %v1866_v62  ;;  %v2088_v22 = vadd.f32 %v2087_v18, %v3728_v39 }
 0x1aa   : > { %v2647_v11 = vpack.c.bf16 %v3726_v3, %v3724_v63 }
 0x1ab   : > { %v2642_v14 = vpack.c.bf16 %v3730_v46, %v3728_v39  ;;  %v2089_v25 = vadd.f32 %v2088_v22, %v3730_v46 }
 0x1ac   : > { %2703 = vst [vmem:[%s3687_s7 + $0x28] sm:$0xff] %v2647_v11  }
 0x1ad   : > { %2702 = vst [vmem:[%s3687_s7 + $0x20] sm:$0xff] %v2642_v14   ;;  %v2090_v45 = vadd.f32 %v2089_v25, %v3724_v63 }
 0x1af   : > { %v2091_v51 = vadd.f32 %v2090_v45, %v3726_v3 }
 0x1b3   : > { %v2753_v20 = vpop.f32.mrb[12].mxu0 }
 0x1b4   : > { %v1787_v34 = vadd.f32 %v2753_v20, %v3671_v28  ;;  %v1778_v15 = vpop.f32.mrb[13].mxu0 }
 0x1b5   : > { %v1779_v26 = vadd.f32 %v3671_v28, %v1778_v15  ;;  %v2754_v9 = vpop.f32.mrb[14].mxu0 }
 0x1b6   : > { %v1871_v17 = vmul.f32 0.2, %v1787_v34  ;;  %v1790_v56 = vadd.f32 %v2754_v9, %v3671_v28  ;;  %v1781_v23 = vpop.f32.mrb[15].mxu0 }
 0x1b7   : > { %v1869_v24 = vmul.f32 0.2, %v1779_v26  ;;  %v1782_v16 = vadd.f32 %v3671_v28, %v1781_v23 }
 0x1b8   : > { %v1872_v52 = vmul.f32 0.2, %v1790_v56  ;;  %v3747_v38 = vmax.f32 %v1787_v34, %v1871_v17 }
 0x1b9   : > { %v1870_v21 = vmul.f32 0.2, %v1782_v16  ;;  %v3751_v31 = vmax.f32 %v1779_v26, %v1869_v24 }
 0x1ba   : > { %v3749_v41 = vmax.f32 %v1790_v56, %v1872_v52 }
 0x1bb   : > { %v3753_v44 = vmax.f32 %v1782_v16, %v1870_v21  ;;  %v2092_v54 = vadd.f32 %v2091_v51, %v3751_v31 }
 0x1bc   : > { %v2657_v48 = vpack.c.bf16 %v3749_v41, %v3747_v38 }
 0x1bd   : > { %v2652_v50 = vpack.c.bf16 %v3753_v44, %v3751_v31  ;;  %v2093_v43 = vadd.f32 %v2092_v54, %v3753_v44 }
 0x1be   : > { %2705 = vst [vmem:[%s3687_s7 + $0x38] sm:$0xff] %v2657_v48  }
 0x1bf   : > { %2704 = vst [vmem:[%s3687_s7 + $0x30] sm:$0xff] %v2652_v50   ;;  %v2094_v47 = vadd.f32 %v2093_v43, %v3747_v38 }
 0x1c1   : > { %v2095_v8 = vadd.f32 %v2094_v47, %v3749_v41 }
 0x1c4   : > { %v2757_v55 = vpop.f32.mrb[0].mxu1 }
 0x1c5   : > { %v1803_v33 = vadd.f32 %v2757_v55, %v3671_v28  ;;  %v1794_v61 = vpop.f32.mrb[1].mxu1 }
 0x1c6   : > { %v1795_v49 = vadd.f32 %v3671_v28, %v1794_v61  ;;  %v2758_v35 = vpop.f32.mrb[2].mxu1 }
 0x1c7   : > { %v1875_v1 = vmul.f32 0.2, %v1803_v33  ;;  %v1806_v2 = vadd.f32 %v2758_v35, %v3671_v28  ;;  %v1797_v13 = vpop.f32.mrb[3].mxu1 }
 0x1c8   : > { %v1873_v37 = vmul.f32 0.2, %v1795_v49  ;;  %v1798_v32 = vadd.f32 %v3671_v28, %v1797_v13 }
 0x1c9   : > { %v1876_v29 = vmul.f32 0.2, %v1806_v2  ;;  %v3770_v12 = vmax.f32 %v1803_v33, %v1875_v1 }
 0x1ca   : > { %v1874_v5 = vmul.f32 0.2, %v1798_v32  ;;  %v3774_v4 = vmax.f32 %v1795_v49, %v1873_v37 }
 0x1cb   : > { %v3772_v40 = vmax.f32 %v1806_v2, %v1876_v29 }
 0x1cc   : > { %v3776_v6 = vmax.f32 %v1798_v32, %v1874_v5  ;;  %v2096_v10 = vadd.f32 %v2095_v8, %v3774_v4 }
 0x1cd   : > { %v2667_v7 = vpack.c.bf16 %v3772_v40, %v3770_v12 }
 0x1ce   : > { %v2662_v42 = vpack.c.bf16 %v3776_v6, %v3774_v4  ;;  %v2097_v62 = vadd.f32 %v2096_v10, %v3776_v6 }
 0x1cf   : > { %2707 = vst [vmem:[%s3687_s7 + $0x48] sm:$0xff] %v2667_v7  }
 0x1d0   : > { %2706 = vst [vmem:[%s3687_s7 + $0x40] sm:$0xff] %v2662_v42   ;;  %v2098_v60 = vadd.f32 %v2097_v62, %v3770_v12 }
 0x1d2   : > { %v2099_v23 = vadd.f32 %v2098_v60, %v3772_v40 }
 0x1d6   : > { %v2761_v53 = vpop.f32.mrb[4].mxu1 }
 0x1d7   : > { %v1819_v11 = vadd.f32 %v2761_v53, %v3671_v28  ;;  %v1810_v14 = vpop.f32.mrb[5].mxu1 }
 0x1d8   : > { %v1811_v18 = vadd.f32 %v3671_v28, %v1810_v14  ;;  %v2762_v20 = vpop.f32.mrb[6].mxu1 }
 0x1d9   : > { %v1879_v22 = vmul.f32 0.2, %v1819_v11  ;;  %v1822_v34 = vadd.f32 %v2762_v20, %v3671_v28  ;;  %v1813_v15 = vpop.f32.mrb[7].mxu1 }
 0x1da   : > { %v1877_v26 = vmul.f32 0.2, %v1811_v18  ;;  %v1814_v9 = vadd.f32 %v3671_v28, %v1813_v15 }
 0x1db   : > { %v1880_v17 = vmul.f32 0.2, %v1822_v34  ;;  %v3795_v16 = vmax.f32 %v1819_v11, %v1879_v22 }
 0x1dc   : > { %v3792_v56 = vmax.f32 %v1811_v18, %v1877_v26  ;;  %v1878_v24 = vmul.f32 0.2, %v1814_v9 }
 0x1dd   : > { %v3797_v25 = vmax.f32 %v1822_v34, %v1880_v17 }
 0x1de   : > { %v2100_v52 = vadd.f32 %v2099_v23, %v3792_v56  ;;  %v3800_v21 = vmax.f32 %v1814_v9, %v1878_v24 }
 0x1df   : > { %v2677_v45 = vpack.c.bf16 %v3797_v25, %v3795_v16 }
 0x1e0   : > { %v2672_v48 = vpack.c.bf16 %v3800_v21, %v3792_v56  ;;  %v2101_v50 = vadd.f32 %v2100_v52, %v3800_v21 }
 0x1e1   : > { %2709 = vst [vmem:[%s3687_s7 + $0x58] sm:$0xff] %v2677_v45  }
 0x1e2   : > { %2708 = vst [vmem:[%s3687_s7 + $0x50] sm:$0xff] %v2672_v48   ;;  %v2102_v51 = vadd.f32 %v2101_v50, %v3795_v16 }
 0x1e4   : > { %v2103_v54 = vadd.f32 %v2102_v51, %v3797_v25 }
 0x1e7   : > { %v2765_v55 = vpop.f32.mrb[8].mxu1 }
 0x1e8   : > { %v1835_v33 = vadd.f32 %v2765_v55, %v3671_v28  ;;  %v1826_v61 = vpop.f32.mrb[9].mxu1 }
 0x1e9   : > { %v1827_v43 = vadd.f32 %v3671_v28, %v1826_v61  ;;  %v2766_v49 = vpop.f32.mrb[10].mxu1 }
 0x1ea   : > { %v1883_v35 = vmul.f32 0.2, %v1835_v33  ;;  %v1838_v1 = vadd.f32 %v2766_v49, %v3671_v28  ;;  %v1829_v2 = vpop.f32.mrb[11].mxu1 }
 0x1eb   : > { %v1881_v13 = vmul.f32 0.2, %v1827_v43  ;;  %v1830_v37 = vadd.f32 %v3671_v28, %v1829_v2 }
 0x1ec   : > { %v1884_v32 = vmul.f32 0.2, %v1838_v1  ;;  %v3817_v5 = vmax.f32 %v1835_v33, %v1883_v35 }
 0x1ed   : > { %v3815_v29 = vmax.f32 %v1827_v43, %v1881_v13  ;;  %v1882_v47 = vmul.f32 0.2, %v1830_v37 }
 0x1ee   : > { %v3819_v7 = vmax.f32 %v1838_v1, %v1884_v32 }
 0x1ef   : > { %v2104_v8 = vadd.f32 %v2103_v54, %v3815_v29  ;;  %v3822_v42 = vmax.f32 %v1830_v37, %v1882_v47 }
 0x1f0   : > { %v2687_v10 = vpack.c.bf16 %v3819_v7, %v3817_v5 }
 0x1f1   : > { %v2682_v62 = vpack.c.bf16 %v3822_v42, %v3815_v29  ;;  %v2105_v53 = vadd.f32 %v2104_v8, %v3822_v42 }
 0x1f2   : > { %2711 = vst [vmem:[%s3687_s7 + $0x68] sm:$0xff] %v2687_v10  }
 0x1f3   : > { %2710 = vst [vmem:[%s3687_s7 + $0x60] sm:$0xff] %v2682_v62   ;;  %v2106_v11 = vadd.f32 %v2105_v53, %v3817_v5 }
 0x1f5   : > { %v2107_v14 = vadd.f32 %v2106_v11, %v3819_v7 }
 0x1f9   : > { %v2769_v60 = vpop.f32.mrb[12].mxu1 }
 0x1fa   : > { %v1851_v18 = vadd.f32 %v2769_v60, %v3671_v28  ;;  %v1842_v20 = vpop.f32.mrb[13].mxu1 }
 0x1fb   : > { %v1843_v22 = vadd.f32 %v3671_v28, %v1842_v20  ;;  %v2770_v34 = vpop.f32.mrb[14].mxu1 }
 0x1fc   : > { %v1887_v15 = vmul.f32 0.2, %v1851_v18  ;;  %v1854_v26 = vadd.f32 %v2770_v34, %v3671_v28  ;;  %v1845_v9 = vpop.f32.mrb[15].mxu1 }
 0x1fd   : > { %v1885_v17 = vmul.f32 0.2, %v1843_v22  ;;  %v1846_v23 = vadd.f32 %v3671_v28, %v1845_v9 }
 0x1fe   : > { %v1888_v24 = vmul.f32 0.2, %v1854_v26  ;;  %v3839_v48 = vmax.f32 %v1851_v18, %v1887_v15 }
 0x1ff   : > { %v3837_v52 = vmax.f32 %v1843_v22, %v1885_v17  ;;  %v1886_v45 = vmul.f32 0.2, %v1846_v23 }
 0x200   : > { %v3841_v50 = vmax.f32 %v1854_v26, %v1888_v24 }
 0x201   : > { %v2108_v51 = vadd.f32 %v2107_v14, %v3837_v52  ;;  %v3844_v54 = vmax.f32 %v1846_v23, %v1886_v45 }
 0x202   : > { %v2697_v55 = vpack.c.bf16 %v3841_v50, %v3839_v48 }
 0x203   : > { %v2692_v33 = vpack.c.bf16 %v3844_v54, %v3837_v52  ;;  %v2109_v28 = vadd.f32 %v2108_v51, %v3844_v54 }
 0x204   : > { %2713 = vst [vmem:[%s3687_s7 + $0x78] sm:$0xff] %v2697_v55  }
 0x205   : > { %2712 = vst [vmem:[%s3687_s7 + $0x70] sm:$0xff] %v2692_v33   ;;  %v2110_v61 = vadd.f32 %v2109_v28, %v3839_v48 }
 0x207   : > { %v2111_v43 = vadd.f32 %v2110_v61, %v3841_v50 }
 0x209   : > { %v2112_v49 = vrot.slane %v2111_v43, 4 }
 0x20b   : > { %v2113_v35 = vadd.f32 %v2112_v49, %v2111_v43 }
 0x20d   : > { %v2114_v1 = vrot.slane %v2113_v35, 2 }
 0x20f   : > { %v2115_v2 = vadd.f32 %v2114_v1, %v2113_v35 }
 0x211   : > { %v2116_v13 = vrot.slane %v2115_v2, 1 }
 0x213   : > { %v3855_v37 = vadd.f32 %v2116_v13, %v2115_v2 }
 0x215   : > { %v3858_v32 = vmul.f32 0.00390625, %v3855_v37 }
 0x217   : > { %v2119_v47 = vsub.f32 %v3682_v19, %v3858_v32  ;;  %v2120_v8 = vsub.f32 %v3689_v27, %v3858_v32  ;;  %v2121_v10 = vsub.f32 %v3678_v30, %v3858_v32  ;;  %v2122_v11 = vsub.f32 %v3680_v36, %v3858_v32 }
 0x218   : > { %v2123_v14 = vsub.f32 %v3705_v0, %v3858_v32  ;;  %v2124_v20 = vsub.f32 %v3707_v59, %v3858_v32  ;;  %v2125_v27 = vsub.f32 %v3701_v57, %v3858_v32  ;;  %v2126_v15 = vsub.f32 %v3703_v58, %v3858_v32 }
 0x219   : > { %v2151_v62 = vmul.f32 %v2119_v47, %v2119_v47  ;;  %v2152_v53 = vmul.f32 %v2120_v8, %v2120_v8  ;;  %v2153_v60 = vmul.f32 %v2121_v10, %v2121_v10  ;;  %v2154_v19 = vmul.f32 %v2122_v11, %v2122_v11 }
 0x21a   : > { %v2155_v34 = vmul.f32 %v2123_v14, %v2123_v14  ;;  %v2156_v26 = vmul.f32 %v2124_v20, %v2124_v20  ;;  %v2127_v0 = vsub.f32 %v3728_v39, %v3858_v32  ;;  %v2157_v9 = vmul.f32 %v2125_v27, %v2125_v27 }
 0x21b   : > { %v2183_v18 = vadd.f32 %v2152_v53, %v2151_v62  ;;  %v2128_v59 = vsub.f32 %v3730_v46, %v3858_v32  ;;  %v2158_v23 = vmul.f32 %v2126_v15, %v2126_v15  ;;  %v2129_v57 = vsub.f32 %v3724_v63, %v3858_v32 }
 0x21c   : > { %v2159_v45 = vmul.f32 %v2127_v0, %v2127_v0  ;;  %v2130_v58 = vsub.f32 %v3726_v3, %v3858_v32  ;;  %v2131_v39 = vsub.f32 %v3751_v31, %v3858_v32  ;;  %v2132_v46 = vsub.f32 %v3753_v44, %v3858_v32 }
 0x21d   : > { %v2184_v22 = vadd.f32 %v2183_v18, %v2153_v60  ;;  %v2160_v55 = vmul.f32 %v2128_v59, %v2128_v59  ;;  %v2161_v28 = vmul.f32 %v2129_v57, %v2129_v57  ;;  %v2133_v63 = vsub.f32 %v3747_v38, %v3858_v32 }
 0x21e   : > { %v2162_v43 = vmul.f32 %v2130_v58, %v2130_v58  ;;  %v2163_v35 = vmul.f32 %v2131_v39, %v2131_v39  ;;  %v2134_v3 = vsub.f32 %v3749_v41, %v3858_v32  ;;  %v2164_v2 = vmul.f32 %v2132_v46, %v2132_v46 }
 0x21f   : > { %v2185_v30 = vadd.f32 %v2184_v22, %v2154_v19  ;;  %v2135_v31 = vsub.f32 %v3774_v4, %v3858_v32  ;;  %v2165_v47 = vmul.f32 %v2133_v63, %v2133_v63  ;;  %v2136_v44 = vsub.f32 %v3776_v6, %v3858_v32 }
 0x220   : > { %v2166_v10 = vmul.f32 %v2134_v3, %v2134_v3  ;;  %v2137_v38 = vsub.f32 %v3770_v12, %v3858_v32  ;;  %v2138_v41 = vsub.f32 %v3772_v40, %v3858_v32  ;;  %v2139_v4 = vsub.f32 %v3792_v56, %v3858_v32 }
 0x221   : > { %v2186_v36 = vadd.f32 %v2185_v30, %v2155_v34  ;;  %v2167_v53 = vmul.f32 %v2135_v31, %v2135_v31  ;;  %v2168_v14 = vmul.f32 %v2136_v44, %v2136_v44  ;;  %v2140_v6 = vsub.f32 %v3800_v21, %v3858_v32 }
 0x222   : > { %v2169_v18 = vmul.f32 %v2137_v38, %v2137_v38  ;;  %v2170_v19 = vmul.f32 %v2138_v41, %v2138_v41  ;;  %v2141_v12 = vsub.f32 %v3795_v16, %v3858_v32  ;;  %v2171_v27 = vmul.f32 %v2139_v4, %v2139_v4 }
 0x223   : > { %v2187_v17 = vadd.f32 %v2186_v36, %v2156_v26  ;;  %v2142_v40 = vsub.f32 %v3797_v25, %v3858_v32  ;;  %v2172_v30 = vmul.f32 %v2140_v6, %v2140_v6  ;;  %v2143_v56 = vsub.f32 %v3815_v29, %v3858_v32 }
 0x224   : > { %v2173_v26 = vmul.f32 %v2141_v12, %v2141_v12  ;;  %v2144_v21 = vsub.f32 %v3822_v42, %v3858_v32  ;;  %v2145_v16 = vsub.f32 %v3817_v5, %v3858_v32  ;;  %v2146_v25 = vsub.f32 %v3819_v7, %v3858_v32 }
 0x225   : > { %v2188_v24 = vadd.f32 %v2187_v17, %v2157_v9  ;;  %v2174_v0 = vmul.f32 %v2142_v40, %v2142_v40  ;;  %v2175_v17 = vmul.f32 %v2143_v56, %v2143_v56  ;;  %v2147_v29 = vsub.f32 %v3837_v52, %v3858_v32 }
 0x226   : > { %v2177_v57 = vmul.f32 %v2145_v16, %v2145_v16  ;;  %v2148_v42 = vsub.f32 %v3844_v54, %v3858_v32  ;;  %v2149_v5 = vsub.f32 %v3839_v48, %v3858_v32  ;;  %v2150_v7 = vsub.f32 %v3841_v50, %v3858_v32 }
 0x227   : > { %v2189_v51 = vadd.f32 %v2188_v24, %v2158_v23  ;;  %v2176_v23 = vmul.f32 %v2144_v21, %v2144_v21 }
 0x228   : > { %v2180_v39 = vmul.f32 %v2148_v42, %v2148_v42  ;;  %v2181_v52 = vmul.f32 %v2149_v5, %v2149_v5  ;;  %v2182_v46 = vmul.f32 %v2150_v7, %v2150_v7 }
 0x229   : > { %v2190_v33 = vadd.f32 %v2189_v51, %v2159_v45  ;;  %v2178_v51 = vmul.f32 %v2146_v25, %v2146_v25 }
 0x22b   : > { %v2191_v61 = vadd.f32 %v2190_v33, %v2160_v55  ;;  %v2179_v55 = vmul.f32 %v2147_v29, %v2147_v29 }
 0x22d   : > { %v2192_v49 = vadd.f32 %v2191_v61, %v2161_v28 }
 0x22f   : > { %v2193_v1 = vadd.f32 %v2192_v49, %v2162_v43 }
 0x231   : > { %v2194_v13 = vadd.f32 %v2193_v1, %v2163_v35 }
 0x233   : > { %v2195_v8 = vadd.f32 %v2194_v13, %v2164_v2 }
 0x235   : > { %v2196_v62 = vadd.f32 %v2195_v8, %v2165_v47 }
 0x237   : > { %v2197_v11 = vadd.f32 %v2196_v62, %v2166_v10 }
 0x239   : > { %v2198_v60 = vadd.f32 %v2197_v11, %v2167_v53 }
 0x23b   : > { %v2199_v20 = vadd.f32 %v2198_v60, %v2168_v14 }
 0x23d   : > { %v2200_v22 = vadd.f32 %v2199_v20, %v2169_v18 }
 0x23f   : > { %v2201_v34 = vadd.f32 %v2200_v22, %v2170_v19 }
 0x241   : > { %v2202_v15 = vadd.f32 %v2201_v34, %v2171_v27 }
 0x243   : > { %v2203_v36 = vadd.f32 %v2202_v15, %v2172_v30 }
 0x245   : > { %v2204_v9 = vadd.f32 %v2203_v36, %v2173_v26 }
 0x247   : > { %v2205_v59 = vadd.f32 %v2204_v9, %v2174_v0 }
 0x249   : > { %v2206_v24 = vadd.f32 %v2205_v59, %v2175_v17 }
 0x24b   : > { %v2207_v45 = vadd.f32 %v2206_v24, %v2176_v23 }
 0x24d   : > { %v2208_v58 = vadd.f32 %v2207_v45, %v2177_v57 }
 0x24f   : > { %v2209_v33 = vadd.f32 %v2208_v58, %v2178_v51 }
 0x251   : > { %v2210_v28 = vadd.f32 %v2209_v33, %v2179_v55 }
 0x253   : > { %v2211_v61 = vadd.f32 %v2210_v28, %v2180_v39 }
 0x255   : > { %v2212_v43 = vadd.f32 %v2211_v61, %v2181_v52 }
 0x257   : > { %v2213_v49 = vadd.f32 %v2212_v43, %v2182_v46 }
 0x259   : > { %v2214_v54 = vrot.slane %v2213_v49, 4 }
 0x25b   : > { %v2215_v63 = vadd.f32 %v2214_v54, %v2213_v49 }
 0x25d   : > { %v2216_v35 = vrot.slane %v2215_v63, 2 }
 0x25f   : > { %v2217_v48 = vadd.f32 %v2216_v35, %v2215_v63 }
 0x261   : > { %v2218_v1 = vrot.slane %v2217_v48, 1 }
 0x263   : > { %v2219_v50 = vadd.f32 %v2218_v1, %v2217_v48 }
 0x265   : > { %v2221_v32 = vsel %vm2220_vm7, %v3855_v37, %v2219_v50 }
 0x266   : > { %2222 = vst [vmem:[%s266_s10] sm:$0x3] %v2221_v32 }
 0x267   : > { %2898 = shalt.err (!%p2895_p5)
}
 0x268   : > { %s2899_s30 = scalar_lea.hbm %s3929_s14, 32  ;;  %s2903_s7 = scalar_lea.hbm %s3981_s4, 64 }
 0x269   : > { %p2900_p6 = scmp.ne.s32.totalorder %s3929_s14, %s2899_s30  ;;  %p2904_p10 = scmp.lt.u32.totalorder %s3929_s14, %s3981_s4 }
 0x26a   : > { %p2905_p11 = scmp.lt.u32.totalorder %s2903_s7, %s2899_s30  ;;  %p2907_p13 = scmp.lt.u32.totalorder %s2899_s30, %s3929_s14 }
 0x26b   : > { %p2901_p7 = pnand %p2900_p6, %p3034_p4 }
 0x26c   : > { %p2906_p12 = por %p2905_p11, %p2904_p10 }
 0x26d   : > { %p2902_p9 = pneg %p2901_p7 }
 0x26e   : > { %p2908_p0 = por %p2907_p13, %p2906_p12 }
 0x270   : > { %p2909_p1 = pnand %p2908_p0, %p2902_p9 }
 0x272   : > { %2912 = shalt.err (!%p2909_p1)
}
 0x273   : > { %2778 = dma.vmem_to_hbm [thread:$0]  (%p3034_p4), %s3931_s11, 32, %s3929_s14, %s2236_s21  }
 0x274 PF: > { %p2784_p2 = scmp.ge.s32.totalorder %s2963_s20, 2  ;;  %s2282_s9 = sand.u32 1, %s2943_s15  }
 0x275   : > { %s2283_s10 = scalar_lea.sflag [#allocation3], %s2282_s9 }
 0x276   : > { %p2781_p3 = pnand %p2784_p2, %p3041_p8 }
 0x278   : > { %2938 = dma.done.wait (!%p2781_p3), %s2283_s10, 32  }
 0x279   : > { %2940 = vsyncadd (!%p2781_p3), %s2283_s10, 4294967264  ;;  %s18_s20 = sadd.s32 1, %s2963_s20   ;;  %s3986_s15 = smov %s2947_s16 }
 0x27a   : > { %p15_p5 = scmp.ge.s32.totalorder %s18_s20, 4   ;;  %s3987_s16 = smov %s2951_s17 }
 0x27b   : > { %s3988_s17 = smov %s3047_s28  ;;  %s3989_s18 = smov %s2959_s19 }
 0x27c   : > { %s3990_s19 = smov %s3992_s23  ;;  %17 = sbr.rel (!%p15_p5) target bundleno = 4 (0x4), region = 86 }
 0x283   :  { %2288 = vsyncpa [#allocation3], 1 }
 0x284   :  { %2290 = vsyncpa [#allocation3 + $0x1], 1 }

// kernel: discriminator_forward.10
= control target key start
LH: loop header
LB: loop body
LE: loop exit
PB: predicated region body
PF: predicated region fallthrough
CT: control target
= control target key end

     0   :  { %s540_s12 = smov 0   ;;  %s542_s13 = smov 0   ;;  %s586_s0 = inlined_call_operand.vmem [shape: bf16[2,64,128], index: 0, kind: input, shape index: {}]   ;;  %s587_s1 = inlined_call_operand.vmem [shape: f32[1,128], index: 1, kind: input, shape index: {}]   ;;  %s588_s2 = inlined_call_operand.vmem [shape: f32[1,128], index: 2, kind: input, shape index: {}]   ;;  %s589_s3 = inlined_call_operand.vmem [shape: bf16[2,64,128], index: 3, kind: output, shape index: {}]  }
   0x1   :  { %s544_s14 = smov 0  }
   0x2 LB: > { %s25_s15 = sadd.s32 1, %s514_s13  ;;  %p403_p0 = scmp.ge.s32.totalorder %s518_s14, 1  ;;  %s518_s14 = sphi %s544_s14, %s13_s14   ;;  %s514_s13 = sphi %s542_s13, %s591_s13   ;;  %s510_s12 = sphi %s540_s12, %s590_s12  }
   0x3   : > { %p27_p1 = scmp.ge.s32.totalorder %s25_s15, 2  ;;  %p158_p2 = scmp.lt.s32.totalorder %s518_s14, 3 }
   0x5   : > { %s593_s15 = smov (%p27_p1, %s25_s15), 0  ;;  %p159_p3 = pnand %p403_p0, %p158_p2 }
   0x6   : > { %p191_p4 = scmp.lt.s32.totalorder (!%p159_p3), %s510_s12, 1  ;;  %v408_v0 = vld [vmem:[%s587_s1] ss:$0 sm:$0xff] (!%p159_p3) }
   0x7   : > { %162 = sbr.rel (%p159_p3) target bundleno = 34 (0x22), region = 32  ;;  %v409_v9 = vld [vmem:[%s588_s2] ss:$0 sm:$0xff] (!%p159_p3) }
   0xe   : > { %s595_s12 = smov (!%p191_p4, %s510_s12), 1 }
   0xf   : > { %s420_s16 = sshll.u32 %s595_s12, 5 }
  0x10   : > { %s198_s19 = scalar_lea.vmem %s586_s0, %s420_s16  ;;  %s208_s26 = scalar_lea.vmem %s589_s3, %s420_s16 }
  0x11   : > { %v431_v1 = vld [vmem:[%s198_s19] sm:$0xff]   ;;  %v466_v2 = vld [vmem:[%s198_s19 + $0x8] sm:$0xff]   ;;  %v467_v3 = vld [vmem:[%s198_s19 + $0x10] sm:$0xff]  }
  0x12   : > { %v432_v4 = vunpack.c.l.bf16 %v431_v1  ;;  %v433_v5 = vunpack.c.h.bf16 %v431_v1  ;;  %v468_v6 = vld [vmem:[%s198_s19 + $0x18] sm:$0xff]   ;;  %v436_v7 = vunpack.c.l.bf16 %v466_v2  ;;  %v437_v8 = vunpack.c.h.bf16 %v466_v2 }
  0x13   : > { %v440_v10 = vunpack.c.l.bf16 %v467_v3  ;;  %v441_v11 = vunpack.c.h.bf16 %v467_v3  ;;  %v444_v12 = vunpack.c.l.bf16 %v468_v6  ;;  %v445_v13 = vunpack.c.h.bf16 %v468_v6 }
  0x14   : > { %v233_v14 = vmul.f32 %v432_v4, %v408_v0  ;;  %v234_v15 = vmul.f32 %v433_v5, %v408_v0  ;;  %v235_v16 = vmul.f32 %v436_v7, %v408_v0  ;;  %v236_v17 = vmul.f32 %v437_v8, %v408_v0 }
  0x15   : > { %v237_v18 = vmul.f32 %v440_v10, %v408_v0  ;;  %v238_v19 = vmul.f32 %v441_v11, %v408_v0  ;;  %v239_v20 = vmul.f32 %v444_v12, %v408_v0  ;;  %v240_v21 = vmul.f32 %v445_v13, %v408_v0 }
  0x16   : > { %v248_v22 = vadd.f32 %v409_v9, %v233_v14  ;;  %v249_v23 = vadd.f32 %v409_v9, %v234_v15  ;;  %v250_v24 = vadd.f32 %v409_v9, %v235_v16  ;;  %v251_v25 = vadd.f32 %v409_v9, %v236_v17 }
  0x17   : > { %v252_v26 = vadd.f32 %v409_v9, %v237_v18  ;;  %v253_v27 = vadd.f32 %v409_v9, %v238_v19  ;;  %v254_v28 = vadd.f32 %v409_v9, %v239_v20  ;;  %v255_v29 = vadd.f32 %v409_v9, %v240_v21 }
  0x18   : > { %v256_v30 = vmul.f32 0.2, %v248_v22  ;;  %v257_v31 = vmul.f32 0.2, %v249_v23  ;;  %v258_v32 = vmul.f32 0.2, %v250_v24 }
  0x19   : > { %v259_v33 = vmul.f32 0.2, %v251_v25  ;;  %v260_v34 = vmul.f32 0.2, %v252_v26  ;;  %v261_v35 = vmul.f32 0.2, %v253_v27 }
  0x1a   : > { %v264_v36 = vmax.f32 %v248_v22, %v256_v30  ;;  %v265_v37 = vmax.f32 %v249_v23, %v257_v31  ;;  %v266_v38 = vmax.f32 %v250_v24, %v258_v32  ;;  %v262_v39 = vmul.f32 0.2, %v254_v28 }
  0x1b   : > { %v267_v40 = vmax.f32 %v251_v25, %v259_v33  ;;  %v268_v41 = vmax.f32 %v252_v26, %v260_v34  ;;  %v269_v42 = vmax.f32 %v253_v27, %v261_v35  ;;  %v263_v43 = vmul.f32 0.2, %v255_v29 }
  0x1c   : > { %v449_v44 = vpack.c.bf16 %v265_v37, %v264_v36  ;;  %v270_v45 = vmax.f32 %v254_v28, %v262_v39 }
  0x1d   : > { %v454_v46 = vpack.c.bf16 %v267_v40, %v266_v38  ;;  %v459_v47 = vpack.c.bf16 %v269_v42, %v268_v41  ;;  %v271_v48 = vmax.f32 %v255_v29, %v263_v43 }
  0x1e   : > { %450 = vst [vmem:[%s208_s26] sm:$0xff] %v449_v44  }
  0x1f   : > { %469 = vst [vmem:[%s208_s26 + $0x8] sm:$0xff] %v454_v46   ;;  %470 = vst [vmem:[%s208_s26 + $0x10] sm:$0xff] %v459_v47   ;;  %v464_v49 = vpack.c.bf16 %v271_v48, %v270_v45 }
  0x21   : > { %471 = vst [vmem:[%s208_s26 + $0x18] sm:$0xff] %v464_v49  }
  0x22 PF: > { %s13_s14 = sadd.s32 1, %s518_s14   ;;  %s590_s12 = smov %s514_s13 }
  0x23   : > { %p10_p5 = scmp.ge.s32.totalorder %s13_s14, 4   ;;  %s591_s13 = smov %s593_s15 }
  0x25   :  { %12 = sbr.rel (!%p10_p5) target bundleno = 2 (0x2), region = 62 }

// kernel: discriminator_forward.9
= control target key start
LH: loop header
LB: loop body
LE: loop exit
PB: predicated region body
PF: predicated region fallthrough
CT: control target
= control target key end

     0   :  { %s3982_s15 = smov 0   ;;  %s3984_s16 = smov 0   ;;  %s4781_s0 = inlined_call_operand.vmem [shape: bf16[2,1,9,9,512], index: 0, kind: input, shape index: {}]   ;;  %s4782_s1 = inlined_call_operand.vmem [shape: bf16[4,512,128], index: 1, kind: input, shape index: {}]   ;;  %s4783_s2 = inlined_call_operand.vmem [shape: f32[1,128], index: 2, kind: input, shape index: {}]   ;;  %s4784_s3 = inlined_call_operand.vmem [shape: bf16[2,64,128], index: 3, kind: output, shape index: {0}]   ;;  %s4785_s4 = inlined_call_operand.vmem [shape: f32[2,1,2,128], index: 4, kind: output, shape index: {1}]  }
   0x1   :  { %s3986_s17 = smov 0  }
   0x2 LB: > { %s34_s18 = sadd.s32 1, %s3951_s16  ;;  %p2980_p0 = scmp.ge.s32.totalorder %s3955_s17, 1  ;;  %s3955_s17 = sphi %s3986_s17, %s15_s17   ;;  %s3951_s16 = sphi %s3984_s16, %s4789_s16   ;;  %s3947_s15 = sphi %s3982_s15, %s4788_s15  }
   0x3   : > { %p36_p1 = scmp.ge.s32.totalorder %s34_s18, 2  ;;  %p215_p2 = scmp.lt.s32.totalorder %s3955_s17, 3 }
   0x5   : > { %s4791_s18 = smov (%p36_p1, %s34_s18), 0  ;;  %p216_p3 = pnand %p2980_p0, %p215_p2 }
   0x6   : > { %v3805_v0 = vld [vmem:[%s4782_s1 + $0x140] sm:$0xff] (!%p216_p3)   ;;  %v3809_v4 = vld [vmem:[%s4782_s1 + $0x148] sm:$0xff] (!%p216_p3)   ;;  %v3813_v8 = vld [vmem:[%s4782_s1 + $0x150] sm:$0xff] (!%p216_p3)   ;;  %p269_p4 = scmp.lt.s32.totalorder (!%p216_p3), %s3947_s15, 1  ;;  %vm405_vm0 = vsmask.f32 (!%p216_p3), 3328 }
   0x7   : > { %219 = sbr.rel (%p216_p3) target bundleno = 438 (0x1b6), region = 32  ;;  %v3806_v1 = vld [vmem:[%s4782_s1 + $0x1c0] sm:$0xff] (!%p216_p3)   ;;  %3460 = vmatprep.subr.bf16.mxu0 (!%p216_p3), %v3805_v0  ;;  %v3810_v5 = vld [vmem:[%s4782_s1 + $0x1c8] sm:$0xff] (!%p216_p3)   ;;  %v3814_v9 = vld [vmem:[%s4782_s1 + $0x1d0] sm:$0xff] (!%p216_p3)   ;;  %vm406_vm1 = vsmask.f32 (!%p216_p3), 7440 }
   0x8   : > { %v3807_v2 = vld [vmem:[%s4782_s1 + $0x100] sm:$0xff] (!%p216_p3)   ;;  %3500 = vmatprep.subr.bf16.mxu1 (!%p216_p3), %v3806_v1  ;;  %v3811_v6 = vld [vmem:[%s4782_s1 + $0x108] sm:$0xff] (!%p216_p3)   ;;  %v3815_v10 = vld [vmem:[%s4782_s1 + $0x110] sm:$0xff] (!%p216_p3)   ;;  %vm2790_vm3 = vcmask (!%p216_p3), 1040384  }
   0x9   : > { %v3808_v3 = vld [vmem:[%s4782_s1 + $0x180] sm:$0xff] (!%p216_p3)   ;;  %3461 = vmatpush3.bf16.msra.mxu0 (!%p216_p3), %v3807_v2  ;;  %v3812_v7 = vld [vmem:[%s4782_s1 + $0x188] sm:$0xff] (!%p216_p3)   ;;  %v3816_v11 = vld [vmem:[%s4782_s1 + $0x190] sm:$0xff] (!%p216_p3)  }
   0xa   : > { %3501 = vmatpush3.bf16.msra.mxu1 (!%p216_p3), %v3808_v3  ;;  %3462 = vmatprep.subr.bf16.mxu0 (!%p216_p3), %v3809_v4  ;;  %v3817_v12 = vld [vmem:[%s4782_s1 + $0x158] sm:$0xff] (!%p216_p3)   ;;  %v3821_v16 = vld [vmem:[%s4782_s1 + $0x160] sm:$0xff] (!%p216_p3)   ;;  %v3825_v20 = vld [vmem:[%s4782_s1 + $0x168] sm:$0xff] (!%p216_p3)  }
   0xb   : > { %3502 = vmatprep.subr.bf16.mxu1 (!%p216_p3), %v3810_v5  ;;  %v3818_v13 = vld [vmem:[%s4782_s1 + $0x1d8] sm:$0xff] (!%p216_p3)   ;;  %v3822_v17 = vld [vmem:[%s4782_s1 + $0x1e0] sm:$0xff] (!%p216_p3)   ;;  %v3826_v21 = vld [vmem:[%s4782_s1 + $0x1e8] sm:$0xff] (!%p216_p3)  }
   0xc   : > { %v3819_v14 = vld [vmem:[%s4782_s1 + $0x118] sm:$0xff] (!%p216_p3)   ;;  %v3823_v18 = vld [vmem:[%s4782_s1 + $0x120] sm:$0xff] (!%p216_p3)   ;;  %v3827_v22 = vld [vmem:[%s4782_s1 + $0x128] sm:$0xff] (!%p216_p3)  }
   0xd   : > { %3463 = vmatpush3.bf16.msra.mxu0 (!%p216_p3), %v3811_v6  ;;  %v3820_v15 = vld [vmem:[%s4782_s1 + $0x198] sm:$0xff] (!%p216_p3)   ;;  %v3824_v19 = vld [vmem:[%s4782_s1 + $0x1a0] sm:$0xff] (!%p216_p3)   ;;  %v3828_v23 = vld [vmem:[%s4782_s1 + $0x1a8] sm:$0xff] (!%p216_p3)  }
   0xe   : > { %3503 = vmatpush3.bf16.msra.mxu1 %v3812_v7  ;;  %3464 = vmatprep.subr.bf16.mxu0 %v3813_v8  ;;  %s4793_s15 = smov (!%p269_p4, %s3947_s15), 1  ;;  %v3829_v24 = vld [vmem:[%s4782_s1 + $0x170] sm:$0xff]   ;;  %v3833_v28 = vld [vmem:[%s4782_s1 + $0x178] sm:$0xff]   ;;  %v3837_v56 = vld [vmem:[%s4782_s1 + $0x40] sm:$0xff]  }
   0xf   : > { %3504 = vmatprep.subr.bf16.mxu1 %v3814_v9  ;;  %v3830_v25 = vld [vmem:[%s4782_s1 + $0x1f0] sm:$0xff]   ;;  %s3780_s27 = smul.u32 288, %s4793_s15  ;;  %v3834_v29 = vld [vmem:[%s4782_s1 + $0x1f8] sm:$0xff]   ;;  %vm4135_vm2 = vmor %vm405_vm0, %vm406_vm1  ;;  %s3428_s25 = sshll.u32 %s4793_s15, 5 }
  0x10   : > { %v3831_v26 = vld [vmem:[%s4782_s1 + $0x130] sm:$0xff]   ;;  %v3835_v30 = vld [vmem:[%s4782_s1 + $0x138] sm:$0xff]   ;;  %v3838_v62 = vld [vmem:[%s4782_s1 + $0xc0] sm:$0xff]   ;;  %s4744_s28 = scalar_lea.vmem %s4784_s3, %s3428_s25  ;;  %s2984_s29 = sshll.u32 %s4793_s15, 1 }
  0x11   : > { %3465 = vmatpush3.bf16.msra.mxu0 %v3815_v10  ;;  %v3832_v27 = vld [vmem:[%s4782_s1 + $0x1b0] sm:$0xff]   ;;  %s4100_s12 = scalar_lea.vmem %s4781_s0, %s3780_s27  ;;  %v3836_v31 = vld [vmem:[%s4782_s1 + $0x1b8] sm:$0xff]   ;;  %s307_s6 = scalar_lea.vmem %s4785_s4, %s2984_s29 }
  0x12   : > { %3505 = vmatpush3.bf16.msra.mxu1 %v3816_v11  ;;  %3466 = vmatprep.subr.bf16.mxu0 %v3817_v12  ;;  %v4109_v32 = vld [vmem:[%s4100_s12] sm:$0xff]  ;;  %v389_v34 = vld [vmem:[%s4100_s12 + $0x10] sm:$0x11]  ;;  %v4121_v42 = vld [vmem:[%s4100_s12 + $0x8] sm:$0xff] }
  0x13   : > { %3506 = vmatprep.subr.bf16.mxu1 %v3818_v13  ;;  %v4112_v33 = vld [vmem:[%s4100_s12 + $0x20] sm:$0xff]  ;;  %v391_v35 = vld [vmem:[%s4100_s12 + $0x30] sm:$0x11]  ;;  %v409_v36 = vshrl.u32 %v4109_v32, 16  ;;  %v412_v37 = vshll.u32 %v4109_v32, 16  ;;  %v418_v38 = vshll.u32 %v389_v34, 16 }
  0x14   : > { %v437_v39 = vshrl.u32 %v4112_v33, 16  ;;  %v440_v40 = vshll.u32 %v4112_v33, 16  ;;  %v446_v41 = vshll.u32 %v391_v35, 16  ;;  %v4124_v43 = vld [vmem:[%s4100_s12 + $0x28] sm:$0xff]  ;;  %v390_v46 = vld [vmem:[%s4100_s12 + $0x18] sm:$0x11] }
  0x15   : > { %3467 = vmatpush3.bf16.msra.mxu0 %v3819_v14  ;;  %v411_v44 = vrot.slane %v409_v36, 4  ;;  %v414_v45 = vrot.slane %v412_v37, 5  ;;  %v392_v47 = vld [vmem:[%s4100_s12 + $0x38] sm:$0x11]  ;;  %v420_v48 = vrot.slane %v418_v38, 5  ;;  %v423_v53 = vshrl.u32 %v4121_v42, 16 }
  0x16   : > { %3507 = vmatpush3.bf16.msra.mxu1 %v3820_v15  ;;  %3468 = vmatprep.subr.bf16.mxu0 %v3821_v16  ;;  %v439_v49 = vrot.slane %v437_v39, 4  ;;  %v442_v50 = vrot.slane %v440_v40, 5  ;;  %v448_v51 = vrot.slane %v446_v41, 5  ;;  %v426_v54 = vshll.u32 %v4121_v42, 16  ;;  %v3839_v14 = vld [vmem:[%s4782_s1] sm:$0xff]   ;;  %v3841_v16 = vld [vmem:[%s4782_s1 + $0x48] sm:$0xff]  }
  0x17   : > { %3508 = vmatprep.subr.bf16.mxu1 %v3822_v17  ;;  %v415_v52 = vor.u32 %v414_v45, %v411_v44  ;;  %v432_v55 = vshll.u32 %v390_v46, 16  ;;  %v451_v59 = vshrl.u32 %v4124_v43, 16  ;;  %v454_v60 = vshll.u32 %v4124_v43, 16  ;;  %v4182_v36 = vld [vmem:[%s4100_s12 + $0x48] sm:$0xff]  ;;  %v394_v41 = vld [vmem:[%s4100_s12 + $0x58] sm:$0x11] }
  0x18   : > { %v443_v58 = vor.u32 %v442_v50, %v439_v49  ;;  %v460_v61 = vshll.u32 %v392_v47, 16  ;;  %v425_v0 = vrot.slane %v423_v53, 4  ;;  %v428_v1 = vrot.slane %v426_v54, 5  ;;  %v4185_v37 = vld [vmem:[%s4100_s12 + $0x68] sm:$0xff]  ;;  %v396_v44 = vld [vmem:[%s4100_s12 + $0x78] sm:$0x11] }
  0x19   : > { %3469 = vmatpush3.bf16.msra.mxu0 %v3823_v18  ;;  %v416_v63 = vrot.slane %v415_v52, 4  ;;  %v453_v3 = vrot.slane %v451_v59, 4  ;;  %v456_v4 = vrot.slane %v454_v60, 5  ;;  %v434_v7 = vrot.slane %v432_v55, 5  ;;  %v3840_v18 = vld [vmem:[%s4782_s1 + $0x80] sm:$0xff]   ;;  %v3844_v38 = vld [vmem:[%s4782_s1 + $0x88] sm:$0xff]  }
  0x1a   : > { %3509 = vmatpush3.bf16.msra.mxu1 %v3824_v19  ;;  %3470 = vmatprep.subr.bf16.mxu0 %v3825_v20  ;;  %v444_v2 = vrot.slane %v443_v58, 4  ;;  %v429_v6 = vor.u32 %v428_v1, %v425_v0  ;;  %v462_v10 = vrot.slane %v460_v61, 5  ;;  %v3842_v20 = vld [vmem:[%s4782_s1 + $0xc8] sm:$0xff]   ;;  %v479_v50 = vshrl.u32 %v4182_v36, 16  ;;  %v3845_v58 = vld [vmem:[%s4782_s1 + $0x50] sm:$0xff]  }
  0x1b   : > { %3510 = vmatprep.subr.bf16.mxu1 %v3826_v21  ;;  %v421_v5 = vsel %vm4135_vm2, %v416_v63, %v420_v48  ;;  %v457_v9 = vor.u32 %v456_v4, %v453_v3  ;;  %v3843_v21 = vld [vmem:[%s4782_s1 + $0x8] sm:$0xff]   ;;  %v488_v52 = vshll.u32 %v394_v41, 16  ;;  %v507_v55 = vshrl.u32 %v4185_v37, 16  ;;  %v3846_v59 = vld [vmem:[%s4782_s1 + $0xd0] sm:$0xff]  }
  0x1c   : > { %v449_v8 = vsel %vm4135_vm2, %v444_v2, %v448_v51  ;;  %v430_v13 = vrot.slane %v429_v6, 4  ;;  %v482_v51 = vshll.u32 %v4182_v36, 16  ;;  %v481_v60 = vrot.slane %v479_v50, 4  ;;  %v3847_v6 = vld [vmem:[%s4782_s1 + $0x10] sm:$0xff]   ;;  %v400_v50 = vld [vmem:[%s4100_s12 + $0xb8] sm:$0x11] }
  0x1d   : > { %3471 = vmatpush3.bf16.msra.mxu0 %v3827_v22  ;;  %v3049_v11 = vcombine.low %v421_v5, %v449_v8  ;;  %v3050_v12 = vcombine.high %v421_v5, %v449_v8  ;;  %v458_v15 = vrot.slane %v457_v9, 4  ;;  %v4168_v22 = vld [vmem:[%s4100_s12 + $0x40] sm:$0xff]  ;;  %v516_v63 = vshll.u32 %v396_v44, 16 }
  0x1e   : > { %3511 = vmatpush3.bf16.msra.mxu1 %v3828_v23  ;;  %3472 = vmatprep.subr.bf16.mxu0 %v3829_v24  ;;  %v435_v17 = vsel %vm4135_vm2, %v430_v13, %v434_v7  ;;  %v484_v61 = vrot.slane %v482_v51, 5  ;;  %v509_v2 = vrot.slane %v507_v55, 4 }
  0x1f   : > { %3512 = vmatprep.subr.bf16.mxu1 %v3830_v25  ;;  %985 = vmatprep.mubr.bf16.mxu0 %v3050_v12  ;;  %v463_v19 = vsel %vm4135_vm2, %v458_v15, %v462_v10  ;;  %v4171_v25 = vld [vmem:[%s4100_s12 + $0x60] sm:$0xff]  ;;  %v518_v5 = vrot.slane %v516_v63, 5  ;;  %v3848_v10 = vld [vmem:[%s4782_s1 + $0x90] sm:$0xff]   ;;  %v3849_v15 = vld [vmem:[%s4782_s1 + $0x58] sm:$0xff]  }
  0x20   : > { %v3051_v23 = vcombine.low %v435_v17, %v463_v19  ;;  %v3052_v24 = vcombine.high %v435_v17, %v463_v19  ;;  %v493_v34 = vshrl.u32 %v4171_v25, 16  ;;  %v496_v35 = vshll.u32 %v4171_v25, 16 }
  0x21   : > { %3473 = vmatpush3.bf16.msra.mxu0 %v3831_v26  ;;  %v393_v26 = vld [vmem:[%s4100_s12 + $0x50] sm:$0x11]  ;;  %v485_v4 = vor.u32 %v484_v61, %v481_v60  ;;  %v3228_v19 = vcombine.high %v4124_v43, %v4182_v36 }
  0x22   : > { %3513 = vmatpush3.bf16.msra.mxu1 %v3832_v27  ;;  %3474 = vmatprep.subr.bf16.mxu0 %v3833_v28  ;;  %v395_v27 = vld [vmem:[%s4100_s12 + $0x70] sm:$0x11]  ;;  %v465_v28 = vshrl.u32 %v4168_v22, 16  ;;  %v495_v47 = vrot.slane %v493_v34, 4  ;;  %v498_v48 = vrot.slane %v496_v35, 5 }
  0x23   : > { %3514 = vmatprep.subr.bf16.mxu1 %v3834_v29  ;;  %v3225_v29 = vcombine.low %v4112_v33, %v4168_v22  ;;  %1050 = vmatprep.mubr.bf16.mxu1 %v3052_v24  ;;  %v502_v40 = vshll.u32 %v395_v27, 16  ;;  %v486_v13 = vrot.slane %v485_v4, 4  ;;  %v3852_v24 = vld [vmem:[%s4782_s1 + $0x98] sm:$0xff]   ;;  %v399_v34 = vld [vmem:[%s4100_s12 + $0xb0] sm:$0x11] }
  0x24   : > { %v467_v39 = vrot.slane %v465_v28, 4  ;;  %v499_v54 = vor.u32 %v498_v48, %v495_v47  ;;  %v558_v48 = vshll.u32 %v399_v34, 16  ;;  %v3858_v34 = vld [vmem:[%s4782_s1 + $0xe8] sm:$0xff]  }
  0x25   : > { %3475 = vmatpush3.bf16.msra.mxu0 %v3835_v30  ;;  %v468_v30 = vshll.u32 %v4168_v22, 16  ;;  %v504_v49 = vrot.slane %v502_v40, 5 }
  0x26   : > { %3515 = vmatpush3.bf16.msra.mxu1 %v3836_v31  ;;  %3540 = vmatprep.subr.bf16.mxu0 %v3837_v56  ;;  %v474_v31 = vshll.u32 %v393_v26, 16  ;;  %v510_v56 = vshll.u32 %v4185_v37, 16  ;;  %v500_v1 = vrot.slane %v499_v54, 4  ;;  %v4235_v26 = vld [vmem:[%s4100_s12 + $0x80] sm:$0xff]  ;;  %v560_v55 = vrot.slane %v558_v48, 5 }
  0x27   : > { %3580 = vmatprep.subr.bf16.mxu1 %v3838_v62  ;;  %v470_v45 = vrot.slane %v468_v30, 5  ;;  %v490_v62 = vrot.slane %v488_v52, 5  ;;  %v4238_v30 = vld [vmem:[%s4100_s12 + $0xa0] sm:$0xff]  ;;  %v521_v35 = vshrl.u32 %v4235_v26, 16 }
  0x28   : > { %986 = vmatmul.mubr.bf16.vlgmr.msra.gmra.mrb[0].mxu0 %v3049_v11  ;;  %v476_v46 = vrot.slane %v474_v31, 5  ;;  %v512_v3 = vrot.slane %v510_v56, 5  ;;  %v505_v8 = vsel %vm4135_vm2, %v500_v1, %v504_v49  ;;  %v3226_v11 = vcombine.high %v4112_v33, %v4168_v22  ;;  %v397_v31 = vld [vmem:[%s4100_s12 + $0x90] sm:$0x11]  ;;  %v398_v49 = vld [vmem:[%s4100_s12 + $0x98] sm:$0x11] }
  0x29   : > { %3541 = vmatpush3.bf16.msra.mxu0 %v3839_v14  ;;  %1051 = vmatmul.mubr.bf16.vlgmr.msra.gmra.mrb[0].mxu1 %v3051_v23  ;;  %v471_v53 = vor.u32 %v470_v45, %v467_v39  ;;  %v524_v39 = vshll.u32 %v4235_v26, 16  ;;  %v530_v40 = vshll.u32 %v397_v31, 16  ;;  %v549_v41 = vshrl.u32 %v4238_v30, 16  ;;  %v4249_v45 = vld [vmem:[%s4100_s12 + $0x88] sm:$0xff]  ;;  %v3854_v1 = vld [vmem:[%s4782_s1 + $0xe0] sm:$0xff]  }
  0x2a   : > { %3542 = vmatprep.subr.bf16.mxu0 %v3841_v16  ;;  %3581 = vmatpush3.bf16.msra.mxu1 %v3840_v18  ;;  %v513_v9 = vor.u32 %v512_v3, %v509_v2  ;;  %v3227_v16 = vcombine.low %v4124_v43, %v4182_v36  ;;  %v3850_v18 = vld [vmem:[%s4782_s1 + $0xd8] sm:$0xff]   ;;  %v552_v44 = vshll.u32 %v4238_v30, 16  ;;  %v523_v47 = vrot.slane %v521_v35, 4 }
  0x2b   : > { %3582 = vmatprep.subr.bf16.mxu1 %v3842_v20  ;;  %v472_v0 = vrot.slane %v471_v53, 4  ;;  %v491_v20 = vsel %vm4135_vm2, %v486_v13, %v490_v62  ;;  %v526_v51 = vrot.slane %v524_v39, 5  ;;  %v532_v52 = vrot.slane %v530_v40, 5  ;;  %v3855_v13 = vld [vmem:[%s4782_s1 + $0x20] sm:$0xff]   ;;  %v3859_v40 = vld [vmem:[%s4782_s1 + $0x28] sm:$0xff]  }
  0x2c   : > { %v514_v17 = vrot.slane %v513_v9, 4  ;;  %v551_v53 = vrot.slane %v549_v41, 4  ;;  %v554_v54 = vrot.slane %v552_v44, 5  ;;  %v535_v56 = vshrl.u32 %v4249_v45, 16  ;;  %v3860_v44 = vld [vmem:[%s4782_s1 + $0xa8] sm:$0xff]  }
  0x2d   : > { %3543 = vmatpush3.bf16.msra.mxu0 %v3843_v21  ;;  %v477_v7 = vsel %vm4135_vm2, %v472_v0, %v476_v46  ;;  %v3851_v21 = vld [vmem:[%s4782_s1 + $0x18] sm:$0xff]   ;;  %v4252_v46 = vld [vmem:[%s4100_s12 + $0xa8] sm:$0xff]  ;;  %v527_v60 = vor.u32 %v526_v51, %v523_v47  ;;  %v3853_v0 = vld [vmem:[%s4782_s1 + $0x60] sm:$0xff]   ;;  %v3231_v35 = vcombine.low %v4185_v37, %v4249_v45 }
  0x2e   : > { %3544 = vmatprep.subr.bf16.mxu0 %v3845_v58  ;;  %3583 = vmatpush3.bf16.msra.mxu1 %v3844_v38  ;;  %v3054_v12 = vcombine.high %v477_v7, %v505_v8  ;;  %v3053_v14 = vcombine.low %v477_v7, %v505_v8  ;;  %v519_v23 = vsel %vm4135_vm2, %v514_v17, %v518_v5  ;;  %v538_v58 = vshll.u32 %v4249_v45, 16  ;;  %v4299_v47 = vld [vmem:[%s4100_s12 + $0xc0] sm:$0xff]  ;;  %v401_v51 = vld [vmem:[%s4100_s12 + $0xd0] sm:$0x11] }
  0x2f   : > { %3584 = vmatprep.subr.bf16.mxu1 %v3846_v59  ;;  %v3056_v27 = vcombine.high %v491_v20, %v519_v23  ;;  %v3055_v28 = vcombine.low %v491_v20, %v519_v23  ;;  %v3230_v38 = vcombine.high %v4171_v25, %v4235_v26  ;;  %v544_v59 = vshll.u32 %v398_v49, 16 }
  0x30   : > { %993 = vmatprep.mubr.bf16.mxu0 %v3054_v12  ;;  %v555_v61 = vor.u32 %v554_v54, %v551_v53  ;;  %v563_v62 = vshrl.u32 %v4252_v46, 16  ;;  %v566_v63 = vshll.u32 %v4252_v46, 16  ;;  %v537_v2 = vrot.slane %v535_v56, 4 }
  0x31   : > { %3545 = vmatpush3.bf16.msra.mxu0 %v3847_v6  ;;  %1058 = vmatprep.mubr.bf16.mxu1 %v3056_v27  ;;  %v540_v3 = vrot.slane %v538_v58, 5  ;;  %v546_v4 = vrot.slane %v544_v59, 5  ;;  %v572_v5 = vshll.u32 %v400_v50, 16  ;;  %v528_v6 = vrot.slane %v527_v60, 4  ;;  %v3857_v27 = vld [vmem:[%s4782_s1 + $0x68] sm:$0xff]   ;;  %v4302_v50 = vld [vmem:[%s4100_s12 + $0xe0] sm:$0xff] }
  0x32   : > { %3585 = vmatpush3.bf16.msra.mxu1 %v3848_v10  ;;  %994 = vmatmul.mubr.bf16.gmra.mrb[4].mxu0 %v3053_v14  ;;  %v556_v7 = vrot.slane %v555_v61, 4  ;;  %v565_v8 = vrot.slane %v563_v62, 4  ;;  %v568_v9 = vrot.slane %v566_v63, 5  ;;  %v3232_v20 = vcombine.high %v4185_v37, %v4249_v45  ;;  %v4311_v59 = vld [vmem:[%s4100_s12 + $0xc8] sm:$0xff]  ;;  %v402_v63 = vld [vmem:[%s4100_s12 + $0xd8] sm:$0x11] }
  0x33   : > { %3546 = vmatprep.subr.bf16.mxu0 %v3849_v15  ;;  %3586 = vmatprep.subr.bf16.mxu1 %v3850_v18  ;;  %v541_v10 = vor.u32 %v540_v3, %v537_v2  ;;  %v574_v12 = vrot.slane %v572_v5, 5  ;;  %v533_v14 = vsel %vm4135_vm2, %v528_v6, %v532_v52  ;;  %v3856_v18 = vld [vmem:[%s4782_s1 + $0xa0] sm:$0xff]   ;;  %v403_v52 = vld [vmem:[%s4100_s12 + $0xf0] sm:$0x11]  ;;  %v577_v53 = vshrl.u32 %v4299_v47, 16  ;;  %v4314_v60 = vld [vmem:[%s4100_s12 + $0xe8] sm:$0xff] }
  0x34   : > { %1059 = vmatmul.mubr.bf16.gmra.mrb[4].mxu1 %v3055_v28  ;;  %v561_v15 = vsel %vm4135_vm2, %v556_v7, %v560_v55  ;;  %v569_v17 = vor.u32 %v568_v9, %v565_v8  ;;  %v3229_v28 = vcombine.low %v4171_v25, %v4235_v26  ;;  %v580_v54 = vshll.u32 %v4299_v47, 16 }
  0x35   : > { %3547 = vmatpush3.bf16.msra.mxu0 %v3851_v21  ;;  %v3058_v21 = vcombine.high %v533_v14, %v561_v15  ;;  %v542_v23 = vrot.slane %v541_v10, 4  ;;  %v586_v55 = vshll.u32 %v401_v51, 16  ;;  %v605_v56 = vshrl.u32 %v4302_v50, 16 }
  0x36   : > { %3587 = vmatpush3.bf16.msra.mxu1 %v3852_v24  ;;  %3548 = vmatprep.subr.bf16.mxu0 %v3853_v0  ;;  %v3057_v24 = vcombine.low %v533_v14, %v561_v15  ;;  %v570_v31 = vrot.slane %v569_v17, 4  ;;  %v608_v58 = vshll.u32 %v4302_v50, 16  ;;  %v579_v61 = vrot.slane %v577_v53, 4  ;;  %v404_v0 = vld [vmem:[%s4100_s12 + $0xf8] sm:$0x11]  ;;  %v3861_v14 = vld [vmem:[%s4782_s1 + $0x70] sm:$0xff]  }
  0x37   : > { %3588 = vmatprep.subr.bf16.mxu1 %v3854_v1  ;;  %1001 = vmatprep.mubr.bf16.mxu0 %v3058_v21  ;;  %v547_v39 = vsel %vm4135_vm2, %v542_v23, %v546_v4  ;;  %v614_v62 = vshll.u32 %v403_v52, 16  ;;  %v582_v1 = vrot.slane %v580_v54, 5  ;;  %v588_v2 = vrot.slane %v586_v55, 5  ;;  %v3862_v15 = vld [vmem:[%s4782_s1 + $0xf0] sm:$0xff]  }
  0x38   : > { %v575_v41 = vsel %vm4135_vm2, %v570_v31, %v574_v12  ;;  %v607_v3 = vrot.slane %v605_v56, 4  ;;  %v610_v4 = vrot.slane %v608_v58, 5  ;;  %v591_v6 = vshrl.u32 %v4311_v59, 16  ;;  %v3864_v52 = vld [vmem:[%s4782_s1 + $0xb0] sm:$0xff]   ;;  %v3865_v56 = vld [vmem:[%s4782_s1 + $0x78] sm:$0xff]  }
  0x39   : > { %3549 = vmatpush3.bf16.msra.mxu0 %v3855_v13  ;;  %v3060_v48 = vcombine.high %v547_v39, %v575_v41  ;;  %v3059_v49 = vcombine.low %v547_v39, %v575_v41  ;;  %v616_v5 = vrot.slane %v614_v62, 5  ;;  %v594_v7 = vshll.u32 %v4311_v59, 16  ;;  %v3866_v62 = vld [vmem:[%s4782_s1 + $0xf8] sm:$0xff]  }
  0x3a   : > { %3589 = vmatpush3.bf16.msra.mxu1 %v3856_v18  ;;  %3550 = vmatprep.subr.bf16.mxu0 %v3857_v27  ;;  %v600_v8 = vshll.u32 %v402_v63, 16  ;;  %v583_v9 = vor.u32 %v582_v1, %v579_v61  ;;  %v611_v10 = vor.u32 %v610_v4, %v607_v3  ;;  %v619_v12 = vshrl.u32 %v4314_v60, 16  ;;  %v3867_v1 = vld [vmem:[%s4782_s1 + $0x38] sm:$0xff]  }
  0x3b   : > { %1002 = vmatmul.mubr.bf16.gmra.mrb[8].mxu0 %v3057_v24  ;;  %3590 = vmatprep.subr.bf16.mxu1 %v3858_v34  ;;  %v622_v13 = vshll.u32 %v4314_v60, 16  ;;  %v593_v17 = vrot.slane %v591_v6, 4  ;;  %v596_v18 = vrot.slane %v594_v7, 5  ;;  %v628_v21 = vshll.u32 %v404_v0, 16  ;;  %v3868_v3 = vld [vmem:[%s4782_s1 + $0xb8] sm:$0xff]   ;;  %v3869_v7 = vld [vmem:[%s4782_s1 + $0x240] sm:$0xff]  }
  0x3c   : > { %1066 = vmatprep.mubr.bf16.mxu1 %v3060_v48  ;;  %v584_v23 = vrot.slane %v583_v9, 4  ;;  %v612_v24 = vrot.slane %v611_v10, 4  ;;  %v621_v27 = vrot.slane %v619_v12, 4  ;;  %v602_v39 = vrot.slane %v600_v8, 5  ;;  %v3870_v8 = vld [vmem:[%s4782_s1 + $0x2c0] sm:$0xff]  }
  0x3d   : > { %3551 = vmatpush3.bf16.msra.mxu0 %v3859_v40  ;;  %1067 = vmatmul.mubr.bf16.gmra.mrb[8].mxu1 %v3059_v49  ;;  %v624_v31 = vrot.slane %v622_v13, 5  ;;  %v597_v34 = vor.u32 %v596_v18, %v593_v17  ;;  %v3863_v40 = vld [vmem:[%s4782_s1 + $0x30] sm:$0xff]   ;;  %v3098_v41 = vcombine.high %v4109_v32, %v4112_v33  ;;  %v630_v51 = vrot.slane %v628_v21, 5  ;;  %v3871_v10 = vld [vmem:[%s4782_s1 + $0x200] sm:$0xff]   ;;  %v3873_v13 = vld [vmem:[%s4782_s1 + $0x248] sm:$0xff]  }
  0x3e   : > { %3591 = vmatpush3.bf16.msra.mxu1 %v3860_v44  ;;  %3552 = vmatprep.subr.bf16.mxu0 %v3861_v14  ;;  %v589_v44 = vsel %vm4135_vm2, %v584_v23, %v588_v2  ;;  %v617_v48 = vsel %vm4135_vm2, %v612_v24, %v616_v5  ;;  %v3233_v58 = vcombine.low %v4238_v30, %v4299_v47  ;;  %v3874_v17 = vld [vmem:[%s4782_s1 + $0x2c8] sm:$0xff]   ;;  %v3877_v21 = vld [vmem:[%s4782_s1 + $0x250] sm:$0xff]  }
  0x3f   : > { %3592 = vmatprep.subr.bf16.mxu1 %v3862_v15  ;;  %v625_v49 = vor.u32 %v624_v31, %v621_v27  ;;  %v3062_v53 = vcombine.high %v589_v44, %v617_v48  ;;  %v598_v54 = vrot.slane %v597_v34, 4  ;;  %v3061_v55 = vcombine.low %v589_v44, %v617_v48  ;;  %v3875_v15 = vld [vmem:[%s4782_s1 + $0x208] sm:$0xff]   ;;  %v3878_v24 = vld [vmem:[%s4782_s1 + $0x2d0] sm:$0xff]   ;;  %v3881_v31 = vld [vmem:[%s4782_s1 + $0x258] sm:$0xff]  }
  0x40   : > { %v3235_v63 = vcombine.low %v4252_v46, %v4311_v59  ;;  %v3100_v6 = vcombine.high %v4121_v42, %v4124_v43  ;;  %v3097_v9 = vcombine.low %v4109_v32, %v4112_v33  ;;  %v3102_v12 = vcombine.high %v4168_v22, %v4171_v25  ;;  %v3872_v32 = vld [vmem:[%s4782_s1 + $0x280] sm:$0xff]   ;;  %v3879_v27 = vld [vmem:[%s4782_s1 + $0x210] sm:$0xff]   ;;  %v3882_v44 = vld [vmem:[%s4782_s1 + $0x2d8] sm:$0xff]  }
  0x41   : > { %3553 = vmatpush3.bf16.msra.mxu0 %v3863_v40  ;;  %v626_v61 = vrot.slane %v625_v49, 4  ;;  %1009 = vmatprep.mubr.bf16.mxu0 %v3062_v53  ;;  %v603_v0 = vsel %vm4135_vm2, %v598_v54, %v602_v39  ;;  %v3099_v14 = vcombine.low %v4121_v42, %v4124_v43  ;;  %v3104_v18 = vcombine.high %v4182_v36, %v4185_v37  ;;  %v3876_v42 = vld [vmem:[%s4782_s1 + $0x288] sm:$0xff]   ;;  %v3880_v40 = vld [vmem:[%s4782_s1 + $0x290] sm:$0xff]   ;;  %v3884_v49 = vld [vmem:[%s4782_s1 + $0x298] sm:$0xff]  }
  0x42   : > { %3593 = vmatpush3.bf16.msra.mxu1 %v3864_v52  ;;  %3554 = vmatprep.subr.bf16.mxu0 %v3865_v56  ;;  %v3101_v23 = vcombine.low %v4168_v22, %v4171_v25  ;;  %v3106_v34 = vcombine.high %v4235_v26, %v4238_v30  ;;  %v3103_v39 = vcombine.low %v4182_v36, %v4185_v37  ;;  %v3886_v53 = vld [vmem:[%s4782_s1 + $0x2e0] sm:$0xff]   ;;  %v3908_v33 = vld [vmem:[%s4782_s1 + $0x388] sm:$0xff]   ;;  %v3909_v22 = vld [vmem:[%s4782_s1 + $0x350] sm:$0xff]  }
  0x43   : > { %v631_v2 = vsel %vm4135_vm2, %v626_v61, %v630_v51  ;;  %1010 = vmatmul.mubr.bf16.gmra.mrb[12].mxu0 %v3061_v55  ;;  %3594 = vmatprep.subr.bf16.mxu1 %v3866_v62  ;;  %v3108_v48 = vcombine.high %v4249_v45, %v4252_v46  ;;  %v3885_v51 = vld [vmem:[%s4782_s1 + $0x260] sm:$0xff]   ;;  %v3105_v52 = vcombine.low %v4235_v26, %v4238_v30  ;;  %v3889_v55 = vld [vmem:[%s4782_s1 + $0x268] sm:$0xff]   ;;  %v3913_v43 = vld [vmem:[%s4782_s1 + $0x358] sm:$0xff]  }
  0x44   : > { %v3064_v4 = vcombine.high %v603_v0, %v631_v2  ;;  %v3063_v5 = vcombine.low %v603_v0, %v631_v2  ;;  %1387 = vmatprep.mubr.bf16.mxu0 %v3098_v41  ;;  %v3883_v41 = vld [vmem:[%s4782_s1 + $0x218] sm:$0xff]   ;;  %v3887_v54 = vld [vmem:[%s4782_s1 + $0x220] sm:$0xff]   ;;  %v3110_v56 = vcombine.high %v4299_v47, %v4302_v50  ;;  %v3107_v61 = vcombine.low %v4249_v45, %v4252_v46  ;;  %v3891_v0 = vld [vmem:[%s4782_s1 + $0x228] sm:$0xff]  }
  0x45   : > { %3555 = vmatpush3.bf16.msra.mxu0 %v3867_v1  ;;  %v3888_v62 = vld [vmem:[%s4782_s1 + $0x2a0] sm:$0xff]   ;;  %v3890_v1 = vld [vmem:[%s4782_s1 + $0x2e8] sm:$0xff]   ;;  %v3112_v2 = vcombine.high %v4311_v59, %v4314_v60  ;;  %v3234_v36 = vcombine.high %v4238_v30, %v4299_v47  ;;  %v3236_v25 = vcombine.high %v4252_v46, %v4311_v59  ;;  %v3916_v26 = vld [vmem:[%s4782_s1 + $0x398] sm:$0xff]  }
  0x46   : > { %3595 = vmatpush3.bf16.msra.mxu1 %v3868_v3  ;;  %1074 = vmatprep.mubr.bf16.mxu1 %v3064_v4  ;;  %v3892_v3 = vld [vmem:[%s4782_s1 + $0x2a8] sm:$0xff]   ;;  %v3893_v4 = vld [vmem:[%s4782_s1 + $0x270] sm:$0xff]   ;;  %v3920_v37 = vld [vmem:[%s4782_s1 + $0x3a0] sm:$0xff]  }
  0x47   : > { %3620 = vmatprep.subr.bf16.mxu0 %v3869_v7  ;;  %1075 = vmatmul.mubr.bf16.gmra.mrb[12].mxu1 %v3063_v5  ;;  %v3109_v5 = vcombine.low %v4299_v47, %v4302_v50  ;;  %v3895_v7 = vld [vmem:[%s4782_s1 + $0x230] sm:$0xff]   ;;  %v3923_v45 = vld [vmem:[%s4782_s1 + $0x328] sm:$0xff]   ;;  %v3929_v46 = vld [vmem:[%s4782_s1 + $0x378] sm:$0xff]  }
  0x48   : > { %3660 = vmatprep.subr.bf16.mxu1 %v3870_v8  ;;  %1452 = vmatprep.mubr.bf16.mxu1 %v3100_v6  ;;  %v3894_v6 = vld [vmem:[%s4782_s1 + $0x2f0] sm:$0xff]   ;;  %v3897_v8 = vld [vmem:[%s4782_s1 + $0x278] sm:$0xff]  }
  0x4b   : > { %1388 = vmatmul.mubr.bf16.vlgmr.msra.gmra.mrb[16].mxu0 %v3097_v9  ;;  %v3111_v9 = vcombine.low %v4311_v59, %v4314_v60 }
  0x4c   : > { %3621 = vmatpush3.bf16.msra.mxu0 %v3871_v10  ;;  %1395 = vmatprep.mubr.bf16.mxu0 %v3102_v12  ;;  %v3896_v10 = vld [vmem:[%s4782_s1 + $0x2b0] sm:$0xff]   ;;  %v3899_v12 = vld [vmem:[%s4782_s1 + $0x238] sm:$0xff]  }
  0x4d   : > { %3622 = vmatprep.subr.bf16.mxu0 %v3873_v13  ;;  %v3898_v13 = vld [vmem:[%s4782_s1 + $0x2f8] sm:$0xff]  }
  0x4f   : > { %1453 = vmatmul.mubr.bf16.vlgmr.msra.gmra.mrb[16].mxu1 %v3099_v14  ;;  %v3900_v14 = vld [vmem:[%s4782_s1 + $0x2b8] sm:$0xff]  }
  0x50   : > { %3661 = vmatpush3.bf16.msra.mxu1 %v3872_v32  ;;  %3623 = vmatpush3.bf16.msra.mxu0 %v3875_v15  ;;  %v3901_v32 = vld [vmem:[%s4782_s1 + $0x340] sm:$0xff]  }
  0x51   : > { %3662 = vmatprep.subr.bf16.mxu1 %v3874_v17  ;;  %1460 = vmatprep.mubr.bf16.mxu1 %v3104_v18  ;;  %v3902_v15 = vld [vmem:[%s4782_s1 + $0x3c0] sm:$0xff]  }
  0x52   : > { %3624 = vmatprep.subr.bf16.mxu0 %v3877_v21  ;;  %v3903_v17 = vld [vmem:[%s4782_s1 + $0x300] sm:$0xff]   ;;  %v3911_v21 = vld [vmem:[%s4782_s1 + $0x310] sm:$0xff]  }
  0x53   : > { %1396 = vmatmul.mubr.bf16.gmra.mrb[20].mxu0 %v3101_v23  ;;  %v3904_v18 = vld [vmem:[%s4782_s1 + $0x380] sm:$0xff]  }
  0x54   : > { %3663 = vmatpush3.bf16.msra.mxu1 %v3876_v42  ;;  %3625 = vmatpush3.bf16.msra.mxu0 %v3879_v27  ;;  %v3907_v42 = vld [vmem:[%s4782_s1 + $0x308] sm:$0xff]   ;;  %v3918_v23 = vld [vmem:[%s4782_s1 + $0x3e0] sm:$0xff]  }
  0x55   : > { %3664 = vmatprep.subr.bf16.mxu1 %v3878_v24  ;;  %3626 = vmatprep.subr.bf16.mxu0 %v3881_v31  ;;  %v3919_v24 = vld [vmem:[%s4782_s1 + $0x320] sm:$0xff]   ;;  %v3921_v27 = vld [vmem:[%s4782_s1 + $0x368] sm:$0xff]  }
  0x56   : > { %1403 = vmatprep.mubr.bf16.mxu0 %v3106_v34  ;;  %v3160_v34 = vld [vmem:[%s4100_s12 + $0x108] sm:$0xff] }
  0x57   : > { %1461 = vmatmul.mubr.bf16.gmra.mrb[20].mxu1 %v3103_v39  ;;  %v3240_v30 = vcombine.high %v4314_v60, %v3160_v34  ;;  %v2223_v59 = vshll.u32 %v3160_v34, 16 }
  0x58   : > { %3665 = vmatpush3.bf16.msra.mxu1 %v3880_v40  ;;  %3627 = vmatpush3.bf16.msra.mxu0 %v3883_v41  ;;  %v3922_v40 = vld [vmem:[%s4782_s1 + $0x3e8] sm:$0xff]   ;;  %v3925_v41 = vld [vmem:[%s4782_s1 + $0x370] sm:$0xff]  }
  0x59   : > { %3666 = vmatprep.subr.bf16.mxu1 %v3882_v44  ;;  %1468 = vmatprep.mubr.bf16.mxu1 %v3108_v48 }
  0x5a   : > { %3628 = vmatprep.subr.bf16.mxu0 %v3885_v51 }
  0x5b   : > { %1404 = vmatmul.mubr.bf16.gmra.mrb[24].mxu0 %v3105_v52  ;;  %v3927_v52 = vld [vmem:[%s4782_s1 + $0x330] sm:$0xff]  }
  0x5c   : > { %3667 = vmatpush3.bf16.msra.mxu1 %v3884_v49  ;;  %3629 = vmatpush3.bf16.msra.mxu0 %v3887_v54  ;;  %v3926_v49 = vld [vmem:[%s4782_s1 + $0x3f0] sm:$0xff]   ;;  %v3239_v54 = vcombine.low %v4314_v60, %v3160_v34  ;;  %v3277_v60 = vld [vmem:[%s4100_s12 + $0x40] sm:$0xff] }
  0x5d   : > { %3668 = vmatprep.subr.bf16.mxu1 %v3886_v53  ;;  %3630 = vmatprep.subr.bf16.mxu0 %v3889_v55  ;;  %v2220_v53 = vshrl.u32 %v3160_v34, 16  ;;  %v3930_v55 = vld [vmem:[%s4782_s1 + $0x3f8] sm:$0xff]  }
  0x5e   : > { %1411 = vmatprep.mubr.bf16.mxu0 %v3110_v56 }
  0x5f   : > { %1469 = vmatmul.mubr.bf16.gmra.mrb[24].mxu1 %v3107_v61  ;;  %v4616_v56 = vrot.slane %v2220_v53, 4  ;;  %v3931_v61 = vld [vmem:[%s4782_s1 + $0x338] sm:$0xff]  }
  0x60   : > { %3669 = vmatpush3.bf16.msra.mxu1 %v3888_v62  ;;  %3631 = vmatpush3.bf16.msra.mxu0 %v3891_v0  ;;  %v3273_v62 = vld [vmem:[%s4100_s12 + $0x20] sm:$0xff]  ;;  %v3275_v0 = vld [vmem:[%s4100_s12 + $0x30] sm:$0x11] }
  0x61   : > { %3670 = vmatprep.subr.bf16.mxu1 %v3890_v1  ;;  %1476 = vmatprep.mubr.bf16.mxu1 %v3112_v2  ;;  %v4625_v2 = vrot.slane %v2223_v59, 5  ;;  %v3284_v59 = vld [vmem:[%s4100_s12 + $0x78] sm:$0x11] }
  0x62   : > { %3632 = vmatprep.subr.bf16.mxu0 %v3893_v4  ;;  %v2010_v4 = vshrl.u32 %v3273_v62, 16 }
  0x63   : > { %1412 = vmatmul.mubr.bf16.gmra.mrb[28].mxu0 %v3109_v5  ;;  %v2013_v5 = vshll.u32 %v3273_v62, 16 }
  0x64   : > { %3671 = vmatpush3.bf16.msra.mxu1 %v3892_v3  ;;  %3633 = vmatpush3.bf16.msra.mxu0 %v3895_v7  ;;  %v3279_v3 = vld [vmem:[%s4100_s12 + $0x50] sm:$0x11]  ;;  %v2038_v7 = vshrl.u32 %v3277_v60, 16 }
  0x65   : > { %3672 = vmatprep.subr.bf16.mxu1 %v3894_v6  ;;  %3634 = vmatprep.subr.bf16.mxu0 %v3897_v8  ;;  %v2019_v6 = vshll.u32 %v3275_v0, 16  ;;  %v2041_v8 = vshll.u32 %v3277_v60, 16 }
  0x66   : > { %1871 = vmatprep.mubr.bf16.mxu0 %v3226_v11  ;;  %v3905_v11 = vld [vmem:[%s4782_s1 + $0x348] sm:$0xff]  }
  0x67   : > { %1477 = vmatmul.mubr.bf16.gmra.mrb[28].mxu1 %v3111_v9  ;;  %v2047_v9 = vshll.u32 %v3279_v3, 16 }
  0x68   : > { %3673 = vmatpush3.bf16.msra.mxu1 %v3896_v10  ;;  %3635 = vmatpush3.bf16.msra.mxu0 %v3899_v12  ;;  %v3274_v10 = vld [vmem:[%s4100_s12 + $0x28] sm:$0xff]  ;;  %v3276_v12 = vld [vmem:[%s4100_s12 + $0x38] sm:$0x11] }
  0x69   : > { %3674 = vmatprep.subr.bf16.mxu1 %v3898_v13  ;;  %1936 = vmatprep.mubr.bf16.mxu1 %v3228_v19  ;;  %v3906_v19 = vld [vmem:[%s4782_s1 + $0x3c8] sm:$0xff]   ;;  %v2012_v13 = vrot.slane %v2010_v4, 4 }
  0x6a   : > { %3700 = vmatprep.subr.bf16.mxu0 %v3901_v32  ;;  %v2021_v32 = vrot.slane %v2019_v6, 5  ;;  %v3286_v6 = vld [vmem:[%s4100_s12 + $0x88] sm:$0xff] }
  0x6b   : > { %1872 = vmatmul.mubr.bf16.vlgmr.msra.gmra.mrb[32].mxu0 %v3225_v29  ;;  %v3910_v29 = vld [vmem:[%s4782_s1 + $0x3d0] sm:$0xff]  }
  0x6c   : > { %3675 = vmatpush3.bf16.msra.mxu1 %v3900_v14  ;;  %3701 = vmatpush3.bf16.msra.mxu0 %v3903_v17  ;;  %v2015_v14 = vrot.slane %v2013_v5, 5  ;;  %v3280_v17 = vld [vmem:[%s4100_s12 + $0x58] sm:$0x11] }
  0x6d   : > { %3740 = vmatprep.subr.bf16.mxu1 %v3902_v15  ;;  %3702 = vmatprep.subr.bf16.mxu0 %v3905_v11  ;;  %v3278_v15 = vld [vmem:[%s4100_s12 + $0x48] sm:$0xff]  ;;  %v3932_v11 = vld [vmem:[%s4782_s1 + $0x3b8] sm:$0xff]  }
  0x6e   : > { %1879 = vmatprep.mubr.bf16.mxu0 %v3230_v38  ;;  %v3915_v38 = vld [vmem:[%s4782_s1 + $0x318] sm:$0xff]  }
  0x6f   : > { %1937 = vmatmul.mubr.bf16.vlgmr.msra.gmra.mrb[32].mxu1 %v3227_v16  ;;  %v3912_v16 = vld [vmem:[%s4782_s1 + $0x390] sm:$0xff]  }
  0x70   : > { %3741 = vmatpush3.bf16.msra.mxu1 %v3904_v18  ;;  %3703 = vmatpush3.bf16.msra.mxu0 %v3907_v42  ;;  %v2040_v18 = vrot.slane %v2038_v7, 4  ;;  %v2043_v42 = vrot.slane %v2041_v8, 5  ;;  %v3288_v7 = vld [vmem:[%s4100_s12 + $0x98] sm:$0x11] }
  0x71   : > { %3742 = vmatprep.subr.bf16.mxu1 %v3906_v19  ;;  %1944 = vmatprep.mubr.bf16.mxu1 %v3232_v20  ;;  %v3914_v20 = vld [vmem:[%s4782_s1 + $0x3d8] sm:$0xff]   ;;  %v2049_v19 = vrot.slane %v2047_v9, 5  ;;  %v2089_v9 = vshll.u32 %v3284_v59, 16  ;;  %v3294_v59 = vld [vmem:[%s4100_s12 + $0xc8] sm:$0xff] }
  0x72   : > { %3704 = vmatprep.subr.bf16.mxu0 %v3909_v22  ;;  %v2016_v22 = vor.u32 %v2015_v14, %v2012_v13 }
  0x73   : > { %1880 = vmatmul.mubr.bf16.gmra.mrb[36].mxu0 %v3229_v28  ;;  %v3917_v28 = vld [vmem:[%s4782_s1 + $0x360] sm:$0xff]  }
  0x74   : > { %3743 = vmatpush3.bf16.msra.mxu1 %v3908_v33  ;;  %3705 = vmatpush3.bf16.msra.mxu0 %v3911_v21  ;;  %v2024_v33 = vshrl.u32 %v3274_v10, 16  ;;  %v2033_v21 = vshll.u32 %v3276_v12, 16 }
  0x75   : > { %3744 = vmatprep.subr.bf16.mxu1 %v3910_v29  ;;  %3706 = vmatprep.subr.bf16.mxu0 %v3913_v43  ;;  %v2027_v29 = vshll.u32 %v3274_v10, 16  ;;  %v2052_v43 = vshrl.u32 %v3278_v15, 16 }
  0x76   : > { %1887 = vmatprep.mubr.bf16.mxu0 %v3234_v36  ;;  %v3281_v36 = vld [vmem:[%s4100_s12 + $0x60] sm:$0xff] }
  0x77   : > { %1945 = vmatmul.mubr.bf16.gmra.mrb[36].mxu1 %v3231_v35  ;;  %v3159_v35 = vld [vmem:[%s4100_s12 + $0x100] sm:$0xff]  ;;  %v2066_v34 = vshrl.u32 %v3281_v36, 16 }
  0x78   : > { %3745 = vmatpush3.bf16.msra.mxu1 %v3912_v16  ;;  %3707 = vmatpush3.bf16.msra.mxu0 %v3915_v38  ;;  %v3238_v31 = vcombine.high %v4302_v50, %v3159_v35  ;;  %v2206_v39 = vshrl.u32 %v3159_v35, 16  ;;  %v2209_v47 = vshll.u32 %v3159_v35, 16  ;;  %v3237_v48 = vcombine.low %v4302_v50, %v3159_v35 }
  0x79   : > { %3746 = vmatprep.subr.bf16.mxu1 %v3914_v20  ;;  %1952 = vmatprep.mubr.bf16.mxu1 %v3236_v25  ;;  %v2044_v16 = vor.u32 %v2043_v42, %v2040_v18  ;;  %v2026_v38 = vrot.slane %v2024_v33, 4  ;;  %v2055_v20 = vshll.u32 %v3278_v15, 16  ;;  %v2061_v25 = vshll.u32 %v3280_v17, 16  ;;  %v3291_v42 = vld [vmem:[%s4100_s12 + $0xb0] sm:$0x11] }
  0x7a   : > { %3708 = vmatprep.subr.bf16.mxu0 %v3917_v28  ;;  %v2208_v44 = vrot.slane %v2206_v39, 4  ;;  %v2211_v51 = vrot.slane %v2209_v47, 5  ;;  %v2017_v28 = vrot.slane %v2016_v22, 4  ;;  %v2091_v18 = vrot.slane %v2089_v9, 5 }
  0x7b   : > { %1888 = vmatmul.mubr.bf16.gmra.mrb[40].mxu0 %v3233_v58  ;;  %v3924_v58 = vld [vmem:[%s4782_s1 + $0x3a8] sm:$0xff]   ;;  %v2057_v35 = vrot.slane %v2055_v20, 5  ;;  %v2108_v33 = vshrl.u32 %v3286_v6, 16  ;;  %v2111_v22 = vshll.u32 %v3286_v6, 16 }
  0x7c   : > { %3747 = vmatpush3.bf16.msra.mxu1 %v3916_v26  ;;  %3709 = vmatpush3.bf16.msra.mxu0 %v3919_v24  ;;  %v2212_v50 = vor.u32 %v2211_v51, %v2208_v44  ;;  %v3283_v26 = vld [vmem:[%s4100_s12 + $0x70] sm:$0x11]  ;;  %v2035_v24 = vrot.slane %v2033_v21, 5  ;;  %v2022_v39 = vsel %vm4135_vm2, %v2017_v28, %v2021_v32  ;;  %v3282_v51 = vld [vmem:[%s4100_s12 + $0x68] sm:$0xff]  ;;  %v3289_v32 = vld [vmem:[%s4100_s12 + $0xa0] sm:$0xff]  ;;  %v2131_v28 = vshll.u32 %v3291_v42, 16 }
  0x7d   : > { %3748 = vmatprep.subr.bf16.mxu1 %v3918_v23  ;;  %3710 = vmatprep.subr.bf16.mxu0 %v3921_v27  ;;  %v2029_v23 = vrot.slane %v2027_v29, 5  ;;  %v2054_v27 = vrot.slane %v2052_v43, 4  ;;  %v2075_v47 = vshll.u32 %v3283_v26, 16  ;;  %v3287_v44 = vld [vmem:[%s4100_s12 + $0x90] sm:$0x11]  ;;  %v2080_v3 = vshrl.u32 %v3282_v51, 16 }
  0x7e   : > { %1895 = vmatprep.mubr.bf16.mxu0 %v3238_v31  ;;  %v4623_v1 = vrot.slane %v2212_v50, 4  ;;  %v2063_v31 = vrot.slane %v2061_v25, 5  ;;  %v2103_v60 = vshll.u32 %v3287_v44, 16  ;;  %v2083_v8 = vshll.u32 %v3282_v51, 16  ;;  %v3293_v26 = vld [vmem:[%s4100_s12 + $0xc0] sm:$0xff] }
  0x7f   : > { %1953 = vmatmul.mubr.bf16.gmra.mrb[40].mxu1 %v3235_v63  ;;  %v3928_v63 = vld [vmem:[%s4782_s1 + $0x3b0] sm:$0xff]   ;;  %v2082_v17 = vrot.slane %v2080_v3, 4  ;;  %v2117_v29 = vshll.u32 %v3288_v7, 16  ;;  %v2113_v20 = vrot.slane %v2111_v22, 5  ;;  %v2153_v44 = vshll.u32 %v3293_v26, 16 }
  0x80   : > { %3749 = vmatpush3.bf16.msra.mxu1 %v3920_v37  ;;  %3711 = vmatpush3.bf16.msra.mxu0 %v3923_v45  ;;  %v3285_v37 = vld [vmem:[%s4100_s12 + $0x80] sm:$0xff]  ;;  %v2045_v45 = vrot.slane %v2044_v16, 4  ;;  %v2105_v14 = vrot.slane %v2103_v60, 5  ;;  %v2125_v16 = vshll.u32 %v3289_v32, 16  ;;  %v3299_v7 = vld [vmem:[%s4100_s12 + $0xf0] sm:$0x11] }
  0x81   : > { %3750 = vmatprep.subr.bf16.mxu1 %v3922_v40  ;;  %1960 = vmatprep.mubr.bf16.mxu1 %v3240_v30  ;;  %v2030_v40 = vor.u32 %v2029_v23, %v2026_v38  ;;  %v2069_v30 = vshll.u32 %v3281_v36, 16  ;;  %v2122_v36 = vshrl.u32 %v3289_v32, 16  ;;  %v2110_v38 = vrot.slane %v2108_v33, 4  ;;  %v3297_v60 = vld [vmem:[%s4100_s12 + $0xe0] sm:$0xff] }
  0x82   : > { %3712 = vmatprep.subr.bf16.mxu0 %v3925_v41  ;;  %v2058_v41 = vor.u32 %v2057_v35, %v2054_v27  ;;  %v2119_v25 = vrot.slane %v2117_v29, 5  ;;  %v3295_v27 = vld [vmem:[%s4100_s12 + $0xd0] sm:$0x11]  ;;  %v3290_v35 = vld [vmem:[%s4100_s12 + $0xa8] sm:$0xff]  ;;  %v2178_v32 = vshrl.u32 %v3297_v60, 16  ;;  %v2187_v33 = vshll.u32 %v3299_v7, 16 }
  0x83   : > { %1896 = vmatmul.mubr.bf16.gmra.mrb[44].mxu0 %v3237_v48  ;;  %v2068_v48 = vrot.slane %v2066_v34, 4  ;;  %v2071_v50 = vrot.slane %v2069_v30, 5  ;;  %v2114_v34 = vor.u32 %v2113_v20, %v2110_v38  ;;  %v3292_v30 = vld [vmem:[%s4100_s12 + $0xb8] sm:$0x11]  ;;  %v2136_v51 = vshrl.u32 %v3290_v35, 16 }
  0x84   : > { %3751 = vmatpush3.bf16.msra.mxu1 %v3924_v58  ;;  %3713 = vmatpush3.bf16.msra.mxu0 %v3927_v52  ;;  %v2050_v58 = vsel %vm4135_vm2, %v2045_v45, %v2049_v19  ;;  %v2127_v45 = vrot.slane %v2125_v16, 5  ;;  %v2180_v29 = vrot.slane %v2178_v32, 4 }
  0x85   : > { %3752 = vmatprep.subr.bf16.mxu1 %v3926_v49  ;;  %3714 = vmatprep.subr.bf16.mxu0 %v3929_v46  ;;  %v2094_v49 = vshrl.u32 %v3285_v37, 16  ;;  %v3369_v52 = vcombine.low %v2022_v39, %v2050_v58  ;;  %v3370_v53 = vcombine.high %v2022_v39, %v2050_v58  ;;  %v2031_v46 = vrot.slane %v2030_v40, 4 }
  0x86   : > { %v2072_v0 = vor.u32 %v2071_v50, %v2068_v48  ;;  %v2133_v40 = vrot.slane %v2131_v28, 5  ;;  %v2115_v48 = vrot.slane %v2114_v34, 4  ;;  %v2155_v50 = vrot.slane %v2153_v44, 5 }
  0x87   : > { %1961 = vmatmul.mubr.bf16.gmra.mrb[44].mxu1 %v3239_v54  ;;  %v2077_v54 = vrot.slane %v2075_v47, 5  ;;  %2586 = vmatprep.mubr.bf16.mxu0 %v3370_v53  ;;  %v2036_v62 = vsel %vm4135_vm2, %v2031_v46, %v2035_v24 }
  0x88   : > { %3753 = vmatpush3.bf16.msra.mxu1 %v3928_v63  ;;  %3715 = vmatpush3.bf16.msra.mxu0 %v3931_v61  ;;  %v2059_v63 = vrot.slane %v2058_v41, 4  ;;  %v2097_v61 = vshll.u32 %v3285_v37, 16  ;;  %v2073_v13 = vrot.slane %v2072_v0, 4  ;;  %v2124_v37 = vrot.slane %v2122_v36, 4 }
  0x89   : > { %3754 = vmatprep.subr.bf16.mxu1 %v3930_v55  ;;  %v2096_v55 = vrot.slane %v2094_v49, 4  ;;  %v2150_v41 = vshrl.u32 %v3293_v26, 16  ;;  %v2159_v49 = vshll.u32 %v3295_v27, 16  ;;  %v2226_v36 = vor.u32 %v4625_v2, %v4616_v56  ;;  %v3304_v26 = vld [vmem:[%s4100_s12 + $0x118] sm:$0x11] }
  0x8a   : > { %v2064_v4 = vsel %vm4135_vm2, %v2059_v63, %v2063_v31  ;;  %v2099_v5 = vrot.slane %v2097_v61, 5  ;;  %v2078_v19 = vsel %vm4135_vm2, %v2073_v13, %v2077_v54  ;;  %v2128_v58 = vor.u32 %v2127_v45, %v2124_v37  ;;  %v3296_v61 = vld [vmem:[%s4100_s12 + $0xd8] sm:$0x11] }
  0x8b   : > { %2587 = vmatmul.mubr.bf16.vlgmr.msra.gmra.mrb[48].mxu0 %v3369_v52  ;;  %v3371_v10 = vcombine.low %v2036_v62, %v2064_v4  ;;  %v3372_v12 = vcombine.high %v2036_v62, %v2064_v4  ;;  %v2139_v52 = vshll.u32 %v3290_v35, 16  ;;  %v2152_v46 = vrot.slane %v2150_v41, 4 }
  0x8c   : > { %3755 = vmatpush3.bf16.msra.mxu1 %v3932_v11  ;;  %v2100_v15 = vor.u32 %v2099_v5, %v2096_v55  ;;  %v2085_v11 = vrot.slane %v2083_v8, 5  ;;  %v2129_v53 = vrot.slane %v2128_v58, 4  ;;  %v2145_v63 = vshll.u32 %v3292_v30, 16 }
  0x8d   : > { %2651 = vmatprep.mubr.bf16.mxu1 %v3372_v12  ;;  %v2120_v54 = vsel %vm4135_vm2, %v2115_v48, %v2119_v25  ;;  %v2161_v55 = vrot.slane %v2159_v49, 5  ;;  %v2138_v62 = vrot.slane %v2136_v51, 4  ;;  %v2141_v0 = vrot.slane %v2139_v52, 5 }
  0x8e   : > { %v2101_v21 = vrot.slane %v2100_v15, 4  ;;  %v2086_v43 = vor.u32 %v2085_v11, %v2082_v17  ;;  %v2134_v5 = vsel %vm4135_vm2, %v2129_v53, %v2133_v40  ;;  %v2156_v6 = vor.u32 %v2155_v50, %v2152_v46  ;;  %v3298_v17 = vld [vmem:[%s4100_s12 + $0xe8] sm:$0xff] }
  0x8f   : > { %2652 = vmatmul.mubr.bf16.vlgmr.msra.gmra.mrb[48].mxu1 %v3371_v10  ;;  %v2142_v8 = vor.u32 %v2141_v0, %v2138_v62  ;;  %v2147_v9 = vrot.slane %v2145_v63, 5  ;;  %v2164_v10 = vshrl.u32 %v3294_v59, 16  ;;  %v2167_v12 = vshll.u32 %v3294_v59, 16 }
  0x90   : > { %v2106_v23 = vsel %vm4135_vm2, %v2101_v21, %v2105_v14  ;;  %v2087_v24 = vrot.slane %v2086_v43, 4  ;;  %v2157_v13 = vrot.slane %v2156_v6, 4  ;;  %v2173_v14 = vshll.u32 %v3296_v61, 16  ;;  %v3300_v43 = vld [vmem:[%s4100_s12 + $0xf8] sm:$0x11] }
  0x91   : > { %v3374_v31 = vcombine.high %v2078_v19, %v2106_v23  ;;  %v3373_v39 = vcombine.low %v2078_v19, %v2106_v23  ;;  %v2181_v15 = vshll.u32 %v3297_v60, 16  ;;  %v2143_v11 = vrot.slane %v2142_v8, 4  ;;  %v3303_v19 = vld [vmem:[%s4100_s12 + $0x110] sm:$0x11] }
  0x92   : > { %v2092_v47 = vsel %vm4135_vm2, %v2087_v24, %v2091_v18  ;;  %v2166_v18 = vrot.slane %v2164_v10, 4  ;;  %v2169_v42 = vrot.slane %v2167_v12, 5  ;;  %v2162_v22 = vsel %vm4135_vm2, %v2157_v13, %v2161_v55 }
  0x93   : > { %2594 = vmatprep.mubr.bf16.mxu0 %v3374_v31  ;;  %v3376_v3 = vcombine.high %v2092_v47, %v2120_v54  ;;  %v3375_v4 = vcombine.low %v2092_v47, %v2120_v54  ;;  %v2183_v21 = vrot.slane %v2181_v15, 5  ;;  %v3378_v16 = vcombine.high %v2134_v5, %v2162_v22 }
  0x94   : > { %2595 = vmatmul.mubr.bf16.gmra.mrb[52].mxu0 %v3373_v39  ;;  %v2170_v38 = vor.u32 %v2169_v42, %v2166_v18  ;;  %v2175_v20 = vrot.slane %v2173_v14, 5  ;;  %v3377_v25 = vcombine.low %v2134_v5, %v2162_v22  ;;  %v2189_v23 = vrot.slane %v2187_v33, 5 }
  0x95   : > { %2659 = vmatprep.mubr.bf16.mxu1 %v3376_v3  ;;  %v2184_v28 = vor.u32 %v2183_v21, %v2180_v29  ;;  %v2215_v24 = vshll.u32 %v3303_v19, 16  ;;  %v2192_v27 = vshrl.u32 %v3298_v17, 16  ;;  %2602 = vmatprep.mubr.bf16.mxu0 %v3378_v16  ;;  %v2148_v37 = vsel %vm4135_vm2, %v2143_v11, %v2147_v9 }
  0x96   : > { %v2171_v45 = vrot.slane %v2170_v38, 4  ;;  %v2195_v35 = vshll.u32 %v3298_v17, 16  ;;  %v2201_v31 = vshll.u32 %v3300_v43, 16  ;;  %v2229_v2 = vshll.u32 %v3304_v26, 16 }
  0x97   : > { %2660 = vmatmul.mubr.bf16.gmra.mrb[52].mxu1 %v3375_v4  ;;  %v2185_v34 = vrot.slane %v2184_v28, 4  ;;  %v2217_v39 = vrot.slane %v2215_v24, 5  ;;  %v2194_v56 = vrot.slane %v2192_v27, 4  ;;  %v2227_v47 = vrot.slane %v2226_v36, 4 }
  0x98   : > { %v2176_v40 = vsel %vm4135_vm2, %v2171_v45, %v2175_v20  ;;  %v2197_v30 = vrot.slane %v2195_v35, 5  ;;  %v2203_v52 = vrot.slane %v2201_v31, 5  ;;  %v2231_v53 = vrot.slane %v2229_v2, 5 }
  0x99   : > { %v3380_v58 = vcombine.high %v2148_v37, %v2176_v40  ;;  %v3379_v41 = vcombine.low %v2148_v37, %v2176_v40  ;;  %v2190_v44 = vsel %vm4135_vm2, %v2185_v34, %v2189_v23  ;;  %v2218_v48 = vsel %vm4135_vm2, %v4623_v1, %v2217_v39 }
  0x9a   : > { %v3382_v49 = vcombine.high %v2190_v44, %v2218_v48  ;;  %v2198_v51 = vor.u32 %v2197_v30, %v2194_v56  ;;  %v3381_v46 = vcombine.low %v2190_v44, %v2218_v48  ;;  %v2232_v59 = vsel %vm4135_vm2, %v2227_v47, %v2231_v53 }
  0x9b   : > { %2667 = vmatprep.mubr.bf16.mxu1 %v3380_v58 }
  0x9c   : > { %2603 = vmatmul.mubr.bf16.gmra.mrb[56].mxu0 %v3377_v25  ;;  %v2199_v50 = vrot.slane %v2198_v51, 4 }
  0x9d   : > { %2610 = vmatprep.mubr.bf16.mxu0 %v3382_v49 }
  0x9e   : > { %v2204_v63 = vsel %vm4135_vm2, %v2199_v50, %v2203_v52 }
  0x9f   : > { %2668 = vmatmul.mubr.bf16.gmra.mrb[56].mxu1 %v3379_v41  ;;  %v3384_v54 = vcombine.high %v2204_v63, %v2232_v59  ;;  %v3383_v55 = vcombine.low %v2204_v63, %v2232_v59 }
  0xa1   : > { %2675 = vmatprep.mubr.bf16.mxu1 %v3384_v54 }
  0xa4   : > { %2611 = vmatmul.mubr.bf16.gmra.mrb[60].mxu0 %v3381_v46 }
  0xa7   : > { %2676 = vmatmul.mubr.bf16.gmra.mrb[60].mxu1 %v3383_v55 }
  0xfb   : > { %v3476_v1 = vpop.f32.mrb[0].mxu0 }
  0xfc   : > { %v3477_v61 = vpop.f32.mrb[1].mxu0  ;;  %v3516_v3 = vpop.f32.mrb[0].mxu1 }
  0xfd   : > { %v3478_v62 = vadd.f32 %v3477_v61, %v3476_v1  ;;  %v3479_v0 = vpop.f32.mrb[2].mxu0  ;;  %v3517_v5 = vpop.f32.mrb[1].mxu1 }
  0xfe   : > { %v3480_v60 = vpop.f32.mrb[3].mxu0  ;;  %v3518_v6 = vadd.f32 %v3517_v5, %v3516_v3  ;;  %v3519_v7 = vpop.f32.mrb[2].mxu1 }
  0xff   : > { %v3481_v4 = vadd.f32 %v3480_v60, %v3479_v0  ;;  %v3520_v8 = vpop.f32.mrb[3].mxu1 }
 0x100   : > { %v1053_v9 = vadd.f32 %v3518_v6, %v3478_v62  ;;  %v3521_v10 = vadd.f32 %v3520_v8, %v3519_v7 }
 0x102   : > { %v1056_v57 = vadd.f32 %v3521_v10, %v3481_v4 }
 0x105   : > { %v3482_v12 = vpop.f32.mrb[4].mxu0 }
 0x106   : > { %v3483_v13 = vpop.f32.mrb[5].mxu0 }
 0x107   : > { %v3484_v14 = vadd.f32 %v3483_v13, %v3482_v12  ;;  %v3485_v32 = vpop.f32.mrb[6].mxu0  ;;  %v3522_v17 = vpop.f32.mrb[4].mxu1 }
 0x108   : > { %v3486_v15 = vpop.f32.mrb[7].mxu0  ;;  %v3523_v18 = vpop.f32.mrb[5].mxu1 }
 0x109   : > { %v3487_v11 = vadd.f32 %v3486_v15, %v3485_v32  ;;  %v3524_v42 = vadd.f32 %v3523_v18, %v3522_v17  ;;  %v3525_v19 = vpop.f32.mrb[6].mxu1 }
 0x10a   : > { %v3526_v33 = vpop.f32.mrb[7].mxu1 }
 0x10b   : > { %v1061_v22 = vadd.f32 %v3524_v42, %v3484_v14  ;;  %v3527_v29 = vadd.f32 %v3526_v33, %v3525_v19 }
 0x10d   : > { %v1064_v21 = vadd.f32 %v3527_v29, %v3487_v11 }
 0x10e   : > { %v3488_v43 = vpop.f32.mrb[8].mxu0 }
 0x10f   : > { %v3489_v36 = vpop.f32.mrb[9].mxu0 }
 0x110   : > { %v3490_v16 = vadd.f32 %v3489_v36, %v3488_v43  ;;  %v3491_v38 = vpop.f32.mrb[10].mxu0  ;;  %v3528_v25 = vpop.f32.mrb[8].mxu1 }
 0x111   : > { %v3492_v20 = vpop.f32.mrb[11].mxu0  ;;  %v3529_v28 = vpop.f32.mrb[9].mxu1 }
 0x112   : > { %v3493_v26 = vadd.f32 %v3492_v20, %v3491_v38  ;;  %v3530_v23 = vadd.f32 %v3529_v28, %v3528_v25  ;;  %v3531_v24 = vpop.f32.mrb[10].mxu1 }
 0x113   : > { %v3532_v27 = vpop.f32.mrb[11].mxu1 }
 0x114   : > { %v1069_v37 = vadd.f32 %v3530_v23, %v3490_v16  ;;  %v3533_v45 = vadd.f32 %v3532_v27, %v3531_v24 }
 0x116   : > { %v1072_v35 = vadd.f32 %v3533_v45, %v3493_v26  ;;  %v3494_v31 = vpop.f32.mrb[12].mxu0 }
 0x117   : > { %v3495_v34 = vpop.f32.mrb[13].mxu0 }
 0x118   : > { %v3496_v39 = vadd.f32 %v3495_v34, %v3494_v31  ;;  %v3497_v56 = vpop.f32.mrb[14].mxu0 }
 0x119   : > { %v3498_v2 = vpop.f32.mrb[15].mxu0 }
 0x11a   : > { %v3534_v40 = vpop.f32.mrb[12].mxu1  ;;  %v3499_v30 = vadd.f32 %v3498_v2, %v3497_v56 }
 0x11b   : > { %v3535_v47 = vpop.f32.mrb[13].mxu1 }
 0x11c   : > { %v3536_v58 = vadd.f32 %v3535_v47, %v3534_v40  ;;  %v3537_v41 = vpop.f32.mrb[14].mxu1 }
 0x11d   : > { %v3538_v44 = vpop.f32.mrb[15].mxu1 }
 0x11e   : > { %v1077_v48 = vadd.f32 %v3536_v58, %v3496_v39  ;;  %v3539_v49 = vadd.f32 %v3538_v44, %v3537_v41  ;;  %v3556_v51 = vpop.f32.mrb[16].mxu0 }
 0x11f   : > { %v3557_v52 = vpop.f32.mrb[17].mxu0 }
 0x120   : > { %v1080_v53 = vadd.f32 %v3539_v49, %v3499_v30  ;;  %v3558_v46 = vadd.f32 %v3557_v52, %v3556_v51  ;;  %v3559_v50 = vpop.f32.mrb[18].mxu0 }
 0x121   : > { %v3560_v59 = vpop.f32.mrb[19].mxu0 }
 0x122   : > { %v3596_v63 = vpop.f32.mrb[16].mxu1  ;;  %v1390_v54 = vadd.f32 %v3558_v46, %v1053_v9  ;;  %v3561_v55 = vadd.f32 %v3560_v59, %v3559_v50 }
 0x123   : > { %v3597_v1 = vpop.f32.mrb[17].mxu1 }
 0x124   : > { %v3598_v61 = vadd.f32 %v3597_v1, %v3596_v63  ;;  %v3599_v62 = vpop.f32.mrb[18].mxu1  ;;  %v1393_v0 = vadd.f32 %v3561_v55, %v1056_v57 }
 0x125   : > { %v3600_v60 = vpop.f32.mrb[19].mxu1 }
 0x126   : > { %v4693_v3 = vadd.f32 %v3598_v61, %v1390_v54  ;;  %v3601_v4 = vadd.f32 %v3600_v60, %v3599_v62  ;;  %v3562_v5 = vpop.f32.mrb[20].mxu0 }
 0x127   : > { %v3563_v6 = vpop.f32.mrb[21].mxu0 }
 0x128   : > { %v4695_v7 = vadd.f32 %v3601_v4, %v1393_v0  ;;  %v3564_v8 = vadd.f32 %v3563_v6, %v3562_v5  ;;  %v3565_v10 = vpop.f32.mrb[22].mxu0 }
 0x129   : > { %v3566_v12 = vpop.f32.mrb[23].mxu0 }
 0x12a   : > { %v3602_v13 = vpop.f32.mrb[20].mxu1  ;;  %v1398_v14 = vadd.f32 %v3564_v8, %v1061_v22  ;;  %v3567_v32 = vadd.f32 %v3566_v12, %v3565_v10 }
 0x12b   : > { %v3603_v9 = vpop.f32.mrb[21].mxu1 }
 0x12c   : > { %v3604_v15 = vadd.f32 %v3603_v9, %v3602_v13  ;;  %v3605_v17 = vpop.f32.mrb[22].mxu1  ;;  %v1401_v11 = vadd.f32 %v3567_v32, %v1064_v21 }
 0x12d   : > { %v3606_v18 = vpop.f32.mrb[23].mxu1 }
 0x12e   : > { %v4697_v57 = vadd.f32 %v3604_v15, %v1398_v14  ;;  %v3607_v42 = vadd.f32 %v3606_v18, %v3605_v17  ;;  %v3568_v19 = vpop.f32.mrb[24].mxu0 }
 0x12f   : > { %v3569_v33 = vpop.f32.mrb[25].mxu0 }
 0x130   : > { %v4699_v29 = vadd.f32 %v3607_v42, %v1401_v11  ;;  %v3570_v43 = vadd.f32 %v3569_v33, %v3568_v19  ;;  %v3571_v36 = vpop.f32.mrb[26].mxu0 }
 0x131   : > { %v3572_v16 = vpop.f32.mrb[27].mxu0 }
 0x132   : > { %v3608_v38 = vpop.f32.mrb[24].mxu1  ;;  %v1406_v20 = vadd.f32 %v3570_v43, %v1069_v37  ;;  %v3573_v25 = vadd.f32 %v3572_v16, %v3571_v36 }
 0x133   : > { %v3609_v22 = vpop.f32.mrb[25].mxu1 }
 0x134   : > { %v3610_v26 = vadd.f32 %v3609_v22, %v3608_v38  ;;  %v3611_v28 = vpop.f32.mrb[26].mxu1  ;;  %v1409_v23 = vadd.f32 %v3573_v25, %v1072_v35 }
 0x135   : > { %v3612_v24 = vpop.f32.mrb[27].mxu1 }
 0x136   : > { %v4701_v21 = vadd.f32 %v3610_v26, %v1406_v20  ;;  %v3613_v27 = vadd.f32 %v3612_v24, %v3611_v28  ;;  %v3574_v45 = vpop.f32.mrb[28].mxu0 }
 0x137   : > { %v3575_v31 = vpop.f32.mrb[29].mxu0 }
 0x138   : > { %v4703_v34 = vadd.f32 %v3613_v27, %v1409_v23  ;;  %v3576_v39 = vadd.f32 %v3575_v31, %v3574_v45  ;;  %v3577_v56 = vpop.f32.mrb[30].mxu0 }
 0x139   : > { %v3578_v2 = vpop.f32.mrb[31].mxu0 }
 0x13a   : > { %v3614_v40 = vpop.f32.mrb[28].mxu1  ;;  %v1414_v30 = vadd.f32 %v3576_v39, %v1077_v48  ;;  %v3579_v47 = vadd.f32 %v3578_v2, %v3577_v56 }
 0x13b   : > { %v3615_v37 = vpop.f32.mrb[29].mxu1 }
 0x13c   : > { %v3616_v58 = vadd.f32 %v3615_v37, %v3614_v40  ;;  %v3617_v41 = vpop.f32.mrb[30].mxu1  ;;  %v1417_v44 = vadd.f32 %v3579_v47, %v1080_v53 }
 0x13d   : > { %v3618_v49 = vpop.f32.mrb[31].mxu1 }
 0x13e   : > { %v4705_v35 = vadd.f32 %v3616_v58, %v1414_v30  ;;  %v3619_v51 = vadd.f32 %v3618_v49, %v3617_v41  ;;  %v3636_v52 = vpop.f32.mrb[32].mxu0 }
 0x13f   : > { %v3637_v46 = vpop.f32.mrb[33].mxu0 }
 0x140   : > { %v1482_v50 = vadd.f32 %v3619_v51, %v1417_v44  ;;  %v3638_v59 = vadd.f32 %v3637_v46, %v3636_v52  ;;  %v3639_v63 = vpop.f32.mrb[34].mxu0 }
 0x141   : > { %v3640_v54 = vpop.f32.mrb[35].mxu0 }
 0x142   : > { %v3676_v55 = vpop.f32.mrb[32].mxu1  ;;  %v3641_v1 = vadd.f32 %v3640_v54, %v3639_v63 }
 0x143   : > { %v3677_v61 = vpop.f32.mrb[33].mxu1 }
 0x144   : > { %v3678_v62 = vadd.f32 %v3677_v61, %v3676_v55  ;;  %v3679_v48 = vpop.f32.mrb[34].mxu1 }
 0x145   : > { %v3680_v0 = vpop.f32.mrb[35].mxu1 }
 0x146   : > { %v1939_v60 = vadd.f32 %v3678_v62, %v3638_v59  ;;  %v3681_v4 = vadd.f32 %v3680_v0, %v3679_v48  ;;  %v3642_v5 = vpop.f32.mrb[36].mxu0 }
 0x147   : > { %v3643_v53 = vpop.f32.mrb[37].mxu0 }
 0x148   : > { %v1969_v6 = vadd.f32 %v1939_v60, %v4693_v3  ;;  %v1942_v8 = vadd.f32 %v3681_v4, %v3641_v1  ;;  %v3644_v10 = vadd.f32 %v3643_v53, %v3642_v5  ;;  %v3645_v12 = vpop.f32.mrb[38].mxu0 }
 0x149   : > { %v3646_v13 = vpop.f32.mrb[39].mxu0 }
 0x14a   : > { %v4709_v14 = vadd.f32 %v1942_v8, %v4695_v7  ;;  %v3682_v32 = vpop.f32.mrb[36].mxu1  ;;  %v3647_v9 = vadd.f32 %v3646_v13, %v3645_v12 }
 0x14b   : > { %v3683_v15 = vpop.f32.mrb[37].mxu1 }
 0x14c   : > { %v3684_v17 = vadd.f32 %v3683_v15, %v3682_v32  ;;  %v3685_v11 = vpop.f32.mrb[38].mxu1 }
 0x14d   : > { %v3686_v18 = vpop.f32.mrb[39].mxu1 }
 0x14e   : > { %v1947_v42 = vadd.f32 %v3684_v17, %v3644_v10  ;;  %v3687_v19 = vadd.f32 %v3686_v18, %v3685_v11  ;;  %v3648_v33 = vpop.f32.mrb[40].mxu0 }
 0x14f   : > { %v3649_v43 = vpop.f32.mrb[41].mxu0 }
 0x150   : > { %v4712_v36 = vadd.f32 %v1947_v42, %v4697_v57  ;;  %v1950_v3 = vadd.f32 %v3687_v19, %v3647_v9  ;;  %v3650_v16 = vadd.f32 %v3649_v43, %v3648_v33  ;;  %v3651_v38 = vpop.f32.mrb[42].mxu0 }
 0x151   : > { %v3652_v20 = vpop.f32.mrb[43].mxu0 }
 0x152   : > { %v4715_v7 = vadd.f32 %v1950_v3, %v4699_v29  ;;  %v3688_v25 = vpop.f32.mrb[40].mxu1  ;;  %v3653_v22 = vadd.f32 %v3652_v20, %v3651_v38 }
 0x153   : > { %v3689_v26 = vpop.f32.mrb[41].mxu1 }
 0x154   : > { %v3690_v28 = vadd.f32 %v3689_v26, %v3688_v25  ;;  %v3691_v23 = vpop.f32.mrb[42].mxu1 }
 0x155   : > { %v3692_v24 = vpop.f32.mrb[43].mxu1 }
 0x156   : > { %v1955_v27 = vadd.f32 %v3690_v28, %v3650_v16  ;;  %v3693_v45 = vadd.f32 %v3692_v24, %v3691_v23  ;;  %v3654_v31 = vpop.f32.mrb[44].mxu0 }
 0x157   : > { %v3655_v39 = vpop.f32.mrb[45].mxu0 }
 0x158   : > { %v4718_v57 = vadd.f32 %v1955_v27, %v4701_v21  ;;  %v1958_v56 = vadd.f32 %v3693_v45, %v3653_v22  ;;  %v3656_v2 = vadd.f32 %v3655_v39, %v3654_v31  ;;  %v3657_v40 = vpop.f32.mrb[46].mxu0 }
 0x159   : > { %v3658_v30 = vpop.f32.mrb[47].mxu0 }
 0x15a   : > { %v4721_v29 = vadd.f32 %v1958_v56, %v4703_v34  ;;  %v3694_v47 = vpop.f32.mrb[44].mxu1  ;;  %v3659_v37 = vadd.f32 %v3658_v30, %v3657_v40 }
 0x15b   : > { %v3695_v58 = vpop.f32.mrb[45].mxu1 }
 0x15c   : > { %v3696_v41 = vadd.f32 %v3695_v58, %v3694_v47  ;;  %v3697_v44 = vpop.f32.mrb[46].mxu1 }
 0x15d   : > { %v3698_v49 = vpop.f32.mrb[47].mxu1 }
 0x15e   : > { %v1963_v51 = vadd.f32 %v3696_v41, %v3656_v2  ;;  %v3699_v52 = vadd.f32 %v3698_v49, %v3697_v44  ;;  %v3716_v63 = vpop.f32.mrb[48].mxu0 }
 0x15f   : > { %v3717_v54 = vpop.f32.mrb[49].mxu0 }
 0x160   : > { %v4724_v46 = vadd.f32 %v1963_v51, %v4705_v35  ;;  %v1966_v21 = vadd.f32 %v3699_v52, %v3659_v37  ;;  %v3718_v55 = vadd.f32 %v3717_v54, %v3716_v63  ;;  %v3719_v34 = vpop.f32.mrb[50].mxu0 }
 0x161   : > { %v3720_v1 = vpop.f32.mrb[51].mxu0 }
 0x162   : > { %v4726_v59 = vadd.f32 %v1966_v21, %v1482_v50  ;;  %v3756_v61 = vpop.f32.mrb[48].mxu1  ;;  %v3721_v62 = vadd.f32 %v3720_v1, %v3719_v34  ;;  %v4731_v50 = vld [vmem:[%s4783_s2] ss:$0 sm:$0xff] }
 0x163   : > { %v3757_v48 = vpop.f32.mrb[49].mxu1 }
 0x164   : > { %v3758_v0 = vadd.f32 %v3757_v48, %v3756_v61  ;;  %v3759_v60 = vpop.f32.mrb[50].mxu1 }
 0x165   : > { %v3760_v4 = vpop.f32.mrb[51].mxu1 }
 0x166   : > { %v2654_v5 = vadd.f32 %v3758_v0, %v3718_v55  ;;  %v3761_v53 = vadd.f32 %v3760_v4, %v3759_v60 }
 0x167   : > { %v3722_v10 = vpop.f32.mrb[52].mxu0 }
 0x168   : > { %v2684_v8 = vadd.f32 %v2654_v5, %v1969_v6  ;;  %v2657_v35 = vadd.f32 %v3761_v53, %v3721_v62  ;;  %v3723_v12 = vpop.f32.mrb[53].mxu0 }
 0x169   : > { %v3724_v32 = vadd.f32 %v3723_v12, %v3722_v10  ;;  %v3725_v9 = vpop.f32.mrb[54].mxu0 }
 0x16a   : > { %v2685_v13 = vadd.f32 %v2657_v35, %v4709_v14  ;;  %v3726_v15 = vpop.f32.mrb[55].mxu0  ;;  %v4736_v17 = vadd.f32 %v4731_v50, %v2684_v8  ;;  %v3762_v18 = vpop.f32.mrb[52].mxu1 }
 0x16b   : > { %v3727_v6 = vadd.f32 %v3726_v15, %v3725_v9  ;;  %v3763_v19 = vpop.f32.mrb[53].mxu1 }
 0x16c   : > { %v4739_v11 = vadd.f32 %v4731_v50, %v2685_v13  ;;  %v3764_v33 = vadd.f32 %v3763_v19, %v3762_v18  ;;  %v3765_v43 = vpop.f32.mrb[54].mxu1 }
 0x16d   : > { %v3766_v3 = vpop.f32.mrb[55].mxu1 }
 0x16e   : > { %v3440_v14 = vpack.c.bf16 %v4739_v11, %v4736_v17  ;;  %v2747_v42 = vadd.f32 %v4739_v11, %v4736_v17  ;;  %v2662_v16 = vadd.f32 %v3764_v33, %v3724_v32  ;;  %v3767_v38 = vadd.f32 %v3766_v3, %v3765_v43 }
 0x16f   : > { %v3728_v20 = vpop.f32.mrb[56].mxu0 }
 0x170   : > { %3441 = vst [vmem:[%s4744_s28] sm:$0xff] %v3440_v14   ;;  %v2686_v25 = vadd.f32 %v2662_v16, %v4712_v36  ;;  %v2665_v22 = vadd.f32 %v3767_v38, %v3727_v6  ;;  %v3729_v26 = vpop.f32.mrb[57].mxu0 }
 0x171   : > { %v3730_v28 = vadd.f32 %v3729_v26, %v3728_v20  ;;  %v3731_v23 = vpop.f32.mrb[58].mxu0 }
 0x172   : > { %v2701_v24 = vadd.f32 %v4731_v50, %v2686_v25  ;;  %v2687_v27 = vadd.f32 %v2665_v22, %v4715_v7  ;;  %v3732_v45 = vpop.f32.mrb[59].mxu0  ;;  %v3768_v2 = vpop.f32.mrb[56].mxu1 }
 0x173   : > { %v3733_v31 = vadd.f32 %v3732_v45, %v3731_v23  ;;  %v3769_v40 = vpop.f32.mrb[57].mxu1 }
 0x174   : > { %v2748_v39 = vadd.f32 %v2747_v42, %v2701_v24  ;;  %v2702_v56 = vadd.f32 %v4731_v50, %v2687_v27  ;;  %v3770_v37 = vadd.f32 %v3769_v40, %v3768_v2  ;;  %v3771_v36 = vpop.f32.mrb[58].mxu1 }
 0x175   : > { %v3772_v58 = vpop.f32.mrb[59].mxu1 }
 0x176   : > { %v3445_v30 = vpack.c.bf16 %v2702_v56, %v2701_v24  ;;  %v2749_v47 = vadd.f32 %v2748_v39, %v2702_v56  ;;  %v2670_v44 = vadd.f32 %v3770_v37, %v3730_v28  ;;  %v3773_v49 = vadd.f32 %v3772_v58, %v3771_v36 }
 0x177   : > { %v3734_v41 = vpop.f32.mrb[60].mxu0 }
 0x178   : > { %3457 = vst [vmem:[%s4744_s28 + $0x8] sm:$0xff] %v3445_v30   ;;  %v3735_v51 = vpop.f32.mrb[61].mxu0  ;;  %v2688_v7 = vadd.f32 %v2670_v44, %v4718_v57  ;;  %v2673_v63 = vadd.f32 %v3773_v49, %v3733_v31 }
 0x179   : > { %v3736_v52 = vadd.f32 %v3735_v51, %v3734_v41  ;;  %v3737_v21 = vpop.f32.mrb[62].mxu0 }
 0x17a   : > { %v3738_v54 = vpop.f32.mrb[63].mxu0  ;;  %v2703_v34 = vadd.f32 %v4731_v50, %v2688_v7  ;;  %v2689_v1 = vadd.f32 %v2673_v63, %v4721_v29  ;;  %v3774_v61 = vpop.f32.mrb[60].mxu1 }
 0x17b   : > { %v3739_v55 = vadd.f32 %v3738_v54, %v3737_v21  ;;  %v3775_v62 = vpop.f32.mrb[61].mxu1 }
 0x17c   : > { %v2750_v48 = vadd.f32 %v2749_v47, %v2703_v34  ;;  %v2704_v0 = vadd.f32 %v4731_v50, %v2689_v1  ;;  %v3776_v60 = vadd.f32 %v3775_v62, %v3774_v61  ;;  %v3777_v4 = vpop.f32.mrb[62].mxu1 }
 0x17d   : > { %v3778_v5 = vpop.f32.mrb[63].mxu1 }
 0x17e   : > { %v3450_v53 = vpack.c.bf16 %v2704_v0, %v2703_v34  ;;  %v2751_v8 = vadd.f32 %v2750_v48, %v2704_v0  ;;  %v2678_v57 = vadd.f32 %v3776_v60, %v3736_v52  ;;  %v3779_v35 = vadd.f32 %v3778_v5, %v3777_v4 }
 0x180   : > { %3458 = vst [vmem:[%s4744_s28 + $0x10] sm:$0xff] %v3450_v53   ;;  %v2690_v10 = vadd.f32 %v2678_v57, %v4724_v46  ;;  %v2681_v12 = vadd.f32 %v3779_v35, %v3739_v55 }
 0x182   : > { %v2705_v13 = vadd.f32 %v4731_v50, %v2690_v10  ;;  %v2691_v29 = vadd.f32 %v2681_v12, %v4726_v59 }
 0x184   : > { %v2752_v32 = vadd.f32 %v2751_v8, %v2705_v13  ;;  %v2706_v9 = vadd.f32 %v4731_v50, %v2691_v29 }
 0x186   : > { %v3455_v15 = vpack.c.bf16 %v2706_v9, %v2705_v13  ;;  %v2753_v6 = vadd.f32 %v2752_v32, %v2706_v9 }
 0x188   : > { %3459 = vst [vmem:[%s4744_s28 + $0x18] sm:$0xff] %v3455_v15   ;;  %v2754_v18 = vrot.slane %v2753_v6, 4 }
 0x18a   : > { %v2755_v14 = vadd.f32 %v2754_v18, %v2753_v6 }
 0x18c   : > { %v2756_v42 = vrot.slane %v2755_v14, 2 }
 0x18e   : > { %v2757_v19 = vadd.f32 %v2756_v42, %v2755_v14 }
 0x190   : > { %v2758_v33 = vrot.slane %v2757_v19, 1 }
 0x192   : > { %v2759_v43 = vadd.f32 %v2758_v33, %v2757_v19 }
 0x194   : > { %v2760_v3 = vmul.f32 0.015625, %v2759_v43 }
 0x196   : > { %v2761_v46 = vsub.f32 %v4736_v17, %v2760_v3  ;;  %v2762_v16 = vsub.f32 %v4739_v11, %v2760_v3  ;;  %v2763_v38 = vsub.f32 %v2701_v24, %v2760_v3  ;;  %v2764_v20 = vsub.f32 %v2702_v56, %v2760_v3 }
 0x197   : > { %v2765_v59 = vsub.f32 %v2703_v34, %v2760_v3  ;;  %v2766_v25 = vsub.f32 %v2704_v0, %v2760_v3  ;;  %v2767_v22 = vsub.f32 %v2705_v13, %v2760_v3  ;;  %v2768_v50 = vsub.f32 %v2706_v9, %v2760_v3 }
 0x198   : > { %v2769_v26 = vmul.f32 %v2761_v46, %v2761_v46  ;;  %v2770_v28 = vmul.f32 %v2762_v16, %v2762_v16  ;;  %v2771_v23 = vmul.f32 %v2763_v38, %v2763_v38  ;;  %v2772_v45 = vmul.f32 %v2764_v20, %v2764_v20 }
 0x199   : > { %v2773_v39 = vmul.f32 %v2765_v59, %v2765_v59  ;;  %v2774_v40 = vmul.f32 %v2766_v25, %v2766_v25  ;;  %v2775_v17 = vmul.f32 %v2767_v22, %v2767_v22  ;;  %v2776_v11 = vmul.f32 %v2768_v50, %v2768_v50 }
 0x19a   : > { %v2777_v27 = vadd.f32 %v2770_v28, %v2769_v26 }
 0x19c   : > { %v2778_v31 = vadd.f32 %v2777_v27, %v2771_v23 }
 0x19e   : > { %v2779_v2 = vadd.f32 %v2778_v31, %v2772_v45 }
 0x1a0   : > { %v2780_v30 = vadd.f32 %v2779_v2, %v2773_v39 }
 0x1a2   : > { %v2781_v47 = vadd.f32 %v2780_v30, %v2774_v40 }
 0x1a4   : > { %v2782_v24 = vadd.f32 %v2781_v47, %v2775_v17 }
 0x1a6   : > { %v2783_v56 = vadd.f32 %v2782_v24, %v2776_v11 }
 0x1a8   : > { %v2784_v37 = vrot.slane %v2783_v56, 4 }
 0x1aa   : > { %v2785_v36 = vadd.f32 %v2784_v37, %v2783_v56 }
 0x1ac   : > { %v2786_v58 = vrot.slane %v2785_v36, 2 }
 0x1ae   : > { %v2787_v41 = vadd.f32 %v2786_v58, %v2785_v36 }
 0x1b0   : > { %v2788_v44 = vrot.slane %v2787_v41, 1 }
 0x1b2   : > { %v2789_v49 = vadd.f32 %v2788_v44, %v2787_v41 }
 0x1b4   : > { %v2791_v51 = vsel %vm2790_vm3, %v2759_v43, %v2789_v49 }
 0x1b5   : > { %2792 = vst [vmem:[%s307_s6] sm:$0x3] %v2791_v51 }
 0x1b6 PF: > { %s15_s17 = sadd.s32 1, %s3955_s17   ;;  %s4788_s15 = smov %s3951_s16 }
 0x1b7   : > { %p12_p5 = scmp.ge.s32.totalorder %s15_s17, 4   ;;  %s4789_s16 = smov %s4791_s18 }
 0x1b9   :  { %14 = sbr.rel (!%p12_p5) target bundleno = 2 (0x2), region = 84 }

// kernel: discriminator_forward.12
= control target key start
LH: loop header
LB: loop body
LE: loop exit
PB: predicated region body
PF: predicated region fallthrough
CT: control target
= control target key end

     0   :  { %s429_s12 = smov 0   ;;  %s431_s13 = smov 0   ;;  %s465_s0 = inlined_call_operand.vmem [shape: bf16[2,16,128], index: 0, kind: input, shape index: {}]   ;;  %s466_s1 = inlined_call_operand.vmem [shape: f32[1,128], index: 1, kind: input, shape index: {}]   ;;  %s467_s2 = inlined_call_operand.vmem [shape: f32[1,128], index: 2, kind: input, shape index: {}]   ;;  %s468_s3 = inlined_call_operand.vmem [shape: bf16[2,16,128], index: 3, kind: output, shape index: {}]  }
   0x1   :  { %s433_s14 = smov 0  }
   0x2 LB: > { %s25_s15 = sadd.s32 1, %s403_s13  ;;  %p337_p0 = scmp.ge.s32.totalorder %s407_s14, 1  ;;  %s407_s14 = sphi %s433_s14, %s13_s14   ;;  %s403_s13 = sphi %s431_s13, %s470_s13   ;;  %s399_s12 = sphi %s429_s12, %s469_s12  }
   0x3   : > { %p27_p1 = scmp.ge.s32.totalorder %s25_s15, 2  ;;  %p158_p2 = scmp.lt.s32.totalorder %s407_s14, 3 }
   0x5   : > { %s472_s15 = smov (%p27_p1, %s25_s15), 0  ;;  %p159_p3 = pnand %p337_p0, %p158_p2 }
   0x6   : > { %p191_p4 = scmp.lt.s32.totalorder (!%p159_p3), %s399_s12, 1  ;;  %v342_v1 = vld [vmem:[%s466_s1] ss:$0 sm:$0xff] (!%p159_p3) }
   0x7   : > { %162 = sbr.rel (%p159_p3) target bundleno = 31 (0x1f), region = 32  ;;  %v343_v4 = vld [vmem:[%s467_s2] ss:$0 sm:$0xff] (!%p159_p3) }
   0xe   : > { %s474_s12 = smov (!%p191_p4, %s399_s12), 1 }
   0xf   : > { %s348_s16 = sshll.u32 %s474_s12, 3 }
  0x10   : > { %s198_s19 = scalar_lea.vmem %s465_s0, %s348_s16  ;;  %s208_s26 = scalar_lea.vmem %s468_s3, %s348_s16 }
  0x11   : > { %v353_v0 = vld [vmem:[%s198_s19] sm:$0xff]  }
  0x12   : > { %v354_v2 = vunpack.c.l.bf16 %v353_v0  ;;  %v355_v3 = vunpack.c.h.bf16 %v353_v0 }
  0x14   : > { %v221_v5 = vmul.f32 %v354_v2, %v342_v1  ;;  %v222_v6 = vmul.f32 %v355_v3, %v342_v1 }
  0x16   : > { %v230_v7 = vadd.f32 %v343_v4, %v221_v5  ;;  %v231_v8 = vadd.f32 %v343_v4, %v222_v6 }
  0x18   : > { %v232_v9 = vmul.f32 0.2, %v230_v7  ;;  %v233_v10 = vmul.f32 0.2, %v231_v8 }
  0x1a   : > { %v234_v11 = vmax.f32 %v230_v7, %v232_v9  ;;  %v235_v12 = vmax.f32 %v231_v8, %v233_v10 }
  0x1c   : > { %v359_v13 = vpack.c.bf16 %v235_v12, %v234_v11 }
  0x1e   : > { %360 = vst [vmem:[%s208_s26] sm:$0xff] %v359_v13  }
  0x1f PF: > { %s13_s14 = sadd.s32 1, %s407_s14   ;;  %s469_s12 = smov %s403_s13 }
  0x20   : > { %p10_p5 = scmp.ge.s32.totalorder %s13_s14, 4   ;;  %s470_s13 = smov %s472_s15 }
  0x22   :  { %12 = sbr.rel (!%p10_p5) target bundleno = 2 (0x2), region = 62 }

// kernel: discriminator_forward.11
= control target key start
LH: loop header
LB: loop body
LE: loop exit
PB: predicated region body
PF: predicated region fallthrough
CT: control target
= control target key end

     0   :  { %s3262_s15 = smov 0   ;;  %s3264_s16 = smov 0   ;;  %s3804_s0 = inlined_call_operand.vmem [shape: bf16[2,1,5,5,512], index: 0, kind: input, shape index: {}]   ;;  %s3805_s1 = inlined_call_operand.vmem [shape: bf16[4,512,128], index: 1, kind: input, shape index: {}]   ;;  %s3806_s2 = inlined_call_operand.vmem [shape: f32[1,128], index: 2, kind: input, shape index: {}]   ;;  %s3807_s3 = inlined_call_operand.vmem [shape: bf16[2,16,128], index: 3, kind: output, shape index: {0}]   ;;  %s3808_s4 = inlined_call_operand.vmem [shape: f32[2,1,2,128], index: 4, kind: output, shape index: {1}]  }
   0x1   :  { %s3266_s17 = smov 0  }
   0x2 LB: > { %s34_s18 = sadd.s32 1, %s3230_s16  ;;  %p2488_p0 = scmp.ge.s32.totalorder %s3234_s17, 1  ;;  %s3234_s17 = sphi %s3266_s17, %s15_s17   ;;  %s3230_s16 = sphi %s3264_s16, %s3814_s16   ;;  %s3226_s15 = sphi %s3262_s15, %s3813_s15  }
   0x3   : > { %p36_p1 = scmp.ge.s32.totalorder %s34_s18, 2  ;;  %p215_p2 = scmp.lt.s32.totalorder %s3234_s17, 3 }
   0x5   : > { %s3816_s18 = smov (%p36_p1, %s34_s18), 0  ;;  %p216_p3 = pnand %p2488_p0, %p215_p2 }
   0x6   : > { %v3084_v0 = vld [vmem:[%s3805_s1 + $0x140] sm:$0xff] (!%p216_p3)   ;;  %v3088_v4 = vld [vmem:[%s3805_s1 + $0x148] sm:$0xff] (!%p216_p3)   ;;  %v3092_v8 = vld [vmem:[%s3805_s1 + $0x150] sm:$0xff] (!%p216_p3)   ;;  %p269_p4 = scmp.lt.s32.totalorder (!%p216_p3), %s3226_s15, 1  ;;  %vm529_vm0 = vsmask.f32 (!%p216_p3), 1280  ;;  %v664_v55 = vlaneseq (!%p216_p3) }
   0x7   : > { %219 = sbr.rel (%p216_p3) target bundleno = 400 (0x190), region = 32  ;;  %v3085_v1 = vld [vmem:[%s3805_s1 + $0x1c0] sm:$0xff] (!%p216_p3)   ;;  %2882 = vmatprep.subr.bf16.mxu0 (!%p216_p3), %v3084_v0  ;;  %v3089_v5 = vld [vmem:[%s3805_s1 + $0x1c8] sm:$0xff] (!%p216_p3)   ;;  %v3093_v9 = vld [vmem:[%s3805_s1 + $0x1d0] sm:$0xff] (!%p216_p3)   ;;  %vm530_vm1 = vsmask.f32 (!%p216_p3), 3336 }
   0x8   : > { %v3086_v2 = vld [vmem:[%s3805_s1 + $0x100] sm:$0xff] (!%p216_p3)   ;;  %2904 = vmatprep.subr.bf16.mxu1 (!%p216_p3), %v3085_v1  ;;  %v3090_v6 = vld [vmem:[%s3805_s1 + $0x108] sm:$0xff] (!%p216_p3)   ;;  %v3094_v10 = vld [vmem:[%s3805_s1 + $0x110] sm:$0xff] (!%p216_p3)   ;;  %vm532_vm2 = vsmask.f32 (!%p216_p3), 5392  ;;  %vm2298_vm7 = vcmask (!%p216_p3), 1040384  }
   0x9   : > { %v3087_v3 = vld [vmem:[%s3805_s1 + $0x180] sm:$0xff] (!%p216_p3)   ;;  %2883 = vmatpush3.bf16.msra.mxu0 (!%p216_p3), %v3086_v2  ;;  %v3091_v7 = vld [vmem:[%s3805_s1 + $0x188] sm:$0xff] (!%p216_p3)   ;;  %v3095_v11 = vld [vmem:[%s3805_s1 + $0x190] sm:$0xff] (!%p216_p3)   ;;  %vm534_vm3 = vsmask.f32 (!%p216_p3), 7448 }
   0xa   : > { %2905 = vmatpush3.bf16.msra.mxu1 (!%p216_p3), %v3087_v3  ;;  %2884 = vmatprep.subr.bf16.mxu0 (!%p216_p3), %v3088_v4  ;;  %v3096_v12 = vld [vmem:[%s3805_s1 + $0x158] sm:$0xff] (!%p216_p3)   ;;  %v3100_v16 = vld [vmem:[%s3805_s1 + $0x160] sm:$0xff] (!%p216_p3)   ;;  %v3104_v20 = vld [vmem:[%s3805_s1 + $0x168] sm:$0xff] (!%p216_p3)  }
   0xb   : > { %2906 = vmatprep.subr.bf16.mxu1 (!%p216_p3), %v3089_v5  ;;  %v3097_v13 = vld [vmem:[%s3805_s1 + $0x1d8] sm:$0xff] (!%p216_p3)   ;;  %v3101_v17 = vld [vmem:[%s3805_s1 + $0x1e0] sm:$0xff] (!%p216_p3)   ;;  %v3105_v21 = vld [vmem:[%s3805_s1 + $0x1e8] sm:$0xff] (!%p216_p3)  }
   0xc   : > { %v3098_v14 = vld [vmem:[%s3805_s1 + $0x118] sm:$0xff] (!%p216_p3)   ;;  %v3102_v18 = vld [vmem:[%s3805_s1 + $0x120] sm:$0xff] (!%p216_p3)   ;;  %v3106_v22 = vld [vmem:[%s3805_s1 + $0x128] sm:$0xff] (!%p216_p3)  }
   0xd   : > { %2885 = vmatpush3.bf16.msra.mxu0 (!%p216_p3), %v3090_v6  ;;  %v3099_v15 = vld [vmem:[%s3805_s1 + $0x198] sm:$0xff] (!%p216_p3)   ;;  %v3103_v19 = vld [vmem:[%s3805_s1 + $0x1a0] sm:$0xff] (!%p216_p3)   ;;  %v3107_v23 = vld [vmem:[%s3805_s1 + $0x1a8] sm:$0xff] (!%p216_p3)  }
   0xe   : > { %2907 = vmatpush3.bf16.msra.mxu1 %v3091_v7  ;;  %2886 = vmatprep.subr.bf16.mxu0 %v3092_v8  ;;  %s3818_s15 = smov (!%p269_p4, %s3226_s15), 1  ;;  %v3108_v24 = vld [vmem:[%s3805_s1 + $0x170] sm:$0xff]   ;;  %v3112_v28 = vld [vmem:[%s3805_s1 + $0x178] sm:$0xff]   ;;  %vm531_vm4 = vmor %vm529_vm0, %vm530_vm1 }
   0xf   : > { %2908 = vmatprep.subr.bf16.mxu1 %v3093_v9  ;;  %v3109_v25 = vld [vmem:[%s3805_s1 + $0x1f0] sm:$0xff]   ;;  %s3058_s27 = smul.u32 80, %s3818_s15  ;;  %v3113_v29 = vld [vmem:[%s3805_s1 + $0x1f8] sm:$0xff]   ;;  %v3116_v45 = vld [vmem:[%s3805_s1 + $0x40] sm:$0xff]   ;;  %s2874_s25 = sshll.u32 %s3818_s15, 3 }
  0x10   : > { %v3110_v26 = vld [vmem:[%s3805_s1 + $0x130] sm:$0xff]   ;;  %v3114_v30 = vld [vmem:[%s3805_s1 + $0x138] sm:$0xff]   ;;  %vm3400_vm5 = vmor %vm531_vm4, %vm532_vm2  ;;  %s296_s28 = scalar_lea.vmem %s3807_s3, %s2874_s25  ;;  %s2492_s29 = sshll.u32 %s3818_s15, 1 }
  0x11   : > { %2887 = vmatpush3.bf16.msra.mxu0 %v3094_v10  ;;  %v3111_v27 = vld [vmem:[%s3805_s1 + $0x1b0] sm:$0xff]   ;;  %s3380_s12 = scalar_lea.vmem %s3804_s0, %s3058_s27  ;;  %v3115_v31 = vld [vmem:[%s3805_s1 + $0x1b8] sm:$0xff]   ;;  %v3117_v60 = vld [vmem:[%s3805_s1 + $0xc0] sm:$0xff]   ;;  %s307_s6 = scalar_lea.vmem %s3808_s4, %s2492_s29 }
  0x12   : > { %2909 = vmatpush3.bf16.msra.mxu1 %v3095_v11  ;;  %2888 = vmatprep.subr.bf16.mxu0 %v3096_v12  ;;  %v2501_v32 = vld.sshfl [vmem:[%s3380_s12] sm:$0x5f pattern:$0x76325410]  ;;  %vm3410_vm6 = vmor %vm3400_vm5, %vm534_vm3  ;;  %v3126_v52 = vld [vmem:[%s3805_s1 + $0x10] sm:$0xff]  }
  0x13   : > { %2910 = vmatprep.subr.bf16.mxu1 %v3097_v13  ;;  %v2502_v33 = vld.sshfl [vmem:[%s3380_s12 + $0x8] sm:$0x5f pattern:$0x76325410] }
  0x14   : > { %v2503_v34 = vld.sshfl [vmem:[%s3380_s12 + $0x10] sm:$0x5f pattern:$0x76325410]  ;;  %v479_v35 = vcombine.low %v2501_v32, %v2502_v33  ;;  %v480_v36 = vcombine.high %v2501_v32, %v2502_v33 }
  0x15   : > { %2889 = vmatpush3.bf16.msra.mxu0 %v3098_v14  ;;  %v2504_v37 = vld.sshfl [vmem:[%s3380_s12 + $0x18] sm:$0x5f pattern:$0x76325410] }
  0x16   : > { %2911 = vmatpush3.bf16.msra.mxu1 %v3099_v15  ;;  %2890 = vmatprep.subr.bf16.mxu0 %v3100_v16  ;;  %v2505_v38 = vld.sshfl [vmem:[%s3380_s12 + $0x20] sm:$0x5f pattern:$0x76325410]  ;;  %v495_v39 = vcombine.low %v2503_v34, %v2504_v37  ;;  %v537_v40 = vshrl.u32 %v479_v35, 16  ;;  %v540_v41 = vshll.u32 %v479_v35, 16  ;;  %v496_v43 = vcombine.high %v2503_v34, %v2504_v37 }
  0x17   : > { %2912 = vmatprep.subr.bf16.mxu1 %v3101_v17  ;;  %v2506_v42 = vld.sshfl [vmem:[%s3380_s12 + $0x28] sm:$0x5f pattern:$0x76325410]  ;;  %v546_v44 = vshll.u32 %v480_v36, 16 }
  0x18   : > { %v2507_v46 = vld.sshfl [vmem:[%s3380_s12 + $0x30] sm:$0x5f pattern:$0x76325410]  ;;  %v511_v47 = vcombine.low %v2505_v38, %v2506_v42  ;;  %v512_v48 = vcombine.high %v2505_v38, %v2506_v42  ;;  %v539_v49 = vrot.slane %v537_v40, 6  ;;  %v542_v50 = vrot.slane %v540_v41, 7 }
  0x19   : > { %2891 = vmatpush3.bf16.msra.mxu0 %v3102_v18  ;;  %v2508_v51 = vld.sshfl [vmem:[%s3380_s12 + $0x38] sm:$0x5f pattern:$0x76325410]  ;;  %v548_v53 = vrot.slane %v546_v44, 7  ;;  %v551_v54 = vshrl.u32 %v495_v39, 16 }
  0x1a   : > { %2913 = vmatpush3.bf16.msra.mxu1 %v3103_v19  ;;  %2892 = vmatprep.subr.bf16.mxu0 %v3104_v20  ;;  %v527_v56 = vcombine.low %v2507_v46, %v2508_v51  ;;  %v528_v57 = vcombine.high %v2507_v46, %v2508_v51  ;;  %v543_v58 = vor.u32 %v542_v50, %v539_v49  ;;  %v554_v59 = vshll.u32 %v495_v39, 16  ;;  %v3118_v40 = vld [vmem:[%s3805_s1] sm:$0xff]   ;;  %v3120_v46 = vld [vmem:[%s3805_s1 + $0x48] sm:$0xff]   ;;  %v3124_v50 = vld [vmem:[%s3805_s1 + $0x50] sm:$0xff]  }
  0x1b   : > { %2914 = vmatprep.subr.bf16.mxu1 %v3105_v21  ;;  %v553_v61 = vrot.slane %v551_v54, 6  ;;  %v560_v62 = vshll.u32 %v496_v43, 16  ;;  %v565_v63 = vshrl.u32 %v511_v47, 16  ;;  %v568_v0 = vshll.u32 %v511_v47, 16  ;;  %v3119_v41 = vld [vmem:[%s3805_s1 + $0x80] sm:$0xff]   ;;  %v3121_v47 = vld [vmem:[%s3805_s1 + $0xc8] sm:$0xff]  }
  0x1c   : > { %v544_v1 = vrot.slane %v543_v58, 2  ;;  %v556_v2 = vrot.slane %v554_v59, 7  ;;  %v574_v3 = vshll.u32 %v512_v48, 16  ;;  %v579_v4 = vshrl.u32 %v527_v56, 16  ;;  %v3122_v48 = vld [vmem:[%s3805_s1 + $0x8] sm:$0xff]   ;;  %v3125_v51 = vld [vmem:[%s3805_s1 + $0xd0] sm:$0xff]  }
  0x1d   : > { %2893 = vmatpush3.bf16.msra.mxu0 %v3106_v22  ;;  %v567_v6 = vrot.slane %v565_v63, 6  ;;  %v570_v7 = vrot.slane %v568_v0, 7  ;;  %v582_v8 = vshll.u32 %v527_v56, 16  ;;  %v562_v10 = vrot.slane %v560_v62, 7  ;;  %v3123_v49 = vld [vmem:[%s3805_s1 + $0x88] sm:$0xff]   ;;  %v3128_v54 = vld [vmem:[%s3805_s1 + $0x58] sm:$0xff]  }
  0x1e   : > { %2915 = vmatpush3.bf16.msra.mxu1 %v3107_v23  ;;  %2894 = vmatprep.subr.bf16.mxu0 %v3108_v24  ;;  %v557_v9 = vor.u32 %v556_v2, %v553_v61  ;;  %v576_v11 = vrot.slane %v574_v3, 7  ;;  %v581_v12 = vrot.slane %v579_v4, 6  ;;  %v588_v15 = vshll.u32 %v528_v57, 16  ;;  %v3130_v56 = vld [vmem:[%s3805_s1 + $0x18] sm:$0xff]   ;;  %v3132_v58 = vld [vmem:[%s3805_s1 + $0x60] sm:$0xff]   ;;  %v3136_v62 = vld [vmem:[%s3805_s1 + $0x68] sm:$0xff]  }
  0x1f   : > { %2916 = vmatprep.subr.bf16.mxu1 %v3109_v25  ;;  %v571_v13 = vor.u32 %v570_v7, %v567_v6  ;;  %v584_v14 = vrot.slane %v582_v8, 7  ;;  %v549_v16 = vsel %vm3410_vm6, %v544_v1, %v548_v53  ;;  %v3236_v18 = vmov 1983009808   ;;  %v3127_v53 = vld [vmem:[%s3805_s1 + $0x90] sm:$0xff]   ;;  %v3131_v57 = vld [vmem:[%s3805_s1 + $0x98] sm:$0xff]   ;;  %v3133_v59 = vld [vmem:[%s3805_s1 + $0xe0] sm:$0xff]  }
  0x20   : > { %v558_v17 = vrot.slane %v557_v9, 2  ;;  %v662_v19 = vunpack.c.l.s4 %v3236_v18  ;;  %v665_v20 = vshrl.u32 %v664_v55, 7  ;;  %v590_v23 = vrot.slane %v588_v15, 7  ;;  %v3129_v55 = vld [vmem:[%s3805_s1 + $0xd8] sm:$0xff]   ;;  %v3135_v61 = vld [vmem:[%s3805_s1 + $0xa0] sm:$0xff]   ;;  %v3137_v63 = vld [vmem:[%s3805_s1 + $0xe8] sm:$0xff]  }
  0x21   : > { %2895 = vmatpush3.bf16.msra.mxu0 %v3110_v26  ;;  %v572_v21 = vrot.slane %v571_v13, 2  ;;  %v585_v22 = vor.u32 %v584_v14, %v581_v12  ;;  %v3138_v0 = vld [vmem:[%s3805_s1 + $0x28] sm:$0xff]   ;;  %v2493_v2 = vld.sshfl [vmem:[%s3380_s12] sm:$0xf pattern:$0x76325410] }
  0x22   : > { %2917 = vmatpush3.bf16.msra.mxu1 %v3111_v27  ;;  %2896 = vmatprep.subr.bf16.mxu0 %v3112_v28  ;;  %v3418_v24 = vsel %vm3410_vm6, %v558_v17, %v562_v10  ;;  %v663_v25 = vunpack.c.0.s8 %v662_v19  ;;  %v3139_v1 = vld [vmem:[%s3805_s1 + $0xa8] sm:$0xff]   ;;  %v3140_v3 = vld [vmem:[%s3805_s1 + $0x70] sm:$0xff]   ;;  %v3521_v7 = vld.sshfl [vmem:[%s3380_s12 + $0x20] sm:$0xf pattern:$0x76325410] }
  0x23   : > { %2918 = vmatprep.subr.bf16.mxu1 %v3113_v29  ;;  %v3422_v26 = vsel %vm3410_vm6, %v572_v21, %v576_v11  ;;  %v586_v27 = vrot.slane %v585_v22, 2  ;;  %v657_v28 = vcombine.low %v549_v16, %v3418_v24  ;;  %v658_v29 = vcombine.high %v549_v16, %v3418_v24  ;;  %v3141_v4 = vld [vmem:[%s3805_s1 + $0xf0] sm:$0xff]   ;;  %v2494_v14 = vld.sshfl [vmem:[%s3380_s12 + $0x8] sm:$0xf pattern:$0x76325410] }
  0x24   : > { %v1945_v32 = vcombine.high %v3418_v24, %v3422_v26  ;;  %v3518_v6 = vld.sshfl [vmem:[%s3380_s12 + $0x10] sm:$0xf pattern:$0x76325410]  ;;  %v3144_v16 = vld [vmem:[%s3805_s1 + $0x78] sm:$0xff]  }
  0x25   : > { %2897 = vmatpush3.bf16.msra.mxu0 %v3114_v30  ;;  %v3426_v30 = vsub.s32 %v663_v25, %v665_v20  ;;  %v3434_v33 = vsel %vm3410_vm6, %v586_v27, %v590_v23  ;;  %v2605_v8 = vcombine.low %v2493_v2, %v3518_v6  ;;  %v3142_v9 = vld [vmem:[%s3805_s1 + $0x30] sm:$0xff]   ;;  %v3538_v15 = vld.sshfl [vmem:[%s3380_s12 + $0x18] sm:$0xf pattern:$0x76325410] }
  0x26   : > { %2919 = vmatpush3.bf16.msra.mxu1 %v3115_v31  ;;  %2926 = vmatprep.subr.bf16.mxu0 %v3116_v45  ;;  %v1944_v31 = vcombine.low %v3418_v24, %v3422_v26  ;;  %v659_v34 = vcombine.low %v3422_v26, %v3434_v33  ;;  %v660_v36 = vcombine.high %v3422_v26, %v3434_v33  ;;  %v3143_v10 = vld [vmem:[%s3805_s1 + $0xb0] sm:$0xff]   ;;  %v3145_v17 = vld [vmem:[%s3805_s1 + $0xf8] sm:$0xff]   ;;  %v3548_v19 = vld.sshfl [vmem:[%s3380_s12 + $0x28] sm:$0xf pattern:$0x76325410] }
  0x27   : > { %2948 = vmatprep.subr.bf16.mxu1 %v3117_v60  ;;  %v667_v35 = vrot.slane %v657_v28, %v3426_v30  ;;  %v674_v37 = vrot.slane %v658_v29, %v3426_v30  ;;  %v3134_v60 = vld [vmem:[%s3805_s1 + $0x20] sm:$0xff]   ;;  %v3531_v11 = vld.sshfl [vmem:[%s3380_s12 + $0x30] sm:$0xf pattern:$0x76325410]  ;;  %v981_v13 = vrot.slane %v2605_v8, %v3426_v30  ;;  %v2606_v20 = vcombine.low %v2494_v14, %v3538_v15  ;;  %v3146_v21 = vld [vmem:[%s3805_s1 + $0x38] sm:$0xff]  }
  0x28   : > { %v681_v38 = vrot.slane %v659_v34, %v3426_v30  ;;  %v688_v39 = vrot.slane %v660_v36, %v3426_v30  ;;  %v2607_v12 = vcombine.low %v3521_v7, %v3531_v11  ;;  %v3147_v22 = vld [vmem:[%s3805_s1 + $0xb8] sm:$0xff]   ;;  %v3148_v29 = vld [vmem:[%s3805_s1 + $0x240] sm:$0xff]   ;;  %v3175_v2 = vld [vmem:[%s3805_s1 + $0x2b0] sm:$0xff]  }
  0x29   : > { %v3558_v23 = vld.sshfl [vmem:[%s3380_s12 + $0x38] sm:$0xf pattern:$0x76325410]  ;;  %v988_v28 = vrot.slane %v2606_v20, %v3426_v30  ;;  %v3150_v36 = vld [vmem:[%s3805_s1 + $0x200] sm:$0xff]  }
  0x2a   : > { %v690_v42 = vcombine.high %v667_v35, %v681_v38  ;;  %v692_v43 = vcombine.high %v674_v37, %v688_v39  ;;  %v689_v44 = vcombine.low %v667_v35, %v681_v38  ;;  %v691_v45 = vcombine.low %v674_v37, %v688_v39  ;;  %v3149_v35 = vld [vmem:[%s3805_s1 + $0x2c0] sm:$0xff]  }
  0x2b   : > { %v995_v18 = vrot.slane %v2607_v12, %v3426_v30  ;;  %v2608_v27 = vcombine.low %v3548_v19, %v3558_v23  ;;  %v3182_v20 = vld [vmem:[%s3805_s1 + $0x300] sm:$0xff]  }
  0x2c   : > { %921 = vmatprep.mubr.bf16.mxu0 %v690_v42  ;;  %962 = vmatprep.mubr.bf16.mxu1 %v692_v43  ;;  %v3153_v42 = vld [vmem:[%s3805_s1 + $0x2c8] sm:$0xff]  }
  0x2d   : > { %922 = vmatmul.mubr.bf16.vlgmr.msra.gmra.mrb[0].mxu0 %v689_v44  ;;  %963 = vmatmul.mubr.bf16.vlgmr.msra.gmra.mrb[0].mxu1 %v691_v45  ;;  %v1004_v25 = vcombine.high %v981_v13, %v995_v18  ;;  %v1002_v34 = vrot.slane %v2608_v27, %v3426_v30  ;;  %v1003_v38 = vcombine.low %v981_v13, %v995_v18  ;;  %v3154_v43 = vld [vmem:[%s3805_s1 + $0x208] sm:$0xff]   ;;  %v3156_v45 = vld [vmem:[%s3805_s1 + $0x250] sm:$0xff]   ;;  %v3178_v13 = vld [vmem:[%s3805_s1 + $0x238] sm:$0xff]  }
  0x2e   : > { %2927 = vmatpush3.bf16.msra.mxu0 %v3118_v40  ;;  %2949 = vmatpush3.bf16.msra.mxu1 %v3119_v41  ;;  %v3151_v40 = vld [vmem:[%s3805_s1 + $0x280] sm:$0xff]   ;;  %v3152_v41 = vld [vmem:[%s3805_s1 + $0x248] sm:$0xff]  }
  0x2f   : > { %2928 = vmatprep.subr.bf16.mxu0 %v3120_v46  ;;  %2950 = vmatprep.subr.bf16.mxu1 %v3121_v47  ;;  %v1006_v37 = vcombine.high %v988_v28, %v1002_v34  ;;  %v1005_v39 = vcombine.low %v988_v28, %v1002_v34  ;;  %v3155_v44 = vld [vmem:[%s3805_s1 + $0x288] sm:$0xff]   ;;  %v3157_v46 = vld [vmem:[%s3805_s1 + $0x2d0] sm:$0xff]  }
  0x30   : > { %1235 = vmatprep.mubr.bf16.mxu0 %v1004_v25  ;;  %v3158_v47 = vld [vmem:[%s3805_s1 + $0x210] sm:$0xff]   ;;  %v3184_v25 = vld [vmem:[%s3805_s1 + $0x348] sm:$0xff]  }
  0x31   : > { %1276 = vmatprep.mubr.bf16.mxu1 %v1006_v37  ;;  %v3185_v27 = vld [vmem:[%s3805_s1 + $0x3c8] sm:$0xff]   ;;  %v3188_v34 = vld [vmem:[%s3805_s1 + $0x350] sm:$0xff]  }
  0x32   : > { %2929 = vmatpush3.bf16.msra.mxu0 %v3122_v48  ;;  %2951 = vmatpush3.bf16.msra.mxu1 %v3123_v49  ;;  %v3159_v48 = vld [vmem:[%s3805_s1 + $0x290] sm:$0xff]   ;;  %v3160_v49 = vld [vmem:[%s3805_s1 + $0x258] sm:$0xff]   ;;  %v3186_v28 = vld [vmem:[%s3805_s1 + $0x308] sm:$0xff]  }
  0x33   : > { %2930 = vmatprep.subr.bf16.mxu0 %v3124_v50  ;;  %2952 = vmatprep.subr.bf16.mxu1 %v3125_v51  ;;  %v3161_v50 = vld [vmem:[%s3805_s1 + $0x2d8] sm:$0xff]   ;;  %v3191_v37 = vld [vmem:[%s3805_s1 + $0x390] sm:$0xff]  }
  0x34   : > { %v3162_v51 = vld [vmem:[%s3805_s1 + $0x218] sm:$0xff]  }
  0x36   : > { %2931 = vmatpush3.bf16.msra.mxu0 %v3126_v52  ;;  %2953 = vmatpush3.bf16.msra.mxu1 %v3127_v53  ;;  %v3163_v52 = vld [vmem:[%s3805_s1 + $0x298] sm:$0xff]   ;;  %v3164_v53 = vld [vmem:[%s3805_s1 + $0x260] sm:$0xff]  }
  0x37   : > { %2932 = vmatprep.subr.bf16.mxu0 %v3128_v54  ;;  %2954 = vmatprep.subr.bf16.mxu1 %v3129_v55  ;;  %v3165_v54 = vld [vmem:[%s3805_s1 + $0x2e0] sm:$0xff]  }
  0x38   : > { %v3166_v55 = vld [vmem:[%s3805_s1 + $0x220] sm:$0xff]  }
  0x3a   : > { %2933 = vmatpush3.bf16.msra.mxu0 %v3130_v56  ;;  %2955 = vmatpush3.bf16.msra.mxu1 %v3131_v57  ;;  %v3167_v56 = vld [vmem:[%s3805_s1 + $0x2a0] sm:$0xff]   ;;  %v3168_v57 = vld [vmem:[%s3805_s1 + $0x268] sm:$0xff]  }
  0x3b   : > { %2934 = vmatprep.subr.bf16.mxu0 %v3132_v58  ;;  %2956 = vmatprep.subr.bf16.mxu1 %v3133_v59  ;;  %v3169_v58 = vld [vmem:[%s3805_s1 + $0x2e8] sm:$0xff]  }
  0x3c   : > { %v3170_v59 = vld [vmem:[%s3805_s1 + $0x228] sm:$0xff]  }
  0x3e   : > { %2935 = vmatpush3.bf16.msra.mxu0 %v3134_v60  ;;  %2957 = vmatpush3.bf16.msra.mxu1 %v3135_v61  ;;  %v3171_v60 = vld [vmem:[%s3805_s1 + $0x2a8] sm:$0xff]   ;;  %v3172_v61 = vld [vmem:[%s3805_s1 + $0x270] sm:$0xff]  }
  0x3f   : > { %2936 = vmatprep.subr.bf16.mxu0 %v3136_v62  ;;  %2958 = vmatprep.subr.bf16.mxu1 %v3137_v63  ;;  %v2721_v62 = vcombine.low %v3518_v6, %v3521_v7  ;;  %v3173_v63 = vld [vmem:[%s3805_s1 + $0x2f0] sm:$0xff]   ;;  %v2655_v6 = vld.sshfl [vmem:[%s3380_s12 + $0x40] sm:$0xf pattern:$0x76325410] }
  0x40   : > { %v2723_v7 = vcombine.low %v3531_v11, %v2655_v6 }
  0x41   : > { %v1437_v8 = vrot.slane %v2721_v62, %v3426_v30 }
  0x42   : > { %2937 = vmatpush3.bf16.msra.mxu0 %v3138_v0  ;;  %2959 = vmatpush3.bf16.msra.mxu1 %v3139_v1  ;;  %v2722_v0 = vcombine.low %v3538_v15, %v3548_v19  ;;  %v3174_v1 = vld [vmem:[%s3805_s1 + $0x230] sm:$0xff]   ;;  %v1451_v14 = vrot.slane %v2723_v7, %v3426_v30  ;;  %v3179_v15 = vld [vmem:[%s3805_s1 + $0x2b8] sm:$0xff]   ;;  %v3181_v19 = vld [vmem:[%s3805_s1 + $0x3c0] sm:$0xff]  }
  0x43   : > { %2938 = vmatprep.subr.bf16.mxu0 %v3140_v3  ;;  %2960 = vmatprep.subr.bf16.mxu1 %v3141_v4  ;;  %v3176_v3 = vld [vmem:[%s3805_s1 + $0x278] sm:$0xff]  }
  0x44   : > { %v3177_v4 = vld [vmem:[%s3805_s1 + $0x2f8] sm:$0xff]   ;;  %v1444_v12 = vrot.slane %v2722_v0, %v3426_v30 }
  0x46   : > { %2939 = vmatpush3.bf16.msra.mxu0 %v3142_v9  ;;  %2961 = vmatpush3.bf16.msra.mxu1 %v3143_v10  ;;  %v2656_v9 = vld.sshfl [vmem:[%s3380_s12 + $0x48] sm:$0xf pattern:$0x76325410] }
  0x47   : > { %2940 = vmatprep.subr.bf16.mxu0 %v3144_v16  ;;  %2962 = vmatprep.subr.bf16.mxu1 %v3145_v17  ;;  %v2724_v10 = vcombine.low %v3558_v23, %v2656_v9  ;;  %v1460_v16 = vcombine.high %v1437_v8, %v1451_v14  ;;  %v3180_v17 = vld [vmem:[%s3805_s1 + $0x340] sm:$0xff]   ;;  %v1954_v9 = vrot.slane %v1944_v31, %v3426_v30 }
  0x48   : > { %v3183_v23 = vld [vmem:[%s3805_s1 + $0x380] sm:$0xff]  }
  0x49   : > { %v1458_v11 = vrot.slane %v2724_v10, %v3426_v30 }
  0x4a   : > { %2941 = vmatpush3.bf16.msra.mxu0 %v3146_v21  ;;  %2963 = vmatpush3.bf16.msra.mxu1 %v3147_v22  ;;  %v1459_v21 = vcombine.low %v1437_v8, %v1451_v14 }
  0x4b   : > { %2970 = vmatprep.subr.bf16.mxu0 %v3148_v29  ;;  %2992 = vmatprep.subr.bf16.mxu1 %v3149_v35  ;;  %v1462_v18 = vcombine.high %v1444_v12, %v1458_v11  ;;  %v1461_v22 = vcombine.low %v1444_v12, %v1458_v11  ;;  %v3187_v29 = vld [vmem:[%s3805_s1 + $0x388] sm:$0xff]   ;;  %v3189_v35 = vld [vmem:[%s3805_s1 + $0x3d0] sm:$0xff]   ;;  %v1961_v12 = vrot.slane %v1945_v32, %v3426_v30 }
  0x4d   : > { %1236 = vmatmul.mubr.bf16.vlgmr.msra.gmra.mrb[4].mxu0 %v1003_v38  ;;  %1277 = vmatmul.mubr.bf16.vlgmr.msra.gmra.mrb[4].mxu1 %v1005_v39  ;;  %v3192_v38 = vld [vmem:[%s3805_s1 + $0x358] sm:$0xff]  }
  0x4e   : > { %2971 = vmatpush3.bf16.msra.mxu0 %v3150_v36  ;;  %2993 = vmatpush3.bf16.msra.mxu1 %v3151_v40  ;;  %v3190_v36 = vld [vmem:[%s3805_s1 + $0x310] sm:$0xff]   ;;  %v3193_v39 = vld [vmem:[%s3805_s1 + $0x3d8] sm:$0xff]  }
  0x4f   : > { %2972 = vmatprep.subr.bf16.mxu0 %v3152_v41  ;;  %2994 = vmatprep.subr.bf16.mxu1 %v3153_v42  ;;  %v3194_v40 = vld [vmem:[%s3805_s1 + $0x318] sm:$0xff]   ;;  %v3196_v42 = vld [vmem:[%s3805_s1 + $0x360] sm:$0xff]  }
  0x50   : > { %1691 = vmatprep.mubr.bf16.mxu0 %v1460_v16  ;;  %1732 = vmatprep.mubr.bf16.mxu1 %v1462_v18  ;;  %v3195_v41 = vld [vmem:[%s3805_s1 + $0x398] sm:$0xff]  }
  0x52   : > { %2973 = vmatpush3.bf16.msra.mxu0 %v3154_v43  ;;  %2995 = vmatpush3.bf16.msra.mxu1 %v3155_v44  ;;  %v3197_v43 = vld [vmem:[%s3805_s1 + $0x3e0] sm:$0xff]  }
  0x53   : > { %2974 = vmatprep.subr.bf16.mxu0 %v3156_v45  ;;  %2996 = vmatprep.subr.bf16.mxu1 %v3157_v46  ;;  %v3198_v44 = vld [vmem:[%s3805_s1 + $0x320] sm:$0xff]   ;;  %v3200_v46 = vld [vmem:[%s3805_s1 + $0x368] sm:$0xff]  }
  0x54   : > { %v3199_v45 = vld [vmem:[%s3805_s1 + $0x3a0] sm:$0xff]  }
  0x56   : > { %2975 = vmatpush3.bf16.msra.mxu0 %v3158_v47  ;;  %2997 = vmatpush3.bf16.msra.mxu1 %v3159_v48  ;;  %v3201_v47 = vld [vmem:[%s3805_s1 + $0x3e8] sm:$0xff]  }
  0x57   : > { %2976 = vmatprep.subr.bf16.mxu0 %v3160_v49  ;;  %2998 = vmatprep.subr.bf16.mxu1 %v3161_v50  ;;  %v3202_v48 = vld [vmem:[%s3805_s1 + $0x328] sm:$0xff]   ;;  %v3204_v50 = vld [vmem:[%s3805_s1 + $0x370] sm:$0xff]  }
  0x58   : > { %v3203_v49 = vld [vmem:[%s3805_s1 + $0x3a8] sm:$0xff]  }
  0x5a   : > { %2977 = vmatpush3.bf16.msra.mxu0 %v3162_v51  ;;  %2999 = vmatpush3.bf16.msra.mxu1 %v3163_v52  ;;  %v3205_v51 = vld [vmem:[%s3805_s1 + $0x3f0] sm:$0xff]  }
  0x5b   : > { %2978 = vmatprep.subr.bf16.mxu0 %v3164_v53  ;;  %3000 = vmatprep.subr.bf16.mxu1 %v3165_v54  ;;  %v3206_v52 = vld [vmem:[%s3805_s1 + $0x330] sm:$0xff]   ;;  %v2771_v54 = vld.sshfl [vmem:[%s3380_s12 + $0x40] sm:$0x5f pattern:$0x76325410] }
  0x5c   : > { %v3207_v53 = vld [vmem:[%s3805_s1 + $0x3b0] sm:$0xff]  }
  0x5e   : > { %2979 = vmatpush3.bf16.msra.mxu0 %v3166_v55  ;;  %3001 = vmatpush3.bf16.msra.mxu1 %v3167_v56  ;;  %v3208_v55 = vld [vmem:[%s3805_s1 + $0x378] sm:$0xff]  }
  0x5f   : > { %2980 = vmatprep.subr.bf16.mxu0 %v3168_v57  ;;  %3002 = vmatprep.subr.bf16.mxu1 %v3169_v58  ;;  %v3209_v56 = vld [vmem:[%s3805_s1 + $0x3f8] sm:$0xff]   ;;  %v2772_v57 = vld.sshfl [vmem:[%s3380_s12 + $0x48] sm:$0x5f pattern:$0x76325410] }
  0x60   : > { %v1821_v58 = vcombine.low %v2771_v54, %v2772_v57 }
  0x62   : > { %2981 = vmatpush3.bf16.msra.mxu0 %v3170_v59  ;;  %3003 = vmatpush3.bf16.msra.mxu1 %v3171_v60  ;;  %v1822_v59 = vcombine.high %v2771_v54, %v2772_v57  ;;  %v3210_v60 = vld [vmem:[%s3805_s1 + $0x338] sm:$0xff]   ;;  %v1866_v62 = vshrl.u32 %v1821_v58, 16 }
  0x63   : > { %2982 = vmatprep.subr.bf16.mxu0 %v3172_v61  ;;  %3004 = vmatprep.subr.bf16.mxu1 %v3173_v63  ;;  %v3211_v61 = vld [vmem:[%s3805_s1 + $0x3b8] sm:$0xff]   ;;  %v1869_v63 = vshll.u32 %v1821_v58, 16 }
  0x64   : > { %v1875_v0 = vshll.u32 %v1822_v59, 16 }
  0x66   : > { %2983 = vmatpush3.bf16.msra.mxu0 %v3174_v1  ;;  %3005 = vmatpush3.bf16.msra.mxu1 %v3175_v2  ;;  %v1868_v1 = vrot.slane %v1866_v62, 6  ;;  %v1871_v2 = vrot.slane %v1869_v63, 7 }
  0x67   : > { %2984 = vmatprep.subr.bf16.mxu0 %v3176_v3  ;;  %3006 = vmatprep.subr.bf16.mxu1 %v3177_v4  ;;  %v1877_v4 = vrot.slane %v1875_v0, 7 }
  0x68   : > { %v1872_v3 = vor.u32 %v1871_v2, %v1868_v1 }
  0x6a   : > { %2985 = vmatpush3.bf16.msra.mxu0 %v3178_v13  ;;  %3007 = vmatpush3.bf16.msra.mxu1 %v3179_v15  ;;  %v1873_v6 = vrot.slane %v1872_v3, 2 }
  0x6b   : > { %3014 = vmatprep.subr.bf16.mxu0 %v3180_v17  ;;  %3036 = vmatprep.subr.bf16.mxu1 %v3181_v19 }
  0x6c   : > { %v1878_v7 = vsel %vm3410_vm6, %v1873_v6, %v1877_v4 }
  0x6d   : > { %1692 = vmatmul.mubr.bf16.vlgmr.msra.gmra.mrb[8].mxu0 %v1459_v21  ;;  %1733 = vmatmul.mubr.bf16.vlgmr.msra.gmra.mrb[8].mxu1 %v1461_v22  ;;  %v1946_v8 = vcombine.low %v3434_v33, %v1878_v7  ;;  %v1947_v10 = vcombine.high %v3434_v33, %v1878_v7 }
  0x6e   : > { %3015 = vmatpush3.bf16.msra.mxu0 %v3182_v20  ;;  %3037 = vmatpush3.bf16.msra.mxu1 %v3183_v23 }
  0x6f   : > { %3016 = vmatprep.subr.bf16.mxu0 %v3184_v25  ;;  %3038 = vmatprep.subr.bf16.mxu1 %v3185_v27  ;;  %v1968_v13 = vrot.slane %v1946_v8, %v3426_v30  ;;  %v1975_v14 = vrot.slane %v1947_v10, %v3426_v30 }
  0x71   : > { %v1977_v5 = vcombine.high %v1954_v9, %v1968_v13  ;;  %v1979_v15 = vcombine.high %v1961_v12, %v1975_v14  ;;  %v1976_v11 = vcombine.low %v1954_v9, %v1968_v13  ;;  %v1978_v16 = vcombine.low %v1961_v12, %v1975_v14 }
  0x72   : > { %3017 = vmatpush3.bf16.msra.mxu0 %v3186_v28  ;;  %3039 = vmatpush3.bf16.msra.mxu1 %v3187_v29 }
  0x73   : > { %3018 = vmatprep.subr.bf16.mxu0 %v3188_v34  ;;  %3040 = vmatprep.subr.bf16.mxu1 %v3189_v35 }
  0x74   : > { %2208 = vmatprep.mubr.bf16.mxu0 %v1977_v5  ;;  %2249 = vmatprep.mubr.bf16.mxu1 %v1979_v15  ;;  %v2869_v15 = vld [vmem:[%s3806_s2] ss:$0 sm:$0xff] }
  0x76   : > { %3019 = vmatpush3.bf16.msra.mxu0 %v3190_v36  ;;  %3041 = vmatpush3.bf16.msra.mxu1 %v3191_v37 }
  0x77   : > { %3020 = vmatprep.subr.bf16.mxu0 %v3192_v38  ;;  %3042 = vmatprep.subr.bf16.mxu1 %v3193_v39 }
  0x7a   : > { %3021 = vmatpush3.bf16.msra.mxu0 %v3194_v40  ;;  %3043 = vmatpush3.bf16.msra.mxu1 %v3195_v41 }
  0x7b   : > { %3022 = vmatprep.subr.bf16.mxu0 %v3196_v42  ;;  %3044 = vmatprep.subr.bf16.mxu1 %v3197_v43 }
  0x7e   : > { %3023 = vmatpush3.bf16.msra.mxu0 %v3198_v44  ;;  %3045 = vmatpush3.bf16.msra.mxu1 %v3199_v45 }
  0x7f   : > { %3024 = vmatprep.subr.bf16.mxu0 %v3200_v46  ;;  %3046 = vmatprep.subr.bf16.mxu1 %v3201_v47 }
  0x82   : > { %3025 = vmatpush3.bf16.msra.mxu0 %v3202_v48  ;;  %3047 = vmatpush3.bf16.msra.mxu1 %v3203_v49 }
  0x83   : > { %3026 = vmatprep.subr.bf16.mxu0 %v3204_v50  ;;  %3048 = vmatprep.subr.bf16.mxu1 %v3205_v51 }
  0x86   : > { %3027 = vmatpush3.bf16.msra.mxu0 %v3206_v52  ;;  %3049 = vmatpush3.bf16.msra.mxu1 %v3207_v53 }
  0x87   : > { %3028 = vmatprep.subr.bf16.mxu0 %v3208_v55  ;;  %3050 = vmatprep.subr.bf16.mxu1 %v3209_v56 }
  0x8a   : > { %3029 = vmatpush3.bf16.msra.mxu0 %v3210_v60  ;;  %3051 = vmatpush3.bf16.msra.mxu1 %v3211_v61 }
  0x8d   : > { %2209 = vmatmul.mubr.bf16.vlgmr.msra.gmra.mrb[12].mxu0 %v1976_v11  ;;  %2250 = vmatmul.mubr.bf16.vlgmr.msra.gmra.mrb[12].mxu1 %v1978_v16 }
 0x100   : > { %v2898_v31 = vpop.f32.mrb[0].mxu0  ;;  %v2920_v17 = vpop.f32.mrb[0].mxu1 }
 0x101   : > { %v2899_v33 = vpop.f32.mrb[1].mxu0  ;;  %v2921_v18 = vpop.f32.mrb[1].mxu1 }
 0x102   : > { %v2900_v19 = vadd.f32 %v2899_v33, %v2898_v31  ;;  %v2922_v20 = vadd.f32 %v2921_v18, %v2920_v17  ;;  %v2901_v24 = vpop.f32.mrb[2].mxu0  ;;  %v2923_v26 = vpop.f32.mrb[2].mxu1 }
 0x103   : > { %v2902_v32 = vpop.f32.mrb[3].mxu0  ;;  %v2924_v21 = vpop.f32.mrb[3].mxu1 }
 0x104   : > { %v965_v22 = vadd.f32 %v2922_v20, %v2900_v19  ;;  %v2903_v30 = vadd.f32 %v2902_v32, %v2901_v24  ;;  %v2925_v23 = vadd.f32 %v2924_v21, %v2923_v26 }
 0x106   : > { %v968_v25 = vadd.f32 %v2925_v23, %v2903_v30 }
 0x120   : > { %v2942_v27 = vpop.f32.mrb[4].mxu0  ;;  %v2964_v28 = vpop.f32.mrb[4].mxu1 }
 0x121   : > { %v2943_v29 = vpop.f32.mrb[5].mxu0  ;;  %v2965_v34 = vpop.f32.mrb[5].mxu1 }
 0x122   : > { %v2944_v35 = vadd.f32 %v2943_v29, %v2942_v27  ;;  %v2966_v36 = vadd.f32 %v2965_v34, %v2964_v28  ;;  %v2945_v37 = vpop.f32.mrb[6].mxu0  ;;  %v2967_v38 = vpop.f32.mrb[6].mxu1 }
 0x123   : > { %v2946_v39 = vpop.f32.mrb[7].mxu0  ;;  %v2968_v40 = vpop.f32.mrb[7].mxu1 }
 0x124   : > { %v1238_v41 = vadd.f32 %v2944_v35, %v965_v22  ;;  %v2947_v42 = vadd.f32 %v2946_v39, %v2945_v37  ;;  %v2969_v43 = vadd.f32 %v2968_v40, %v2967_v38 }
 0x126   : > { %v1279_v44 = vadd.f32 %v2966_v36, %v1238_v41  ;;  %v1241_v45 = vadd.f32 %v2947_v42, %v968_v25 }
 0x128   : > { %v1282_v46 = vadd.f32 %v2969_v43, %v1241_v45 }
 0x140   : > { %v2986_v47 = vpop.f32.mrb[8].mxu0  ;;  %v3008_v48 = vpop.f32.mrb[8].mxu1 }
 0x141   : > { %v2987_v49 = vpop.f32.mrb[9].mxu0  ;;  %v3009_v50 = vpop.f32.mrb[9].mxu1 }
 0x142   : > { %v2988_v51 = vadd.f32 %v2987_v49, %v2986_v47  ;;  %v3010_v52 = vadd.f32 %v3009_v50, %v3008_v48  ;;  %v2989_v53 = vpop.f32.mrb[10].mxu0  ;;  %v3011_v54 = vpop.f32.mrb[10].mxu1 }
 0x143   : > { %v2990_v55 = vpop.f32.mrb[11].mxu0  ;;  %v3012_v56 = vpop.f32.mrb[11].mxu1 }
 0x144   : > { %v1735_v57 = vadd.f32 %v3010_v52, %v2988_v51  ;;  %v2991_v58 = vadd.f32 %v2990_v55, %v2989_v53  ;;  %v3013_v59 = vadd.f32 %v3012_v56, %v3011_v54 }
 0x146   : > { %v1741_v60 = vadd.f32 %v1735_v57, %v1279_v44  ;;  %v1738_v61 = vadd.f32 %v3013_v59, %v2991_v58 }
 0x148   : > { %v1742_v62 = vadd.f32 %v1738_v61, %v1282_v46 }
 0x160   : > { %v3030_v63 = vpop.f32.mrb[12].mxu0  ;;  %v3052_v0 = vpop.f32.mrb[12].mxu1 }
 0x161   : > { %v3031_v1 = vpop.f32.mrb[13].mxu0  ;;  %v3053_v2 = vpop.f32.mrb[13].mxu1 }
 0x162   : > { %v3032_v3 = vadd.f32 %v3031_v1, %v3030_v63  ;;  %v3054_v4 = vadd.f32 %v3053_v2, %v3052_v0  ;;  %v3033_v6 = vpop.f32.mrb[14].mxu0  ;;  %v3055_v7 = vpop.f32.mrb[14].mxu1 }
 0x163   : > { %v3034_v8 = vpop.f32.mrb[15].mxu0  ;;  %v3056_v9 = vpop.f32.mrb[15].mxu1 }
 0x164   : > { %v2252_v10 = vadd.f32 %v3054_v4, %v3032_v3  ;;  %v3035_v12 = vadd.f32 %v3034_v8, %v3033_v6  ;;  %v3057_v13 = vadd.f32 %v3056_v9, %v3055_v7 }
 0x166   : > { %v2258_v14 = vadd.f32 %v2252_v10, %v1741_v60  ;;  %v2255_v5 = vadd.f32 %v3057_v13, %v3035_v12 }
 0x168   : > { %v2259_v11 = vadd.f32 %v2255_v5, %v1742_v62  ;;  %v2267_v16 = vadd.f32 %v2869_v15, %v2258_v14 }
 0x16a   : > { %v2268_v31 = vadd.f32 %v2869_v15, %v2259_v11 }
 0x16c   : > { %v2880_v17 = vpack.c.bf16 %v2268_v31, %v2267_v16  ;;  %v2279_v33 = vadd.f32 %v2268_v31, %v2267_v16 }
 0x16e   : > { %2881 = vst [vmem:[%s296_s28] sm:$0xff] %v2880_v17   ;;  %v2280_v18 = vrot.slane %v2279_v33, 4 }
 0x170   : > { %v2281_v19 = vadd.f32 %v2280_v18, %v2279_v33 }
 0x172   : > { %v2282_v20 = vrot.slane %v2281_v19, 2 }
 0x174   : > { %v2283_v24 = vadd.f32 %v2282_v20, %v2281_v19 }
 0x176   : > { %v2284_v26 = vrot.slane %v2283_v24, 1 }
 0x178   : > { %v2285_v32 = vadd.f32 %v2284_v26, %v2283_v24 }
 0x17a   : > { %v2286_v21 = vmul.f32 0.0625, %v2285_v32 }
 0x17c   : > { %v2287_v22 = vsub.f32 %v2267_v16, %v2286_v21  ;;  %v2288_v30 = vsub.f32 %v2268_v31, %v2286_v21 }
 0x17e   : > { %v2289_v23 = vmul.f32 %v2287_v22, %v2287_v22  ;;  %v2290_v25 = vmul.f32 %v2288_v30, %v2288_v30 }
 0x180   : > { %v2291_v27 = vadd.f32 %v2290_v25, %v2289_v23 }
 0x182   : > { %v2292_v28 = vrot.slane %v2291_v27, 4 }
 0x184   : > { %v2293_v29 = vadd.f32 %v2292_v28, %v2291_v27 }
 0x186   : > { %v2294_v34 = vrot.slane %v2293_v29, 2 }
 0x188   : > { %v2295_v35 = vadd.f32 %v2294_v34, %v2293_v29 }
 0x18a   : > { %v2296_v36 = vrot.slane %v2295_v35, 1 }
 0x18c   : > { %v2297_v37 = vadd.f32 %v2296_v36, %v2295_v35 }
 0x18e   : > { %v2299_v38 = vsel %vm2298_vm7, %v2285_v32, %v2297_v37 }
 0x18f   : > { %2300 = vst [vmem:[%s307_s6] sm:$0x3] %v2299_v38 }
 0x190 PF: > { %s15_s17 = sadd.s32 1, %s3234_s17   ;;  %s3813_s15 = smov %s3230_s16 }
 0x191   : > { %p12_p5 = scmp.ge.s32.totalorder %s15_s17, 4   ;;  %s3814_s16 = smov %s3816_s18 }
 0x193   :  { %14 = sbr.rel (!%p12_p5) target bundleno = 2 (0x2), region = 84 }

// kernel: discriminator_forward.14
= control target key start
LH: loop header
LB: loop body
LE: loop exit
PB: predicated region body
PF: predicated region fallthrough
CT: control target
= control target key end

     0   :  { %s425_s12 = smov 0   ;;  %s427_s13 = smov 0   ;;  %s464_s0 = inlined_call_operand.vmem [shape: bf16[2,9,128], index: 0, kind: input, shape index: {}]   ;;  %s465_s1 = inlined_call_operand.vmem [shape: f32[1,128], index: 1, kind: input, shape index: {}]   ;;  %s466_s2 = inlined_call_operand.vmem [shape: f32[1,128], index: 2, kind: input, shape index: {}]   ;;  %s467_s3 = inlined_call_operand.vmem [shape: bf16[2,9,128], index: 3, kind: output, shape index: {}]  }
   0x1   :  { %s429_s14 = smov 0  }
   0x2 LB: > { %s25_s15 = sadd.s32 1, %s399_s13  ;;  %p342_p0 = scmp.ge.s32.totalorder %s403_s14, 1  ;;  %s403_s14 = sphi %s429_s14, %s13_s14   ;;  %s399_s13 = sphi %s427_s13, %s469_s13   ;;  %s395_s12 = sphi %s425_s12, %s468_s12  }
   0x3   : > { %p27_p1 = scmp.ge.s32.totalorder %s25_s15, 2  ;;  %p158_p2 = scmp.lt.s32.totalorder %s403_s14, 3 }
   0x5   : > { %s471_s15 = smov (%p27_p1, %s25_s15), 0  ;;  %p159_p3 = pnand %p342_p0, %p158_p2 }
   0x6   : > { %p191_p4 = scmp.lt.s32.totalorder (!%p159_p3), %s395_s12, 1  ;;  %v347_v2 = vld [vmem:[%s465_s1] ss:$0 sm:$0xff] (!%p159_p3)  ;;  %vm245_vm0 = vcmask (!%p159_p3), 1040384   ;;  %vm246_vm1 = vsmask.f32 (!%p159_p3), 256 }
   0x7   : > { %162 = sbr.rel (%p159_p3) target bundleno = 32 (0x20), region = 32  ;;  %v348_v5 = vld [vmem:[%s466_s2] ss:$0 sm:$0xff] (!%p159_p3)  ;;  %vm247_vm2 = vmand (!%p159_p3), %vm245_vm0, %vm246_vm1 }
   0xe   : > { %s473_s12 = smov (!%p191_p4, %s395_s12), 1 }
   0xf   : > { %s353_s16 = sshll.u32 %s473_s12, 3 }
  0x10   : > { %s198_s19 = scalar_lea.vmem %s464_s0, %s353_s16  ;;  %s208_s26 = scalar_lea.vmem %s467_s3, %s353_s16 }
  0x11   : > { %v210_v0 = vld [vmem:[%s198_s19] sm:$0xf]  ;;  %v211_v1 = vld [vmem:[%s198_s19 + $0x4] sm:$0x1] }
  0x12   : > { %v212_v3 = vunpack.c.l.bf16 %v210_v0  ;;  %v213_v4 = vunpack.c.l.bf16 %v211_v1  ;;  %v248_v14 = vld [vmem:[%s208_s26 + $0x4] sm:$0x1] }
  0x14   : > { %v221_v6 = vmul.f32 %v347_v2, %v212_v3  ;;  %v222_v7 = vmul.f32 %v347_v2, %v213_v4 }
  0x16   : > { %v230_v8 = vadd.f32 %v348_v5, %v221_v6  ;;  %v231_v9 = vadd.f32 %v348_v5, %v222_v7 }
  0x18   : > { %v232_v10 = vmul.f32 0.2, %v230_v8  ;;  %v233_v11 = vmul.f32 0.2, %v231_v9 }
  0x1a   : > { %v234_v12 = vmax.f32 %v230_v8, %v232_v10  ;;  %v235_v13 = vmax.f32 %v231_v9, %v233_v11 }
  0x1c   : > { %v355_v15 = vpack.c.bf16 %v234_v12, %v234_v12  ;;  %v356_v16 = vpack.c.bf16 %v235_v13, %v235_v13 }
  0x1e   : > { %244 = vst [vmem:[%s208_s26] sm:$0xf] %v355_v15  ;;  %v249_v17 = vsel %vm247_vm2, %v356_v16, %v248_v14 }
  0x1f   : > { %250 = vst [vmem:[%s208_s26 + $0x4] sm:$0x1] %v249_v17 }
  0x20 PF: > { %s13_s14 = sadd.s32 1, %s403_s14   ;;  %s468_s12 = smov %s399_s13 }
  0x21   : > { %p10_p5 = scmp.ge.s32.totalorder %s13_s14, 4   ;;  %s469_s13 = smov %s471_s15 }
  0x23   :  { %12 = sbr.rel (!%p10_p5) target bundleno = 2 (0x2), region = 62 }

// kernel: discriminator_forward.13
= control target key start
LH: loop header
LB: loop body
LE: loop exit
PB: predicated region body
PF: predicated region fallthrough
CT: control target
= control target key end

     0   :  { %s5398_s15 = smov 0   ;;  %s5400_s16 = smov 0   ;;  %s6326_s0 = inlined_call_operand.vmem [shape: bf16[2,1,6,6,128], index: 0, kind: input, shape index: {}]   ;;  %s6327_s1 = inlined_call_operand.vmem [shape: bf16[16,128,128], index: 1, kind: input, shape index: {}]   ;;  %s6328_s2 = inlined_call_operand.vmem [shape: f32[1,128], index: 2, kind: input, shape index: {}]   ;;  %s6329_s3 = inlined_call_operand.vmem [shape: bf16[2,9,128], index: 3, kind: output, shape index: {0}]   ;;  %s6330_s4 = inlined_call_operand.vmem [shape: f32[2,1,2,128], index: 4, kind: output, shape index: {1}]  }
   0x1   :  { %s5402_s17 = smov 0  }
   0x2 LB: > { %s34_s18 = sadd.s32 1, %s5364_s16  ;;  %p4232_p0 = scmp.ge.s32.totalorder %s5368_s17, 1  ;;  %s5368_s17 = sphi %s5402_s17, %s15_s17   ;;  %s5364_s16 = sphi %s5400_s16, %s6332_s16   ;;  %s5360_s15 = sphi %s5398_s15, %s6331_s15  }
   0x3   : > { %p36_p1 = scmp.ge.s32.totalorder %s34_s18, 2  ;;  %p215_p2 = scmp.lt.s32.totalorder %s5368_s17, 3 }
   0x5   : > { %s6334_s18 = smov (%p36_p1, %s34_s18), 0  ;;  %p216_p3 = pnand %p4232_p0, %p215_p2 }
   0x6   : > { %v5218_v0 = vld [vmem:[%s6327_s1 + $0x40] sm:$0xff] (!%p216_p3)   ;;  %v5370_v1 = vmov (!%p216_p3), 0.0   ;;  %v5220_v3 = vld [vmem:[%s6327_s1 + $0x48] sm:$0xff] (!%p216_p3)   ;;  %vm5371_vm0 = vmmov (!%p216_p3), 0   ;;  %p269_p4 = scmp.lt.s32.totalorder (!%p216_p3), %s5360_s15, 1  ;;  %v5222_v5 = vld [vmem:[%s6327_s1 + $0x50] sm:$0xff] (!%p216_p3)   ;;  %v326_v9 = vlaneseq (!%p216_p3) }
   0x7   : > { %219 = sbr.rel (%p216_p3) target bundleno = 521 (0x209), region = 32  ;;  %4870 = vmatprep.subr.bf16.mxu0 (!%p216_p3), %v5370_v1  ;;  %4890 = vmatprep.subr.bf16.mxu1 (!%p216_p3), %v5370_v1  ;;  %v5219_v2 = vld [vmem:[%s6327_s1] sm:$0xff] (!%p216_p3)   ;;  %v5221_v4 = vld [vmem:[%s6327_s1 + $0x8] sm:$0xff] (!%p216_p3)   ;;  %v5223_v6 = vld [vmem:[%s6327_s1 + $0x10] sm:$0xff] (!%p216_p3)   ;;  %v5372_v16 = vmov (!%p216_p3), 1966171168  }
   0x8   : > { %4871 = vmatpush3.bf16.msra.mxu0 (!%p216_p3), %v5218_v0  ;;  %4886 = vmatprep.mubr.msk.bf16.mxu0 (!%p216_p3), %vm5371_vm0, %v5370_v1  ;;  %v5224_v7 = vld [vmem:[%s6327_s1 + $0x58] sm:$0xff] (!%p216_p3)   ;;  %v5226_v10 = vld [vmem:[%s6327_s1 + $0x60] sm:$0xff] (!%p216_p3)   ;;  %v327_v12 = vshrl.u32 (!%p216_p3), %v326_v9, 7  ;;  %v5228_v13 = vld [vmem:[%s6327_s1 + $0x68] sm:$0xff] (!%p216_p3)   ;;  %v324_v17 = vunpack.c.l.s4 (!%p216_p3), %v5372_v16  ;;  %vm4015_vm1 = vcmask (!%p216_p3), 1040384  }
   0x9   : > { %4891 = vmatpush3.bf16.msra.mxu1 (!%p216_p3), %v5219_v2  ;;  %4872 = vmatprep.subr.bf16.mxu0 (!%p216_p3), %v5370_v1  ;;  %v5225_v8 = vld [vmem:[%s6327_s1 + $0x18] sm:$0xff] (!%p216_p3)   ;;  %v5227_v11 = vld [vmem:[%s6327_s1 + $0x20] sm:$0xff] (!%p216_p3)   ;;  %v5229_v19 = vld [vmem:[%s6327_s1 + $0x28] sm:$0xff] (!%p216_p3)   ;;  %vm4016_vm2 = vsmask.f32 (!%p216_p3), 256 }
   0xa   : > { %4892 = vmatprep.subr.bf16.mxu1 (!%p216_p3), %v5370_v1  ;;  %4906 = vmatprep.mubr.msk.bf16.mxu1 (!%p216_p3), %vm5371_vm0, %v5370_v1  ;;  %v325_v21 = vunpack.c.0.s8 (!%p216_p3), %v324_v17  ;;  %v5230_v25 = vld [vmem:[%s6327_s1 + $0x70] sm:$0xff] (!%p216_p3)   ;;  %v5232_v37 = vld [vmem:[%s6327_s1 + $0x78] sm:$0xff] (!%p216_p3)   ;;  %v5235_v2 = vld [vmem:[%s6327_s1 + $0xc0] sm:$0xff] (!%p216_p3)  }
   0xb   : > { %v5231_v26 = vld [vmem:[%s6327_s1 + $0x30] sm:$0xff] (!%p216_p3)   ;;  %v5233_v42 = vld [vmem:[%s6327_s1 + $0x38] sm:$0xff] (!%p216_p3)   ;;  %vm4017_vm3 = vmand (!%p216_p3), %vm4015_vm1, %vm4016_vm2 }
   0xc   : > { %4873 = vmatpush3.bf16.msra.mxu0 (!%p216_p3), %v5220_v3  ;;  %v5479_v24 = vsub.s32 (!%p216_p3), %v325_v21, %v327_v12 }
   0xd   : > { %4893 = vmatpush3.bf16.msra.mxu1 (!%p216_p3), %v5221_v4  ;;  %4874 = vmatprep.subr.bf16.mxu0 (!%p216_p3), %v5370_v1 }
   0xe   : > { %s6336_s15 = smov (!%p269_p4, %s5360_s15), 1  ;;  %4894 = vmatprep.subr.bf16.mxu1 %v5370_v1 }
   0xf   : > { %s5190_s5 = smul.u32 24, %s6336_s15  ;;  %s4723_s20 = sshll.u32 %s6336_s15, 3 }
  0x10   : > { %4875 = vmatpush3.bf16.msra.mxu0 %v5222_v5  ;;  %s296_s25 = scalar_lea.vmem %s6329_s3, %s4723_s20  ;;  %s4236_s26 = sshll.u32 %s6336_s15, 1 }
  0x11   : > { %4895 = vmatpush3.bf16.msra.mxu1 %v5223_v6  ;;  %4876 = vmatprep.subr.bf16.mxu0 %v5370_v1  ;;  %s5458_s12 = scalar_lea.vmem %s6326_s0, %s5190_s5  ;;  %s307_s29 = scalar_lea.vmem %s6330_s4, %s4236_s26 }
  0x12   : > { %4896 = vmatprep.subr.bf16.mxu1 %v5370_v1  ;;  %v4237_v14 = vld.sshfl [vmem:[%s5458_s12] sm:$0x11 pattern:$0x75316420] }
  0x13   : > { %v4238_v15 = vld.sshfl [vmem:[%s5458_s12 + $0x4] sm:$0x11 pattern:$0x75316420]  ;;  %v322_v20 = vcombine.high %v4237_v14, %v4237_v14  ;;  %v329_v27 = vrot.slane %v4237_v14, %v5479_v24 }
  0x14   : > { %4877 = vmatpush3.bf16.msra.mxu0 %v5224_v7  ;;  %v4239_v18 = vld.sshfl [vmem:[%s5458_s12 + $0x8] sm:$0x11 pattern:$0x75316420]  ;;  %v344_v22 = vcombine.high %v4238_v15, %v4238_v15  ;;  %v351_v29 = vrot.slane %v4238_v15, %v5479_v24 }
  0x15   : > { %4897 = vmatpush3.bf16.msra.mxu1 %v5225_v8  ;;  %4878 = vmatprep.subr.bf16.mxu0 %v5370_v1  ;;  %v366_v23 = vcombine.high %v4239_v18, %v4239_v18  ;;  %v336_v28 = vrot.slane %v322_v20, %v5479_v24  ;;  %v373_v31 = vrot.slane %v4239_v18, %v5479_v24  ;;  %v382_v33 = vunpack.i.h.s16 %v329_v27  ;;  %v4276_v3 = vld.sshfl [vmem:[%s5458_s12] sm:$0x12 pattern:$0x75316420] }
  0x16   : > { %4898 = vmatprep.subr.bf16.mxu1 %v5370_v1  ;;  %v358_v30 = vrot.slane %v344_v22, %v5479_v24  ;;  %v385_v34 = vunpack.i.h.s16 %v351_v29  ;;  %v4277_v5 = vld.sshfl [vmem:[%s5458_s12 + $0x4] sm:$0x12 pattern:$0x75316420]  ;;  %v707_v6 = vcombine.high %v4276_v3, %v4276_v3  ;;  %v714_v7 = vrot.slane %v4276_v3, %v5479_v24  ;;  %v5237_v22 = vld [vmem:[%s6327_s1 + $0xc8] sm:$0xff]  }
  0x17   : > { %v5495_v32 = vrot.slane %v366_v23, %v5479_v24  ;;  %v406_v35 = vunpack.i.h.s16 %v336_v28  ;;  %v4266_v36 = vpack.i.b16 %v351_v29, %v336_v28  ;;  %v388_v38 = vunpack.i.h.s16 %v373_v31  ;;  %v4278_v9 = vld.sshfl [vmem:[%s5458_s12 + $0x8] sm:$0x12 pattern:$0x75316420] }
  0x18   : > { %4879 = vmatpush3.bf16.msra.mxu0 %v5226_v10  ;;  %v4356_v41 = vpack.i.b16 %v373_v31, %v358_v30  ;;  %v4256_v43 = vpack.i.b16 %v336_v28, %v382_v33  ;;  %v5506_v45 = vpack.i.b16 %v358_v30, %v385_v34  ;;  %v1477_v46 = vunpack.i.h.s16 %v358_v30  ;;  %v5236_v23 = vld [vmem:[%s6327_s1 + $0x88] sm:$0xff]  }
  0x19   : > { %4899 = vmatpush3.bf16.msra.mxu1 %v5227_v11  ;;  %4880 = vmatprep.subr.bf16.mxu0 %v5370_v1  ;;  %v408_v39 = vunpack.i.h.s16 %v5495_v32  ;;  %v389_v40 = vunpack.i.l.s16 %v5495_v32  ;;  %v427_v44 = vpack.i.b16 %v385_v34, %v406_v35  ;;  %v5510_v47 = vpack.i.b16 %v5495_v32, %v388_v38  ;;  %v5239_v35 = vld [vmem:[%s6327_s1 + $0xd0] sm:$0xff]   ;;  %v5245_v3 = vld [vmem:[%s6327_s1 + $0xe8] sm:$0xff]  }
  0x1a   : > { %4900 = vmatprep.subr.bf16.mxu1 %v5370_v1  ;;  %v565_v48 = vcombine.low %v329_v27, %v4266_v36  ;;  %v566_v51 = vcombine.low %v5506_v45, %v373_v31  ;;  %v5514_v52 = vcombine.low %v351_v29, %v4356_v41  ;;  %v5516_v53 = vpack.i.b16 %v388_v38, %v1477_v46  ;;  %v5238_v36 = vld [vmem:[%s6327_s1 + $0x90] sm:$0xff]   ;;  %v5241_v41 = vld [vmem:[%s6327_s1 + $0xd8] sm:$0xff]  }
  0x1b   : > { %v587_v49 = vrot.slane %v389_v40, %v5479_v24  ;;  %v431_v50 = vcombine.low %v4256_v43, %v427_v44  ;;  %v432_v54 = vcombine.low %v358_v30, %v5510_v47  ;;  %v453_v55 = vrot.slane %v408_v39, %v5479_v24  ;;  %v5240_v43 = vld [vmem:[%s6327_s1 + $0x98] sm:$0xff]  }
  0x1c   : > { %4881 = vmatpush3.bf16.msra.mxu0 %v5228_v13  ;;  %v573_v56 = vrot.slane %v565_v48, %v5479_v24  ;;  %v580_v58 = vrot.slane %v566_v51, %v5479_v24  ;;  %v1506_v60 = vcombine.low %v5506_v45, %v5516_v53  ;;  %v730_v10 = vcombine.high %v4277_v5, %v4277_v5  ;;  %v5234_v13 = vld [vmem:[%s6327_s1 + $0x80] sm:$0xff]   ;;  %v5246_v45 = vld [vmem:[%s6327_s1 + $0xb0] sm:$0xff]  }
  0x1d   : > { %4901 = vmatpush3.bf16.msra.mxu1 %v5229_v19  ;;  %4882 = vmatprep.subr.bf16.mxu0 %v5370_v1  ;;  %v439_v57 = vrot.slane %v431_v50, %v5479_v24  ;;  %v446_v59 = vrot.slane %v432_v54, %v5479_v24  ;;  %v602_v62 = vrot.slane %v587_v49, %v5479_v24  ;;  %v5243_v49 = vld [vmem:[%s6327_s1 + $0xe0] sm:$0xff]   ;;  %v4339_v54 = vld.sshfl [vmem:[%s5458_s12 + $0xc] sm:$0x11 pattern:$0x75316420] }
  0x1e   : > { %4902 = vmatprep.subr.bf16.mxu1 %v5370_v1  ;;  %v588_v61 = vcombine.low %v573_v56, %v580_v58  ;;  %v468_v0 = vrot.slane %v453_v55, %v5479_v24  ;;  %v737_v11 = vrot.slane %v4277_v5, %v5479_v24  ;;  %v721_v14 = vrot.slane %v707_v6, %v5479_v24  ;;  %v5242_v55 = vld [vmem:[%s6327_s1 + $0xa0] sm:$0xff]  }
  0x1f   : > { %v454_v63 = vcombine.low %v439_v57, %v446_v59  ;;  %v753_v15 = vcombine.high %v4278_v9, %v4278_v9  ;;  %v722_v17 = vcombine.high %v714_v7, %v714_v7  ;;  %v744_v18 = vrot.slane %v730_v10, %v5479_v24 }
  0x20   : > { %4883 = vmatpush3.bf16.msra.mxu0 %v5230_v25  ;;  %v595_v4 = vrot.slane %v588_v61, %v5479_v24  ;;  %v760_v19 = vrot.slane %v4278_v9, %v5479_v24  ;;  %v745_v20 = vcombine.high %v737_v11, %v737_v11  ;;  %v1006_v29 = vunpack.i.h.s16 %v721_v14 }
  0x21   : > { %4903 = vmatpush3.bf16.msra.mxu1 %v5231_v26  ;;  %4884 = vmatprep.subr.bf16.mxu0 %v5370_v1  ;;  %v461_v8 = vrot.slane %v454_v63, %v5479_v24  ;;  %v767_v21 = vrot.slane %v753_v15, %v5479_v24  ;;  %v773_v28 = vunpack.i.h.s16 %v744_v18  ;;  %v1008_v30 = vunpack.i.h.s16 %v722_v17 }
  0x22   : > { %4904 = vmatprep.subr.bf16.mxu1 %v5370_v1  ;;  %v603_v12 = vcombine.low %v595_v4, %v602_v62  ;;  %v5554_v25 = vcombine.high %v760_v19, %v760_v19  ;;  %v1951_v34 = vunpack.i.h.s16 %v745_v20  ;;  %v1226_v56 = vcombine.high %v4339_v54, %v4339_v54 }
  0x23   : > { %v469_v16 = vcombine.low %v461_v8, %v468_v0  ;;  %v1716_v26 = vunpack.i.h.s16 %v767_v21  ;;  %v4420_v27 = vpack.i.b16 %v767_v21, %v745_v20  ;;  %v1033_v38 = vpack.i.b16 %v773_v28, %v1008_v30  ;;  %v5253_v30 = vld [vmem:[%s6327_s1 + $0x148] sm:$0xff]  }
  0x24   : > { %4885 = vmatpush3.bf16.msra.mxu0 %v5232_v37  ;;  %v4324_v37 = vpack.i.b16 %v722_v17, %v1006_v29  ;;  %v5574_v39 = vpack.i.b16 %v745_v20, %v773_v28  ;;  %v5599_v57 = vrot.slane %v4339_v54, %v5479_v24  ;;  %v1014_v58 = vunpack.i.h.s16 %v5554_v25  ;;  %v4465_v54 = vld.sshfl [vmem:[%s5458_s12 + $0x8] sm:$0x11 pattern:$0x75316420] }
  0x25   : > { %4905 = vmatpush3.bf16.msra.mxu1 %v5233_v42  ;;  %4910 = vmatprep.subr.bf16.mxu0 %v5370_v1  ;;  %v5562_v31 = vpack.i.b16 %v5554_v25, %v1716_v26  ;;  %v5564_v33 = vcombine.low %v744_v18, %v4420_v27  ;;  %v5576_v40 = vpack.i.b16 %v1716_v26, %v1951_v34  ;;  %v777_v4 = vunpack.i.l.s16 %v5554_v25  ;;  %v5251_v26 = vld [vmem:[%s6327_s1 + $0x140] sm:$0xff]   ;;  %v4403_v27 = vld.sshfl [vmem:[%s5458_s12 + $0xc] sm:$0x12 pattern:$0x75316420] }
  0x26   : > { %4930 = vmatprep.subr.bf16.mxu1 %v5370_v1  ;;  %v4295_v42 = vpack.i.b16 %v744_v18, %v722_v17  ;;  %v1037_v46 = vcombine.low %v4324_v37, %v1033_v38  ;;  %v801_v51 = vcombine.low %v5574_v39, %v767_v21  ;;  %v1280_v62 = vrot.slane %v5514_v52, %v5479_v24  ;;  %v5249_v17 = vld [vmem:[%s6327_s1 + $0xf8] sm:$0xff]  }
  0x27   : > { %4887 = vmatmul.mubr.bf16.vlgmr.msra.gmra.mrb[0].mxu0 %v469_v16  ;;  %v1980_v44 = vcombine.low %v5574_v39, %v5576_v40  ;;  %v1038_v48 = vcombine.low %v745_v20, %v5562_v31  ;;  %v5608_v63 = vrot.slane %v1226_v56, %v5479_v24  ;;  %v1273_v0 = vcombine.low %v5510_v47, %v5599_v57  ;;  %v5244_v47 = vld [vmem:[%s6327_s1 + $0xa8] sm:$0xff]   ;;  %v5248_v20 = vld [vmem:[%s6327_s1 + $0xb8] sm:$0xff]   ;;  %v5259_v40 = vld [vmem:[%s6327_s1 + $0x160] sm:$0xff]  }
  0x28   : > { %4907 = vmatmul.mubr.bf16.vlgmr.msra.gmra.mrb[0].mxu1 %v603_v12  ;;  %4911 = vmatpush3.bf16.msra.mxu0 %v5234_v13  ;;  %v800_v50 = vcombine.low %v721_v14, %v4295_v42  ;;  %v1045_v59 = vrot.slane %v1037_v46, %v5479_v24  ;;  %v815_v6 = vrot.slane %v801_v51, %v5479_v24  ;;  %v5247_v13 = vld [vmem:[%s6327_s1 + $0xf0] sm:$0xff]  }
  0x29   : > { %4931 = vmatpush3.bf16.msra.mxu1 %v5235_v2  ;;  %4912 = vmatprep.subr.bf16.mxu0 %v5370_v1  ;;  %v1052_v61 = vrot.slane %v1038_v48, %v5479_v24  ;;  %v1481_v2 = vunpack.i.h.s16 %v5599_v57  ;;  %v1287_v52 = vrot.slane %v1273_v0, %v5479_v24  ;;  %v5634_v8 = vrot.slane %v1506_v60, %v5479_v24  ;;  %v5255_v42 = vld [vmem:[%s6327_s1 + $0x150] sm:$0xff]  }
  0x2a   : > { %4932 = vmatprep.subr.bf16.mxu1 %v5370_v1  ;;  %4926 = vmatprep.mubr.msk.bf16.mxu0 %vm5371_vm0, %v5370_v1  ;;  %v808_v5 = vrot.slane %v800_v50, %v5479_v24  ;;  %v1059_v9 = vrot.slane %v1014_v58, %v5479_v24  ;;  %v822_v14 = vrot.slane %v777_v4, %v5479_v24  ;;  %v5257_v50 = vld [vmem:[%s6327_s1 + $0x158] sm:$0xff]  }
  0x2b   : > { %4946 = vmatprep.mubr.msk.bf16.mxu1 %vm5371_vm0, %v5370_v1  ;;  %v5627_v7 = vpack.i.b16 %v5608_v63, %v1481_v2  ;;  %v1060_v10 = vcombine.low %v1045_v59, %v1052_v61  ;;  %v5637_v11 = vcombine.low %v1280_v62, %v1287_v52  ;;  %v1696_v28 = vcombine.high %v4403_v27, %v4403_v27 }
  0x2c   : > { %4913 = vmatpush3.bf16.msra.mxu0 %v5236_v23  ;;  %v823_v15 = vcombine.low %v808_v5, %v815_v6  ;;  %v1074_v60 = vrot.slane %v1059_v9, %v5479_v24  ;;  %v837_v19 = vrot.slane %v822_v14, %v5479_v24  ;;  %v1703_v29 = vrot.slane %v4403_v27, %v5479_v24  ;;  %v5260_v6 = vld [vmem:[%s6327_s1 + $0x128] sm:$0xff]  }
  0x2d   : > { %4933 = vmatpush3.bf16.msra.mxu1 %v5237_v22  ;;  %4914 = vmatprep.subr.bf16.mxu0 %v5370_v1  ;;  %v1507_v12 = vcombine.low %v5495_v32, %v5627_v7  ;;  %v1067_v32 = vrot.slane %v1060_v10, %v5479_v24  ;;  %v5250_v22 = vld [vmem:[%s6327_s1 + $0x100] sm:$0xff]   ;;  %v5681_v34 = vrot.slane %v1696_v28, %v5479_v24  ;;  %v1249_v59 = vunpack.i.l.s16 %v5608_v63 }
  0x2e   : > { %4934 = vmatprep.subr.bf16.mxu1 %v5370_v1  ;;  %v830_v18 = vrot.slane %v823_v15, %v5479_v24  ;;  %v1751_v38 = vrot.slane %v5564_v33, %v5479_v24  ;;  %v2125_v56 = vcombine.high %v4465_v54, %v4465_v54  ;;  %v2132_v58 = vrot.slane %v4465_v54, %v5479_v24 }
  0x2f   : > { %v5650_v53 = vrot.slane %v1507_v12, %v5479_v24  ;;  %v1075_v21 = vcombine.low %v1067_v32, %v1074_v60  ;;  %v1744_v37 = vcombine.low %v5562_v31, %v5681_v34  ;;  %v5254_v31 = vld [vmem:[%s6327_s1 + $0x110] sm:$0xff]   ;;  %v1483_v61 = vunpack.i.h.s16 %v5608_v63 }
  0x30   : > { %4915 = vmatpush3.bf16.msra.mxu0 %v5238_v36  ;;  %v838_v23 = vcombine.low %v830_v18, %v837_v19  ;;  %v5252_v36 = vld [vmem:[%s6327_s1 + $0x108] sm:$0xff]   ;;  %v2139_v4 = vrot.slane %v2125_v56, %v5479_v24  ;;  %v2418_v5 = vunpack.i.h.s16 %v2132_v58  ;;  %v1294_v14 = vrot.slane %v1249_v59, %v5479_v24  ;;  %v5262_v18 = vld [vmem:[%s6327_s1 + $0x130] sm:$0xff]  }
  0x31   : > { %4935 = vmatpush3.bf16.msra.mxu1 %v5239_v35  ;;  %4916 = vmatprep.subr.bf16.mxu0 %v5370_v1  ;;  %v1529_v16 = vcombine.low %v5634_v8, %v5650_v53  ;;  %v5683_v35 = vcombine.high %v1703_v29, %v1703_v29  ;;  %v1528_v15 = vrot.slane %v1483_v61, %v5479_v24  ;;  %v5264_v53 = vld [vmem:[%s6327_s1 + $0x138] sm:$0xff]   ;;  %v5267_v29 = vld [vmem:[%s6327_s1 + $0x1c0] sm:$0xff]   ;;  %v5271_v59 = vld [vmem:[%s6327_s1 + $0x1d0] sm:$0xff]  }
  0x32   : > { %4936 = vmatprep.subr.bf16.mxu1 %v5370_v1  ;;  %v4484_v10 = vpack.i.b16 %v5599_v57, %v2139_v4  ;;  %v2420_v12 = vunpack.i.h.s16 %v2139_v4 }
  0x33   : > { %v1536_v57 = vrot.slane %v1529_v16, %v5479_v24 }
  0x34   : > { %4917 = vmatpush3.bf16.msra.mxu0 %v5240_v43  ;;  %v1758_v43 = vrot.slane %v1744_v37, %v5479_v24  ;;  %v2215_v32 = vcombine.low %v2132_v58, %v4484_v10  ;;  %v4529_v37 = vld.sshfl [vmem:[%s5458_s12 + $0x8] sm:$0x12 pattern:$0x75316420] }
  0x35   : > { %4937 = vmatpush3.bf16.msra.mxu1 %v5241_v41  ;;  %4918 = vmatprep.subr.bf16.mxu0 %v5370_v1  ;;  %v1955_v41 = vunpack.i.h.s16 %v5681_v34 }
  0x36   : > { %4938 = vmatprep.subr.bf16.mxu1 %v5370_v1  ;;  %v5713_v33 = vcombine.low %v1751_v38, %v1758_v43  ;;  %v4531_v38 = vld.sshfl [vmem:[%s5458_s12 + $0x10] sm:$0x12 pattern:$0x75316420]  ;;  %v2600_v43 = vrot.slane %v4529_v37, %v5479_v24 }
  0x37   : > { %v5706_v46 = vpack.i.b16 %v5683_v35, %v1955_v41 }
  0x38   : > { %4919 = vmatpush3.bf16.msra.mxu0 %v5242_v55  ;;  %v4467_v55 = vld.sshfl [vmem:[%s5458_s12 + $0x10] sm:$0x11 pattern:$0x75316420] }
  0x39   : > { %4939 = vmatpush3.bf16.msra.mxu1 %v5243_v49  ;;  %4920 = vmatprep.subr.bf16.mxu0 %v5370_v1  ;;  %v1981_v48 = vcombine.low %v5554_v25, %v5706_v46  ;;  %v5721_v49 = vrot.slane %v1980_v44, %v5479_v24  ;;  %v5256_v25 = vld [vmem:[%s6327_s1 + $0x118] sm:$0xff]   ;;  %v5258_v44 = vld [vmem:[%s6327_s1 + $0x120] sm:$0xff]   ;;  %v2169_v62 = vcombine.high %v4467_v55, %v4467_v55 }
  0x3a   : > { %4940 = vmatprep.subr.bf16.mxu1 %v5370_v1  ;;  %v5750_v0 = vrot.slane %v4467_v55, %v5479_v24 }
  0x3b   : > { %v5727_v51 = vrot.slane %v1981_v48, %v5479_v24  ;;  %v2646_v48 = vrot.slane %v4531_v38, %v5479_v24 }
  0x3c   : > { %4921 = vmatpush3.bf16.msra.mxu0 %v5244_v47  ;;  %v5761_v47 = vrot.slane %v2169_v62, %v5479_v24  ;;  %v2216_v52 = vcombine.low %v5627_v7, %v5750_v0  ;;  %v2424_v9 = vunpack.i.h.s16 %v5750_v0  ;;  %v5263_v7 = vld [vmem:[%s6327_s1 + $0x170] sm:$0xff]  }
  0x3d   : > { %4941 = vmatpush3.bf16.msra.mxu1 %v5245_v3  ;;  %4922 = vmatprep.subr.bf16.mxu0 %v5370_v1  ;;  %v2003_v39 = vcombine.low %v5721_v49, %v5727_v51  ;;  %v5261_v3 = vld [vmem:[%s6327_s1 + $0x168] sm:$0xff]   ;;  %v5841_v54 = vcombine.high %v2646_v48, %v2646_v48  ;;  %v5278_v48 = vld [vmem:[%s6327_s1 + $0x1b0] sm:$0xff]   ;;  %v5280_v49 = vld [vmem:[%s6327_s1 + $0x1b8] sm:$0xff]  }
  0x3e   : > { %4942 = vmatprep.subr.bf16.mxu1 %v5370_v1  ;;  %v2230_v60 = vrot.slane %v2216_v52, %v5479_v24 }
  0x40   : > { %4923 = vmatpush3.bf16.msra.mxu0 %v5246_v45  ;;  %v5773_v45 = vpack.i.b16 %v5761_v47, %v2424_v9 }
  0x41   : > { %4943 = vmatpush3.bf16.msra.mxu1 %v5247_v13  ;;  %4924 = vmatprep.subr.bf16.mxu0 %v5370_v1  ;;  %v4516_v13 = vpack.i.b16 %v2139_v4, %v2418_v5 }
  0x42   : > { %4944 = vmatprep.subr.bf16.mxu1 %v5370_v1  ;;  %v2450_v19 = vcombine.low %v5608_v63, %v5773_v45  ;;  %v5265_v63 = vld [vmem:[%s6327_s1 + $0x178] sm:$0xff]  }
  0x44   : > { %4925 = vmatpush3.bf16.msra.mxu0 %v5248_v20  ;;  %v2223_v20 = vrot.slane %v2215_v32, %v5479_v24  ;;  %v5275_v32 = vld [vmem:[%s6327_s1 + $0x1e0] sm:$0xff]  }
  0x45   : > { %4945 = vmatpush3.bf16.msra.mxu1 %v5249_v17  ;;  %4950 = vmatprep.subr.bf16.mxu0 %v5370_v1  ;;  %v2445_v17 = vpack.i.b16 %v1481_v2, %v2420_v12  ;;  %v1543_v2 = vrot.slane %v1528_v15, %v5479_v24 }
  0x46   : > { %4970 = vmatprep.subr.bf16.mxu1 %v5370_v1  ;;  %v5803_v27 = vcombine.low %v2223_v20, %v2230_v60  ;;  %v5277_v20 = vld [vmem:[%s6327_s1 + $0x1e8] sm:$0xff]  }
  0x47   : > { %4927 = vmatmul.mubr.bf16.vlgmr.msra.gmra.mrb[4].mxu0 %v838_v23  ;;  %v1302_v23 = vrot.slane %v5637_v11, %v5479_v24  ;;  %v1544_v16 = vcombine.low %v1536_v57, %v1543_v2  ;;  %v4593_v57 = vld.sshfl [vmem:[%s5458_s12 + $0xc] sm:$0x11 pattern:$0x75316420] }
  0x48   : > { %4947 = vmatmul.mubr.bf16.vlgmr.msra.gmra.mrb[4].mxu1 %v1075_v21  ;;  %4951 = vmatpush3.bf16.msra.mxu0 %v5250_v22  ;;  %v2449_v21 = vcombine.low %v4516_v13, %v2445_v17  ;;  %v5795_v22 = vrot.slane %v2450_v19, %v5479_v24  ;;  %v5273_v13 = vld [vmem:[%s6327_s1 + $0x1d8] sm:$0xff]   ;;  %v5274_v17 = vld [vmem:[%s6327_s1 + $0x1a0] sm:$0xff]   ;;  %v5276_v19 = vld [vmem:[%s6327_s1 + $0x1a8] sm:$0xff]  }
  0x49   : > { %4971 = vmatpush3.bf16.msra.mxu1 %v5251_v26  ;;  %4952 = vmatprep.subr.bf16.mxu0 %v5370_v1  ;;  %v1309_v26 = vrot.slane %v1294_v14, %v5479_v24  ;;  %v4595_v2 = vld.sshfl [vmem:[%s5458_s12 + $0x14] sm:$0x11 pattern:$0x75316420] }
  0x4a   : > { %4972 = vmatprep.subr.bf16.mxu1 %v5370_v1  ;;  %4966 = vmatprep.mubr.msk.bf16.mxu0 %vm5371_vm0, %v5370_v1  ;;  %v5806_v8 = vrot.slane %v2449_v21, %v5479_v24  ;;  %v1957_v21 = vunpack.i.h.s16 %v5683_v35 }
  0x4b   : > { %4986 = vmatprep.mubr.msk.bf16.mxu1 %vm5371_vm0, %v5370_v1  ;;  %v1310_v28 = vcombine.low %v1302_v23, %v1309_v26  ;;  %v3075_v23 = vrot.slane %v4593_v57, %v5479_v24 }
  0x4c   : > { %4953 = vmatpush3.bf16.msra.mxu0 %v5252_v36  ;;  %v2472_v11 = vcombine.low %v5806_v8, %v5795_v22  ;;  %v5269_v36 = vld [vmem:[%s6327_s1 + $0x1c8] sm:$0xff]   ;;  %v5296_v22 = vld [vmem:[%s6327_s1 + $0x238] sm:$0xff]  }
  0x4d   : > { %4973 = vmatpush3.bf16.msra.mxu1 %v5253_v30  ;;  %4954 = vmatprep.subr.bf16.mxu0 %v5370_v1  ;;  %v5266_v30 = vld [vmem:[%s6327_s1 + $0x180] sm:$0xff]  }
  0x4e   : > { %4974 = vmatprep.subr.bf16.mxu1 %v5370_v1 }
  0x50   : > { %4955 = vmatpush3.bf16.msra.mxu0 %v5254_v31  ;;  %v2639_v31 = vcombine.high %v4531_v38, %v4531_v38  ;;  %v5279_v38 = vld [vmem:[%s6327_s1 + $0x1f0] sm:$0xff]  }
  0x51   : > { %4975 = vmatpush3.bf16.msra.mxu1 %v5255_v42  ;;  %4956 = vmatprep.subr.bf16.mxu0 %v5370_v1  ;;  %v2593_v42 = vcombine.high %v4529_v37, %v4529_v37 }
  0x52   : > { %4976 = vmatprep.subr.bf16.mxu1 %v5370_v1 }
  0x54   : > { %4957 = vmatpush3.bf16.msra.mxu0 %v5256_v25  ;;  %v2607_v25 = vrot.slane %v2593_v42, %v5479_v24 }
  0x55   : > { %4977 = vmatpush3.bf16.msra.mxu1 %v5257_v50  ;;  %4958 = vmatprep.subr.bf16.mxu0 %v5370_v1  ;;  %v5268_v50 = vld [vmem:[%s6327_s1 + $0x188] sm:$0xff]  }
  0x56   : > { %4978 = vmatprep.subr.bf16.mxu1 %v5370_v1  ;;  %v2892_v56 = vunpack.i.h.s16 %v2607_v25 }
  0x58   : > { %4959 = vmatpush3.bf16.msra.mxu0 %v5258_v44  ;;  %v5839_v44 = vrot.slane %v2639_v31, %v5479_v24 }
  0x59   : > { %4979 = vmatpush3.bf16.msra.mxu1 %v5259_v40  ;;  %4960 = vmatprep.subr.bf16.mxu0 %v5370_v1  ;;  %v2608_v40 = vcombine.high %v2600_v43, %v2600_v43 }
  0x5a   : > { %4980 = vmatprep.subr.bf16.mxu1 %v5370_v1  ;;  %v2687_v61 = vcombine.low %v5706_v46, %v5839_v44  ;;  %v2898_v62 = vunpack.i.h.s16 %v5839_v44 }
  0x5b   : > { %v4548_v55 = vpack.i.b16 %v5681_v34, %v2608_v40  ;;  %v2894_v58 = vunpack.i.h.s16 %v2608_v40  ;;  %v4580_v5 = vpack.i.b16 %v2608_v40, %v2892_v56 }
  0x5c   : > { %4961 = vmatpush3.bf16.msra.mxu0 %v5260_v6  ;;  %v2701_v52 = vrot.slane %v2687_v61, %v5479_v24  ;;  %v5863_v46 = vpack.i.b16 %v5841_v54, %v2898_v62  ;;  %v1773_v61 = vrot.slane %v5713_v33, %v5479_v24 }
  0x5d   : > { %4981 = vmatpush3.bf16.msra.mxu1 %v5261_v3  ;;  %4962 = vmatprep.subr.bf16.mxu0 %v5370_v1  ;;  %v5270_v3 = vld [vmem:[%s6327_s1 + $0x190] sm:$0xff]   ;;  %v2686_v4 = vcombine.low %v2607_v25, %v4548_v55  ;;  %v2919_v6 = vpack.i.b16 %v1955_v41, %v2894_v58  ;;  %v5272_v41 = vld [vmem:[%s6327_s1 + $0x198] sm:$0xff]   ;;  %v2010_v55 = vrot.slane %v2003_v39, %v5479_v24 }
  0x5e   : > { %4982 = vmatprep.subr.bf16.mxu1 %v5370_v1  ;;  %v2924_v34 = vcombine.low %v5683_v35, %v5863_v46 }
  0x5f   : > { %v2694_v10 = vrot.slane %v2686_v4, %v5479_v24  ;;  %v2923_v12 = vcombine.low %v4580_v5, %v2919_v6  ;;  %v5283_v6 = vld [vmem:[%s6327_s1 + $0x240] sm:$0xff]  }
  0x60   : > { %4963 = vmatpush3.bf16.msra.mxu0 %v5262_v18  ;;  %v1720_v18 = vunpack.i.l.s16 %v5683_v35  ;;  %v2002_v35 = vrot.slane %v1957_v21, %v5479_v24 }
  0x61   : > { %4983 = vmatpush3.bf16.msra.mxu1 %v5263_v7  ;;  %4964 = vmatprep.subr.bf16.mxu0 %v5370_v1  ;;  %v5875_v14 = vcombine.low %v2694_v10, %v2701_v52  ;;  %v5878_v15 = vrot.slane %v2923_v12, %v5479_v24  ;;  %v5882_v7 = vrot.slane %v2924_v34, %v5479_v24  ;;  %v5282_v10 = vld [vmem:[%s6327_s1 + $0x200] sm:$0xff]   ;;  %v5285_v12 = vld [vmem:[%s6327_s1 + $0x248] sm:$0xff]  }
  0x62   : > { %4984 = vmatprep.subr.bf16.mxu1 %v5370_v1  ;;  %v1765_v26 = vrot.slane %v1720_v18, %v5479_v24  ;;  %v2017_v56 = vrot.slane %v2002_v35, %v5479_v24  ;;  %v5284_v34 = vld [vmem:[%s6327_s1 + $0x208] sm:$0xff]  }
  0x63   : > { %v2946_v60 = vcombine.low %v5878_v15, %v5882_v7  ;;  %v5312_v15 = vld [vmem:[%s6327_s1 + $0x2b8] sm:$0xff]  }
  0x64   : > { %4965 = vmatpush3.bf16.msra.mxu0 %v5264_v53  ;;  %v3112_v53 = vcombine.high %v4595_v2, %v4595_v2  ;;  %v2018_v4 = vcombine.low %v2010_v55, %v2017_v56  ;;  %v2426_v56 = vunpack.i.h.s16 %v5761_v47 }
  0x65   : > { %4985 = vmatpush3.bf16.msra.mxu1 %v5265_v63  ;;  %4990 = vmatprep.subr.bf16.mxu0 %v5370_v1  ;;  %v3068_v63 = vcombine.high %v4593_v57, %v4593_v57  ;;  %v5287_v57 = vld [vmem:[%s6327_s1 + $0x250] sm:$0xff]  }
  0x66   : > { %5010 = vmatprep.subr.bf16.mxu1 %v5370_v1 }
  0x67   : > { %4967 = vmatmul.mubr.bf16.vlgmr.msra.gmra.mrb[8].mxu0 %v1310_v28  ;;  %v3082_v28 = vrot.slane %v3068_v63, %v5479_v24 }
  0x68   : > { %4987 = vmatmul.mubr.bf16.vlgmr.msra.gmra.mrb[8].mxu1 %v1544_v16  ;;  %4991 = vmatpush3.bf16.msra.mxu0 %v5266_v30  ;;  %v3119_v16 = vrot.slane %v4595_v2, %v5479_v24  ;;  %v5912_v30 = vrot.slane %v3112_v53, %v5479_v24 }
  0x69   : > { %5011 = vmatpush3.bf16.msra.mxu1 %v5267_v29  ;;  %4992 = vmatprep.subr.bf16.mxu0 %v5370_v1  ;;  %v3361_v29 = vunpack.i.h.s16 %v3075_v23  ;;  %v4612_v42 = vpack.i.b16 %v5750_v0, %v3082_v28  ;;  %v3363_v43 = vunpack.i.h.s16 %v3082_v28  ;;  %v1780_v0 = vrot.slane %v1765_v26, %v5479_v24 }
  0x6a   : > { %5012 = vmatprep.subr.bf16.mxu1 %v5370_v1  ;;  %5006 = vmatprep.mubr.msk.bf16.mxu0 %vm5371_vm0, %v5370_v1  ;;  %v3367_v37 = vunpack.i.h.s16 %v3119_v16 }
  0x6b   : > { %5026 = vmatprep.mubr.msk.bf16.mxu1 %vm5371_vm0, %v5370_v1  ;;  %v4644_v31 = vpack.i.b16 %v3082_v28, %v3361_v29  ;;  %v3388_v40 = vpack.i.b16 %v2424_v9, %v3363_v43  ;;  %v1781_v5 = vcombine.low %v1773_v61, %v1780_v0  ;;  %v5292_v61 = vld [vmem:[%s6327_s1 + $0x228] sm:$0xff]   ;;  %v2471_v0 = vrot.slane %v2426_v56, %v5479_v24 }
  0x6c   : > { %4993 = vmatpush3.bf16.msra.mxu0 %v5268_v50  ;;  %v4645_v50 = vpack.i.b16 %v5912_v30, %v3367_v37  ;;  %v3369_v56 = vunpack.i.h.s16 %v5912_v30 }
  0x6d   : > { %5013 = vmatpush3.bf16.msra.mxu1 %v5269_v36  ;;  %4994 = vmatprep.subr.bf16.mxu0 %v5370_v1  ;;  %v3159_v36 = vcombine.low %v5773_v45, %v3119_v16  ;;  %v3158_v45 = vcombine.low %v3075_v23, %v4612_v42  ;;  %v5286_v23 = vld [vmem:[%s6327_s1 + $0x210] sm:$0xff]  }
  0x6e   : > { %5014 = vmatprep.subr.bf16.mxu1 %v5370_v1  ;;  %v3393_v58 = vcombine.low %v5761_v47, %v4645_v50 }
  0x6f   : > { %v3173_v25 = vrot.slane %v3159_v36, %v5479_v24  ;;  %v3166_v9 = vrot.slane %v3158_v45, %v5479_v24  ;;  %v5291_v45 = vld [vmem:[%s6327_s1 + $0x260] sm:$0xff]  }
  0x70   : > { %4995 = vmatpush3.bf16.msra.mxu0 %v5270_v3  ;;  %v3392_v3 = vcombine.low %v4644_v31, %v3388_v40  ;;  %v5946_v51 = vrot.slane %v3393_v58, %v5479_v24  ;;  %v5290_v40 = vld [vmem:[%s6327_s1 + $0x220] sm:$0xff]   ;;  %v5293_v58 = vld [vmem:[%s6327_s1 + $0x268] sm:$0xff]  }
  0x71   : > { %5015 = vmatpush3.bf16.msra.mxu1 %v5271_v59  ;;  %4996 = vmatprep.subr.bf16.mxu0 %v5370_v1  ;;  %v5281_v59 = vld [vmem:[%s6327_s1 + $0x1f8] sm:$0xff]   ;;  %v5949_v39 = vcombine.low %v3166_v9, %v3173_v25  ;;  %v5295_v9 = vld [vmem:[%s6327_s1 + $0x270] sm:$0xff]  }
  0x72   : > { %5016 = vmatprep.subr.bf16.mxu1 %v5370_v1  ;;  %v5952_v33 = vrot.slane %v3392_v3, %v5479_v24 }
  0x74   : > { %4997 = vmatpush3.bf16.msra.mxu0 %v5272_v41  ;;  %v3415_v52 = vcombine.low %v5952_v33, %v5946_v51  ;;  %v4659_v41 = vld.sshfl [vmem:[%s5458_s12 + $0x14] sm:$0x12 pattern:$0x75316420]  ;;  %v5328_v51 = vld [vmem:[%s6327_s1 + $0x338] sm:$0xff]  }
  0x75   : > { %5017 = vmatpush3.bf16.msra.mxu1 %v5273_v13  ;;  %4998 = vmatprep.subr.bf16.mxu0 %v5370_v1  ;;  %v4657_v13 = vld.sshfl [vmem:[%s5458_s12 + $0xc] sm:$0x12 pattern:$0x75316420]  ;;  %v3582_v18 = vcombine.high %v4659_v41, %v4659_v41 }
  0x76   : > { %5018 = vmatprep.subr.bf16.mxu1 %v5370_v1 }
  0x77   : > { %v3596_v2 = vrot.slane %v3582_v18, %v5479_v24  ;;  %v5304_v18 = vld [vmem:[%s6327_s1 + $0x298] sm:$0xff]  }
  0x78   : > { %4999 = vmatpush3.bf16.msra.mxu0 %v5274_v17  ;;  %v3543_v17 = vrot.slane %v4657_v13, %v5479_v24 }
  0x79   : > { %5019 = vmatpush3.bf16.msra.mxu1 %v5275_v32  ;;  %5000 = vmatprep.subr.bf16.mxu0 %v5370_v1  ;;  %v3536_v32 = vcombine.high %v4657_v13, %v4657_v13  ;;  %v3630_v28 = vcombine.low %v5863_v46, %v3596_v2  ;;  %v3841_v29 = vunpack.i.h.s16 %v3596_v2  ;;  %v5288_v46 = vld [vmem:[%s6327_s1 + $0x218] sm:$0xff]   ;;  %v5301_v13 = vld [vmem:[%s6327_s1 + $0x2c8] sm:$0xff]   ;;  %v2663_v2 = vunpack.i.l.s16 %v5841_v54 }
  0x7a   : > { %5020 = vmatprep.subr.bf16.mxu1 %v5370_v1  ;;  %v3551_v21 = vcombine.high %v3543_v17, %v3543_v17  ;;  %v5305_v17 = vld [vmem:[%s6327_s1 + $0x2d8] sm:$0xff]  }
  0x7b   : > { %v3644_v42 = vrot.slane %v3630_v28, %v5479_v24  ;;  %v2953_v28 = vrot.slane %v2946_v60, %v5479_v24 }
  0x7c   : > { %5001 = vmatpush3.bf16.msra.mxu0 %v5276_v19  ;;  %v3589_v19 = vrot.slane %v4659_v41, %v5479_v24  ;;  %v4676_v26 = vpack.i.b16 %v5839_v44, %v3551_v21  ;;  %v3837_v16 = vunpack.i.h.s16 %v3551_v21  ;;  %v5303_v41 = vld [vmem:[%s6327_s1 + $0x2d0] sm:$0xff]  }
  0x7d   : > { %5021 = vmatpush3.bf16.msra.mxu1 %v5277_v20  ;;  %5002 = vmatprep.subr.bf16.mxu0 %v5370_v1  ;;  %v3550_v20 = vrot.slane %v3536_v32, %v5479_v24  ;;  %v5302_v32 = vld [vmem:[%s6327_s1 + $0x290] sm:$0xff]  }
  0x7e   : > { %5022 = vmatprep.subr.bf16.mxu1 %v5370_v1  ;;  %v5985_v63 = vcombine.high %v3589_v19, %v3589_v19  ;;  %v3862_v37 = vpack.i.b16 %v2898_v62, %v3837_v16  ;;  %v5307_v19 = vld [vmem:[%s6327_s1 + $0x2e0] sm:$0xff]   ;;  %v2708_v16 = vrot.slane %v2663_v2, %v5479_v24 }
  0x7f   : > { %v3835_v53 = vunpack.i.h.s16 %v3550_v20  ;;  %v3629_v35 = vcombine.low %v3550_v20, %v4676_v26  ;;  %v5306_v20 = vld [vmem:[%s6327_s1 + $0x2a0] sm:$0xff]  }
  0x80   : > { %5003 = vmatpush3.bf16.msra.mxu0 %v5278_v48  ;;  %v4709_v43 = vpack.i.b16 %v5985_v63, %v3841_v29 }
  0x81   : > { %5023 = vmatpush3.bf16.msra.mxu1 %v5279_v38  ;;  %5004 = vmatprep.subr.bf16.mxu0 %v5370_v1  ;;  %v4708_v36 = vpack.i.b16 %v3551_v21, %v3835_v53  ;;  %v5289_v38 = vld [vmem:[%s6327_s1 + $0x258] sm:$0xff]   ;;  %v3637_v31 = vrot.slane %v3629_v35, %v5479_v24  ;;  %v2900_v21 = vunpack.i.h.s16 %v5841_v54  ;;  %v5311_v53 = vld [vmem:[%s6327_s1 + $0x2f0] sm:$0xff]  }
  0x82   : > { %5024 = vmatprep.subr.bf16.mxu1 %v5370_v1  ;;  %v3867_v62 = vcombine.low %v5841_v54, %v4709_v43  ;;  %v5310_v54 = vld [vmem:[%s6327_s1 + $0x2b0] sm:$0xff]   ;;  %v5313_v35 = vld [vmem:[%s6327_s1 + $0x2f8] sm:$0xff]   ;;  %v5316_v43 = vld [vmem:[%s6327_s1 + $0x308] sm:$0xff]  }
  0x83   : > { %v3866_v44 = vcombine.low %v4708_v36, %v3862_v37  ;;  %v6008_v48 = vcombine.low %v3637_v31, %v3644_v42  ;;  %v2945_v26 = vrot.slane %v2900_v21, %v5479_v24  ;;  %v2716_v36 = vrot.slane %v5875_v14, %v5479_v24  ;;  %v5314_v14 = vld [vmem:[%s6327_s1 + $0x300] sm:$0xff]   ;;  %v5317_v42 = vld [vmem:[%s6327_s1 + $0x348] sm:$0xff]   ;;  %v5318_v31 = vld [vmem:[%s6327_s1 + $0x310] sm:$0xff]  }
  0x84   : > { %5005 = vmatpush3.bf16.msra.mxu0 %v5280_v49  ;;  %v6017_v25 = vrot.slane %v3867_v62, %v5479_v24  ;;  %v2479_v49 = vrot.slane %v2472_v11, %v5479_v24  ;;  %v2723_v37 = vrot.slane %v2708_v16, %v5479_v24  ;;  %v5320_v62 = vld [vmem:[%s6327_s1 + $0x318] sm:$0xff]  }
  0x85   : > { %5025 = vmatpush3.bf16.msra.mxu1 %v5281_v59  ;;  %5030 = vmatprep.subr.bf16.mxu0 %v5370_v1  ;;  %v6011_v50 = vrot.slane %v3866_v44, %v5479_v24  ;;  %v2192_v59 = vunpack.i.l.s16 %v5761_v47  ;;  %v5294_v47 = vld [vmem:[%s6327_s1 + $0x230] sm:$0xff]   ;;  %v2960_v29 = vrot.slane %v2945_v26, %v5479_v24  ;;  %v5321_v44 = vld [vmem:[%s6327_s1 + $0x358] sm:$0xff]  }
  0x86   : > { %5050 = vmatprep.subr.bf16.mxu1 %v5370_v1  ;;  %v2724_v60 = vcombine.low %v2716_v36, %v2723_v37 }
  0x87   : > { %5007 = vmatmul.mubr.bf16.vlgmr.msra.gmra.mrb[12].mxu0 %v1781_v5  ;;  %v3889_v55 = vcombine.low %v6011_v50, %v6017_v25  ;;  %v2237_v3 = vrot.slane %v2192_v59, %v5479_v24  ;;  %v5297_v5 = vld [vmem:[%s6327_s1 + $0x278] sm:$0xff]   ;;  %v2961_v7 = vcombine.low %v2953_v28, %v2960_v29  ;;  %v3135_v59 = vunpack.i.l.s16 %v5912_v30  ;;  %v5326_v30 = vld [vmem:[%s6327_s1 + $0x330] sm:$0xff]  }
  0x88   : > { %5027 = vmatmul.mubr.bf16.vlgmr.msra.gmra.mrb[12].mxu1 %v2018_v4  ;;  %5031 = vmatpush3.bf16.msra.mxu0 %v5282_v10  ;;  %v2486_v4 = vrot.slane %v2471_v0, %v5479_v24  ;;  %v3414_v0 = vrot.slane %v3369_v56, %v5479_v24  ;;  %v5342_v29 = vld [vmem:[%s6327_s1 + $0x3b0] sm:$0xff]   ;;  %v5344_v50 = vld [vmem:[%s6327_s1 + $0x3b8] sm:$0xff]  }
  0x89   : > { %5051 = vmatpush3.bf16.msra.mxu1 %v5283_v6  ;;  %5032 = vmatprep.subr.bf16.mxu0 %v5370_v1  ;;  %v2245_v6 = vrot.slane %v5803_v27, %v5479_v24  ;;  %v2252_v10 = vrot.slane %v2237_v3, %v5479_v24  ;;  %v5298_v27 = vld [vmem:[%s6327_s1 + $0x280] sm:$0xff]   ;;  %v3180_v3 = vrot.slane %v3135_v59, %v5479_v24 }
  0x8a   : > { %5052 = vmatprep.subr.bf16.mxu1 %v5370_v1  ;;  %5046 = vmatprep.mubr.msk.bf16.mxu0 %vm5371_vm0, %v5370_v1  ;;  %v2487_v8 = vcombine.low %v2479_v49, %v2486_v4  ;;  %v3429_v49 = vrot.slane %v3414_v0, %v5479_v24  ;;  %v5329_v4 = vld [vmem:[%s6327_s1 + $0x378] sm:$0xff]   ;;  %v3896_v37 = vrot.slane %v3889_v55, %v5479_v24 }
  0x8b   : > { %5066 = vmatprep.mubr.msk.bf16.mxu1 %vm5371_vm0, %v5370_v1  ;;  %v2253_v11 = vcombine.low %v2245_v6, %v2252_v10  ;;  %v3195_v6 = vrot.slane %v3180_v3, %v5479_v24  ;;  %v5331_v10 = vld [vmem:[%s6327_s1 + $0x3c0] sm:$0xff]  }
  0x8c   : > { %5033 = vmatpush3.bf16.msra.mxu0 %v5284_v34  ;;  %v5300_v34 = vld [vmem:[%s6327_s1 + $0x288] sm:$0xff]  }
  0x8d   : > { %5053 = vmatpush3.bf16.msra.mxu1 %v5285_v12  ;;  %5034 = vmatprep.subr.bf16.mxu0 %v5370_v1  ;;  %v5299_v12 = vld [vmem:[%s6327_s1 + $0x2c0] sm:$0xff]  }
  0x8e   : > { %5054 = vmatprep.subr.bf16.mxu1 %v5370_v1 }
  0x90   : > { %5035 = vmatpush3.bf16.msra.mxu0 %v5286_v23  ;;  %v5308_v23 = vld [vmem:[%s6327_s1 + $0x2a8] sm:$0xff]  }
  0x91   : > { %5055 = vmatpush3.bf16.msra.mxu1 %v5287_v57  ;;  %5036 = vmatprep.subr.bf16.mxu0 %v5370_v1  ;;  %v5309_v57 = vld [vmem:[%s6327_s1 + $0x2e8] sm:$0xff]  }
  0x92   : > { %5056 = vmatprep.subr.bf16.mxu1 %v5370_v1 }
  0x94   : > { %5037 = vmatpush3.bf16.msra.mxu0 %v5288_v46  ;;  %v5319_v46 = vld [vmem:[%s6327_s1 + $0x350] sm:$0xff]  }
  0x95   : > { %5057 = vmatpush3.bf16.msra.mxu1 %v5289_v38  ;;  %5038 = vmatprep.subr.bf16.mxu0 %v5370_v1  ;;  %v5315_v38 = vld [vmem:[%s6327_s1 + $0x340] sm:$0xff]  }
  0x96   : > { %5058 = vmatprep.subr.bf16.mxu1 %v5370_v1 }
  0x98   : > { %5039 = vmatpush3.bf16.msra.mxu0 %v5290_v40  ;;  %v5322_v40 = vld [vmem:[%s6327_s1 + $0x320] sm:$0xff]  }
  0x99   : > { %5059 = vmatpush3.bf16.msra.mxu1 %v5291_v45  ;;  %5040 = vmatprep.subr.bf16.mxu0 %v5370_v1  ;;  %v5323_v45 = vld [vmem:[%s6327_s1 + $0x360] sm:$0xff]  }
  0x9a   : > { %5060 = vmatprep.subr.bf16.mxu1 %v5370_v1 }
  0x9c   : > { %5041 = vmatpush3.bf16.msra.mxu0 %v5292_v61  ;;  %v5324_v61 = vld [vmem:[%s6327_s1 + $0x328] sm:$0xff]  }
  0x9d   : > { %5061 = vmatpush3.bf16.msra.mxu1 %v5293_v58  ;;  %5042 = vmatprep.subr.bf16.mxu0 %v5370_v1  ;;  %v5325_v58 = vld [vmem:[%s6327_s1 + $0x368] sm:$0xff]  }
  0x9e   : > { %5062 = vmatprep.subr.bf16.mxu1 %v5370_v1 }
  0xa0   : > { %5043 = vmatpush3.bf16.msra.mxu0 %v5294_v47  ;;  %v3422_v47 = vrot.slane %v3415_v52, %v5479_v24 }
  0xa1   : > { %5063 = vmatpush3.bf16.msra.mxu1 %v5295_v9  ;;  %5044 = vmatprep.subr.bf16.mxu0 %v5370_v1  ;;  %v5327_v9 = vld [vmem:[%s6327_s1 + $0x370] sm:$0xff]  }
  0xa2   : > { %5064 = vmatprep.subr.bf16.mxu1 %v5370_v1  ;;  %v3430_v33 = vcombine.low %v3422_v47, %v3429_v49 }
  0xa4   : > { %5045 = vmatpush3.bf16.msra.mxu0 %v5296_v22  ;;  %v5333_v22 = vld [vmem:[%s6327_s1 + $0x3c8] sm:$0xff]  }
  0xa5   : > { %5065 = vmatpush3.bf16.msra.mxu1 %v5297_v5  ;;  %5070 = vmatprep.subr.bf16.mxu0 %v5370_v1  ;;  %v3188_v5 = vrot.slane %v5949_v39, %v5479_v24  ;;  %v5330_v39 = vld [vmem:[%s6327_s1 + $0x380] sm:$0xff]  }
  0xa6   : > { %5090 = vmatprep.subr.bf16.mxu1 %v5370_v1 }
  0xa7   : > { %5047 = vmatmul.mubr.bf16.vlgmr.msra.gmra.mrb[16].mxu0 %v2253_v11  ;;  %v3196_v52 = vcombine.low %v3188_v5, %v3195_v6  ;;  %v5335_v11 = vld [vmem:[%s6327_s1 + $0x3d0] sm:$0xff]  }
  0xa8   : > { %5067 = vmatmul.mubr.bf16.vlgmr.msra.gmra.mrb[16].mxu1 %v2487_v8  ;;  %5071 = vmatpush3.bf16.msra.mxu0 %v5298_v27  ;;  %v5332_v8 = vld [vmem:[%s6327_s1 + $0x388] sm:$0xff]   ;;  %v5337_v27 = vld [vmem:[%s6327_s1 + $0x3d8] sm:$0xff]  }
  0xa9   : > { %5091 = vmatpush3.bf16.msra.mxu1 %v5299_v12  ;;  %5072 = vmatprep.subr.bf16.mxu0 %v5370_v1  ;;  %v5334_v12 = vld [vmem:[%s6327_s1 + $0x390] sm:$0xff]  }
  0xaa   : > { %5092 = vmatprep.subr.bf16.mxu1 %v5370_v1  ;;  %5086 = vmatprep.mubr.msk.bf16.mxu0 %vm5371_vm0, %v5370_v1 }
  0xab   : > { %5106 = vmatprep.mubr.msk.bf16.mxu1 %vm5371_vm0, %v5370_v1 }
  0xac   : > { %5073 = vmatpush3.bf16.msra.mxu0 %v5300_v34  ;;  %v5339_v34 = vld [vmem:[%s6327_s1 + $0x3e0] sm:$0xff]  }
  0xad   : > { %5093 = vmatpush3.bf16.msra.mxu1 %v5301_v13  ;;  %5074 = vmatprep.subr.bf16.mxu0 %v5370_v1  ;;  %v5336_v13 = vld [vmem:[%s6327_s1 + $0x398] sm:$0xff]  }
  0xae   : > { %5094 = vmatprep.subr.bf16.mxu1 %v5370_v1 }
  0xb0   : > { %5075 = vmatpush3.bf16.msra.mxu0 %v5302_v32  ;;  %v3843_v32 = vunpack.i.h.s16 %v5985_v63 }
  0xb1   : > { %5095 = vmatpush3.bf16.msra.mxu1 %v5303_v41  ;;  %5076 = vmatprep.subr.bf16.mxu0 %v5370_v1  ;;  %v5338_v41 = vld [vmem:[%s6327_s1 + $0x3a0] sm:$0xff]  }
  0xb2   : > { %5096 = vmatprep.subr.bf16.mxu1 %v5370_v1  ;;  %v3888_v2 = vrot.slane %v3843_v32, %v5479_v24 }
  0xb4   : > { %5077 = vmatpush3.bf16.msra.mxu0 %v5304_v18  ;;  %v3606_v18 = vunpack.i.l.s16 %v5985_v63  ;;  %v5343_v63 = vld [vmem:[%s6327_s1 + $0x3f0] sm:$0xff]  }
  0xb5   : > { %5097 = vmatpush3.bf16.msra.mxu1 %v5305_v17  ;;  %5078 = vmatprep.subr.bf16.mxu0 %v5370_v1  ;;  %v5341_v17 = vld [vmem:[%s6327_s1 + $0x3e8] sm:$0xff]  }
  0xb6   : > { %5098 = vmatprep.subr.bf16.mxu1 %v5370_v1  ;;  %v3651_v16 = vrot.slane %v3606_v18, %v5479_v24 }
  0xb8   : > { %5079 = vmatpush3.bf16.msra.mxu0 %v5306_v20 }
  0xb9   : > { %5099 = vmatpush3.bf16.msra.mxu1 %v5307_v19  ;;  %5080 = vmatprep.subr.bf16.mxu0 %v5370_v1  ;;  %v5340_v19 = vld [vmem:[%s6327_s1 + $0x3a8] sm:$0xff]  }
  0xba   : > { %5100 = vmatprep.subr.bf16.mxu1 %v5370_v1 }
  0xbc   : > { %5081 = vmatpush3.bf16.msra.mxu0 %v5308_v23 }
  0xbd   : > { %5101 = vmatpush3.bf16.msra.mxu1 %v5309_v57  ;;  %5082 = vmatprep.subr.bf16.mxu0 %v5370_v1 }
  0xbe   : > { %5102 = vmatprep.subr.bf16.mxu1 %v5370_v1 }
  0xc0   : > { %5083 = vmatpush3.bf16.msra.mxu0 %v5310_v54 }
  0xc1   : > { %5103 = vmatpush3.bf16.msra.mxu1 %v5311_v53  ;;  %5084 = vmatprep.subr.bf16.mxu0 %v5370_v1 }
  0xc2   : > { %5104 = vmatprep.subr.bf16.mxu1 %v5370_v1 }
  0xc4   : > { %5085 = vmatpush3.bf16.msra.mxu0 %v5312_v15  ;;  %v3903_v15 = vrot.slane %v3888_v2, %v5479_v24 }
  0xc5   : > { %5105 = vmatpush3.bf16.msra.mxu1 %v5313_v35  ;;  %5110 = vmatprep.subr.bf16.mxu0 %v5370_v1 }
  0xc6   : > { %5130 = vmatprep.subr.bf16.mxu1 %v5370_v1  ;;  %v3904_v25 = vcombine.low %v3896_v37, %v3903_v15 }
  0xc7   : > { %5087 = vmatmul.mubr.bf16.vlgmr.msra.gmra.mrb[20].mxu0 %v2724_v60  ;;  %v3659_v60 = vrot.slane %v6008_v48, %v5479_v24 }
  0xc8   : > { %5107 = vmatmul.mubr.bf16.vlgmr.msra.gmra.mrb[20].mxu1 %v2961_v7  ;;  %5111 = vmatpush3.bf16.msra.mxu0 %v5314_v14  ;;  %v5345_v7 = vld [vmem:[%s6327_s1 + $0x3f8] sm:$0xff]  }
  0xc9   : > { %5131 = vmatpush3.bf16.msra.mxu1 %v5315_v38  ;;  %5112 = vmatprep.subr.bf16.mxu0 %v5370_v1  ;;  %v3666_v38 = vrot.slane %v3651_v16, %v5479_v24 }
  0xca   : > { %5132 = vmatprep.subr.bf16.mxu1 %v5370_v1  ;;  %5126 = vmatprep.mubr.msk.bf16.mxu0 %vm5371_vm0, %v5370_v1 }
  0xcb   : > { %5146 = vmatprep.mubr.msk.bf16.mxu1 %vm5371_vm0, %v5370_v1  ;;  %v3667_v55 = vcombine.low %v3659_v60, %v3666_v38 }
  0xcc   : > { %5113 = vmatpush3.bf16.msra.mxu0 %v5316_v43 }
  0xcd   : > { %5133 = vmatpush3.bf16.msra.mxu1 %v5317_v42  ;;  %5114 = vmatprep.subr.bf16.mxu0 %v5370_v1 }
  0xce   : > { %5134 = vmatprep.subr.bf16.mxu1 %v5370_v1 }
  0xd0   : > { %5115 = vmatpush3.bf16.msra.mxu0 %v5318_v31 }
  0xd1   : > { %5135 = vmatpush3.bf16.msra.mxu1 %v5319_v46  ;;  %5116 = vmatprep.subr.bf16.mxu0 %v5370_v1 }
  0xd2   : > { %5136 = vmatprep.subr.bf16.mxu1 %v5370_v1 }
  0xd4   : > { %5117 = vmatpush3.bf16.msra.mxu0 %v5320_v62 }
  0xd5   : > { %5137 = vmatpush3.bf16.msra.mxu1 %v5321_v44  ;;  %5118 = vmatprep.subr.bf16.mxu0 %v5370_v1 }
  0xd6   : > { %5138 = vmatprep.subr.bf16.mxu1 %v5370_v1 }
  0xd8   : > { %5119 = vmatpush3.bf16.msra.mxu0 %v5322_v40 }
  0xd9   : > { %5139 = vmatpush3.bf16.msra.mxu1 %v5323_v45  ;;  %5120 = vmatprep.subr.bf16.mxu0 %v5370_v1 }
  0xda   : > { %5140 = vmatprep.subr.bf16.mxu1 %v5370_v1 }
  0xdc   : > { %5121 = vmatpush3.bf16.msra.mxu0 %v5324_v61 }
  0xdd   : > { %5141 = vmatpush3.bf16.msra.mxu1 %v5325_v58  ;;  %5122 = vmatprep.subr.bf16.mxu0 %v5370_v1 }
  0xde   : > { %5142 = vmatprep.subr.bf16.mxu1 %v5370_v1 }
  0xe0   : > { %5123 = vmatpush3.bf16.msra.mxu0 %v5326_v30 }
  0xe1   : > { %5143 = vmatpush3.bf16.msra.mxu1 %v5327_v9  ;;  %5124 = vmatprep.subr.bf16.mxu0 %v5370_v1 }
  0xe2   : > { %5144 = vmatprep.subr.bf16.mxu1 %v5370_v1 }
  0xe4   : > { %5125 = vmatpush3.bf16.msra.mxu0 %v5328_v51 }
  0xe5   : > { %5145 = vmatpush3.bf16.msra.mxu1 %v5329_v4  ;;  %5150 = vmatprep.subr.bf16.mxu0 %v5370_v1 }
  0xe6   : > { %5170 = vmatprep.subr.bf16.mxu1 %v5370_v1 }
  0xe7   : > { %5127 = vmatmul.mubr.bf16.vlgmr.msra.gmra.mrb[24].mxu0 %v3196_v52 }
  0xe8   : > { %5147 = vmatmul.mubr.bf16.vlgmr.msra.gmra.mrb[24].mxu1 %v3430_v33  ;;  %5151 = vmatpush3.bf16.msra.mxu0 %v5330_v39 }
  0xe9   : > { %5171 = vmatpush3.bf16.msra.mxu1 %v5331_v10  ;;  %5152 = vmatprep.subr.bf16.mxu0 %v5370_v1 }
  0xea   : > { %5172 = vmatprep.subr.bf16.mxu1 %v5370_v1  ;;  %5166 = vmatprep.mubr.msk.bf16.mxu0 %vm5371_vm0, %v5370_v1 }
  0xeb   : > { %5186 = vmatprep.mubr.msk.bf16.mxu1 %vm5371_vm0, %v5370_v1 }
  0xec   : > { %5153 = vmatpush3.bf16.msra.mxu0 %v5332_v8 }
  0xed   : > { %5173 = vmatpush3.bf16.msra.mxu1 %v5333_v22  ;;  %5154 = vmatprep.subr.bf16.mxu0 %v5370_v1 }
  0xee   : > { %5174 = vmatprep.subr.bf16.mxu1 %v5370_v1 }
  0xf0   : > { %5155 = vmatpush3.bf16.msra.mxu0 %v5334_v12 }
  0xf1   : > { %5175 = vmatpush3.bf16.msra.mxu1 %v5335_v11  ;;  %5156 = vmatprep.subr.bf16.mxu0 %v5370_v1 }
  0xf2   : > { %5176 = vmatprep.subr.bf16.mxu1 %v5370_v1 }
  0xf4   : > { %5157 = vmatpush3.bf16.msra.mxu0 %v5336_v13 }
  0xf5   : > { %5177 = vmatpush3.bf16.msra.mxu1 %v5337_v27  ;;  %5158 = vmatprep.subr.bf16.mxu0 %v5370_v1 }
  0xf6   : > { %5178 = vmatprep.subr.bf16.mxu1 %v5370_v1 }
  0xf8   : > { %5159 = vmatpush3.bf16.msra.mxu0 %v5338_v41 }
  0xf9   : > { %5179 = vmatpush3.bf16.msra.mxu1 %v5339_v34  ;;  %5160 = vmatprep.subr.bf16.mxu0 %v5370_v1 }
  0xfa   : > { %5180 = vmatprep.subr.bf16.mxu1 %v5370_v1  ;;  %v553_v21 = vpop.f32.mrb[0].mxu0 }
  0xfb   : > { %v687_v20 = vpop.f32.mrb[0].mxu1  ;;  %v4888_v26 = vpop.f32.mrb[1].mxu0 }
  0xfc   : > { %v4908_v57 = vpop.f32.mrb[1].mxu1  ;;  %v688_v23 = vadd.f32 %v687_v20, %v553_v21  ;;  %v556_v54 = vpop.f32.mrb[2].mxu0  ;;  %5161 = vmatpush3.bf16.msra.mxu0 %v5340_v19 }
  0xfd   : > { %v690_v53 = vpop.f32.mrb[2].mxu1  ;;  %5181 = vmatpush3.bf16.msra.mxu1 %v5341_v17  ;;  %v4889_v36 = vpop.f32.mrb[3].mxu0  ;;  %5162 = vmatprep.subr.bf16.mxu0 %v5370_v1 }
  0xfe   : > { %v4909_v28 = vpop.f32.mrb[3].mxu1  ;;  %5182 = vmatprep.subr.bf16.mxu1 %v5370_v1  ;;  %v691_v35 = vadd.f32 %v690_v53, %v556_v54 }
 0x100   : > { %5163 = vmatpush3.bf16.msra.mxu0 %v5342_v29 }
 0x101   : > { %5183 = vmatpush3.bf16.msra.mxu1 %v5343_v63  ;;  %5164 = vmatprep.subr.bf16.mxu0 %v5370_v1 }
 0x102   : > { %5184 = vmatprep.subr.bf16.mxu1 %v5370_v1 }
 0x104   : > { %5165 = vmatpush3.bf16.msra.mxu0 %v5344_v50 }
 0x105   : > { %5185 = vmatpush3.bf16.msra.mxu1 %v5345_v7 }
 0x107   : > { %5167 = vmatmul.mubr.bf16.vlgmr.msra.gmra.mrb[28].mxu0 %v3667_v55 }
 0x108   : > { %5187 = vmatmul.mubr.bf16.vlgmr.msra.gmra.mrb[28].mxu1 %v3904_v25 }
 0x11a   : > { %v922_v42 = vpop.f32.mrb[4].mxu0 }
 0x11b   : > { %v1159_v14 = vpop.f32.mrb[4].mxu1  ;;  %v929_v43 = vadd.f32 %v922_v42, %v688_v23  ;;  %v4928_v24 = vpop.f32.mrb[5].mxu0 }
 0x11c   : > { %v4948_v48 = vpop.f32.mrb[5].mxu1  ;;  %v925_v31 = vpop.f32.mrb[6].mxu0 }
 0x11d   : > { %v1162_v46 = vpop.f32.mrb[6].mxu1  ;;  %v1166_v62 = vadd.f32 %v1159_v14, %v929_v43  ;;  %v930_v45 = vadd.f32 %v925_v31, %v691_v35  ;;  %v4929_v40 = vpop.f32.mrb[7].mxu0 }
 0x11e   : > { %v4949_v44 = vpop.f32.mrb[7].mxu1 }
 0x11f   : > { %v1167_v56 = vadd.f32 %v1162_v46, %v930_v45 }
 0x13a   : > { %v1394_v1 = vpop.f32.mrb[8].mxu0 }
 0x13b   : > { %v1628_v58 = vpop.f32.mrb[8].mxu1  ;;  %v1401_v61 = vadd.f32 %v1394_v1, %v1166_v62  ;;  %v4968_v0 = vpop.f32.mrb[9].mxu0 }
 0x13c   : > { %v4988_v59 = vpop.f32.mrb[9].mxu1  ;;  %v1397_v3 = vpop.f32.mrb[10].mxu0 }
 0x13d   : > { %v1631_v9 = vpop.f32.mrb[10].mxu1  ;;  %v1635_v47 = vadd.f32 %v1628_v58, %v1401_v61  ;;  %v1402_v49 = vadd.f32 %v1397_v3, %v1167_v56  ;;  %v4969_v4 = vpop.f32.mrb[11].mxu0  ;;  %v4718_v59 = vld [vmem:[%s6328_s2] ss:$0 sm:$0xff] }
 0x13e   : > { %v4989_v30 = vpop.f32.mrb[11].mxu1 }
 0x13f   : > { %v1636_v5 = vadd.f32 %v1631_v9, %v1402_v49 }
 0x15a   : > { %v1865_v51 = vpop.f32.mrb[12].mxu0 }
 0x15b   : > { %v2102_v6 = vpop.f32.mrb[12].mxu1  ;;  %v1872_v52 = vadd.f32 %v1865_v51, %v1635_v47  ;;  %v5008_v10 = vpop.f32.mrb[13].mxu0 }
 0x15c   : > { %v5028_v33 = vpop.f32.mrb[13].mxu1  ;;  %v1868_v22 = vpop.f32.mrb[14].mxu0 }
 0x15d   : > { %v2105_v39 = vpop.f32.mrb[14].mxu1  ;;  %v2109_v11 = vadd.f32 %v2102_v6, %v1872_v52  ;;  %v1873_v12 = vadd.f32 %v1868_v22, %v1636_v5  ;;  %v5009_v27 = vpop.f32.mrb[15].mxu0  ;;  %v4018_v6 = vld [vmem:[%s296_s25 + $0x4] sm:$0x1] }
 0x15e   : > { %v5029_v8 = vpop.f32.mrb[15].mxu1 }
 0x15f   : > { %v2110_v13 = vadd.f32 %v2105_v39, %v1873_v12 }
 0x17a   : > { %v2337_v41 = vpop.f32.mrb[16].mxu0 }
 0x17b   : > { %v2571_v34 = vpop.f32.mrb[16].mxu1  ;;  %v2344_v17 = vadd.f32 %v2337_v41, %v2109_v11  ;;  %v5048_v18 = vpop.f32.mrb[17].mxu0 }
 0x17c   : > { %v5068_v32 = vpop.f32.mrb[17].mxu1  ;;  %v2340_v20 = vpop.f32.mrb[18].mxu0 }
 0x17d   : > { %v2574_v19 = vpop.f32.mrb[18].mxu1  ;;  %v2578_v57 = vadd.f32 %v2571_v34, %v2344_v17  ;;  %v2345_v2 = vadd.f32 %v2340_v20, %v2110_v13  ;;  %v5049_v23 = vpop.f32.mrb[19].mxu0 }
 0x17e   : > { %v5069_v21 = vpop.f32.mrb[19].mxu1 }
 0x17f   : > { %v2579_v26 = vadd.f32 %v2574_v19, %v2345_v2 }
 0x19a   : > { %v2808_v63 = vpop.f32.mrb[20].mxu0 }
 0x19b   : > { %v3045_v53 = vpop.f32.mrb[20].mxu1  ;;  %v2815_v54 = vadd.f32 %v2808_v63, %v2578_v57  ;;  %v5088_v28 = vpop.f32.mrb[21].mxu0 }
 0x19c   : > { %v5108_v16 = vpop.f32.mrb[21].mxu1  ;;  %v2811_v35 = vpop.f32.mrb[22].mxu0 }
 0x19d   : > { %v3048_v29 = vpop.f32.mrb[22].mxu1  ;;  %v3052_v37 = vadd.f32 %v3045_v53, %v2815_v54  ;;  %v2816_v15 = vadd.f32 %v2811_v35, %v2579_v26  ;;  %v5089_v7 = vpop.f32.mrb[23].mxu0 }
 0x19e   : > { %v5109_v36 = vpop.f32.mrb[23].mxu1 }
 0x19f   : > { %v3053_v60 = vadd.f32 %v3048_v29, %v2816_v15 }
 0x1ba   : > { %v3280_v50 = vpop.f32.mrb[24].mxu0 }
 0x1bb   : > { %v3514_v38 = vpop.f32.mrb[24].mxu1  ;;  %v3287_v55 = vadd.f32 %v3280_v50, %v3052_v37  ;;  %v5128_v14 = vpop.f32.mrb[25].mxu0 }
 0x1bc   : > { %v5148_v25 = vpop.f32.mrb[25].mxu1  ;;  %v3283_v48 = vpop.f32.mrb[26].mxu0 }
 0x1bd   : > { %v3517_v42 = vpop.f32.mrb[26].mxu1  ;;  %v3521_v24 = vadd.f32 %v3514_v38, %v3287_v55  ;;  %v3288_v46 = vadd.f32 %v3283_v48, %v3053_v60  ;;  %v5129_v31 = vpop.f32.mrb[27].mxu0 }
 0x1be   : > { %v5149_v43 = vpop.f32.mrb[27].mxu1 }
 0x1bf   : > { %v3522_v44 = vadd.f32 %v3517_v42, %v3288_v46 }
 0x1da   : > { %v3751_v45 = vpop.f32.mrb[28].mxu0 }
 0x1db   : > { %v3988_v62 = vpop.f32.mrb[28].mxu1  ;;  %v3758_v56 = vadd.f32 %v3751_v45, %v3521_v24  ;;  %v5168_v58 = vpop.f32.mrb[29].mxu0 }
 0x1dc   : > { %v5188_v40 = vpop.f32.mrb[29].mxu1  ;;  %v3754_v61 = vpop.f32.mrb[30].mxu0 }
 0x1dd   : > { %v3991_v1 = vpop.f32.mrb[30].mxu1  ;;  %v3995_v9 = vadd.f32 %v3988_v62, %v3758_v56  ;;  %v3759_v3 = vadd.f32 %v3754_v61, %v3522_v44  ;;  %v5169_v30 = vpop.f32.mrb[31].mxu0 }
 0x1de   : > { %v5189_v0 = vpop.f32.mrb[31].mxu1 }
 0x1df   : > { %v4004_v47 = vadd.f32 %v4718_v59, %v3995_v9  ;;  %v3996_v49 = vadd.f32 %v3991_v1, %v3759_v3 }
 0x1e1   : > { %v4724_v4 = vpack.c.bf16 %v4004_v47, %v4004_v47  ;;  %v4005_v5 = vadd.f32 %v4718_v59, %v3996_v49 }
 0x1e3   : > { %4014 = vst [vmem:[%s296_s25] sm:$0xf] %v4724_v4  ;;  %v4725_v51 = vpack.c.bf16 %v4005_v5, %v4005_v5  ;;  %v4022_v33 = vsel %vm4015_vm1, %v4005_v5, 0.0 }
 0x1e4   : > { %v4023_v52 = vadd.f32 %v4022_v33, %v4004_v47 }
 0x1e5   : > { %v4019_v10 = vsel %vm4017_vm3, %v4725_v51, %v4018_v6 }
 0x1e6   : > { %4020 = vst [vmem:[%s296_s25 + $0x4] sm:$0x1] %v4019_v10  ;;  %v4024_v39 = vrot.slane %v4023_v52, 4 }
 0x1e8   : > { %v4025_v22 = vadd.f32 %v4024_v39, %v4023_v52 }
 0x1ea   : > { %v4026_v8 = vrot.slane %v4025_v22, 2 }
 0x1ec   : > { %v4027_v11 = vadd.f32 %v4026_v8, %v4025_v22 }
 0x1ee   : > { %v4028_v12 = vrot.slane %v4027_v11, 1 }
 0x1f0   : > { %v4029_v27 = vadd.f32 %v4028_v12, %v4027_v11 }
 0x1f2   : > { %v4030_v13 = vmul.f32 0.11111111, %v4029_v27 }
 0x1f4   : > { %v4031_v34 = vsub.f32 %v4004_v47, %v4030_v13  ;;  %v4032_v41 = vsub.f32 %v4005_v5, %v4030_v13 }
 0x1f6   : > { %v4033_v32 = vmul.f32 %v4031_v34, %v4031_v34  ;;  %v4034_v17 = vmul.f32 %v4032_v41, %v4032_v41 }
 0x1f8   : > { %v4035_v18 = vsel %vm4015_vm1, %v4034_v17, 0.0 }
 0x1f9   : > { %v4036_v19 = vadd.f32 %v4035_v18, %v4033_v32 }
 0x1fb   : > { %v4037_v20 = vrot.slane %v4036_v19, 4 }
 0x1fd   : > { %v4038_v21 = vadd.f32 %v4037_v20, %v4036_v19 }
 0x1ff   : > { %v4039_v57 = vrot.slane %v4038_v21, 2 }
 0x201   : > { %v4040_v2 = vadd.f32 %v4039_v57, %v4038_v21 }
 0x203   : > { %v4041_v23 = vrot.slane %v4040_v2, 1 }
 0x205   : > { %v4042_v26 = vadd.f32 %v4041_v23, %v4040_v2 }
 0x207   : > { %v4043_v53 = vsel %vm4015_vm1, %v4029_v27, %v4042_v26 }
 0x208   : > { %4044 = vst [vmem:[%s307_s29] sm:$0x3] %v4043_v53 }
 0x209 PF: > { %s15_s17 = sadd.s32 1, %s5368_s17   ;;  %s6331_s15 = smov %s5364_s16 }
 0x20a   : > { %p12_p5 = scmp.ge.s32.totalorder %s15_s17, 4   ;;  %s6332_s16 = smov %s6334_s18 }
 0x20c   :  { %14 = sbr.rel (!%p12_p5) target bundleno = 2 (0x2), region = 98 }

// kernel: discriminator_forward.15
= control target key start
LH: loop header
LB: loop body
LE: loop exit
PB: predicated region body
PF: predicated region fallthrough
CT: control target
= control target key end

     0   :  { %10 = vsyncpa [#allocation3], 0  ;;  %s5170_s0 = inlined_call_operand.vmem [shape: bf16[2,1,5,5,128], index: 0, kind: input, shape index: {}]   ;;  %s5171_s1 = inlined_call_operand.vmem [shape: bf16[16,128,128], index: 1, kind: input, shape index: {}]   ;;  %s5172_s2 = inlined_call_operand.vmem [shape: f32[1,128], index: 2, kind: input, shape index: {}]   ;;  %s5173_s3 = inlined_call_operand.vmem [shape: f32[2,4,128], index: 3, kind: output, shape index: {0}]   ;;  %s5174_s4 = inlined_call_operand.hbm [shape: f32[2,1,2,128], index: 4, kind: output, shape index: {1}]  }
   0x1   :  { %12 = vsyncpa [#allocation3 + $0x1], 0  ;;  %s4367_s15 = smov 0   ;;  %s4369_s16 = smov 0  }
   0x2   :  { %s4371_s17 = smov 0   ;;  %s4373_s18 = smov 0  }
   0x3   :  { %s4375_s19 = smov 0   ;;  %s4377_s20 = smov 0  }
   0x4 LB: > { %s3152_s21 = sadd.s32 4294967295, %s4336_s20   ;;  %s3153_s22 = sadd.s32 4294967294, %s4336_s20   ;;  %s4336_s20 = sphi %s4377_s20, %s18_s20   ;;  %s4332_s19 = sphi %s4375_s19, %s5183_s19   ;;  %s4328_s18 = sphi %s4373_s18, %s5182_s18   ;;  %s4324_s17 = sphi %s4371_s17, %s5181_s17   ;;  %s4320_s16 = sphi %s4369_s16, %s5180_s16   ;;  %s4316_s15 = sphi %s4367_s15, %s5179_s15  }
   0x5   : > { %s37_s23 = sadd.s32 1, %s4332_s19  ;;  %s158_s24 = sadd.s32 1, %s4324_s17 }
   0x6   : > { %p39_p0 = scmp.ge.s32.totalorder %s37_s23, 2  ;;  %p168_p1 = scmp.ne.s32.totalorder %s4324_s17, %s4320_s16 }
   0x7   : > { %p169_p2 = scmp.eq.s32.totalorder %s3152_s21, 1  ;;  %p174_p3 = scmp.ne.s32.totalorder %s4320_s16, %s4316_s15 }
   0x8   : > { %s5185_s23 = smov (%p39_p0, %s37_s23), 0  ;;  %p175_p5 = scmp.eq.s32.totalorder %s3153_s22, 1 }
   0x9   : > { %p4407_p4 = por %p169_p2, %p168_p1  ;;  %s151_s26 = ssub.s32 %s4332_s19, %s5185_s23 }
   0xa   : > { %p3158_p6 = scmp.ge.s32.totalorder %s4336_s20, 1  ;;  %p156_p7 = scmp.eq.s32.totalorder %s151_s26, 0 }
   0xb   : > { %p4414_p8 = por %p175_p5, %p174_p3  ;;  %p218_p9 = scmp.lt.s32.totalorder %s4336_s20, 3 }
   0xc   : > { %s4420_s28 = scalar_select %p156_p7, %s4324_s17, %s158_s24  }
   0xd   : > { %p219_p10 = pnand %p3158_p6, %p218_p9 }
   0xe   : > { %v4122_v0 = vld [vmem:[%s5171_s1 + $0x40] sm:$0xff] (!%p219_p10)   ;;  %v4338_v1 = vmov (!%p219_p10), 0.0   ;;  %v4124_v3 = vld [vmem:[%s5171_s1 + $0x48] sm:$0xff] (!%p219_p10)   ;;  %vm4339_vm0 = vmmov (!%p219_p10), 0   ;;  %p265_p11 = scmp.lt.s32.totalorder (!%p219_p10), %s4328_s18, 1  ;;  %v4126_v5 = vld [vmem:[%s5171_s1 + $0x50] sm:$0xff] (!%p219_p10)   ;;  %v325_v9 = vlaneseq (!%p219_p10) }
   0xf   : > { %222 = sbr.rel (%p219_p10) target bundleno = 536 (0x218), region = 32  ;;  %3743 = vmatprep.subr.bf16.mxu0 (!%p219_p10), %v4338_v1  ;;  %3763 = vmatprep.subr.bf16.mxu1 (!%p219_p10), %v4338_v1  ;;  %v4123_v2 = vld [vmem:[%s5171_s1] sm:$0xff] (!%p219_p10)   ;;  %v4125_v4 = vld [vmem:[%s5171_s1 + $0x8] sm:$0xff] (!%p219_p10)   ;;  %v4127_v6 = vld [vmem:[%s5171_s1 + $0x10] sm:$0xff] (!%p219_p10)   ;;  %v4340_v16 = vmov (!%p219_p10), 1966171168  }
  0x10   : > { %3744 = vmatpush3.bf16.msra.mxu0 (!%p219_p10), %v4122_v0  ;;  %3759 = vmatprep.mubr.msk.bf16.mxu0 (!%p219_p10), %vm4339_vm0, %v4338_v1  ;;  %v4128_v7 = vld [vmem:[%s5171_s1 + $0x58] sm:$0xff] (!%p219_p10)   ;;  %v4130_v10 = vld [vmem:[%s5171_s1 + $0x60] sm:$0xff] (!%p219_p10)   ;;  %v326_v12 = vshrl.u32 (!%p219_p10), %v325_v9, 7  ;;  %v4132_v13 = vld [vmem:[%s5171_s1 + $0x68] sm:$0xff] (!%p219_p10)   ;;  %v323_v17 = vunpack.c.l.s4 (!%p219_p10), %v4340_v16  ;;  %vm358_vm1 = vsmask.f32 (!%p219_p10), 256 }
  0x11   : > { %3764 = vmatpush3.bf16.msra.mxu1 (!%p219_p10), %v4123_v2  ;;  %3745 = vmatprep.subr.bf16.mxu0 (!%p219_p10), %v4338_v1  ;;  %v4129_v8 = vld [vmem:[%s5171_s1 + $0x18] sm:$0xff] (!%p219_p10)   ;;  %v4131_v11 = vld [vmem:[%s5171_s1 + $0x20] sm:$0xff] (!%p219_p10)   ;;  %vm359_vm2 = vsmask.f32 (!%p219_p10), 1284  ;;  %vm361_vm3 = vsmask.f32 (!%p219_p10), 2312 }
  0x12   : > { %3765 = vmatprep.subr.bf16.mxu1 (!%p219_p10), %v4338_v1  ;;  %3779 = vmatprep.mubr.msk.bf16.mxu1 (!%p219_p10), %vm4339_vm0, %v4338_v1  ;;  %vm363_vm4 = vsmask.f32 (!%p219_p10), 3340  ;;  %v4133_v18 = vld [vmem:[%s5171_s1 + $0x28] sm:$0xff] (!%p219_p10)   ;;  %v324_v20 = vunpack.c.0.s8 (!%p219_p10), %v323_v17  ;;  %vm360_vm5 = vmor (!%p219_p10), %vm358_vm1, %vm359_vm2  ;;  %vm365_vm6 = vsmask.f32 (!%p219_p10), 4368  ;;  %v4134_v21 = vld [vmem:[%s5171_s1 + $0x70] sm:$0xff] (!%p219_p10)  }
  0x13   : > { %vm362_vm7 = vmor (!%p219_p10), %vm360_vm5, %vm361_vm3  ;;  %vm367_vm8 = vsmask.f32 (!%p219_p10), 5396  ;;  %v4135_v23 = vld [vmem:[%s5171_s1 + $0x30] sm:$0xff] (!%p219_p10)   ;;  %vm369_vm10 = vsmask.f32 (!%p219_p10), 6424  ;;  %v4136_v34 = vld [vmem:[%s5171_s1 + $0x78] sm:$0xff] (!%p219_p10)  }
  0x14   : > { %3746 = vmatpush3.bf16.msra.mxu0 (!%p219_p10), %v4124_v3  ;;  %v4492_v24 = vsub.s32 (!%p219_p10), %v324_v20, %v326_v12  ;;  %vm364_vm9 = vmor (!%p219_p10), %vm362_vm7, %vm363_vm4  ;;  %vm371_vm12 = vsmask.f32 (!%p219_p10), 7452  ;;  %v4137_v36 = vld [vmem:[%s5171_s1 + $0x38] sm:$0xff] (!%p219_p10)   ;;  %v4140_v42 = vld [vmem:[%s5171_s1 + $0xc0] sm:$0xff] (!%p219_p10)   ;;  %vm2974_vm1 = vcmask (!%p219_p10), 1040384  }
  0x15   : > { %3766 = vmatpush3.bf16.msra.mxu1 (!%p219_p10), %v4125_v4  ;;  %3747 = vmatprep.subr.bf16.mxu0 (!%p219_p10), %v4338_v1  ;;  %vm366_vm11 = vmor (!%p219_p10), %vm364_vm9, %vm365_vm6  ;;  %v4139_v43 = vld [vmem:[%s5171_s1 + $0x80] sm:$0xff] (!%p219_p10)   ;;  %v4142_v45 = vld [vmem:[%s5171_s1 + $0xc8] sm:$0xff] (!%p219_p10)  }
  0x16   : > { %s4444_s11 = scalar_select %p265_p11, %s4328_s18, 1  ;;  %3767 = vmatprep.subr.bf16.mxu1 %v4338_v1  ;;  %vm368_vm13 = vmor %vm366_vm11, %vm367_vm8  ;;  %v4141_v46 = vld [vmem:[%s5171_s1 + $0x88] sm:$0xff]   ;;  %v4144_v47 = vld [vmem:[%s5171_s1 + $0xd0] sm:$0xff]  }
  0x17   : > { %vm370_vm14 = vmor %vm368_vm13, %vm369_vm10  ;;  %v4143_v48 = vld [vmem:[%s5171_s1 + $0x90] sm:$0xff]   ;;  %v4146_v49 = vld [vmem:[%s5171_s1 + $0xd8] sm:$0xff]  }
  0x18   : > { %s4063_s22 = smul.u32 20, %s4444_s11  ;;  %3748 = vmatpush3.bf16.msra.mxu0 %v4126_v5  ;;  %vm4502_vm15 = vmor %vm370_vm14, %vm371_vm12  ;;  %v4145_v58 = vld [vmem:[%s5171_s1 + $0x98] sm:$0xff]   ;;  %v4148_v63 = vld [vmem:[%s5171_s1 + $0xe0] sm:$0xff]   ;;  %s3161_s9 = sshll.u32 %s4444_s11, 2 }
  0x19   : > { %3768 = vmatpush3.bf16.msra.mxu1 %v4127_v6  ;;  %3749 = vmatprep.subr.bf16.mxu0 %v4338_v1  ;;  %v4151_v17 = vld [vmem:[%s5171_s1 + $0xb0] sm:$0xff]   ;;  %s290_s14 = scalar_lea.vmem %s5173_s3, %s3161_s9  ;;  %s262_s11 = sand.u32 1, %s4320_s16  }
  0x1a   : > { %3769 = vmatprep.subr.bf16.mxu1 %v4338_v1  ;;  %s4466_s7 = scalar_lea.vmem %s5170_s0, %s4063_s22  ;;  %v4251_v30 = vld [vmem:[%s5171_s1 + $0x3f0] sm:$0xff]   ;;  %s3159_s21 = sshll.u32 %s262_s11, 1 }
  0x1b   : > { %v3162_v14 = vld.sshfl [vmem:[%s4466_s7] sm:$0x11 pattern:$0x75316420]  ;;  %s3596_s22 = sshll.u32 %s4328_s18, 5  ;;  %s264_s24 = scalar_lea.vmem [#allocation2], %s3159_s21 }
  0x1c   : > { %3750 = vmatpush3.bf16.msra.mxu0 %v4128_v7  ;;  %v3163_v15 = vld.sshfl [vmem:[%s4466_s7 + $0x4] sm:$0x11 pattern:$0x75316420]  ;;  %v321_v19 = vcombine.high %v3162_v14, %v3162_v14  ;;  %v328_v26 = vrot.slane %v3162_v14, %v4492_v24  ;;  %s3006_s26 = sshll.u32 %s264_s24, 4  ;;  %s5123_s5 = scalar_lea.hbm %s5174_s4, %s3596_s22  ;;  %s5125_s26 = int_to_ptr.vmem [resolvable:$true] %s3006_s26 }
  0x1d   : > { %3770 = vmatpush3.bf16.msra.mxu1 %v4129_v8  ;;  %3751 = vmatprep.subr.bf16.mxu0 %v4338_v1  ;;  %v343_v22 = vcombine.high %v3163_v15, %v3163_v15  ;;  %v4254_v25 = vld.sshfl [vmem:[%s4466_s7] sm:$0x5 pattern:$0x75316420]  ;;  %v350_v28 = vrot.slane %v3163_v15, %v4492_v24  ;;  %v4150_v8 = vld [vmem:[%s5171_s1 + $0xe8] sm:$0xff]   ;;  %v4152_v15 = vld [vmem:[%s5171_s1 + $0xf0] sm:$0xff]  }
  0x1e   : > { %3771 = vmatprep.subr.bf16.mxu1 %v4338_v1  ;;  %v335_v27 = vrot.slane %v321_v19, %v4492_v24  ;;  %v374_v31 = vshrl.u32 %v328_v26, 16  ;;  %v528_v40 = vrot.slane %v4254_v25, %v4492_v24  ;;  %v3224_v50 = vld.sshfl [vmem:[%s4466_s7] sm:$0x12 pattern:$0x75316420]  ;;  %v4154_v19 = vld [vmem:[%s5171_s1 + $0xf8] sm:$0xff]  }
  0x1f   : > { %v357_v29 = vrot.slane %v343_v22, %v4492_v24  ;;  %v383_v33 = vshrl.u32 %v350_v28, 16  ;;  %v3198_v51 = vld.sshfl [vmem:[%s4466_s7] sm:$0x10 pattern:$0x75316420]  ;;  %v785_v54 = vcombine.high %v3224_v50, %v3224_v50  ;;  %v792_v55 = vrot.slane %v3224_v50, %v4492_v24  ;;  %v4158_v28 = vld [vmem:[%s5171_s1 + $0x148] sm:$0xff]  }
  0x20   : > { %3752 = vmatpush3.bf16.msra.mxu0 %v4130_v10  ;;  %v379_v32 = vshll.u32 %v335_v27, 16  ;;  %v3199_v52 = vld.sshfl [vmem:[%s4466_s7 + $0x4] sm:$0x10 pattern:$0x75316420]  ;;  %v629_v3 = vcombine.high %v3198_v51, %v3198_v51  ;;  %v4170_v51 = vld [vmem:[%s5171_s1 + $0x178] sm:$0xff]  }
  0x21   : > { %3772 = vmatpush3.bf16.msra.mxu1 %v4131_v11  ;;  %3753 = vmatprep.subr.bf16.mxu0 %v4338_v1  ;;  %v388_v35 = vshll.u32 %v357_v29, 16  ;;  %v3225_v53 = vld.sshfl [vmem:[%s4466_s7 + $0x4] sm:$0x12 pattern:$0x75316420]  ;;  %v799_v59 = vrot.slane %v785_v54, %v4492_v24  ;;  %v800_v60 = vcombine.high %v792_v55, %v792_v55  ;;  %v644_v4 = vcombine.high %v3199_v52, %v3199_v52  ;;  %v4157_v29 = vld [vmem:[%s5171_s1 + $0x108] sm:$0xff]  }
  0x22   : > { %3773 = vmatprep.subr.bf16.mxu1 %v4338_v1  ;;  %v381_v37 = vsel %vm4502_vm15, %v374_v31, %v379_v32  ;;  %v808_v56 = vcombine.high %v3225_v53, %v3225_v53  ;;  %v815_v57 = vrot.slane %v3225_v53, %v4492_v24  ;;  %v4147_v7 = vld [vmem:[%s5171_s1 + $0xa0] sm:$0xff]   ;;  %v636_v9 = vrot.slane %v629_v3, %v4492_v24  ;;  %v3281_v27 = vld.sshfl [vmem:[%s4466_s7 + $0x8] sm:$0x11 pattern:$0x75316420]  ;;  %v4160_v31 = vld [vmem:[%s5171_s1 + $0x150] sm:$0xff]  }
  0x23   : > { %v4518_v38 = vsel %vm4502_vm15, %v383_v33, %v388_v35  ;;  %v825_v0 = vshrl.u32 %v799_v59, 16  ;;  %v830_v2 = vshll.u32 %v800_v60, 16  ;;  %v4581_v10 = vrot.slane %v644_v4, %v4492_v24  ;;  %v4156_v25 = vld [vmem:[%s5171_s1 + $0x140] sm:$0xff]   ;;  %v4159_v33 = vld [vmem:[%s5171_s1 + $0x110] sm:$0xff]   ;;  %v4178_v4 = vld [vmem:[%s5171_s1 + $0x198] sm:$0xff]   ;;  %s2988_s6 = scalar_lea.sflag [#allocation3], %s262_s11 }
  0x24   : > { %3754 = vmatpush3.bf16.msra.mxu0 %v4132_v13  ;;  %v408_v39 = vcombine.low %v381_v37, %v4518_v38  ;;  %v822_v61 = vrot.slane %v808_v56, %v4492_v24  ;;  %v823_v62 = vcombine.high %v815_v57, %v815_v57  ;;  %v4149_v13 = vld [vmem:[%s5171_s1 + $0xa8] sm:$0xff]   ;;  %v4155_v26 = vld [vmem:[%s5171_s1 + $0x100] sm:$0xff]   ;;  %v1124_v32 = vcombine.high %v3281_v27, %v3281_v27  ;;  %v4161_v37 = vld [vmem:[%s5171_s1 + $0x118] sm:$0xff]   ;;  %s4258_s8 = scalar_lea.vmem %s5125_s26, 32  ;;  %s4341_s18 = smov [#allocation2]  }
  0x25   : > { %3774 = vmatpush3.bf16.msra.mxu1 %v4133_v18  ;;  %3755 = vmatprep.subr.bf16.mxu0 %v4338_v1  ;;  %v832_v11 = vsel %vm4502_vm15, %v825_v0, %v830_v2  ;;  %v669_v16 = vcombine.low %v636_v9, %v4581_v10  ;;  %v1131_v35 = vrot.slane %v3281_v27, %v4492_v24  ;;  %v4173_v54 = vld [vmem:[%s5171_s1 + $0x1c0] sm:$0xff]   ;;  %v3339_v56 = vld.sshfl [vmem:[%s4466_s7 + $0x8] sm:$0x12 pattern:$0x75316420]  ;;  %v4177_v59 = vld [vmem:[%s5171_s1 + $0x1d0] sm:$0xff]   ;;  %p4259_p12 = scmp.ne.s32.totalorder %s5125_s26, %s4258_s8 }
  0x26   : > { %3775 = vmatprep.subr.bf16.mxu1 %v4338_v1  ;;  %v415_v41 = vrot.slane %v408_v39, %v4492_v24  ;;  %v834_v5 = vshrl.u32 %v822_v61, 16  ;;  %v839_v6 = vshll.u32 %v823_v62, 16  ;;  %v4164_v39 = vld [vmem:[%s5171_s1 + $0x160] sm:$0xff]   ;;  %v4175_v57 = vld [vmem:[%s5171_s1 + $0x1c8] sm:$0xff]   ;;  %v1469_v60 = vcombine.high %v3339_v56, %v3339_v56  ;;  %v4176_v62 = vld [vmem:[%s5171_s1 + $0x190] sm:$0xff]   ;;  %s4262_s9 = sshll.u32 %s4341_s18, 4  ;;  %s4263_s9 = int_to_ptr.vmem [resolvable:$false] %s4262_s9 }
  0x27   : > { %v676_v20 = vrot.slane %v669_v16, %v4492_v24  ;;  %v4172_v55 = vld [vmem:[%s5171_s1 + $0x180] sm:$0xff]   ;;  %v1476_v61 = vrot.slane %v3339_v56, %v4492_v24  ;;  %v4179_v0 = vld [vmem:[%s5171_s1 + $0x1d8] sm:$0xff]   ;;  %v3395_v27 = vld.sshfl [vmem:[%s4466_s7 + $0xc] sm:$0x11 pattern:$0x75316420]  ;;  %p4260_p13 = pnand %p4259_p12, %p4407_p4  ;;  %p4265_p1 = scmp.lt.s32.totalorder %s5125_s26, %s4263_s9 }
  0x28   : > { %3756 = vmatpush3.bf16.msra.mxu0 %v4134_v21  ;;  %v422_v44 = vrot.slane %v415_v41, %v4492_v24  ;;  %v4587_v12 = vsel %vm4502_vm15, %v834_v5, %v839_v6  ;;  %v4153_v21 = vld [vmem:[%s5171_s1 + $0xb8] sm:$0xff]   ;;  %v1483_v2 = vrot.slane %v1469_v60, %v4492_v24  ;;  %v4181_v5 = vld [vmem:[%s5171_s1 + $0x1e0] sm:$0xff]   ;;  %v4208_v56 = vld [vmem:[%s5171_s1 + $0x2c8] sm:$0xff]   ;;  %s4264_s10 = scalar_lea.vmem %s4263_s9, 64 }
  0x29   : > { %3776 = vmatpush3.bf16.msra.mxu1 %v4135_v23  ;;  %3757 = vmatprep.subr.bf16.mxu0 %v4338_v1  ;;  %v859_v14 = vcombine.low %v832_v11, %v4587_v12  ;;  %v683_v23 = vrot.slane %v676_v20, %v4492_v24  ;;  %v1484_v3 = vcombine.high %v1476_v61, %v1476_v61  ;;  %v4180_v9 = vld [vmem:[%s5171_s1 + $0x1a0] sm:$0xff]   ;;  %v4183_v11 = vld [vmem:[%s5171_s1 + $0x1e8] sm:$0xff]   ;;  %p4261_p0 = pneg %p4260_p13  ;;  %p4266_p2 = scmp.lt.s32.totalorder %s4264_s10, %s4258_s8 }
  0x2a   : > { %3777 = vmatprep.subr.bf16.mxu1 %v4338_v1 }
  0x2b   : > { %v866_v18 = vrot.slane %v859_v14, %v4492_v24  ;;  %p4267_p3 = por %p4266_p2, %p4265_p1 }
  0x2c   : > { %3758 = vmatpush3.bf16.msra.mxu0 %v4136_v34  ;;  %v4162_v34 = vld [vmem:[%s5171_s1 + $0x158] sm:$0xff]  }
  0x2d   : > { %3778 = vmatpush3.bf16.msra.mxu1 %v4137_v36  ;;  %3783 = vmatprep.subr.bf16.mxu0 %v4338_v1  ;;  %v873_v22 = vrot.slane %v866_v18, %v4492_v24  ;;  %v1138_v36 = vrot.slane %v1124_v32, %v4492_v24  ;;  %v1785_v32 = vcombine.high %v3395_v27, %v3395_v27  ;;  %p4268_p5 = pnand %p4267_p3, %p4261_p0 }
  0x2e   : > { %3803 = vmatprep.subr.bf16.mxu1 %v4338_v1 }
  0x2f   : > { %3760 = vmatmul.mubr.bf16.vlgmr.msra.gmra.mrb[0].mxu0 %v422_v44  ;;  %v1154_v41 = vshll.u32 %v1138_v36, 16  ;;  %v1799_v36 = vrot.slane %v1785_v32, %v4492_v24 }
  0x30   : > { %3780 = vmatmul.mubr.bf16.vlgmr.msra.gmra.mrb[0].mxu1 %v528_v40  ;;  %3784 = vmatpush3.bf16.msra.mxu0 %v4139_v43  ;;  %v1149_v40 = vshrl.u32 %v1131_v35, 16  ;;  %v4166_v43 = vld [vmem:[%s5171_s1 + $0x168] sm:$0xff]   ;;  %v1792_v35 = vrot.slane %v3395_v27, %v4492_v24 }
  0x31   : > { %3804 = vmatpush3.bf16.msra.mxu1 %v4140_v42  ;;  %3785 = vmatprep.subr.bf16.mxu0 %v4338_v1  ;;  %v4163_v42 = vld [vmem:[%s5171_s1 + $0x120] sm:$0xff]   ;;  %v4224_v27 = vld [vmem:[%s5171_s1 + $0x348] sm:$0xff]  }
  0x32   : > { %3805 = vmatprep.subr.bf16.mxu1 %v4338_v1  ;;  %3799 = vmatprep.mubr.msk.bf16.mxu0 %vm4339_vm0, %v4338_v1  ;;  %v4668_v44 = vsel %vm4502_vm15, %v1149_v40, %v1154_v41  ;;  %v1810_v40 = vshrl.u32 %v1792_v35, 16  ;;  %v1815_v41 = vshll.u32 %v1799_v36, 16 }
  0x33   : > { %3819 = vmatprep.mubr.msk.bf16.mxu1 %vm4339_vm0, %v4338_v1 }
  0x34   : > { %3786 = vmatpush3.bf16.msra.mxu0 %v4141_v46  ;;  %v4168_v46 = vld [vmem:[%s5171_s1 + $0x170] sm:$0xff]  }
  0x35   : > { %3806 = vmatpush3.bf16.msra.mxu1 %v4142_v45  ;;  %3787 = vmatprep.subr.bf16.mxu0 %v4338_v1  ;;  %v4165_v45 = vld [vmem:[%s5171_s1 + $0x128] sm:$0xff]  }
  0x36   : > { %3807 = vmatprep.subr.bf16.mxu1 %v4338_v1 }
  0x38   : > { %3788 = vmatpush3.bf16.msra.mxu0 %v4143_v48  ;;  %v4255_v48 = vld.sshfl [vmem:[%s4466_s7 + $0x4] sm:$0x5 pattern:$0x75316420] }
  0x39   : > { %3808 = vmatpush3.bf16.msra.mxu1 %v4144_v47  ;;  %3789 = vmatprep.subr.bf16.mxu0 %v4338_v1  ;;  %v1174_v47 = vcombine.low %v4518_v38, %v4668_v44  ;;  %v4169_v38 = vld [vmem:[%s5171_s1 + $0x138] sm:$0xff]   ;;  %v1000_v53 = vrot.slane %v4255_v48, %v4492_v24  ;;  %v4201_v48 = vld [vmem:[%s5171_s1 + $0x270] sm:$0xff]  }
  0x3a   : > { %3809 = vmatprep.subr.bf16.mxu1 %v4338_v1 }
  0x3b   : > { %v1181_v50 = vrot.slane %v1174_v47, %v4492_v24 }
  0x3c   : > { %3790 = vmatpush3.bf16.msra.mxu0 %v4145_v58  ;;  %v4174_v58 = vld [vmem:[%s5171_s1 + $0x188] sm:$0xff]  }
  0x3d   : > { %3810 = vmatpush3.bf16.msra.mxu1 %v4146_v49  ;;  %3791 = vmatprep.subr.bf16.mxu0 %v4338_v1  ;;  %v4167_v49 = vld [vmem:[%s5171_s1 + $0x130] sm:$0xff]   ;;  %v1188_v52 = vrot.slane %v1181_v50, %v4492_v24 }
  0x3e   : > { %3811 = vmatprep.subr.bf16.mxu1 %v4338_v1  ;;  %v4200_v50 = vld [vmem:[%s5171_s1 + $0x230] sm:$0xff]  }
  0x40   : > { %3792 = vmatpush3.bf16.msra.mxu0 %v4147_v7  ;;  %v1495_v7 = vshrl.u32 %v1483_v2, 16 }
  0x41   : > { %3812 = vmatpush3.bf16.msra.mxu1 %v4148_v63  ;;  %3793 = vmatprep.subr.bf16.mxu0 %v4338_v1  ;;  %v3311_v63 = vld.sshfl [vmem:[%s4466_s7 + $0x8] sm:$0x10 pattern:$0x75316420] }
  0x42   : > { %3813 = vmatprep.subr.bf16.mxu1 %v4338_v1  ;;  %v1305_v6 = vcombine.high %v3311_v63, %v3311_v63  ;;  %v4212_v63 = vld [vmem:[%s5171_s1 + $0x2d8] sm:$0xff]  }
  0x44   : > { %3794 = vmatpush3.bf16.msra.mxu0 %v4149_v13  ;;  %v4749_v13 = vrot.slane %v1305_v6, %v4492_v24 }
  0x45   : > { %3814 = vmatpush3.bf16.msra.mxu1 %v4150_v8  ;;  %3795 = vmatprep.subr.bf16.mxu0 %v4338_v1  ;;  %v1500_v8 = vshll.u32 %v1484_v3, 16  ;;  %v4211_v3 = vld [vmem:[%s5171_s1 + $0x298] sm:$0xff]  }
  0x46   : > { %3815 = vmatprep.subr.bf16.mxu1 %v4338_v1  ;;  %v1330_v18 = vcombine.low %v4581_v10, %v4749_v13  ;;  %v4186_v10 = vld [vmem:[%s5171_s1 + $0x1b8] sm:$0xff]  }
  0x47   : > { %v4753_v14 = vsel %vm4502_vm15, %v1495_v7, %v1500_v8 }
  0x48   : > { %3796 = vmatpush3.bf16.msra.mxu0 %v4151_v17  ;;  %v1520_v16 = vcombine.low %v4587_v12, %v4753_v14  ;;  %v4185_v17 = vld [vmem:[%s5171_s1 + $0x1f0] sm:$0xff]   ;;  %v4187_v12 = vld [vmem:[%s5171_s1 + $0x1f8] sm:$0xff]  }
  0x49   : > { %3816 = vmatpush3.bf16.msra.mxu1 %v4152_v15  ;;  %3797 = vmatprep.subr.bf16.mxu0 %v4338_v1  ;;  %v4182_v15 = vld [vmem:[%s5171_s1 + $0x1a8] sm:$0xff]  }
  0x4a   : > { %3817 = vmatprep.subr.bf16.mxu1 %v4338_v1  ;;  %v1527_v20 = vrot.slane %v1520_v16, %v4492_v24 }
  0x4c   : > { %3798 = vmatpush3.bf16.msra.mxu0 %v4153_v21  ;;  %v1337_v21 = vrot.slane %v1330_v18, %v4492_v24 }
  0x4d   : > { %3818 = vmatpush3.bf16.msra.mxu1 %v4154_v19  ;;  %3823 = vmatprep.subr.bf16.mxu0 %v4338_v1  ;;  %v4184_v19 = vld [vmem:[%s5171_s1 + $0x1b0] sm:$0xff]  }
  0x4e   : > { %3843 = vmatprep.subr.bf16.mxu1 %v4338_v1 }
  0x4f   : > { %3800 = vmatmul.mubr.bf16.vlgmr.msra.gmra.mrb[4].mxu0 %v683_v23  ;;  %v1344_v23 = vrot.slane %v1337_v21, %v4492_v24 }
  0x50   : > { %3820 = vmatmul.mubr.bf16.vlgmr.msra.gmra.mrb[4].mxu1 %v873_v22  ;;  %3824 = vmatpush3.bf16.msra.mxu0 %v4155_v26  ;;  %v1534_v22 = vrot.slane %v1527_v20, %v4492_v24  ;;  %v4188_v26 = vld [vmem:[%s5171_s1 + $0x200] sm:$0xff]  }
  0x51   : > { %3844 = vmatpush3.bf16.msra.mxu1 %v4156_v25  ;;  %3825 = vmatprep.subr.bf16.mxu0 %v4338_v1  ;;  %v4189_v25 = vld [vmem:[%s5171_s1 + $0x240] sm:$0xff]  }
  0x52   : > { %3845 = vmatprep.subr.bf16.mxu1 %v4338_v1  ;;  %3839 = vmatprep.mubr.msk.bf16.mxu0 %vm4339_vm0, %v4338_v1 }
  0x53   : > { %3859 = vmatprep.mubr.msk.bf16.mxu1 %vm4339_vm0, %v4338_v1 }
  0x54   : > { %3826 = vmatpush3.bf16.msra.mxu0 %v4157_v29  ;;  %v4190_v29 = vld [vmem:[%s5171_s1 + $0x208] sm:$0xff]  }
  0x55   : > { %3846 = vmatpush3.bf16.msra.mxu1 %v4158_v28  ;;  %3827 = vmatprep.subr.bf16.mxu0 %v4338_v1  ;;  %v4191_v28 = vld [vmem:[%s5171_s1 + $0x248] sm:$0xff]  }
  0x56   : > { %3847 = vmatprep.subr.bf16.mxu1 %v4338_v1 }
  0x58   : > { %3828 = vmatpush3.bf16.msra.mxu0 %v4159_v33  ;;  %v4192_v33 = vld [vmem:[%s5171_s1 + $0x210] sm:$0xff]  }
  0x59   : > { %3848 = vmatpush3.bf16.msra.mxu1 %v4160_v31  ;;  %3829 = vmatprep.subr.bf16.mxu0 %v4338_v1  ;;  %v4193_v31 = vld [vmem:[%s5171_s1 + $0x250] sm:$0xff]  }
  0x5a   : > { %3849 = vmatprep.subr.bf16.mxu1 %v4338_v1 }
  0x5c   : > { %3830 = vmatpush3.bf16.msra.mxu0 %v4161_v37  ;;  %v4194_v37 = vld [vmem:[%s5171_s1 + $0x218] sm:$0xff]  }
  0x5d   : > { %3850 = vmatpush3.bf16.msra.mxu1 %v4162_v34  ;;  %3831 = vmatprep.subr.bf16.mxu0 %v4338_v1  ;;  %v4195_v34 = vld [vmem:[%s5171_s1 + $0x258] sm:$0xff]  }
  0x5e   : > { %3851 = vmatprep.subr.bf16.mxu1 %v4338_v1 }
  0x60   : > { %3832 = vmatpush3.bf16.msra.mxu0 %v4163_v42  ;;  %v4196_v42 = vld [vmem:[%s5171_s1 + $0x220] sm:$0xff]  }
  0x61   : > { %3852 = vmatpush3.bf16.msra.mxu1 %v4164_v39  ;;  %3833 = vmatprep.subr.bf16.mxu0 %v4338_v1  ;;  %v4197_v39 = vld [vmem:[%s5171_s1 + $0x260] sm:$0xff]  }
  0x62   : > { %3853 = vmatprep.subr.bf16.mxu1 %v4338_v1 }
  0x64   : > { %3834 = vmatpush3.bf16.msra.mxu0 %v4165_v45  ;;  %v4836_v45 = vsel %vm4502_vm15, %v1810_v40, %v1815_v41 }
  0x65   : > { %3854 = vmatpush3.bf16.msra.mxu1 %v4166_v43  ;;  %3835 = vmatprep.subr.bf16.mxu0 %v4338_v1  ;;  %v4199_v43 = vld [vmem:[%s5171_s1 + $0x268] sm:$0xff]   ;;  %v1835_v47 = vcombine.low %v4668_v44, %v4836_v45  ;;  %v4203_v44 = vld [vmem:[%s5171_s1 + $0x278] sm:$0xff]  }
  0x66   : > { %3855 = vmatprep.subr.bf16.mxu1 %v4338_v1 }
  0x68   : > { %3836 = vmatpush3.bf16.msra.mxu0 %v4167_v49  ;;  %v4256_v49 = vld.sshfl [vmem:[%s4466_s7 + $0x8] sm:$0x5 pattern:$0x75316420] }
  0x69   : > { %3856 = vmatpush3.bf16.msra.mxu1 %v4168_v46  ;;  %3837 = vmatprep.subr.bf16.mxu0 %v4338_v1  ;;  %v4198_v46 = vld [vmem:[%s5171_s1 + $0x228] sm:$0xff]  }
  0x6a   : > { %3857 = vmatprep.subr.bf16.mxu1 %v4338_v1 }
  0x6c   : > { %3838 = vmatpush3.bf16.msra.mxu0 %v4169_v38  ;;  %v4202_v38 = vld [vmem:[%s5171_s1 + $0x238] sm:$0xff]  }
  0x6d   : > { %3858 = vmatpush3.bf16.msra.mxu1 %v4170_v51  ;;  %3863 = vmatprep.subr.bf16.mxu0 %v4338_v1  ;;  %v1842_v51 = vrot.slane %v1835_v47, %v4492_v24  ;;  %v4231_v47 = vld [vmem:[%s5171_s1 + $0x328] sm:$0xff]  }
  0x6e   : > { %3883 = vmatprep.subr.bf16.mxu1 %v4338_v1 }
  0x6f   : > { %3840 = vmatmul.mubr.bf16.vlgmr.msra.gmra.mrb[8].mxu0 %v1000_v53  ;;  %v1661_v53 = vrot.slane %v4256_v49, %v4492_v24  ;;  %v4234_v49 = vld [vmem:[%s5171_s1 + $0x370] sm:$0xff]  }
  0x70   : > { %3860 = vmatmul.mubr.bf16.vlgmr.msra.gmra.mrb[8].mxu1 %v1188_v52  ;;  %3864 = vmatpush3.bf16.msra.mxu0 %v4172_v55  ;;  %v1849_v52 = vrot.slane %v1842_v51, %v4492_v24  ;;  %v4205_v55 = vld [vmem:[%s5171_s1 + $0x280] sm:$0xff]   ;;  %v4233_v51 = vld [vmem:[%s5171_s1 + $0x330] sm:$0xff]  }
  0x71   : > { %3884 = vmatpush3.bf16.msra.mxu1 %v4173_v54  ;;  %3865 = vmatprep.subr.bf16.mxu0 %v4338_v1  ;;  %v4206_v54 = vld [vmem:[%s5171_s1 + $0x2c0] sm:$0xff]  }
  0x72   : > { %3885 = vmatprep.subr.bf16.mxu1 %v4338_v1  ;;  %3879 = vmatprep.mubr.msk.bf16.mxu0 %vm4339_vm0, %v4338_v1 }
  0x73   : > { %3899 = vmatprep.mubr.msk.bf16.mxu1 %vm4339_vm0, %v4338_v1 }
  0x74   : > { %3866 = vmatpush3.bf16.msra.mxu0 %v4174_v58  ;;  %v3453_v58 = vld.sshfl [vmem:[%s4466_s7 + $0xc] sm:$0x12 pattern:$0x75316420] }
  0x75   : > { %3886 = vmatpush3.bf16.msra.mxu1 %v4175_v57  ;;  %3867 = vmatprep.subr.bf16.mxu0 %v4338_v1  ;;  %v4207_v57 = vld [vmem:[%s5171_s1 + $0x288] sm:$0xff]   ;;  %v2130_v60 = vcombine.high %v3453_v58, %v3453_v58  ;;  %v2137_v61 = vrot.slane %v3453_v58, %v4492_v24  ;;  %v3567_v58 = vld.sshfl [vmem:[%s4466_s7 + $0x10] sm:$0x12 pattern:$0x75316420] }
  0x76   : > { %3887 = vmatprep.subr.bf16.mxu1 %v4338_v1 }
  0x77   : > { %v2145_v2 = vcombine.high %v2137_v61, %v2137_v61  ;;  %v2798_v61 = vrot.slane %v3567_v58, %v4492_v24 }
  0x78   : > { %3868 = vmatpush3.bf16.msra.mxu0 %v4176_v62  ;;  %v4209_v62 = vld [vmem:[%s5171_s1 + $0x290] sm:$0xff]  }
  0x79   : > { %3888 = vmatpush3.bf16.msra.mxu1 %v4177_v59  ;;  %3869 = vmatprep.subr.bf16.mxu0 %v4338_v1  ;;  %v4210_v59 = vld [vmem:[%s5171_s1 + $0x2d0] sm:$0xff]   ;;  %v2161_v8 = vshll.u32 %v2145_v2, 16  ;;  %v2806_v2 = vcombine.high %v2798_v61, %v2798_v61 }
  0x7a   : > { %3889 = vmatprep.subr.bf16.mxu1 %v4338_v1 }
  0x7c   : > { %3870 = vmatpush3.bf16.msra.mxu0 %v4178_v4  ;;  %v3425_v4 = vld.sshfl [vmem:[%s4466_s7 + $0xc] sm:$0x10 pattern:$0x75316420] }
  0x7d   : > { %3890 = vmatpush3.bf16.msra.mxu1 %v4179_v0  ;;  %3871 = vmatprep.subr.bf16.mxu0 %v4338_v1  ;;  %v2144_v0 = vrot.slane %v2130_v60, %v4492_v24  ;;  %v1966_v6 = vcombine.high %v3425_v4, %v3425_v4  ;;  %v2791_v60 = vcombine.high %v3567_v58, %v3567_v58  ;;  %v3539_v4 = vld.sshfl [vmem:[%s4466_s7 + $0x10] sm:$0x10 pattern:$0x75316420] }
  0x7e   : > { %3891 = vmatprep.subr.bf16.mxu1 %v4338_v1 }
  0x7f   : > { %v2156_v7 = vshrl.u32 %v2144_v0, 16  ;;  %v2805_v0 = vrot.slane %v2791_v60, %v4492_v24 }
  0x80   : > { %3872 = vmatpush3.bf16.msra.mxu0 %v4180_v9  ;;  %v4213_v9 = vld [vmem:[%s5171_s1 + $0x2a0] sm:$0xff]  }
  0x81   : > { %3892 = vmatpush3.bf16.msra.mxu1 %v4181_v5  ;;  %3873 = vmatprep.subr.bf16.mxu0 %v4338_v1  ;;  %v4214_v5 = vld [vmem:[%s5171_s1 + $0x2e0] sm:$0xff]   ;;  %v4921_v16 = vsel %vm4502_vm15, %v2156_v7, %v2161_v8  ;;  %v2817_v7 = vshrl.u32 %v2805_v0, 16  ;;  %v2822_v8 = vshll.u32 %v2806_v2, 16 }
  0x82   : > { %3893 = vmatprep.subr.bf16.mxu1 %v4338_v1  ;;  %v2181_v18 = vcombine.low %v4753_v14, %v4921_v16  ;;  %v4220_v14 = vld [vmem:[%s5171_s1 + $0x2f8] sm:$0xff]  }
  0x84   : > { %3874 = vmatpush3.bf16.msra.mxu0 %v4182_v15  ;;  %v4917_v15 = vrot.slane %v1966_v6, %v4492_v24  ;;  %v2188_v21 = vrot.slane %v2181_v18, %v4492_v24  ;;  %v2627_v6 = vcombine.high %v3539_v4, %v3539_v4  ;;  %v2824_v18 = vsel %vm4502_vm15, %v2817_v7, %v2822_v8 }
  0x85   : > { %3894 = vmatpush3.bf16.msra.mxu1 %v4183_v11  ;;  %3875 = vmatprep.subr.bf16.mxu0 %v4338_v1  ;;  %v4216_v11 = vld [vmem:[%s5171_s1 + $0x2e8] sm:$0xff]  }
  0x86   : > { %3895 = vmatprep.subr.bf16.mxu1 %v4338_v1  ;;  %v1991_v20 = vcombine.low %v4749_v13, %v4917_v15  ;;  %v4219_v13 = vld [vmem:[%s5171_s1 + $0x2b8] sm:$0xff]  }
  0x88   : > { %3876 = vmatpush3.bf16.msra.mxu0 %v4184_v19  ;;  %v4218_v19 = vld [vmem:[%s5171_s1 + $0x2f0] sm:$0xff]  }
  0x89   : > { %3896 = vmatpush3.bf16.msra.mxu1 %v4185_v17  ;;  %3877 = vmatprep.subr.bf16.mxu0 %v4338_v1  ;;  %v4215_v17 = vld [vmem:[%s5171_s1 + $0x2a8] sm:$0xff]  }
  0x8a   : > { %3897 = vmatprep.subr.bf16.mxu1 %v4338_v1 }
  0x8c   : > { %3878 = vmatpush3.bf16.msra.mxu0 %v4186_v10  ;;  %v1998_v10 = vrot.slane %v1991_v20, %v4492_v24 }
  0x8d   : > { %3898 = vmatpush3.bf16.msra.mxu1 %v4187_v12  ;;  %3903 = vmatprep.subr.bf16.mxu0 %v4338_v1  ;;  %v4217_v12 = vld [vmem:[%s5171_s1 + $0x2b0] sm:$0xff]  }
  0x8e   : > { %3923 = vmatprep.subr.bf16.mxu1 %v4338_v1 }
  0x8f   : > { %3880 = vmatmul.mubr.bf16.vlgmr.msra.gmra.mrb[12].mxu0 %v1344_v23  ;;  %v2005_v23 = vrot.slane %v1998_v10, %v4492_v24 }
  0x90   : > { %3900 = vmatmul.mubr.bf16.vlgmr.msra.gmra.mrb[12].mxu1 %v1534_v22  ;;  %3904 = vmatpush3.bf16.msra.mxu0 %v4188_v26  ;;  %v2195_v22 = vrot.slane %v2188_v21, %v4492_v24  ;;  %v4221_v26 = vld [vmem:[%s5171_s1 + $0x300] sm:$0xff]  }
  0x91   : > { %3924 = vmatpush3.bf16.msra.mxu1 %v4189_v25  ;;  %3905 = vmatprep.subr.bf16.mxu0 %v4338_v1  ;;  %v4222_v25 = vld [vmem:[%s5171_s1 + $0x340] sm:$0xff]  }
  0x92   : > { %3925 = vmatprep.subr.bf16.mxu1 %v4338_v1  ;;  %3919 = vmatprep.mubr.msk.bf16.mxu0 %vm4339_vm0, %v4338_v1 }
  0x93   : > { %3939 = vmatprep.mubr.msk.bf16.mxu1 %vm4339_vm0, %v4338_v1 }
  0x94   : > { %3906 = vmatpush3.bf16.msra.mxu0 %v4190_v29  ;;  %v3509_v29 = vld.sshfl [vmem:[%s4466_s7 + $0x10] sm:$0x11 pattern:$0x75316420] }
  0x95   : > { %3926 = vmatpush3.bf16.msra.mxu1 %v4191_v28  ;;  %3907 = vmatprep.subr.bf16.mxu0 %v4338_v1  ;;  %v4223_v28 = vld [vmem:[%s5171_s1 + $0x308] sm:$0xff]   ;;  %v2446_v32 = vcombine.high %v3509_v29, %v3509_v29  ;;  %v2453_v35 = vrot.slane %v3509_v29, %v4492_v24  ;;  %v4253_v29 = vld [vmem:[%s5171_s1 + $0x3f8] sm:$0xff]  }
  0x96   : > { %3927 = vmatprep.subr.bf16.mxu1 %v4338_v1 }
  0x97   : > { %v2460_v36 = vrot.slane %v2446_v32, %v4492_v24  ;;  %v2471_v40 = vshrl.u32 %v2453_v35, 16 }
  0x98   : > { %3908 = vmatpush3.bf16.msra.mxu0 %v4192_v33  ;;  %v4225_v33 = vld [vmem:[%s5171_s1 + $0x310] sm:$0xff]  }
  0x99   : > { %3928 = vmatpush3.bf16.msra.mxu1 %v4193_v31  ;;  %3909 = vmatprep.subr.bf16.mxu0 %v4338_v1  ;;  %v4226_v31 = vld [vmem:[%s5171_s1 + $0x350] sm:$0xff]   ;;  %v2476_v41 = vshll.u32 %v2460_v36, 16 }
  0x9a   : > { %3929 = vmatprep.subr.bf16.mxu1 %v4338_v1 }
  0x9c   : > { %3910 = vmatpush3.bf16.msra.mxu0 %v4194_v37  ;;  %v4227_v37 = vld [vmem:[%s5171_s1 + $0x318] sm:$0xff]  }
  0x9d   : > { %3930 = vmatpush3.bf16.msra.mxu1 %v4195_v34  ;;  %3911 = vmatprep.subr.bf16.mxu0 %v4338_v1  ;;  %v4228_v34 = vld [vmem:[%s5171_s1 + $0x358] sm:$0xff]  }
  0x9e   : > { %3931 = vmatprep.subr.bf16.mxu1 %v4338_v1 }
  0xa0   : > { %3912 = vmatpush3.bf16.msra.mxu0 %v4196_v42  ;;  %v4229_v42 = vld [vmem:[%s5171_s1 + $0x320] sm:$0xff]  }
  0xa1   : > { %3932 = vmatpush3.bf16.msra.mxu1 %v4197_v39  ;;  %3913 = vmatprep.subr.bf16.mxu0 %v4338_v1  ;;  %v4230_v39 = vld [vmem:[%s5171_s1 + $0x360] sm:$0xff]  }
  0xa2   : > { %3933 = vmatprep.subr.bf16.mxu1 %v4338_v1 }
  0xa4   : > { %3914 = vmatpush3.bf16.msra.mxu0 %v4198_v46  ;;  %v2478_v46 = vsel %vm4502_vm15, %v2471_v40, %v2476_v41 }
  0xa5   : > { %3934 = vmatpush3.bf16.msra.mxu1 %v4199_v43  ;;  %3915 = vmatprep.subr.bf16.mxu0 %v4338_v1  ;;  %v4232_v43 = vld [vmem:[%s5171_s1 + $0x368] sm:$0xff]  }
  0xa6   : > { %3935 = vmatprep.subr.bf16.mxu1 %v4338_v1 }
  0xa8   : > { %3916 = vmatpush3.bf16.msra.mxu0 %v4200_v50  ;;  %v4257_v50 = vld.sshfl [vmem:[%s4466_s7 + $0xc] sm:$0x5 pattern:$0x75316420] }
  0xa9   : > { %3936 = vmatpush3.bf16.msra.mxu1 %v4201_v48  ;;  %3917 = vmatprep.subr.bf16.mxu0 %v4338_v1  ;;  %v2496_v48 = vcombine.low %v4836_v45, %v2478_v46  ;;  %v4236_v45 = vld [vmem:[%s5171_s1 + $0x378] sm:$0xff]  }
  0xaa   : > { %3937 = vmatprep.subr.bf16.mxu1 %v4338_v1 }
  0xac   : > { %3918 = vmatpush3.bf16.msra.mxu0 %v4202_v38  ;;  %v4235_v38 = vld [vmem:[%s5171_s1 + $0x338] sm:$0xff]  }
  0xad   : > { %3938 = vmatpush3.bf16.msra.mxu1 %v4203_v44  ;;  %3943 = vmatprep.subr.bf16.mxu0 %v4338_v1  ;;  %v2503_v44 = vrot.slane %v2496_v48, %v4492_v24 }
  0xae   : > { %3963 = vmatprep.subr.bf16.mxu1 %v4338_v1 }
  0xaf   : > { %3920 = vmatmul.mubr.bf16.vlgmr.msra.gmra.mrb[16].mxu0 %v1661_v53  ;;  %v2322_v53 = vrot.slane %v4257_v50, %v4492_v24 }
  0xb0   : > { %3940 = vmatmul.mubr.bf16.vlgmr.msra.gmra.mrb[16].mxu1 %v1849_v52  ;;  %3944 = vmatpush3.bf16.msra.mxu0 %v4205_v55  ;;  %v2510_v52 = vrot.slane %v2503_v44, %v4492_v24  ;;  %v4238_v55 = vld [vmem:[%s5171_s1 + $0x380] sm:$0xff]  }
  0xb1   : > { %3964 = vmatpush3.bf16.msra.mxu1 %v4206_v54  ;;  %3945 = vmatprep.subr.bf16.mxu0 %v4338_v1  ;;  %v4239_v54 = vld [vmem:[%s5171_s1 + $0x3c0] sm:$0xff]  }
  0xb2   : > { %3965 = vmatprep.subr.bf16.mxu1 %v4338_v1  ;;  %3959 = vmatprep.mubr.msk.bf16.mxu0 %vm4339_vm0, %v4338_v1 }
  0xb3   : > { %3979 = vmatprep.mubr.msk.bf16.mxu1 %vm4339_vm0, %v4338_v1 }
  0xb4   : > { %3946 = vmatpush3.bf16.msra.mxu0 %v4207_v57  ;;  %v4240_v57 = vld [vmem:[%s5171_s1 + $0x388] sm:$0xff]  }
  0xb5   : > { %3966 = vmatpush3.bf16.msra.mxu1 %v4208_v56  ;;  %3947 = vmatprep.subr.bf16.mxu0 %v4338_v1  ;;  %v4241_v56 = vld [vmem:[%s5171_s1 + $0x3c8] sm:$0xff]  }
  0xb6   : > { %3967 = vmatprep.subr.bf16.mxu1 %v4338_v1 }
  0xb8   : > { %3948 = vmatpush3.bf16.msra.mxu0 %v4209_v62  ;;  %v4242_v62 = vld [vmem:[%s5171_s1 + $0x390] sm:$0xff]  }
  0xb9   : > { %3968 = vmatpush3.bf16.msra.mxu1 %v4210_v59  ;;  %3949 = vmatprep.subr.bf16.mxu0 %v4338_v1  ;;  %v4243_v59 = vld [vmem:[%s5171_s1 + $0x3d0] sm:$0xff]  }
  0xba   : > { %3969 = vmatprep.subr.bf16.mxu1 %v4338_v1 }
  0xbc   : > { %3950 = vmatpush3.bf16.msra.mxu0 %v4211_v3  ;;  %v4244_v3 = vld [vmem:[%s5171_s1 + $0x398] sm:$0xff]  }
  0xbd   : > { %3970 = vmatpush3.bf16.msra.mxu1 %v4212_v63  ;;  %3951 = vmatprep.subr.bf16.mxu0 %v4338_v1  ;;  %v4245_v63 = vld [vmem:[%s5171_s1 + $0x3d8] sm:$0xff]  }
  0xbe   : > { %3971 = vmatprep.subr.bf16.mxu1 %v4338_v1 }
  0xc0   : > { %3952 = vmatpush3.bf16.msra.mxu0 %v4213_v9  ;;  %v4246_v9 = vld [vmem:[%s5171_s1 + $0x3a0] sm:$0xff]  }
  0xc1   : > { %3972 = vmatpush3.bf16.msra.mxu1 %v4214_v5  ;;  %3953 = vmatprep.subr.bf16.mxu0 %v4338_v1  ;;  %v4247_v5 = vld [vmem:[%s5171_s1 + $0x3e0] sm:$0xff]  }
  0xc2   : > { %3973 = vmatprep.subr.bf16.mxu1 %v4338_v1 }
  0xc4   : > { %3954 = vmatpush3.bf16.msra.mxu0 %v4215_v17  ;;  %v2634_v17 = vrot.slane %v2627_v6, %v4492_v24 }
  0xc5   : > { %3974 = vmatpush3.bf16.msra.mxu1 %v4216_v11  ;;  %3955 = vmatprep.subr.bf16.mxu0 %v4338_v1  ;;  %v4249_v11 = vld [vmem:[%s5171_s1 + $0x3e8] sm:$0xff]  }
  0xc6   : > { %3975 = vmatprep.subr.bf16.mxu1 %v4338_v1 }
  0xc8   : > { %3956 = vmatpush3.bf16.msra.mxu0 %v4217_v12 }
  0xc9   : > { %3976 = vmatpush3.bf16.msra.mxu1 %v4218_v19  ;;  %3957 = vmatprep.subr.bf16.mxu0 %v4338_v1  ;;  %v4248_v19 = vld [vmem:[%s5171_s1 + $0x3a8] sm:$0xff]  }
  0xca   : > { %3977 = vmatprep.subr.bf16.mxu1 %v4338_v1 }
  0xcc   : > { %3958 = vmatpush3.bf16.msra.mxu0 %v4219_v13 }
  0xcd   : > { %3978 = vmatpush3.bf16.msra.mxu1 %v4220_v14  ;;  %3983 = vmatprep.subr.bf16.mxu0 %v4338_v1  ;;  %v2842_v14 = vcombine.low %v4921_v16, %v2824_v18 }
  0xce   : > { %4003 = vmatprep.subr.bf16.mxu1 %v4338_v1 }
  0xcf   : > { %3960 = vmatmul.mubr.bf16.vlgmr.msra.gmra.mrb[20].mxu0 %v2005_v23  ;;  %v2652_v23 = vcombine.low %v4917_v15, %v2634_v17 }
  0xd0   : > { %3980 = vmatmul.mubr.bf16.vlgmr.msra.gmra.mrb[20].mxu1 %v2195_v22  ;;  %3984 = vmatpush3.bf16.msra.mxu0 %v4221_v26 }
  0xd1   : > { %4004 = vmatpush3.bf16.msra.mxu1 %v4222_v25  ;;  %3985 = vmatprep.subr.bf16.mxu0 %v4338_v1  ;;  %v2659_v15 = vrot.slane %v2652_v23, %v4492_v24 }
  0xd2   : > { %4005 = vmatprep.subr.bf16.mxu1 %v4338_v1  ;;  %3999 = vmatprep.mubr.msk.bf16.mxu0 %vm4339_vm0, %v4338_v1 }
  0xd3   : > { %4019 = vmatprep.mubr.msk.bf16.mxu1 %vm4339_vm0, %v4338_v1 }
  0xd4   : > { %3986 = vmatpush3.bf16.msra.mxu0 %v4223_v28  ;;  %v2849_v28 = vrot.slane %v2842_v14, %v4492_v24 }
  0xd5   : > { %4006 = vmatpush3.bf16.msra.mxu1 %v4224_v27  ;;  %3987 = vmatprep.subr.bf16.mxu0 %v4338_v1  ;;  %v4250_v27 = vld [vmem:[%s5171_s1 + $0x3b0] sm:$0xff]  }
  0xd6   : > { %4007 = vmatprep.subr.bf16.mxu1 %v4338_v1  ;;  %v2856_v32 = vrot.slane %v2849_v28, %v4492_v24 }
  0xd8   : > { %3988 = vmatpush3.bf16.msra.mxu0 %v4225_v33  ;;  %v2666_v33 = vrot.slane %v2659_v15, %v4492_v24 }
  0xd9   : > { %4008 = vmatpush3.bf16.msra.mxu1 %v4226_v31  ;;  %3989 = vmatprep.subr.bf16.mxu0 %v4338_v1  ;;  %v4252_v31 = vld [vmem:[%s5171_s1 + $0x3b8] sm:$0xff]  }
  0xda   : > { %4009 = vmatprep.subr.bf16.mxu1 %v4338_v1 }
  0xdc   : > { %3990 = vmatpush3.bf16.msra.mxu0 %v4227_v37 }
  0xdd   : > { %4010 = vmatpush3.bf16.msra.mxu1 %v4228_v34  ;;  %3991 = vmatprep.subr.bf16.mxu0 %v4338_v1 }
  0xde   : > { %4011 = vmatprep.subr.bf16.mxu1 %v4338_v1 }
  0xe0   : > { %3992 = vmatpush3.bf16.msra.mxu0 %v4229_v42 }
  0xe1   : > { %4012 = vmatpush3.bf16.msra.mxu1 %v4230_v39  ;;  %3993 = vmatprep.subr.bf16.mxu0 %v4338_v1 }
  0xe2   : > { %4013 = vmatprep.subr.bf16.mxu1 %v4338_v1 }
  0xe4   : > { %3994 = vmatpush3.bf16.msra.mxu0 %v4231_v47 }
  0xe5   : > { %4014 = vmatpush3.bf16.msra.mxu1 %v4232_v43  ;;  %3995 = vmatprep.subr.bf16.mxu0 %v4338_v1 }
  0xe6   : > { %4015 = vmatprep.subr.bf16.mxu1 %v4338_v1 }
  0xe8   : > { %3996 = vmatpush3.bf16.msra.mxu0 %v4233_v51 }
  0xe9   : > { %4016 = vmatpush3.bf16.msra.mxu1 %v4234_v49  ;;  %3997 = vmatprep.subr.bf16.mxu0 %v4338_v1 }
  0xea   : > { %4017 = vmatprep.subr.bf16.mxu1 %v4338_v1 }
  0xec   : > { %3998 = vmatpush3.bf16.msra.mxu0 %v4235_v38 }
  0xed   : > { %4018 = vmatpush3.bf16.msra.mxu1 %v4236_v45  ;;  %4023 = vmatprep.subr.bf16.mxu0 %v4338_v1 }
  0xee   : > { %4043 = vmatprep.subr.bf16.mxu1 %v4338_v1 }
  0xef   : > { %4000 = vmatmul.mubr.bf16.vlgmr.msra.gmra.mrb[24].mxu0 %v2322_v53 }
  0xf0   : > { %4020 = vmatmul.mubr.bf16.vlgmr.msra.gmra.mrb[24].mxu1 %v2510_v52  ;;  %4024 = vmatpush3.bf16.msra.mxu0 %v4238_v55 }
  0xf1   : > { %4044 = vmatpush3.bf16.msra.mxu1 %v4239_v54  ;;  %4025 = vmatprep.subr.bf16.mxu0 %v4338_v1 }
  0xf2   : > { %4045 = vmatprep.subr.bf16.mxu1 %v4338_v1  ;;  %4039 = vmatprep.mubr.msk.bf16.mxu0 %vm4339_vm0, %v4338_v1 }
  0xf3   : > { %4059 = vmatprep.mubr.msk.bf16.mxu1 %vm4339_vm0, %v4338_v1  ;;  %vm2956_vm0 = vcmask 1043456  }
  0xf4   : > { %4026 = vmatpush3.bf16.msra.mxu0 %v4240_v57 }
  0xf5   : > { %4046 = vmatpush3.bf16.msra.mxu1 %v4241_v56  ;;  %4027 = vmatprep.subr.bf16.mxu0 %v4338_v1 }
  0xf6   : > { %4047 = vmatprep.subr.bf16.mxu1 %v4338_v1 }
  0xf8   : > { %4028 = vmatpush3.bf16.msra.mxu0 %v4242_v62 }
  0xf9   : > { %4048 = vmatpush3.bf16.msra.mxu1 %v4243_v59  ;;  %4029 = vmatprep.subr.bf16.mxu0 %v4338_v1 }
  0xfa   : > { %4049 = vmatprep.subr.bf16.mxu1 %v4338_v1 }
  0xfc   : > { %4030 = vmatpush3.bf16.msra.mxu0 %v4244_v3 }
  0xfd   : > { %4050 = vmatpush3.bf16.msra.mxu1 %v4245_v63  ;;  %4031 = vmatprep.subr.bf16.mxu0 %v4338_v1 }
  0xfe   : > { %4051 = vmatprep.subr.bf16.mxu1 %v4338_v1 }
 0x100   : > { %4032 = vmatpush3.bf16.msra.mxu0 %v4246_v9 }
 0x101   : > { %4052 = vmatpush3.bf16.msra.mxu1 %v4247_v5  ;;  %4033 = vmatprep.subr.bf16.mxu0 %v4338_v1 }
 0x102   : > { %4053 = vmatprep.subr.bf16.mxu1 %v4338_v1  ;;  %v506_v12 = vpop.f32.mrb[0].mxu0 }
 0x103   : > { %v612_v20 = vpop.f32.mrb[0].mxu1  ;;  %v3761_v13 = vpop.f32.mrb[1].mxu0 }
 0x104   : > { %v3781_v21 = vpop.f32.mrb[1].mxu1  ;;  %v613_v10 = vadd.f32 %v612_v20, %v506_v12  ;;  %v509_v25 = vpop.f32.mrb[2].mxu0  ;;  %4034 = vmatpush3.bf16.msra.mxu0 %v4248_v19 }
 0x105   : > { %v615_v22 = vpop.f32.mrb[2].mxu1  ;;  %4054 = vmatpush3.bf16.msra.mxu1 %v4249_v11  ;;  %v3762_v16 = vpop.f32.mrb[3].mxu0  ;;  %4035 = vmatprep.subr.bf16.mxu0 %v4338_v1 }
 0x106   : > { %v3782_v26 = vpop.f32.mrb[3].mxu1  ;;  %4055 = vmatprep.subr.bf16.mxu1 %v4338_v1 }
 0x108   : > { %4036 = vmatpush3.bf16.msra.mxu0 %v4250_v27 }
 0x109   : > { %4056 = vmatpush3.bf16.msra.mxu1 %v4251_v30  ;;  %4037 = vmatprep.subr.bf16.mxu0 %v4338_v1 }
 0x10a   : > { %4057 = vmatprep.subr.bf16.mxu1 %v4338_v1 }
 0x10c   : > { %4038 = vmatpush3.bf16.msra.mxu0 %v4252_v31 }
 0x10d   : > { %4058 = vmatpush3.bf16.msra.mxu1 %v4253_v29 }
 0x10f   : > { %4040 = vmatmul.mubr.bf16.vlgmr.msra.gmra.mrb[28].mxu0 %v2666_v33 }
 0x110   : > { %4060 = vmatmul.mubr.bf16.vlgmr.msra.gmra.mrb[28].mxu1 %v2856_v32 }
 0x122   : > { %v767_v35 = vpop.f32.mrb[4].mxu0 }
 0x123   : > { %v957_v34 = vpop.f32.mrb[4].mxu1  ;;  %v773_v37 = vadd.f32 %v767_v35, %v613_v10  ;;  %v3801_v39 = vpop.f32.mrb[5].mxu0 }
 0x124   : > { %v3821_v36 = vpop.f32.mrb[5].mxu1  ;;  %v770_v41 = vpop.f32.mrb[6].mxu0 }
 0x125   : > { %v960_v40 = vpop.f32.mrb[6].mxu1  ;;  %v963_v43 = vadd.f32 %v957_v34, %v773_v37  ;;  %v3802_v46 = vpop.f32.mrb[7].mxu0  ;;  %v3594_v36 = vld [vmem:[%s5172_s2] ss:$0 sm:$0xff] }
 0x126   : > { %v3822_v42 = vpop.f32.mrb[7].mxu1 }
 0x142   : > { %v1084_v1 = vpop.f32.mrb[8].mxu0 }
 0x143   : > { %v1272_v47 = vpop.f32.mrb[8].mxu1  ;;  %v1090_v49 = vadd.f32 %v1084_v1, %v963_v43  ;;  %v3841_v50 = vpop.f32.mrb[9].mxu0 }
 0x144   : > { %v3861_v48 = vpop.f32.mrb[9].mxu1  ;;  %v1087_v24 = vpop.f32.mrb[10].mxu0 }
 0x145   : > { %v1275_v51 = vpop.f32.mrb[10].mxu1  ;;  %v1278_v45 = vadd.f32 %v1272_v47, %v1090_v49  ;;  %v3842_v38 = vpop.f32.mrb[11].mxu0 }
 0x146   : > { %v3862_v44 = vpop.f32.mrb[11].mxu1 }
 0x162   : > { %v1428_v53 = vpop.f32.mrb[12].mxu0 }
 0x163   : > { %v1618_v52 = vpop.f32.mrb[12].mxu1  ;;  %v1434_v55 = vadd.f32 %v1428_v53, %v1278_v45  ;;  %v3881_v56 = vpop.f32.mrb[13].mxu0 }
 0x164   : > { %v3901_v54 = vpop.f32.mrb[13].mxu1  ;;  %v1431_v58 = vpop.f32.mrb[14].mxu0 }
 0x165   : > { %v1621_v57 = vpop.f32.mrb[14].mxu1  ;;  %v1624_v60 = vadd.f32 %v1618_v52, %v1434_v55  ;;  %v3882_v61 = vpop.f32.mrb[15].mxu0 }
 0x166   : > { %v3902_v59 = vpop.f32.mrb[15].mxu1 }
 0x182   : > { %v1745_v63 = vpop.f32.mrb[16].mxu0 }
 0x183   : > { %v1933_v62 = vpop.f32.mrb[16].mxu1  ;;  %v1751_v2 = vadd.f32 %v1745_v63, %v1624_v60  ;;  %v3921_v3 = vpop.f32.mrb[17].mxu0 }
 0x184   : > { %v3941_v0 = vpop.f32.mrb[17].mxu1  ;;  %v1748_v5 = vpop.f32.mrb[18].mxu0 }
 0x185   : > { %v1936_v4 = vpop.f32.mrb[18].mxu1  ;;  %v1939_v7 = vadd.f32 %v1933_v62, %v1751_v2  ;;  %v3922_v8 = vpop.f32.mrb[19].mxu0 }
 0x186   : > { %v3942_v6 = vpop.f32.mrb[19].mxu1 }
 0x1a2   : > { %v2089_v11 = vpop.f32.mrb[20].mxu0 }
 0x1a3   : > { %v2279_v9 = vpop.f32.mrb[20].mxu1  ;;  %v2095_v18 = vadd.f32 %v2089_v11, %v1939_v7  ;;  %v3961_v19 = vpop.f32.mrb[21].mxu0 }
 0x1a4   : > { %v3981_v17 = vpop.f32.mrb[21].mxu1  ;;  %v2092_v12 = vpop.f32.mrb[22].mxu0 }
 0x1a5   : > { %v2282_v20 = vpop.f32.mrb[22].mxu1  ;;  %v2285_v14 = vadd.f32 %v2279_v9, %v2095_v18  ;;  %v3962_v10 = vpop.f32.mrb[23].mxu0 }
 0x1a6   : > { %v3982_v21 = vpop.f32.mrb[23].mxu1 }
 0x1c2   : > { %v2406_v22 = vpop.f32.mrb[24].mxu0 }
 0x1c3   : > { %v2594_v13 = vpop.f32.mrb[24].mxu1  ;;  %v2412_v23 = vadd.f32 %v2406_v22, %v2285_v14  ;;  %v4001_v25 = vpop.f32.mrb[25].mxu0 }
 0x1c4   : > { %v4021_v30 = vpop.f32.mrb[25].mxu1  ;;  %v2409_v27 = vpop.f32.mrb[26].mxu0 }
 0x1c5   : > { %v2597_v26 = vpop.f32.mrb[26].mxu1  ;;  %v2600_v28 = vadd.f32 %v2594_v13, %v2412_v23  ;;  %v4002_v29 = vpop.f32.mrb[27].mxu0 }
 0x1c6   : > { %v4022_v16 = vpop.f32.mrb[27].mxu1 }
 0x1e2   : > { %v2750_v31 = vpop.f32.mrb[28].mxu0 }
 0x1e3   : > { %v2940_v15 = vpop.f32.mrb[28].mxu1  ;;  %v2756_v33 = vadd.f32 %v2750_v31, %v2600_v28  ;;  %v4041_v34 = vpop.f32.mrb[29].mxu0 }
 0x1e4   : > { %v4061_v32 = vpop.f32.mrb[29].mxu1  ;;  %v2753_v37 = vpop.f32.mrb[30].mxu0 }
 0x1e5   : > { %v2943_v35 = vpop.f32.mrb[30].mxu1  ;;  %v2946_v40 = vadd.f32 %v2940_v15, %v2756_v33  ;;  %v4042_v41 = vpop.f32.mrb[31].mxu0 }
 0x1e6   : > { %v4062_v39 = vpop.f32.mrb[31].mxu1 }
 0x1e7   : > { %v2954_v42 = vadd.f32 %v3594_v36, %v2946_v40 }
 0x1e9   : > { %2955 = vst [vmem:[%s290_s14] sm:$0xf] %v2954_v42  ;;  %v2957_v43 = vsel %vm2956_vm0, %v2954_v42, 0.0 }
 0x1ea   : > { %v2958_v46 = vrot.slane %v2957_v43, 4 }
 0x1ec   : > { %v2959_v47 = vadd.f32 %v2958_v46, %v2957_v43 }
 0x1ee   : > { %v2960_v1 = vrot.slane %v2959_v47, 2 }
 0x1f0   : > { %v2961_v48 = vadd.f32 %v2960_v1, %v2959_v47 }
 0x1f2   : > { %v2962_v49 = vrot.slane %v2961_v48, 1 }
 0x1f4   : > { %v2963_v50 = vadd.f32 %v2962_v49, %v2961_v48 }
 0x1f6   : > { %v2964_v51 = vmul.f32 0.25, %v2963_v50 }
 0x1f8   : > { %v2965_v24 = vsub.f32 %v2954_v42, %v2964_v51 }
 0x1fa   : > { %v2966_v44 = vmul.f32 %v2965_v24, %v2965_v24 }
 0x1fc   : > { %v2967_v45 = vsel %vm2956_vm0, %v2966_v44, 0.0 }
 0x1fd   : > { %v2968_v38 = vrot.slane %v2967_v45, 4 }
 0x1ff   : > { %v2969_v52 = vadd.f32 %v2968_v38, %v2967_v45 }
 0x201   : > { %v2970_v53 = vrot.slane %v2969_v52, 2 }
 0x203   : > { %v2971_v54 = vadd.f32 %v2970_v53, %v2969_v52 }
 0x205   : > { %v2972_v55 = vrot.slane %v2971_v54, 1 }
 0x207   : > { %v2973_v56 = vadd.f32 %v2972_v55, %v2971_v54 }
 0x209   : > { %v2975_v57 = vsel %vm2974_vm1, %v2963_v50, %v2973_v56 }
 0x20a   : > { %2976 = vst [vmem:[%s264_s24] sm:$0x3] %v2975_v57 }
 0x20b   : > { %4271 = shalt.err (!%p4268_p5)
}
 0x20c   : > { %s4272_s12 = scalar_lea.hbm %s5123_s5, 32  ;;  %s4276_s14 = scalar_lea.hbm %s5174_s4, 64 }
 0x20d   : > { %p4273_p6 = scmp.ne.s32.totalorder %s5123_s5, %s4272_s12  ;;  %p4277_p10 = scmp.lt.u32.totalorder %s5123_s5, %s5174_s4 }
 0x20e   : > { %p4278_p11 = scmp.lt.u32.totalorder %s4276_s14, %s4272_s12  ;;  %p4280_p13 = scmp.lt.u32.totalorder %s4272_s12, %s5123_s5 }
 0x20f   : > { %p4274_p7 = pnand %p4273_p6, %p4407_p4 }
 0x210   : > { %p4279_p12 = por %p4278_p11, %p4277_p10 }
 0x211   : > { %p4275_p9 = pneg %p4274_p7 }
 0x212   : > { %p4281_p0 = por %p4280_p13, %p4279_p12 }
 0x214   : > { %p4282_p1 = pnand %p4281_p0, %p4275_p9 }
 0x216   : > { %4285 = shalt.err (!%p4282_p1)
}
 0x217   : > { %4064 = dma.vmem_to_hbm [thread:$0]  (%p4407_p4), %s5125_s26, 32, %s5123_s5, %s2988_s6  }
 0x218 PF: > { %p4070_p2 = scmp.ge.s32.totalorder %s4336_s20, 2  ;;  %s3031_s22 = sand.u32 1, %s4316_s15  }
 0x219   : > { %s3032_s24 = scalar_lea.sflag [#allocation3], %s3031_s22 }
 0x21a   : > { %p4067_p3 = pnand %p4070_p2, %p4414_p8 }
 0x21c   : > { %4311 = dma.done.wait (!%p4067_p3), %s3032_s24, 32  }
 0x21d   : > { %4313 = vsyncadd (!%p4067_p3), %s3032_s24, 4294967264  ;;  %s18_s20 = sadd.s32 1, %s4336_s20   ;;  %s5179_s15 = smov %s4320_s16 }
 0x21e   : > { %p15_p5 = scmp.ge.s32.totalorder %s18_s20, 4   ;;  %s5180_s16 = smov %s4324_s17 }
 0x21f   : > { %s5181_s17 = smov %s4420_s28  ;;  %s5182_s18 = smov %s4332_s19 }
 0x220   : > { %s5183_s19 = smov %s5185_s23  ;;  %17 = sbr.rel (!%p15_p5) target bundleno = 4 (0x4), region = 103 }
 0x227   :  { %3037 = vsyncpa [#allocation3], 1 }
 0x228   :  { %3039 = vsyncpa [#allocation3 + $0x1], 1 }

</bundles_post_ra>
